<compile_context>
chip_gen: v7x
topology: tpu7x:2x2x1
jax: 0.10.0
libtpu: 0.0.40
codegen_flags: <defaults>
</compile_context>

<pallas_src>
import functools

import jax
import jax.numpy as jnp
from jax import lax
from jax.experimental import pallas as pl
from jax.experimental.pallas import tpu as pltpu


# ------------------------------ fused kernel ------------------------------- #
# Shapes are specialized for batch B = 2 (28x28x1 input, as the PyTorch model
# implies through fc1 = Linear(4*4*50, 500)).
#
# Row layouts used inside the kernel (channels always on the 128-lane axis):
#   conv1 out  a1 : (1152, 128)  rows r = b*576 + h*24 + w      (h,w in 0..23)
#   pool1         : (384, 128) -> (2, 12, 16, 128)  (w padded 12->16, zeros)
#   conv2 out  a2 : (128, 128)   rows r = b*64 + oh*8 + ow      (oh,ow in 0..7)
#   fc1/fc2       : (2, 512) / (2, 128)

def _mnist_fused_kernel(p1_ref, w1_ref, b1_ref, w2_ref, b2_ref,
                        s1_ref, s2_ref, wf1_ref, bf1_ref, wf2_ref, bf2_ref,
                        out_ref):
    f32 = jnp.float32
    bf16 = jnp.bfloat16

    def shift_rows(v, k):
        # y[r] = v[r + k]; rows wrap around, but wrapped rows land on odd
        # spatial positions that the pooling selection never reads.
        return jnp.concatenate([v[k:, :], v[:k, :]], axis=0)

    # ---- conv1 + bias + ReLU : (1152,32) @ (32,128) on the MXU -------------
    a1 = jnp.dot(p1_ref[...], w1_ref[...], preferred_element_type=f32)
    a1 = jnp.maximum(a1 + b1_ref[...], 0.0)                       # (1152,128)

    # ---- max_pool2d(2,2): neighbour max along w then h, then select rows ---
    t = jnp.maximum(a1, shift_rows(a1, 1))                        # pair along w
    t = jnp.maximum(t, shift_rows(t, 24))                         # pair along h
    pool1 = jnp.dot(s1_ref[...], t.astype(bf16),
                    preferred_element_type=f32)                   # (384,128)
    pool1 = pool1.reshape(2, 12, 16, 128)                         # (b,h,w_pad,c)

    # ---- conv2 (in-kernel im2col: 25 shifted-window dot-accumulates) -------
    acc2 = jnp.zeros((128, 128), f32)                             # rows (b,oh,ow)
    for tap in range(25):
        dy, dx = tap // 5, tap % 5
        lhs = pool1[:, dy:dy + 8, dx:dx + 8, :]                   # (2,8,8,128)
        lhs = lhs.reshape(128, 128).astype(bf16)
        acc2 = acc2 + jnp.dot(lhs, w2_ref[tap], preferred_element_type=f32)
    a2 = jnp.maximum(acc2 + b2_ref[...], 0.0)                     # (128,128)

    # ---- second max_pool2d(2,2): neighbour max; row-selection fused into fc1
    t = jnp.maximum(a2, shift_rows(a2, 1))
    t = jnp.maximum(t, shift_rows(t, 8))
    t = t.astype(bf16)                  # pooled values sit at even (oh,ow) rows

    # ---- flatten (PyTorch c*16 + h*4 + w order is baked into wf1) + fc1 ----
    accf = jnp.zeros((2, 512), f32)
    for r in range(16):                 # r = h*4 + w of the 4x4 pooled map
        rows = jnp.dot(s2_ref[pl.ds(2 * r, 2), :], t,
                       preferred_element_type=f32)                # (2,128)
        accf = accf + jnp.dot(rows.astype(bf16), wf1_ref[r],
                              preferred_element_type=f32)         # (2,512)
    f1 = jnp.maximum(accf + bf1_ref[...], 0.0)

    # ---- fc2 ---------------------------------------------------------------
    f2 = jnp.dot(f1.astype(bf16), wf2_ref[...], preferred_element_type=f32)
    out_ref[...] = f2 + bf2_ref[...]                              # (2,128)


# --------------------------- one-time weight prep --------------------------- #

def init_params(num_classes, key):
    ks = jax.random.split(key, 8)

    def u(k, shape, fan_in):
        bound = 1.0 / jnp.sqrt(float(fan_in))
        return jax.random.uniform(k, shape, jnp.float32, -bound, bound)

    return {
        "w1": u(ks[0], (20, 1, 5, 5), 1 * 25),      # conv1 (Cout, Cin, kh, kw)
        "b1": u(ks[1], (20,), 1 * 25),
        "w2": u(ks[2], (50, 20, 5, 5), 20 * 25),    # conv2
        "b2": u(ks[3], (50,), 20 * 25),
        "wf1": u(ks[4], (500, 800), 800),           # fc1 (out, in)
        "bf1": u(ks[5], (500,), 800),
        "wf2": u(ks[6], (num_classes, 500), 500),   # fc2
        "bf2": u(ks[7], (num_classes,), 500),
    }


def prepare_params(params):
    """Pre-pack / pad / pre-transpose all weights once (lane-dense, bf16)."""
    bf16 = jnp.bfloat16
    f32 = jnp.float32

    # conv1: (Cout,Cin,kh,kw) -> (tap=kh*5+kw, Cout) padded to (32, 128)
    w1 = jnp.transpose(params["w1"], (2, 3, 1, 0)).reshape(25, 20)
    w1 = jnp.pad(w1, ((0, 7), (0, 108))).astype(bf16)
    b1 = jnp.pad(params["b1"], (0, 108)).reshape(1, 128).astype(f32)

    # conv2: (Cout,Cin,kh,kw) -> (tap, Cin, Cout) padded to (25, 128, 128)
    w2 = jnp.transpose(params["w2"], (2, 3, 1, 0)).reshape(25, 20, 50)
    w2 = jnp.pad(w2, ((0, 0), (0, 108), (0, 78))).astype(bf16)
    b2 = jnp.pad(params["b2"], (0, 78)).reshape(1, 128).astype(f32)

    # fc1: (500, 800) with in-index c*16 + r  ->  (r, c, out) = (16, 128, 512)
    wf1 = params["wf1"].reshape(500, 50, 16)          # (o, c, r)
    wf1 = jnp.transpose(wf1, (2, 1, 0))               # (r, c, o)
    wf1 = jnp.pad(wf1, ((0, 0), (0, 78), (0, 12))).astype(bf16)
    bf1 = jnp.pad(params["bf1"], (0, 12)).reshape(1, 512).astype(f32)

    # fc2: (num_classes, 500) -> (512, 128)
    nc = params["wf2"].shape[0]
    wf2 = jnp.pad(params["wf2"].T, ((0, 12), (0, 128 - nc))).astype(bf16)
    bf2 = jnp.pad(params["bf2"], (0, 128 - nc)).reshape(1, 128).astype(f32)

    # pool1 row-selection (one-hot): out row q = b*192 + m*16 + n (n<12 valid)
    q = jnp.arange(384)
    b = q // 192
    rem = q % 192
    m, n = rem // 16, rem % 16
    col1 = jnp.where(n < 12, b * 576 + 48 * m + 2 * n, -1)
    s1 = (col1[:, None] == jnp.arange(1152)[None, :]).astype(bf16)   # (384,1152)

    # pool2 row-selection, rows ordered (spatial r, batch b): q = r*2 + b
    q = jnp.arange(32)
    b = q % 2
    r = q // 2
    i, j = r // 4, r % 4
    col2 = b * 64 + 16 * i + 2 * j
    s2 = (col2[:, None] == jnp.arange(128)[None, :]).astype(bf16)    # (32,128)

    return {"w1": w1, "b1": b1, "w2": w2, "b2": b2, "s1": s1, "s2": s2,
            "wf1": wf1, "bf1": bf1, "wf2": wf2, "bf2": bf2}


# --------------------------------- forward ---------------------------------- #

def mnistnet_forward(prep, x_nchw, *, num_classes):
    B = x_nchw.shape[0]
    assert B == 2, "fused kernel is specialized for batch = 2"

    # conv1 patch matrix from the raw 6 KB input (single fused XLA computation);
    # everything after this point runs inside one Pallas kernel.
    x2d = x_nchw[:, 0, :, :]                                      # (2,28,28)
    cols = [x2d[:, dy:dy + 24, dx:dx + 24]
            for dy in range(5) for dx in range(5)]
    patches = jnp.stack(cols, axis=-1)                            # (2,24,24,25)
    patches = jnp.pad(patches, ((0, 0), (0, 0), (0, 0), (0, 7)))  # K 25 -> 32
    patches = patches.reshape(B * 24 * 24, 32).astype(jnp.bfloat16)

    out = pl.pallas_call(
        _mnist_fused_kernel,
        out_shape=jax.ShapeDtypeStruct((B, 128), jnp.float32),
        in_specs=[pl.BlockSpec(memory_space=pltpu.MemorySpace.VMEM)] * 11,
        out_specs=pl.BlockSpec(memory_space=pltpu.MemorySpace.VMEM),
        compiler_params=pltpu.CompilerParams(
            vmem_limit_bytes=32 * 1024 * 1024),
        cost_estimate=pl.CostEstimate(flops=233_000_000,
                                      transcendentals=0,
                                      bytes_accessed=4_200_000),
    )(patches, prep["w1"], prep["b1"], prep["w2"], prep["b2"],
      prep["s1"], prep["s2"], prep["wf1"], prep["bf1"],
      prep["wf2"], prep["bf2"])
    return out[:, :num_classes]


# ------------------------- pure-JAX reference check ------------------------- #

def mnistnet_reference(params, x_nchw):
    y = lax.conv_general_dilated(x_nchw, params["w1"], (1, 1), "VALID",
                                 dimension_numbers=("NCHW", "OIHW", "NCHW"))
    y = jax.nn.relu(y + params["b1"][None, :, None, None])
    y = lax.reduce_window(y, -jnp.inf, lax.max, (1, 1, 2, 2), (1, 1, 2, 2),
                          "VALID")
    y = lax.conv_general_dilated(y, params["w2"], (1, 1), "VALID",
                                 dimension_numbers=("NCHW", "OIHW", "NCHW"))
    y = jax.nn.relu(y + params["b2"][None, :, None, None])
    y = lax.reduce_window(y, -jnp.inf, lax.max, (1, 1, 2, 2), (1, 1, 2, 2),
                          "VALID")
    y = y.reshape(y.shape[0], -1)
    y = jax.nn.relu(y @ params["wf1"].T + params["bf1"])
    y = y @ params["wf2"].T + params["bf2"]
    return y


if __name__ == "__main__":
    num_classes = 10
    batch = 2
    key = jax.random.PRNGKey(0)
    kx, kp = jax.random.split(key)
    x = jax.random.normal(kx, (batch, 1, 28, 28), jnp.float32)
    params = init_params(num_classes, kp)

    prep = prepare_params(params)          # one-time weight packing (not per step)

    fwd = jax.jit(functools.partial(mnistnet_forward, num_classes=num_classes))
    out = jax.block_until_ready(fwd(prep, x))
    assert out.shape == (batch, num_classes), out.shape

    ref = jax.block_until_ready(mnistnet_reference(params, x))
    assert jnp.allclose(out, ref, rtol=5e-2, atol=5e-2), \
        f"max abs diff {jnp.max(jnp.abs(out - ref))}"

    print("KERNEL_OK")
</pallas_src>

<mosaic_0001>
module attributes {stable_mosaic.version = 11 : i64} {
  func.func @_mnist_fused_kernel(%arg0: memref<1152x32xbf16, #tpu.memory_space<vmem>>, %arg1: memref<32x128xbf16, #tpu.memory_space<vmem>>, %arg2: memref<1x128xf32, #tpu.memory_space<vmem>>, %arg3: memref<25x128x128xbf16, #tpu.memory_space<vmem>>, %arg4: memref<1x128xf32, #tpu.memory_space<vmem>>, %arg5: memref<384x1152xbf16, #tpu.memory_space<vmem>>, %arg6: memref<32x128xbf16, #tpu.memory_space<vmem>>, %arg7: memref<16x128x512xbf16, #tpu.memory_space<vmem>>, %arg8: memref<1x512xf32, #tpu.memory_space<vmem>>, %arg9: memref<512x128xbf16, #tpu.memory_space<vmem>>, %arg10: memref<1x128xf32, #tpu.memory_space<vmem>>, %arg11: memref<2x128xf32, #tpu.memory_space<vmem>>) attributes {dimension_semantics = [], scalar_prefetch = 0 : i64, scratch_operands = 0 : i64, tpu.core_type = #tpu.core_type<tc>} {
    %c0 = arith.constant 0 : index
    %c0_0 = arith.constant 0 : index
    %0 = vector.load %arg0[%c0, %c0_0] : memref<1152x32xbf16, #tpu.memory_space<vmem>>, vector<1152x32xbf16>
    %c0_1 = arith.constant 0 : index
    %c0_2 = arith.constant 0 : index
    %1 = vector.load %arg1[%c0_1, %c0_2] : memref<32x128xbf16, #tpu.memory_space<vmem>>, vector<32x128xbf16>
    %cst = arith.constant dense<0.000000e+00> : vector<1152x128xf32>
    %2 = tpu.matmul %0, %1, %cst {dimension_numbers = #tpu.dot_dimension_numbers<[1], [0], [0], [1], [0, 0, 1, 1], [], []>} : vector<1152x32xbf16>, vector<32x128xbf16>, vector<1152x128xf32> -> vector<1152x128xf32>
    %c0_3 = arith.constant 0 : index
    %c0_4 = arith.constant 0 : index
    %3 = vector.load %arg2[%c0_3, %c0_4] : memref<1x128xf32, #tpu.memory_space<vmem>>, vector<1x128xf32>
    %4 = vector.broadcast %3 : vector<1x128xf32> to vector<1152x128xf32>
    %5 = arith.addf %2, %4 : vector<1152x128xf32>
    %cst_5 = arith.constant 0.000000e+00 : f32
    %6 = vector.broadcast %cst_5 : f32 to vector<1152x128xf32>
    %7 = arith.maximumf %5, %6 : vector<1152x128xf32>
    %8 = vector.extract_strided_slice %7 {offsets = [1, 0], sizes = [1151, 128], strides = [1, 1]} : vector<1152x128xf32> to vector<1151x128xf32>
    %9 = vector.extract_strided_slice %7 {offsets = [0, 0], sizes = [1, 128], strides = [1, 1]} : vector<1152x128xf32> to vector<1x128xf32>
    %10 = tpu.concatenate %8, %9 in 0 : vector<1151x128xf32>, vector<1x128xf32> -> vector<1152x128xf32>
    %11 = arith.maximumf %7, %10 : vector<1152x128xf32>
    %12 = vector.extract_strided_slice %11 {offsets = [24, 0], sizes = [1128, 128], strides = [1, 1]} : vector<1152x128xf32> to vector<1128x128xf32>
    %13 = vector.extract_strided_slice %11 {offsets = [0, 0], sizes = [24, 128], strides = [1, 1]} : vector<1152x128xf32> to vector<24x128xf32>
    %14 = tpu.concatenate %12, %13 in 0 : vector<1128x128xf32>, vector<24x128xf32> -> vector<1152x128xf32>
    %15 = arith.maximumf %11, %14 : vector<1152x128xf32>
    %c0_6 = arith.constant 0 : index
    %c0_7 = arith.constant 0 : index
    %16 = vector.load %arg5[%c0_6, %c0_7] : memref<384x1152xbf16, #tpu.memory_space<vmem>>, vector<384x1152xbf16>
    %17 = arith.truncf %15 : vector<1152x128xf32> to vector<1152x128xbf16>
    %cst_8 = arith.constant dense<0.000000e+00> : vector<384x128xf32>
    %18 = tpu.matmul %16, %17, %cst_8 {dimension_numbers = #tpu.dot_dimension_numbers<[1], [0], [0], [1], [0, 0, 1, 1], [], []>} : vector<384x1152xbf16>, vector<1152x128xbf16>, vector<384x128xf32> -> vector<384x128xf32>
    %19 = vector.shape_cast %18 : vector<384x128xf32> to vector<2x12x16x128xf32>
    %cst_9 = arith.constant 0.000000e+00 : f32
    %20 = vector.broadcast %cst_9 : f32 to vector<128x128xf32>
    %21 = vector.extract_strided_slice %19 {offsets = [0, 0, 0, 0], sizes = [2, 8, 8, 128], strides = [1, 1, 1, 1]} : vector<2x12x16x128xf32> to vector<2x8x8x128xf32>
    %22 = vector.shape_cast %21 : vector<2x8x8x128xf32> to vector<128x128xf32>
    %23 = arith.truncf %22 : vector<128x128xf32> to vector<128x128xbf16>
    %c0_10 = arith.constant 0 : index
    %c0_11 = arith.constant 0 : index
    %c0_12 = arith.constant 0 : index
    %24 = vector.load %arg3[%c0_10, %c0_11, %c0_12] : memref<25x128x128xbf16, #tpu.memory_space<vmem>>, vector<1x128x128xbf16>
    %25 = vector.shape_cast %24 : vector<1x128x128xbf16> to vector<128x128xbf16>
    %cst_13 = arith.constant dense<0.000000e+00> : vector<128x128xf32>
    %26 = tpu.matmul %23, %25, %cst_13 {dimension_numbers = #tpu.dot_dimension_numbers<[1], [0], [0], [1], [0, 0, 1, 1], [], []>} : vector<128x128xbf16>, vector<128x128xbf16>, vector<128x128xf32> -> vector<128x128xf32>
    %27 = arith.addf %20, %26 : vector<128x128xf32>
    %28 = vector.extract_strided_slice %19 {offsets = [0, 0, 1, 0], sizes = [2, 8, 8, 128], strides = [1, 1, 1, 1]} : vector<2x12x16x128xf32> to vector<2x8x8x128xf32>
    %29 = vector.shape_cast %28 : vector<2x8x8x128xf32> to vector<128x128xf32>
    %30 = arith.truncf %29 : vector<128x128xf32> to vector<128x128xbf16>
    %c1 = arith.constant 1 : index
    %c0_14 = arith.constant 0 : index
    %c0_15 = arith.constant 0 : index
    %31 = vector.load %arg3[%c1, %c0_14, %c0_15] : memref<25x128x128xbf16, #tpu.memory_space<vmem>>, vector<1x128x128xbf16>
    %32 = vector.shape_cast %31 : vector<1x128x128xbf16> to vector<128x128xbf16>
    %cst_16 = arith.constant dense<0.000000e+00> : vector<128x128xf32>
    %33 = tpu.matmul %30, %32, %cst_16 {dimension_numbers = #tpu.dot_dimension_numbers<[1], [0], [0], [1], [0, 0, 1, 1], [], []>} : vector<128x128xbf16>, vector<128x128xbf16>, vector<128x128xf32> -> vector<128x128xf32>
    %34 = arith.addf %27, %33 : vector<128x128xf32>
    %35 = vector.extract_strided_slice %19 {offsets = [0, 0, 2, 0], sizes = [2, 8, 8, 128], strides = [1, 1, 1, 1]} : vector<2x12x16x128xf32> to vector<2x8x8x128xf32>
    %36 = vector.shape_cast %35 : vector<2x8x8x128xf32> to vector<128x128xf32>
    %37 = arith.truncf %36 : vector<128x128xf32> to vector<128x128xbf16>
    %c2 = arith.constant 2 : index
    %c0_17 = arith.constant 0 : index
    %c0_18 = arith.constant 0 : index
    %38 = vector.load %arg3[%c2, %c0_17, %c0_18] : memref<25x128x128xbf16, #tpu.memory_space<vmem>>, vector<1x128x128xbf16>
    %39 = vector.shape_cast %38 : vector<1x128x128xbf16> to vector<128x128xbf16>
    %cst_19 = arith.constant dense<0.000000e+00> : vector<128x128xf32>
    %40 = tpu.matmul %37, %39, %cst_19 {dimension_numbers = #tpu.dot_dimension_numbers<[1], [0], [0], [1], [0, 0, 1, 1], [], []>} : vector<128x128xbf16>, vector<128x128xbf16>, vector<128x128xf32> -> vector<128x128xf32>
    %41 = arith.addf %34, %40 : vector<128x128xf32>
    %42 = vector.extract_strided_slice %19 {offsets = [0, 0, 3, 0], sizes = [2, 8, 8, 128], strides = [1, 1, 1, 1]} : vector<2x12x16x128xf32> to vector<2x8x8x128xf32>
    %43 = vector.shape_cast %42 : vector<2x8x8x128xf32> to vector<128x128xf32>
    %44 = arith.truncf %43 : vector<128x128xf32> to vector<128x128xbf16>
    %c3 = arith.constant 3 : index
    %c0_20 = arith.constant 0 : index
    %c0_21 = arith.constant 0 : index
    %45 = vector.load %arg3[%c3, %c0_20, %c0_21] : memref<25x128x128xbf16, #tpu.memory_space<vmem>>, vector<1x128x128xbf16>
    %46 = vector.shape_cast %45 : vector<1x128x128xbf16> to vector<128x128xbf16>
    %cst_22 = arith.constant dense<0.000000e+00> : vector<128x128xf32>
    %47 = tpu.matmul %44, %46, %cst_22 {dimension_numbers = #tpu.dot_dimension_numbers<[1], [0], [0], [1], [0, 0, 1, 1], [], []>} : vector<128x128xbf16>, vector<128x128xbf16>, vector<128x128xf32> -> vector<128x128xf32>
    %48 = arith.addf %41, %47 : vector<128x128xf32>
    %49 = vector.extract_strided_slice %19 {offsets = [0, 0, 4, 0], sizes = [2, 8, 8, 128], strides = [1, 1, 1, 1]} : vector<2x12x16x128xf32> to vector<2x8x8x128xf32>
    %50 = vector.shape_cast %49 : vector<2x8x8x128xf32> to vector<128x128xf32>
    %51 = arith.truncf %50 : vector<128x128xf32> to vector<128x128xbf16>
    %c4 = arith.constant 4 : index
    %c0_23 = arith.constant 0 : index
    %c0_24 = arith.constant 0 : index
    %52 = vector.load %arg3[%c4, %c0_23, %c0_24] : memref<25x128x128xbf16, #tpu.memory_space<vmem>>, vector<1x128x128xbf16>
    %53 = vector.shape_cast %52 : vector<1x128x128xbf16> to vector<128x128xbf16>
    %cst_25 = arith.constant dense<0.000000e+00> : vector<128x128xf32>
    %54 = tpu.matmul %51, %53, %cst_25 {dimension_numbers = #tpu.dot_dimension_numbers<[1], [0], [0], [1], [0, 0, 1, 1], [], []>} : vector<128x128xbf16>, vector<128x128xbf16>, vector<128x128xf32> -> vector<128x128xf32>
    %55 = arith.addf %48, %54 : vector<128x128xf32>
    %56 = vector.extract_strided_slice %19 {offsets = [0, 1, 0, 0], sizes = [2, 8, 8, 128], strides = [1, 1, 1, 1]} : vector<2x12x16x128xf32> to vector<2x8x8x128xf32>
    %57 = vector.shape_cast %56 : vector<2x8x8x128xf32> to vector<128x128xf32>
    %58 = arith.truncf %57 : vector<128x128xf32> to vector<128x128xbf16>
    %c5 = arith.constant 5 : index
    %c0_26 = arith.constant 0 : index
    %c0_27 = arith.constant 0 : index
    %59 = vector.load %arg3[%c5, %c0_26, %c0_27] : memref<25x128x128xbf16, #tpu.memory_space<vmem>>, vector<1x128x128xbf16>
    %60 = vector.shape_cast %59 : vector<1x128x128xbf16> to vector<128x128xbf16>
    %cst_28 = arith.constant dense<0.000000e+00> : vector<128x128xf32>
    %61 = tpu.matmul %58, %60, %cst_28 {dimension_numbers = #tpu.dot_dimension_numbers<[1], [0], [0], [1], [0, 0, 1, 1], [], []>} : vector<128x128xbf16>, vector<128x128xbf16>, vector<128x128xf32> -> vector<128x128xf32>
    %62 = arith.addf %55, %61 : vector<128x128xf32>
    %63 = vector.extract_strided_slice %19 {offsets = [0, 1, 1, 0], sizes = [2, 8, 8, 128], strides = [1, 1, 1, 1]} : vector<2x12x16x128xf32> to vector<2x8x8x128xf32>
    %64 = vector.shape_cast %63 : vector<2x8x8x128xf32> to vector<128x128xf32>
    %65 = arith.truncf %64 : vector<128x128xf32> to vector<128x128xbf16>
    %c6 = arith.constant 6 : index
    %c0_29 = arith.constant 0 : index
    %c0_30 = arith.constant 0 : index
    %66 = vector.load %arg3[%c6, %c0_29, %c0_30] : memref<25x128x128xbf16, #tpu.memory_space<vmem>>, vector<1x128x128xbf16>
    %67 = vector.shape_cast %66 : vector<1x128x128xbf16> to vector<128x128xbf16>
    %cst_31 = arith.constant dense<0.000000e+00> : vector<128x128xf32>
    %68 = tpu.matmul %65, %67, %cst_31 {dimension_numbers = #tpu.dot_dimension_numbers<[1], [0], [0], [1], [0, 0, 1, 1], [], []>} : vector<128x128xbf16>, vector<128x128xbf16>, vector<128x128xf32> -> vector<128x128xf32>
    %69 = arith.addf %62, %68 : vector<128x128xf32>
    %70 = vector.extract_strided_slice %19 {offsets = [0, 1, 2, 0], sizes = [2, 8, 8, 128], strides = [1, 1, 1, 1]} : vector<2x12x16x128xf32> to vector<2x8x8x128xf32>
    %71 = vector.shape_cast %70 : vector<2x8x8x128xf32> to vector<128x128xf32>
    %72 = arith.truncf %71 : vector<128x128xf32> to vector<128x128xbf16>
    %c7 = arith.constant 7 : index
    %c0_32 = arith.constant 0 : index
    %c0_33 = arith.constant 0 : index
    %73 = vector.load %arg3[%c7, %c0_32, %c0_33] : memref<25x128x128xbf16, #tpu.memory_space<vmem>>, vector<1x128x128xbf16>
    %74 = vector.shape_cast %73 : vector<1x128x128xbf16> to vector<128x128xbf16>
    %cst_34 = arith.constant dense<0.000000e+00> : vector<128x128xf32>
    %75 = tpu.matmul %72, %74, %cst_34 {dimension_numbers = #tpu.dot_dimension_numbers<[1], [0], [0], [1], [0, 0, 1, 1], [], []>} : vector<128x128xbf16>, vector<128x128xbf16>, vector<128x128xf32> -> vector<128x128xf32>
    %76 = arith.addf %69, %75 : vector<128x128xf32>
    %77 = vector.extract_strided_slice %19 {offsets = [0, 1, 3, 0], sizes = [2, 8, 8, 128], strides = [1, 1, 1, 1]} : vector<2x12x16x128xf32> to vector<2x8x8x128xf32>
    %78 = vector.shape_cast %77 : vector<2x8x8x128xf32> to vector<128x128xf32>
    %79 = arith.truncf %78 : vector<128x128xf32> to vector<128x128xbf16>
    %c8 = arith.constant 8 : index
    %c0_35 = arith.constant 0 : index
    %c0_36 = arith.constant 0 : index
    %80 = vector.load %arg3[%c8, %c0_35, %c0_36] : memref<25x128x128xbf16, #tpu.memory_space<vmem>>, vector<1x128x128xbf16>
    %81 = vector.shape_cast %80 : vector<1x128x128xbf16> to vector<128x128xbf16>
    %cst_37 = arith.constant dense<0.000000e+00> : vector<128x128xf32>
    %82 = tpu.matmul %79, %81, %cst_37 {dimension_numbers = #tpu.dot_dimension_numbers<[1], [0], [0], [1], [0, 0, 1, 1], [], []>} : vector<128x128xbf16>, vector<128x128xbf16>, vector<128x128xf32> -> vector<128x128xf32>
    %83 = arith.addf %76, %82 : vector<128x128xf32>
    %84 = vector.extract_strided_slice %19 {offsets = [0, 1, 4, 0], sizes = [2, 8, 8, 128], strides = [1, 1, 1, 1]} : vector<2x12x16x128xf32> to vector<2x8x8x128xf32>
    %85 = vector.shape_cast %84 : vector<2x8x8x128xf32> to vector<128x128xf32>
    %86 = arith.truncf %85 : vector<128x128xf32> to vector<128x128xbf16>
    %c9 = arith.constant 9 : index
    %c0_38 = arith.constant 0 : index
    %c0_39 = arith.constant 0 : index
    %87 = vector.load %arg3[%c9, %c0_38, %c0_39] : memref<25x128x128xbf16, #tpu.memory_space<vmem>>, vector<1x128x128xbf16>
    %88 = vector.shape_cast %87 : vector<1x128x128xbf16> to vector<128x128xbf16>
    %cst_40 = arith.constant dense<0.000000e+00> : vector<128x128xf32>
    %89 = tpu.matmul %86, %88, %cst_40 {dimension_numbers = #tpu.dot_dimension_numbers<[1], [0], [0], [1], [0, 0, 1, 1], [], []>} : vector<128x128xbf16>, vector<128x128xbf16>, vector<128x128xf32> -> vector<128x128xf32>
    %90 = arith.addf %83, %89 : vector<128x128xf32>
    %91 = vector.extract_strided_slice %19 {offsets = [0, 2, 0, 0], sizes = [2, 8, 8, 128], strides = [1, 1, 1, 1]} : vector<2x12x16x128xf32> to vector<2x8x8x128xf32>
    %92 = vector.shape_cast %91 : vector<2x8x8x128xf32> to vector<128x128xf32>
    %93 = arith.truncf %92 : vector<128x128xf32> to vector<128x128xbf16>
    %c10 = arith.constant 10 : index
    %c0_41 = arith.constant 0 : index
    %c0_42 = arith.constant 0 : index
    %94 = vector.load %arg3[%c10, %c0_41, %c0_42] : memref<25x128x128xbf16, #tpu.memory_space<vmem>>, vector<1x128x128xbf16>
    %95 = vector.shape_cast %94 : vector<1x128x128xbf16> to vector<128x128xbf16>
    %cst_43 = arith.constant dense<0.000000e+00> : vector<128x128xf32>
    %96 = tpu.matmul %93, %95, %cst_43 {dimension_numbers = #tpu.dot_dimension_numbers<[1], [0], [0], [1], [0, 0, 1, 1], [], []>} : vector<128x128xbf16>, vector<128x128xbf16>, vector<128x128xf32> -> vector<128x128xf32>
    %97 = arith.addf %90, %96 : vector<128x128xf32>
    %98 = vector.extract_strided_slice %19 {offsets = [0, 2, 1, 0], sizes = [2, 8, 8, 128], strides = [1, 1, 1, 1]} : vector<2x12x16x128xf32> to vector<2x8x8x128xf32>
    %99 = vector.shape_cast %98 : vector<2x8x8x128xf32> to vector<128x128xf32>
    %100 = arith.truncf %99 : vector<128x128xf32> to vector<128x128xbf16>
    %c11 = arith.constant 11 : index
    %c0_44 = arith.constant 0 : index
    %c0_45 = arith.constant 0 : index
    %101 = vector.load %arg3[%c11, %c0_44, %c0_45] : memref<25x128x128xbf16, #tpu.memory_space<vmem>>, vector<1x128x128xbf16>
    %102 = vector.shape_cast %101 : vector<1x128x128xbf16> to vector<128x128xbf16>
    %cst_46 = arith.constant dense<0.000000e+00> : vector<128x128xf32>
    %103 = tpu.matmul %100, %102, %cst_46 {dimension_numbers = #tpu.dot_dimension_numbers<[1], [0], [0], [1], [0, 0, 1, 1], [], []>} : vector<128x128xbf16>, vector<128x128xbf16>, vector<128x128xf32> -> vector<128x128xf32>
    %104 = arith.addf %97, %103 : vector<128x128xf32>
    %105 = vector.extract_strided_slice %19 {offsets = [0, 2, 2, 0], sizes = [2, 8, 8, 128], strides = [1, 1, 1, 1]} : vector<2x12x16x128xf32> to vector<2x8x8x128xf32>
    %106 = vector.shape_cast %105 : vector<2x8x8x128xf32> to vector<128x128xf32>
    %107 = arith.truncf %106 : vector<128x128xf32> to vector<128x128xbf16>
    %c12 = arith.constant 12 : index
    %c0_47 = arith.constant 0 : index
    %c0_48 = arith.constant 0 : index
    %108 = vector.load %arg3[%c12, %c0_47, %c0_48] : memref<25x128x128xbf16, #tpu.memory_space<vmem>>, vector<1x128x128xbf16>
    %109 = vector.shape_cast %108 : vector<1x128x128xbf16> to vector<128x128xbf16>
    %cst_49 = arith.constant dense<0.000000e+00> : vector<128x128xf32>
    %110 = tpu.matmul %107, %109, %cst_49 {dimension_numbers = #tpu.dot_dimension_numbers<[1], [0], [0], [1], [0, 0, 1, 1], [], []>} : vector<128x128xbf16>, vector<128x128xbf16>, vector<128x128xf32> -> vector<128x128xf32>
    %111 = arith.addf %104, %110 : vector<128x128xf32>
    %112 = vector.extract_strided_slice %19 {offsets = [0, 2, 3, 0], sizes = [2, 8, 8, 128], strides = [1, 1, 1, 1]} : vector<2x12x16x128xf32> to vector<2x8x8x128xf32>
    %113 = vector.shape_cast %112 : vector<2x8x8x128xf32> to vector<128x128xf32>
    %114 = arith.truncf %113 : vector<128x128xf32> to vector<128x128xbf16>
    %c13 = arith.constant 13 : index
    %c0_50 = arith.constant 0 : index
    %c0_51 = arith.constant 0 : index
    %115 = vector.load %arg3[%c13, %c0_50, %c0_51] : memref<25x128x128xbf16, #tpu.memory_space<vmem>>, vector<1x128x128xbf16>
    %116 = vector.shape_cast %115 : vector<1x128x128xbf16> to vector<128x128xbf16>
    %cst_52 = arith.constant dense<0.000000e+00> : vector<128x128xf32>
    %117 = tpu.matmul %114, %116, %cst_52 {dimension_numbers = #tpu.dot_dimension_numbers<[1], [0], [0], [1], [0, 0, 1, 1], [], []>} : vector<128x128xbf16>, vector<128x128xbf16>, vector<128x128xf32> -> vector<128x128xf32>
    %118 = arith.addf %111, %117 : vector<128x128xf32>
    %119 = vector.extract_strided_slice %19 {offsets = [0, 2, 4, 0], sizes = [2, 8, 8, 128], strides = [1, 1, 1, 1]} : vector<2x12x16x128xf32> to vector<2x8x8x128xf32>
    %120 = vector.shape_cast %119 : vector<2x8x8x128xf32> to vector<128x128xf32>
    %121 = arith.truncf %120 : vector<128x128xf32> to vector<128x128xbf16>
    %c14 = arith.constant 14 : index
    %c0_53 = arith.constant 0 : index
    %c0_54 = arith.constant 0 : index
    %122 = vector.load %arg3[%c14, %c0_53, %c0_54] : memref<25x128x128xbf16, #tpu.memory_space<vmem>>, vector<1x128x128xbf16>
    %123 = vector.shape_cast %122 : vector<1x128x128xbf16> to vector<128x128xbf16>
    %cst_55 = arith.constant dense<0.000000e+00> : vector<128x128xf32>
    %124 = tpu.matmul %121, %123, %cst_55 {dimension_numbers = #tpu.dot_dimension_numbers<[1], [0], [0], [1], [0, 0, 1, 1], [], []>} : vector<128x128xbf16>, vector<128x128xbf16>, vector<128x128xf32> -> vector<128x128xf32>
    %125 = arith.addf %118, %124 : vector<128x128xf32>
    %126 = vector.extract_strided_slice %19 {offsets = [0, 3, 0, 0], sizes = [2, 8, 8, 128], strides = [1, 1, 1, 1]} : vector<2x12x16x128xf32> to vector<2x8x8x128xf32>
    %127 = vector.shape_cast %126 : vector<2x8x8x128xf32> to vector<128x128xf32>
    %128 = arith.truncf %127 : vector<128x128xf32> to vector<128x128xbf16>
    %c15 = arith.constant 15 : index
    %c0_56 = arith.constant 0 : index
    %c0_57 = arith.constant 0 : index
    %129 = vector.load %arg3[%c15, %c0_56, %c0_57] : memref<25x128x128xbf16, #tpu.memory_space<vmem>>, vector<1x128x128xbf16>
    %130 = vector.shape_cast %129 : vector<1x128x128xbf16> to vector<128x128xbf16>
    %cst_58 = arith.constant dense<0.000000e+00> : vector<128x128xf32>
    %131 = tpu.matmul %128, %130, %cst_58 {dimension_numbers = #tpu.dot_dimension_numbers<[1], [0], [0], [1], [0, 0, 1, 1], [], []>} : vector<128x128xbf16>, vector<128x128xbf16>, vector<128x128xf32> -> vector<128x128xf32>
    %132 = arith.addf %125, %131 : vector<128x128xf32>
    %133 = vector.extract_strided_slice %19 {offsets = [0, 3, 1, 0], sizes = [2, 8, 8, 128], strides = [1, 1, 1, 1]} : vector<2x12x16x128xf32> to vector<2x8x8x128xf32>
    %134 = vector.shape_cast %133 : vector<2x8x8x128xf32> to vector<128x128xf32>
    %135 = arith.truncf %134 : vector<128x128xf32> to vector<128x128xbf16>
    %c16 = arith.constant 16 : index
    %c0_59 = arith.constant 0 : index
    %c0_60 = arith.constant 0 : index
    %136 = vector.load %arg3[%c16, %c0_59, %c0_60] : memref<25x128x128xbf16, #tpu.memory_space<vmem>>, vector<1x128x128xbf16>
    %137 = vector.shape_cast %136 : vector<1x128x128xbf16> to vector<128x128xbf16>
    %cst_61 = arith.constant dense<0.000000e+00> : vector<128x128xf32>
    %138 = tpu.matmul %135, %137, %cst_61 {dimension_numbers = #tpu.dot_dimension_numbers<[1], [0], [0], [1], [0, 0, 1, 1], [], []>} : vector<128x128xbf16>, vector<128x128xbf16>, vector<128x128xf32> -> vector<128x128xf32>
    %139 = arith.addf %132, %138 : vector<128x128xf32>
    %140 = vector.extract_strided_slice %19 {offsets = [0, 3, 2, 0], sizes = [2, 8, 8, 128], strides = [1, 1, 1, 1]} : vector<2x12x16x128xf32> to vector<2x8x8x128xf32>
    %141 = vector.shape_cast %140 : vector<2x8x8x128xf32> to vector<128x128xf32>
    %142 = arith.truncf %141 : vector<128x128xf32> to vector<128x128xbf16>
    %c17 = arith.constant 17 : index
    %c0_62 = arith.constant 0 : index
    %c0_63 = arith.constant 0 : index
    %143 = vector.load %arg3[%c17, %c0_62, %c0_63] : memref<25x128x128xbf16, #tpu.memory_space<vmem>>, vector<1x128x128xbf16>
    %144 = vector.shape_cast %143 : vector<1x128x128xbf16> to vector<128x128xbf16>
    %cst_64 = arith.constant dense<0.000000e+00> : vector<128x128xf32>
    %145 = tpu.matmul %142, %144, %cst_64 {dimension_numbers = #tpu.dot_dimension_numbers<[1], [0], [0], [1], [0, 0, 1, 1], [], []>} : vector<128x128xbf16>, vector<128x128xbf16>, vector<128x128xf32> -> vector<128x128xf32>
    %146 = arith.addf %139, %145 : vector<128x128xf32>
    %147 = vector.extract_strided_slice %19 {offsets = [0, 3, 3, 0], sizes = [2, 8, 8, 128], strides = [1, 1, 1, 1]} : vector<2x12x16x128xf32> to vector<2x8x8x128xf32>
    %148 = vector.shape_cast %147 : vector<2x8x8x128xf32> to vector<128x128xf32>
    %149 = arith.truncf %148 : vector<128x128xf32> to vector<128x128xbf16>
    %c18 = arith.constant 18 : index
    %c0_65 = arith.constant 0 : index
    %c0_66 = arith.constant 0 : index
    %150 = vector.load %arg3[%c18, %c0_65, %c0_66] : memref<25x128x128xbf16, #tpu.memory_space<vmem>>, vector<1x128x128xbf16>
    %151 = vector.shape_cast %150 : vector<1x128x128xbf16> to vector<128x128xbf16>
    %cst_67 = arith.constant dense<0.000000e+00> : vector<128x128xf32>
    %152 = tpu.matmul %149, %151, %cst_67 {dimension_numbers = #tpu.dot_dimension_numbers<[1], [0], [0], [1], [0, 0, 1, 1], [], []>} : vector<128x128xbf16>, vector<128x128xbf16>, vector<128x128xf32> -> vector<128x128xf32>
    %153 = arith.addf %146, %152 : vector<128x128xf32>
    %154 = vector.extract_strided_slice %19 {offsets = [0, 3, 4, 0], sizes = [2, 8, 8, 128], strides = [1, 1, 1, 1]} : vector<2x12x16x128xf32> to vector<2x8x8x128xf32>
    %155 = vector.shape_cast %154 : vector<2x8x8x128xf32> to vector<128x128xf32>
    %156 = arith.truncf %155 : vector<128x128xf32> to vector<128x128xbf16>
    %c19 = arith.constant 19 : index
    %c0_68 = arith.constant 0 : index
    %c0_69 = arith.constant 0 : index
    %157 = vector.load %arg3[%c19, %c0_68, %c0_69] : memref<25x128x128xbf16, #tpu.memory_space<vmem>>, vector<1x128x128xbf16>
    %158 = vector.shape_cast %157 : vector<1x128x128xbf16> to vector<128x128xbf16>
    %cst_70 = arith.constant dense<0.000000e+00> : vector<128x128xf32>
    %159 = tpu.matmul %156, %158, %cst_70 {dimension_numbers = #tpu.dot_dimension_numbers<[1], [0], [0], [1], [0, 0, 1, 1], [], []>} : vector<128x128xbf16>, vector<128x128xbf16>, vector<128x128xf32> -> vector<128x128xf32>
    %160 = arith.addf %153, %159 : vector<128x128xf32>
    %161 = vector.extract_strided_slice %19 {offsets = [0, 4, 0, 0], sizes = [2, 8, 8, 128], strides = [1, 1, 1, 1]} : vector<2x12x16x128xf32> to vector<2x8x8x128xf32>
    %162 = vector.shape_cast %161 : vector<2x8x8x128xf32> to vector<128x128xf32>
    %163 = arith.truncf %162 : vector<128x128xf32> to vector<128x128xbf16>
    %c20 = arith.constant 20 : index
    %c0_71 = arith.constant 0 : index
    %c0_72 = arith.constant 0 : index
    %164 = vector.load %arg3[%c20, %c0_71, %c0_72] : memref<25x128x128xbf16, #tpu.memory_space<vmem>>, vector<1x128x128xbf16>
    %165 = vector.shape_cast %164 : vector<1x128x128xbf16> to vector<128x128xbf16>
    %cst_73 = arith.constant dense<0.000000e+00> : vector<128x128xf32>
    %166 = tpu.matmul %163, %165, %cst_73 {dimension_numbers = #tpu.dot_dimension_numbers<[1], [0], [0], [1], [0, 0, 1, 1], [], []>} : vector<128x128xbf16>, vector<128x128xbf16>, vector<128x128xf32> -> vector<128x128xf32>
    %167 = arith.addf %160, %166 : vector<128x128xf32>
    %168 = vector.extract_strided_slice %19 {offsets = [0, 4, 1, 0], sizes = [2, 8, 8, 128], strides = [1, 1, 1, 1]} : vector<2x12x16x128xf32> to vector<2x8x8x128xf32>
    %169 = vector.shape_cast %168 : vector<2x8x8x128xf32> to vector<128x128xf32>
    %170 = arith.truncf %169 : vector<128x128xf32> to vector<128x128xbf16>
    %c21 = arith.constant 21 : index
    %c0_74 = arith.constant 0 : index
    %c0_75 = arith.constant 0 : index
    %171 = vector.load %arg3[%c21, %c0_74, %c0_75] : memref<25x128x128xbf16, #tpu.memory_space<vmem>>, vector<1x128x128xbf16>
    %172 = vector.shape_cast %171 : vector<1x128x128xbf16> to vector<128x128xbf16>
    %cst_76 = arith.constant dense<0.000000e+00> : vector<128x128xf32>
    %173 = tpu.matmul %170, %172, %cst_76 {dimension_numbers = #tpu.dot_dimension_numbers<[1], [0], [0], [1], [0, 0, 1, 1], [], []>} : vector<128x128xbf16>, vector<128x128xbf16>, vector<128x128xf32> -> vector<128x128xf32>
    %174 = arith.addf %167, %173 : vector<128x128xf32>
    %175 = vector.extract_strided_slice %19 {offsets = [0, 4, 2, 0], sizes = [2, 8, 8, 128], strides = [1, 1, 1, 1]} : vector<2x12x16x128xf32> to vector<2x8x8x128xf32>
    %176 = vector.shape_cast %175 : vector<2x8x8x128xf32> to vector<128x128xf32>
    %177 = arith.truncf %176 : vector<128x128xf32> to vector<128x128xbf16>
    %c22 = arith.constant 22 : index
    %c0_77 = arith.constant 0 : index
    %c0_78 = arith.constant 0 : index
    %178 = vector.load %arg3[%c22, %c0_77, %c0_78] : memref<25x128x128xbf16, #tpu.memory_space<vmem>>, vector<1x128x128xbf16>
    %179 = vector.shape_cast %178 : vector<1x128x128xbf16> to vector<128x128xbf16>
    %cst_79 = arith.constant dense<0.000000e+00> : vector<128x128xf32>
    %180 = tpu.matmul %177, %179, %cst_79 {dimension_numbers = #tpu.dot_dimension_numbers<[1], [0], [0], [1], [0, 0, 1, 1], [], []>} : vector<128x128xbf16>, vector<128x128xbf16>, vector<128x128xf32> -> vector<128x128xf32>
    %181 = arith.addf %174, %180 : vector<128x128xf32>
    %182 = vector.extract_strided_slice %19 {offsets = [0, 4, 3, 0], sizes = [2, 8, 8, 128], strides = [1, 1, 1, 1]} : vector<2x12x16x128xf32> to vector<2x8x8x128xf32>
    %183 = vector.shape_cast %182 : vector<2x8x8x128xf32> to vector<128x128xf32>
    %184 = arith.truncf %183 : vector<128x128xf32> to vector<128x128xbf16>
    %c23 = arith.constant 23 : index
    %c0_80 = arith.constant 0 : index
    %c0_81 = arith.constant 0 : index
    %185 = vector.load %arg3[%c23, %c0_80, %c0_81] : memref<25x128x128xbf16, #tpu.memory_space<vmem>>, vector<1x128x128xbf16>
    %186 = vector.shape_cast %185 : vector<1x128x128xbf16> to vector<128x128xbf16>
    %cst_82 = arith.constant dense<0.000000e+00> : vector<128x128xf32>
    %187 = tpu.matmul %184, %186, %cst_82 {dimension_numbers = #tpu.dot_dimension_numbers<[1], [0], [0], [1], [0, 0, 1, 1], [], []>} : vector<128x128xbf16>, vector<128x128xbf16>, vector<128x128xf32> -> vector<128x128xf32>
    %188 = arith.addf %181, %187 : vector<128x128xf32>
    %189 = vector.extract_strided_slice %19 {offsets = [0, 4, 4, 0], sizes = [2, 8, 8, 128], strides = [1, 1, 1, 1]} : vector<2x12x16x128xf32> to vector<2x8x8x128xf32>
    %190 = vector.shape_cast %189 : vector<2x8x8x128xf32> to vector<128x128xf32>
    %191 = arith.truncf %190 : vector<128x128xf32> to vector<128x128xbf16>
    %c24 = arith.constant 24 : index
    %c0_83 = arith.constant 0 : index
    %c0_84 = arith.constant 0 : index
    %192 = vector.load %arg3[%c24, %c0_83, %c0_84] : memref<25x128x128xbf16, #tpu.memory_space<vmem>>, vector<1x128x128xbf16>
    %193 = vector.shape_cast %192 : vector<1x128x128xbf16> to vector<128x128xbf16>
    %cst_85 = arith.constant dense<0.000000e+00> : vector<128x128xf32>
    %194 = tpu.matmul %191, %193, %cst_85 {dimension_numbers = #tpu.dot_dimension_numbers<[1], [0], [0], [1], [0, 0, 1, 1], [], []>} : vector<128x128xbf16>, vector<128x128xbf16>, vector<128x128xf32> -> vector<128x128xf32>
    %195 = arith.addf %188, %194 : vector<128x128xf32>
    %c0_86 = arith.constant 0 : index
    %c0_87 = arith.constant 0 : index
    %196 = vector.load %arg4[%c0_86, %c0_87] : memref<1x128xf32, #tpu.memory_space<vmem>>, vector<1x128xf32>
    %197 = vector.broadcast %196 : vector<1x128xf32> to vector<128x128xf32>
    %198 = arith.addf %195, %197 : vector<128x128xf32>
    %cst_88 = arith.constant 0.000000e+00 : f32
    %199 = vector.broadcast %cst_88 : f32 to vector<128x128xf32>
    %200 = arith.maximumf %198, %199 : vector<128x128xf32>
    %201 = vector.extract_strided_slice %200 {offsets = [1, 0], sizes = [127, 128], strides = [1, 1]} : vector<128x128xf32> to vector<127x128xf32>
    %202 = vector.extract_strided_slice %200 {offsets = [0, 0], sizes = [1, 128], strides = [1, 1]} : vector<128x128xf32> to vector<1x128xf32>
    %203 = tpu.concatenate %201, %202 in 0 : vector<127x128xf32>, vector<1x128xf32> -> vector<128x128xf32>
    %204 = arith.maximumf %200, %203 : vector<128x128xf32>
    %205 = vector.extract_strided_slice %204 {offsets = [8, 0], sizes = [120, 128], strides = [1, 1]} : vector<128x128xf32> to vector<120x128xf32>
    %206 = vector.extract_strided_slice %204 {offsets = [0, 0], sizes = [8, 128], strides = [1, 1]} : vector<128x128xf32> to vector<8x128xf32>
    %207 = tpu.concatenate %205, %206 in 0 : vector<120x128xf32>, vector<8x128xf32> -> vector<128x128xf32>
    %208 = arith.maximumf %204, %207 : vector<128x128xf32>
    %209 = arith.truncf %208 : vector<128x128xf32> to vector<128x128xbf16>
    %cst_89 = arith.constant 0.000000e+00 : f32
    %210 = vector.broadcast %cst_89 : f32 to vector<2x512xf32>
    %c0_90 = arith.constant 0 : index
    %c0_91 = arith.constant 0 : index
    %211 = vector.load %arg6[%c0_90, %c0_91] : memref<32x128xbf16, #tpu.memory_space<vmem>>, vector<2x128xbf16>
    %cst_92 = arith.constant dense<0.000000e+00> : vector<2x128xf32>
    %212 = tpu.matmul %211, %209, %cst_92 {dimension_numbers = #tpu.dot_dimension_numbers<[1], [0], [0], [1], [0, 0, 1, 1], [], []>} : vector<2x128xbf16>, vector<128x128xbf16>, vector<2x128xf32> -> vector<2x128xf32>
    %213 = arith.truncf %212 : vector<2x128xf32> to vector<2x128xbf16>
    %c0_93 = arith.constant 0 : index
    %c0_94 = arith.constant 0 : index
    %c0_95 = arith.constant 0 : index
    %214 = vector.load %arg7[%c0_93, %c0_94, %c0_95] : memref<16x128x512xbf16, #tpu.memory_space<vmem>>, vector<1x128x512xbf16>
    %215 = vector.shape_cast %214 : vector<1x128x512xbf16> to vector<128x512xbf16>
    %cst_96 = arith.constant dense<0.000000e+00> : vector<2x512xf32>
    %216 = tpu.matmul %213, %215, %cst_96 {dimension_numbers = #tpu.dot_dimension_numbers<[1], [0], [0], [1], [0, 0, 1, 1], [], []>} : vector<2x128xbf16>, vector<128x512xbf16>, vector<2x512xf32> -> vector<2x512xf32>
    %217 = arith.addf %210, %216 : vector<2x512xf32>
    %c2_97 = arith.constant 2 : index
    %c0_98 = arith.constant 0 : index
    %218 = vector.load %arg6[%c2_97, %c0_98] : memref<32x128xbf16, #tpu.memory_space<vmem>>, vector<2x128xbf16>
    %cst_99 = arith.constant dense<0.000000e+00> : vector<2x128xf32>
    %219 = tpu.matmul %218, %209, %cst_99 {dimension_numbers = #tpu.dot_dimension_numbers<[1], [0], [0], [1], [0, 0, 1, 1], [], []>} : vector<2x128xbf16>, vector<128x128xbf16>, vector<2x128xf32> -> vector<2x128xf32>
    %220 = arith.truncf %219 : vector<2x128xf32> to vector<2x128xbf16>
    %c1_100 = arith.constant 1 : index
    %c0_101 = arith.constant 0 : index
    %c0_102 = arith.constant 0 : index
    %221 = vector.load %arg7[%c1_100, %c0_101, %c0_102] : memref<16x128x512xbf16, #tpu.memory_space<vmem>>, vector<1x128x512xbf16>
    %222 = vector.shape_cast %221 : vector<1x128x512xbf16> to vector<128x512xbf16>
    %cst_103 = arith.constant dense<0.000000e+00> : vector<2x512xf32>
    %223 = tpu.matmul %220, %222, %cst_103 {dimension_numbers = #tpu.dot_dimension_numbers<[1], [0], [0], [1], [0, 0, 1, 1], [], []>} : vector<2x128xbf16>, vector<128x512xbf16>, vector<2x512xf32> -> vector<2x512xf32>
    %224 = arith.addf %217, %223 : vector<2x512xf32>
    %c4_104 = arith.constant 4 : index
    %c0_105 = arith.constant 0 : index
    %225 = vector.load %arg6[%c4_104, %c0_105] : memref<32x128xbf16, #tpu.memory_space<vmem>>, vector<2x128xbf16>
    %cst_106 = arith.constant dense<0.000000e+00> : vector<2x128xf32>
    %226 = tpu.matmul %225, %209, %cst_106 {dimension_numbers = #tpu.dot_dimension_numbers<[1], [0], [0], [1], [0, 0, 1, 1], [], []>} : vector<2x128xbf16>, vector<128x128xbf16>, vector<2x128xf32> -> vector<2x128xf32>
    %227 = arith.truncf %226 : vector<2x128xf32> to vector<2x128xbf16>
    %c2_107 = arith.constant 2 : index
    %c0_108 = arith.constant 0 : index
    %c0_109 = arith.constant 0 : index
    %228 = vector.load %arg7[%c2_107, %c0_108, %c0_109] : memref<16x128x512xbf16, #tpu.memory_space<vmem>>, vector<1x128x512xbf16>
    %229 = vector.shape_cast %228 : vector<1x128x512xbf16> to vector<128x512xbf16>
    %cst_110 = arith.constant dense<0.000000e+00> : vector<2x512xf32>
    %230 = tpu.matmul %227, %229, %cst_110 {dimension_numbers = #tpu.dot_dimension_numbers<[1], [0], [0], [1], [0, 0, 1, 1], [], []>} : vector<2x128xbf16>, vector<128x512xbf16>, vector<2x512xf32> -> vector<2x512xf32>
    %231 = arith.addf %224, %230 : vector<2x512xf32>
    %c6_111 = arith.constant 6 : index
    %c0_112 = arith.constant 0 : index
    %232 = vector.load %arg6[%c6_111, %c0_112] : memref<32x128xbf16, #tpu.memory_space<vmem>>, vector<2x128xbf16>
    %cst_113 = arith.constant dense<0.000000e+00> : vector<2x128xf32>
    %233 = tpu.matmul %232, %209, %cst_113 {dimension_numbers = #tpu.dot_dimension_numbers<[1], [0], [0], [1], [0, 0, 1, 1], [], []>} : vector<2x128xbf16>, vector<128x128xbf16>, vector<2x128xf32> -> vector<2x128xf32>
    %234 = arith.truncf %233 : vector<2x128xf32> to vector<2x128xbf16>
    %c3_114 = arith.constant 3 : index
    %c0_115 = arith.constant 0 : index
    %c0_116 = arith.constant 0 : index
    %235 = vector.load %arg7[%c3_114, %c0_115, %c0_116] : memref<16x128x512xbf16, #tpu.memory_space<vmem>>, vector<1x128x512xbf16>
    %236 = vector.shape_cast %235 : vector<1x128x512xbf16> to vector<128x512xbf16>
    %cst_117 = arith.constant dense<0.000000e+00> : vector<2x512xf32>
    %237 = tpu.matmul %234, %236, %cst_117 {dimension_numbers = #tpu.dot_dimension_numbers<[1], [0], [0], [1], [0, 0, 1, 1], [], []>} : vector<2x128xbf16>, vector<128x512xbf16>, vector<2x512xf32> -> vector<2x512xf32>
    %238 = arith.addf %231, %237 : vector<2x512xf32>
    %c8_118 = arith.constant 8 : index
    %c0_119 = arith.constant 0 : index
    %239 = vector.load %arg6[%c8_118, %c0_119] : memref<32x128xbf16, #tpu.memory_space<vmem>>, vector<2x128xbf16>
    %cst_120 = arith.constant dense<0.000000e+00> : vector<2x128xf32>
    %240 = tpu.matmul %239, %209, %cst_120 {dimension_numbers = #tpu.dot_dimension_numbers<[1], [0], [0], [1], [0, 0, 1, 1], [], []>} : vector<2x128xbf16>, vector<128x128xbf16>, vector<2x128xf32> -> vector<2x128xf32>
    %241 = arith.truncf %240 : vector<2x128xf32> to vector<2x128xbf16>
    %c4_121 = arith.constant 4 : index
    %c0_122 = arith.constant 0 : index
    %c0_123 = arith.constant 0 : index
    %242 = vector.load %arg7[%c4_121, %c0_122, %c0_123] : memref<16x128x512xbf16, #tpu.memory_space<vmem>>, vector<1x128x512xbf16>
    %243 = vector.shape_cast %242 : vector<1x128x512xbf16> to vector<128x512xbf16>
    %cst_124 = arith.constant dense<0.000000e+00> : vector<2x512xf32>
    %244 = tpu.matmul %241, %243, %cst_124 {dimension_numbers = #tpu.dot_dimension_numbers<[1], [0], [0], [1], [0, 0, 1, 1], [], []>} : vector<2x128xbf16>, vector<128x512xbf16>, vector<2x512xf32> -> vector<2x512xf32>
    %245 = arith.addf %238, %244 : vector<2x512xf32>
    %c10_125 = arith.constant 10 : index
    %c0_126 = arith.constant 0 : index
    %246 = vector.load %arg6[%c10_125, %c0_126] : memref<32x128xbf16, #tpu.memory_space<vmem>>, vector<2x128xbf16>
    %cst_127 = arith.constant dense<0.000000e+00> : vector<2x128xf32>
    %247 = tpu.matmul %246, %209, %cst_127 {dimension_numbers = #tpu.dot_dimension_numbers<[1], [0], [0], [1], [0, 0, 1, 1], [], []>} : vector<2x128xbf16>, vector<128x128xbf16>, vector<2x128xf32> -> vector<2x128xf32>
    %248 = arith.truncf %247 : vector<2x128xf32> to vector<2x128xbf16>
    %c5_128 = arith.constant 5 : index
    %c0_129 = arith.constant 0 : index
    %c0_130 = arith.constant 0 : index
    %249 = vector.load %arg7[%c5_128, %c0_129, %c0_130] : memref<16x128x512xbf16, #tpu.memory_space<vmem>>, vector<1x128x512xbf16>
    %250 = vector.shape_cast %249 : vector<1x128x512xbf16> to vector<128x512xbf16>
    %cst_131 = arith.constant dense<0.000000e+00> : vector<2x512xf32>
    %251 = tpu.matmul %248, %250, %cst_131 {dimension_numbers = #tpu.dot_dimension_numbers<[1], [0], [0], [1], [0, 0, 1, 1], [], []>} : vector<2x128xbf16>, vector<128x512xbf16>, vector<2x512xf32> -> vector<2x512xf32>
    %252 = arith.addf %245, %251 : vector<2x512xf32>
    %c12_132 = arith.constant 12 : index
    %c0_133 = arith.constant 0 : index
    %253 = vector.load %arg6[%c12_132, %c0_133] : memref<32x128xbf16, #tpu.memory_space<vmem>>, vector<2x128xbf16>
    %cst_134 = arith.constant dense<0.000000e+00> : vector<2x128xf32>
    %254 = tpu.matmul %253, %209, %cst_134 {dimension_numbers = #tpu.dot_dimension_numbers<[1], [0], [0], [1], [0, 0, 1, 1], [], []>} : vector<2x128xbf16>, vector<128x128xbf16>, vector<2x128xf32> -> vector<2x128xf32>
    %255 = arith.truncf %254 : vector<2x128xf32> to vector<2x128xbf16>
    %c6_135 = arith.constant 6 : index
    %c0_136 = arith.constant 0 : index
    %c0_137 = arith.constant 0 : index
    %256 = vector.load %arg7[%c6_135, %c0_136, %c0_137] : memref<16x128x512xbf16, #tpu.memory_space<vmem>>, vector<1x128x512xbf16>
    %257 = vector.shape_cast %256 : vector<1x128x512xbf16> to vector<128x512xbf16>
    %cst_138 = arith.constant dense<0.000000e+00> : vector<2x512xf32>
    %258 = tpu.matmul %255, %257, %cst_138 {dimension_numbers = #tpu.dot_dimension_numbers<[1], [0], [0], [1], [0, 0, 1, 1], [], []>} : vector<2x128xbf16>, vector<128x512xbf16>, vector<2x512xf32> -> vector<2x512xf32>
    %259 = arith.addf %252, %258 : vector<2x512xf32>
    %c14_139 = arith.constant 14 : index
    %c0_140 = arith.constant 0 : index
    %260 = vector.load %arg6[%c14_139, %c0_140] : memref<32x128xbf16, #tpu.memory_space<vmem>>, vector<2x128xbf16>
    %cst_141 = arith.constant dense<0.000000e+00> : vector<2x128xf32>
    %261 = tpu.matmul %260, %209, %cst_141 {dimension_numbers = #tpu.dot_dimension_numbers<[1], [0], [0], [1], [0, 0, 1, 1], [], []>} : vector<2x128xbf16>, vector<128x128xbf16>, vector<2x128xf32> -> vector<2x128xf32>
    %262 = arith.truncf %261 : vector<2x128xf32> to vector<2x128xbf16>
    %c7_142 = arith.constant 7 : index
    %c0_143 = arith.constant 0 : index
    %c0_144 = arith.constant 0 : index
    %263 = vector.load %arg7[%c7_142, %c0_143, %c0_144] : memref<16x128x512xbf16, #tpu.memory_space<vmem>>, vector<1x128x512xbf16>
    %264 = vector.shape_cast %263 : vector<1x128x512xbf16> to vector<128x512xbf16>
    %cst_145 = arith.constant dense<0.000000e+00> : vector<2x512xf32>
    %265 = tpu.matmul %262, %264, %cst_145 {dimension_numbers = #tpu.dot_dimension_numbers<[1], [0], [0], [1], [0, 0, 1, 1], [], []>} : vector<2x128xbf16>, vector<128x512xbf16>, vector<2x512xf32> -> vector<2x512xf32>
    %266 = arith.addf %259, %265 : vector<2x512xf32>
    %c16_146 = arith.constant 16 : index
    %c0_147 = arith.constant 0 : index
    %267 = vector.load %arg6[%c16_146, %c0_147] : memref<32x128xbf16, #tpu.memory_space<vmem>>, vector<2x128xbf16>
    %cst_148 = arith.constant dense<0.000000e+00> : vector<2x128xf32>
    %268 = tpu.matmul %267, %209, %cst_148 {dimension_numbers = #tpu.dot_dimension_numbers<[1], [0], [0], [1], [0, 0, 1, 1], [], []>} : vector<2x128xbf16>, vector<128x128xbf16>, vector<2x128xf32> -> vector<2x128xf32>
    %269 = arith.truncf %268 : vector<2x128xf32> to vector<2x128xbf16>
    %c8_149 = arith.constant 8 : index
    %c0_150 = arith.constant 0 : index
    %c0_151 = arith.constant 0 : index
    %270 = vector.load %arg7[%c8_149, %c0_150, %c0_151] : memref<16x128x512xbf16, #tpu.memory_space<vmem>>, vector<1x128x512xbf16>
    %271 = vector.shape_cast %270 : vector<1x128x512xbf16> to vector<128x512xbf16>
    %cst_152 = arith.constant dense<0.000000e+00> : vector<2x512xf32>
    %272 = tpu.matmul %269, %271, %cst_152 {dimension_numbers = #tpu.dot_dimension_numbers<[1], [0], [0], [1], [0, 0, 1, 1], [], []>} : vector<2x128xbf16>, vector<128x512xbf16>, vector<2x512xf32> -> vector<2x512xf32>
    %273 = arith.addf %266, %272 : vector<2x512xf32>
    %c18_153 = arith.constant 18 : index
    %c0_154 = arith.constant 0 : index
    %274 = vector.load %arg6[%c18_153, %c0_154] : memref<32x128xbf16, #tpu.memory_space<vmem>>, vector<2x128xbf16>
    %cst_155 = arith.constant dense<0.000000e+00> : vector<2x128xf32>
    %275 = tpu.matmul %274, %209, %cst_155 {dimension_numbers = #tpu.dot_dimension_numbers<[1], [0], [0], [1], [0, 0, 1, 1], [], []>} : vector<2x128xbf16>, vector<128x128xbf16>, vector<2x128xf32> -> vector<2x128xf32>
    %276 = arith.truncf %275 : vector<2x128xf32> to vector<2x128xbf16>
    %c9_156 = arith.constant 9 : index
    %c0_157 = arith.constant 0 : index
    %c0_158 = arith.constant 0 : index
    %277 = vector.load %arg7[%c9_156, %c0_157, %c0_158] : memref<16x128x512xbf16, #tpu.memory_space<vmem>>, vector<1x128x512xbf16>
    %278 = vector.shape_cast %277 : vector<1x128x512xbf16> to vector<128x512xbf16>
    %cst_159 = arith.constant dense<0.000000e+00> : vector<2x512xf32>
    %279 = tpu.matmul %276, %278, %cst_159 {dimension_numbers = #tpu.dot_dimension_numbers<[1], [0], [0], [1], [0, 0, 1, 1], [], []>} : vector<2x128xbf16>, vector<128x512xbf16>, vector<2x512xf32> -> vector<2x512xf32>
    %280 = arith.addf %273, %279 : vector<2x512xf32>
    %c20_160 = arith.constant 20 : index
    %c0_161 = arith.constant 0 : index
    %281 = vector.load %arg6[%c20_160, %c0_161] : memref<32x128xbf16, #tpu.memory_space<vmem>>, vector<2x128xbf16>
    %cst_162 = arith.constant dense<0.000000e+00> : vector<2x128xf32>
    %282 = tpu.matmul %281, %209, %cst_162 {dimension_numbers = #tpu.dot_dimension_numbers<[1], [0], [0], [1], [0, 0, 1, 1], [], []>} : vector<2x128xbf16>, vector<128x128xbf16>, vector<2x128xf32> -> vector<2x128xf32>
    %283 = arith.truncf %282 : vector<2x128xf32> to vector<2x128xbf16>
    %c10_163 = arith.constant 10 : index
    %c0_164 = arith.constant 0 : index
    %c0_165 = arith.constant 0 : index
    %284 = vector.load %arg7[%c10_163, %c0_164, %c0_165] : memref<16x128x512xbf16, #tpu.memory_space<vmem>>, vector<1x128x512xbf16>
    %285 = vector.shape_cast %284 : vector<1x128x512xbf16> to vector<128x512xbf16>
    %cst_166 = arith.constant dense<0.000000e+00> : vector<2x512xf32>
    %286 = tpu.matmul %283, %285, %cst_166 {dimension_numbers = #tpu.dot_dimension_numbers<[1], [0], [0], [1], [0, 0, 1, 1], [], []>} : vector<2x128xbf16>, vector<128x512xbf16>, vector<2x512xf32> -> vector<2x512xf32>
    %287 = arith.addf %280, %286 : vector<2x512xf32>
    %c22_167 = arith.constant 22 : index
    %c0_168 = arith.constant 0 : index
    %288 = vector.load %arg6[%c22_167, %c0_168] : memref<32x128xbf16, #tpu.memory_space<vmem>>, vector<2x128xbf16>
    %cst_169 = arith.constant dense<0.000000e+00> : vector<2x128xf32>
    %289 = tpu.matmul %288, %209, %cst_169 {dimension_numbers = #tpu.dot_dimension_numbers<[1], [0], [0], [1], [0, 0, 1, 1], [], []>} : vector<2x128xbf16>, vector<128x128xbf16>, vector<2x128xf32> -> vector<2x128xf32>
    %290 = arith.truncf %289 : vector<2x128xf32> to vector<2x128xbf16>
    %c11_170 = arith.constant 11 : index
    %c0_171 = arith.constant 0 : index
    %c0_172 = arith.constant 0 : index
    %291 = vector.load %arg7[%c11_170, %c0_171, %c0_172] : memref<16x128x512xbf16, #tpu.memory_space<vmem>>, vector<1x128x512xbf16>
    %292 = vector.shape_cast %291 : vector<1x128x512xbf16> to vector<128x512xbf16>
    %cst_173 = arith.constant dense<0.000000e+00> : vector<2x512xf32>
    %293 = tpu.matmul %290, %292, %cst_173 {dimension_numbers = #tpu.dot_dimension_numbers<[1], [0], [0], [1], [0, 0, 1, 1], [], []>} : vector<2x128xbf16>, vector<128x512xbf16>, vector<2x512xf32> -> vector<2x512xf32>
    %294 = arith.addf %287, %293 : vector<2x512xf32>
    %c24_174 = arith.constant 24 : index
    %c0_175 = arith.constant 0 : index
    %295 = vector.load %arg6[%c24_174, %c0_175] : memref<32x128xbf16, #tpu.memory_space<vmem>>, vector<2x128xbf16>
    %cst_176 = arith.constant dense<0.000000e+00> : vector<2x128xf32>
    %296 = tpu.matmul %295, %209, %cst_176 {dimension_numbers = #tpu.dot_dimension_numbers<[1], [0], [0], [1], [0, 0, 1, 1], [], []>} : vector<2x128xbf16>, vector<128x128xbf16>, vector<2x128xf32> -> vector<2x128xf32>
    %297 = arith.truncf %296 : vector<2x128xf32> to vector<2x128xbf16>
    %c12_177 = arith.constant 12 : index
    %c0_178 = arith.constant 0 : index
    %c0_179 = arith.constant 0 : index
    %298 = vector.load %arg7[%c12_177, %c0_178, %c0_179] : memref<16x128x512xbf16, #tpu.memory_space<vmem>>, vector<1x128x512xbf16>
    %299 = vector.shape_cast %298 : vector<1x128x512xbf16> to vector<128x512xbf16>
    %cst_180 = arith.constant dense<0.000000e+00> : vector<2x512xf32>
    %300 = tpu.matmul %297, %299, %cst_180 {dimension_numbers = #tpu.dot_dimension_numbers<[1], [0], [0], [1], [0, 0, 1, 1], [], []>} : vector<2x128xbf16>, vector<128x512xbf16>, vector<2x512xf32> -> vector<2x512xf32>
    %301 = arith.addf %294, %300 : vector<2x512xf32>
    %c26 = arith.constant 26 : index
    %c0_181 = arith.constant 0 : index
    %302 = vector.load %arg6[%c26, %c0_181] : memref<32x128xbf16, #tpu.memory_space<vmem>>, vector<2x128xbf16>
    %cst_182 = arith.constant dense<0.000000e+00> : vector<2x128xf32>
    %303 = tpu.matmul %302, %209, %cst_182 {dimension_numbers = #tpu.dot_dimension_numbers<[1], [0], [0], [1], [0, 0, 1, 1], [], []>} : vector<2x128xbf16>, vector<128x128xbf16>, vector<2x128xf32> -> vector<2x128xf32>
    %304 = arith.truncf %303 : vector<2x128xf32> to vector<2x128xbf16>
    %c13_183 = arith.constant 13 : index
    %c0_184 = arith.constant 0 : index
    %c0_185 = arith.constant 0 : index
    %305 = vector.load %arg7[%c13_183, %c0_184, %c0_185] : memref<16x128x512xbf16, #tpu.memory_space<vmem>>, vector<1x128x512xbf16>
    %306 = vector.shape_cast %305 : vector<1x128x512xbf16> to vector<128x512xbf16>
    %cst_186 = arith.constant dense<0.000000e+00> : vector<2x512xf32>
    %307 = tpu.matmul %304, %306, %cst_186 {dimension_numbers = #tpu.dot_dimension_numbers<[1], [0], [0], [1], [0, 0, 1, 1], [], []>} : vector<2x128xbf16>, vector<128x512xbf16>, vector<2x512xf32> -> vector<2x512xf32>
    %308 = arith.addf %301, %307 : vector<2x512xf32>
    %c28 = arith.constant 28 : index
    %c0_187 = arith.constant 0 : index
    %309 = vector.load %arg6[%c28, %c0_187] : memref<32x128xbf16, #tpu.memory_space<vmem>>, vector<2x128xbf16>
    %cst_188 = arith.constant dense<0.000000e+00> : vector<2x128xf32>
    %310 = tpu.matmul %309, %209, %cst_188 {dimension_numbers = #tpu.dot_dimension_numbers<[1], [0], [0], [1], [0, 0, 1, 1], [], []>} : vector<2x128xbf16>, vector<128x128xbf16>, vector<2x128xf32> -> vector<2x128xf32>
    %311 = arith.truncf %310 : vector<2x128xf32> to vector<2x128xbf16>
    %c14_189 = arith.constant 14 : index
    %c0_190 = arith.constant 0 : index
    %c0_191 = arith.constant 0 : index
    %312 = vector.load %arg7[%c14_189, %c0_190, %c0_191] : memref<16x128x512xbf16, #tpu.memory_space<vmem>>, vector<1x128x512xbf16>
    %313 = vector.shape_cast %312 : vector<1x128x512xbf16> to vector<128x512xbf16>
    %cst_192 = arith.constant dense<0.000000e+00> : vector<2x512xf32>
    %314 = tpu.matmul %311, %313, %cst_192 {dimension_numbers = #tpu.dot_dimension_numbers<[1], [0], [0], [1], [0, 0, 1, 1], [], []>} : vector<2x128xbf16>, vector<128x512xbf16>, vector<2x512xf32> -> vector<2x512xf32>
    %315 = arith.addf %308, %314 : vector<2x512xf32>
    %c30 = arith.constant 30 : index
    %c0_193 = arith.constant 0 : index
    %316 = vector.load %arg6[%c30, %c0_193] : memref<32x128xbf16, #tpu.memory_space<vmem>>, vector<2x128xbf16>
    %cst_194 = arith.constant dense<0.000000e+00> : vector<2x128xf32>
    %317 = tpu.matmul %316, %209, %cst_194 {dimension_numbers = #tpu.dot_dimension_numbers<[1], [0], [0], [1], [0, 0, 1, 1], [], []>} : vector<2x128xbf16>, vector<128x128xbf16>, vector<2x128xf32> -> vector<2x128xf32>
    %318 = arith.truncf %317 : vector<2x128xf32> to vector<2x128xbf16>
    %c15_195 = arith.constant 15 : index
    %c0_196 = arith.constant 0 : index
    %c0_197 = arith.constant 0 : index
    %319 = vector.load %arg7[%c15_195, %c0_196, %c0_197] : memref<16x128x512xbf16, #tpu.memory_space<vmem>>, vector<1x128x512xbf16>
    %320 = vector.shape_cast %319 : vector<1x128x512xbf16> to vector<128x512xbf16>
    %cst_198 = arith.constant dense<0.000000e+00> : vector<2x512xf32>
    %321 = tpu.matmul %318, %320, %cst_198 {dimension_numbers = #tpu.dot_dimension_numbers<[1], [0], [0], [1], [0, 0, 1, 1], [], []>} : vector<2x128xbf16>, vector<128x512xbf16>, vector<2x512xf32> -> vector<2x512xf32>
    %322 = arith.addf %315, %321 : vector<2x512xf32>
    %c0_199 = arith.constant 0 : index
    %c0_200 = arith.constant 0 : index
    %323 = vector.load %arg8[%c0_199, %c0_200] : memref<1x512xf32, #tpu.memory_space<vmem>>, vector<1x512xf32>
    %324 = vector.broadcast %323 : vector<1x512xf32> to vector<2x512xf32>
    %325 = arith.addf %322, %324 : vector<2x512xf32>
    %cst_201 = arith.constant 0.000000e+00 : f32
    %326 = vector.broadcast %cst_201 : f32 to vector<2x512xf32>
    %327 = arith.maximumf %325, %326 : vector<2x512xf32>
    %328 = arith.truncf %327 : vector<2x512xf32> to vector<2x512xbf16>
    %c0_202 = arith.constant 0 : index
    %c0_203 = arith.constant 0 : index
    %329 = vector.load %arg9[%c0_202, %c0_203] : memref<512x128xbf16, #tpu.memory_space<vmem>>, vector<512x128xbf16>
    %cst_204 = arith.constant dense<0.000000e+00> : vector<2x128xf32>
    %330 = tpu.matmul %328, %329, %cst_204 {dimension_numbers = #tpu.dot_dimension_numbers<[1], [0], [0], [1], [0, 0, 1, 1], [], []>} : vector<2x512xbf16>, vector<512x128xbf16>, vector<2x128xf32> -> vector<2x128xf32>
    %c0_205 = arith.constant 0 : index
    %c0_206 = arith.constant 0 : index
    %331 = vector.load %arg10[%c0_205, %c0_206] : memref<1x128xf32, #tpu.memory_space<vmem>>, vector<1x128xf32>
    %332 = vector.broadcast %331 : vector<1x128xf32> to vector<2x128xf32>
    %333 = arith.addf %330, %332 : vector<2x128xf32>
    %c0_207 = arith.constant 0 : index
    %c0_208 = arith.constant 0 : index
    %334 = vector.load %arg11[%c0_207, %c0_208] : memref<2x128xf32, #tpu.memory_space<vmem>>, vector<2x128xf32>
    tpu.vector_store %arg11[%c0_207, %c0_208], %333 {strides = array<i32>} : memref<2x128xf32, #tpu.memory_space<vmem>>, vector<2x128xf32>,
    return
  }
}

</mosaic_0001>

<bundles_post_ra>
// kernel: mnistnet_forward.1
= control target key start
LH: loop header
LB: loop body
LE: loop exit
PB: predicated region body
PF: predicated region fallthrough
CT: control target
= control target key end

     0   :  { %16 = vsyncpa [#allocation3], 0  ;;  %s25429_s0 = inlined_call_operand.vmem [shape: bf16[1152,32], index: 0, kind: input, shape index: {}]   ;;  %s25430_s1 = inlined_call_operand.hbm [shape: bf16[32,128], index: 1, kind: input, shape index: {}]   ;;  %s25431_s2 = inlined_call_operand.hbm [shape: f32[1,128], index: 2, kind: input, shape index: {}]   ;;  %s25432_s3 = inlined_call_operand.vmem [shape: bf16[25,128,128], index: 3, kind: input, shape index: {}]   ;;  %s25433_s4 = inlined_call_operand.hbm [shape: f32[1,128], index: 4, kind: input, shape index: {}]   ;;  %s25434_s5 = inlined_call_operand.vmem [shape: bf16[384,1152], index: 5, kind: input, shape index: {}]   ;;  %s25435_s6 = inlined_call_operand.hbm [shape: bf16[32,128], index: 6, kind: input, shape index: {}]   ;;  %s25436_s7 = inlined_call_operand.hbm [shape: bf16[16,128,512], index: 7, kind: input, shape index: {}]   ;;  %s25437_s8 = inlined_call_operand.hbm [shape: f32[1,512], index: 8, kind: input, shape index: {}]   ;;  %s25438_s9 = inlined_call_operand.hbm [shape: bf16[512,128], index: 9, kind: input, shape index: {}]   ;;  %s25439_s10 = inlined_call_operand.hbm [shape: f32[1,128], index: 10, kind: input, shape index: {}]   ;;  %s25440_s11 = inlined_call_operand.hbm [shape: f32[2,128], index: 11, kind: output, shape index: {}]  }
   0x1   :  { %17 = vsyncpa [#allocation6], 0 }
   0x2   :  { %18 = vsyncpa [#allocation9], 0 }
   0x3   :  { %19 = vsyncpa [#allocation12], 0 }
   0x4   :  { %20 = vsyncpa [#allocation15], 0 }
   0x5   :  { %21 = vsyncpa [#allocation4], 0  ;;  %s21565_s17 = smov [#allocation5]   ;;  %s21355_s21 = scalar_lea.hbm %s25431_s2, 16 }
   0x6   :  { %s42_s18 = sshll.u32 %s21565_s17, 4  ;;  %p21356_p0 = scmp.ne.s32.totalorder %s25431_s2, %s21355_s21  ;;  %s43_s18 = int_to_ptr.vmem [resolvable:$true] %s42_s18 }
   0x7   :  { %p21359_p1 = scmp.lt.u32.totalorder %s21355_s21, %s25431_s2 }
   0x9   :  { %p21361_p2 = pnand %p21359_p1, %p21356_p0 }
   0xb   :  { %21364 = shalt.err (!%p21361_p2)
}
   0xc   :  { %s21365_s26 = scalar_lea.vmem %s43_s18, 16  ;;  %s21369_s27 = scalar_lea.vmem %s43_s18, 32 }
   0xd   :  { %p21366_p3 = scmp.ne.s32.totalorder %s43_s18, %s21365_s26  ;;  %p21370_p4 = scmp.lt.s32.totalorder %s43_s18, %s43_s18 }
   0xe   :  { %p21371_p5 = scmp.lt.s32.totalorder %s21369_s27, %s21365_s26 }
  0x10   :  { %p21372_p6 = por %p21371_p5, %p21370_p4 }
  0x12   :  { %p21373_p7 = pnand %p21372_p6, %p21366_p3 }
  0x14   :  { %21376 = shalt.err (!%p21373_p7)
}
  0x15   :  { %45 = dma.hbm_to_vmem [thread:$0]  %s25431_s2, 16, %s43_s18, [#allocation6]  }
  0x16   :  { %s21566_s30 = smov [#allocation8]   ;;  %s21567_s13 = smov [#allocation11]  }
  0x17   :  { %s65_s12 = sshll.u32 %s21566_s30, 4  ;;  %s90_s14 = sshll.u32 %s21567_s13, 4  ;;  %s66_s12 = int_to_ptr.vmem [resolvable:$true] %s65_s12  ;;  %s91_s14 = int_to_ptr.vmem [resolvable:$true] %s90_s14 }
  0x18   :  { %s21377_s17 = scalar_lea.hbm %s25435_s6, 256 }
  0x19   :  { %p21378_p8 = scmp.ne.s32.totalorder %s25435_s6, %s21377_s17  ;;  %p21381_p9 = scmp.lt.u32.totalorder %s21377_s17, %s25435_s6 }
  0x1b   :  { %p21383_p10 = pnand %p21381_p9, %p21378_p8 }
  0x1d   :  { %21386 = shalt.err (!%p21383_p10)
}
  0x1e   :  { %s21387_s2 = scalar_lea.vmem %s66_s12, 256  ;;  %p21392_p12 = scmp.lt.s32.totalorder %s66_s12, %s66_s12 }
  0x1f   :  { %p21388_p11 = scmp.ne.s32.totalorder %s66_s12, %s21387_s2  ;;  %p21393_p13 = scmp.lt.s32.totalorder %s21387_s2, %s21387_s2 }
  0x21   :  { %p21394_p0 = por %p21393_p13, %p21392_p12 }
  0x23   :  { %p21395_p1 = pnand %p21394_p0, %p21388_p11 }
  0x25   :  { %21398 = shalt.err (!%p21395_p1)
}
  0x26   :  { %s21568_s18 = smov 64   ;;  %s21569_s23 = smov 4  }
  0x27   :  { %71 = dma.hbm_to_vmem [thread:$0]  %s25435_s6, 256, %s66_s12, [#allocation9], %s21568_s18, %s21568_s18, %s21569_s23  }
  0x28   :  { %s21399_s28 = scalar_lea.hbm %s25437_s8, 64 }
  0x29   :  { %p21400_p2 = scmp.ne.s32.totalorder %s25437_s8, %s21399_s28  ;;  %p21403_p3 = scmp.lt.u32.totalorder %s21399_s28, %s25437_s8 }
  0x2b   :  { %p21405_p4 = pnand %p21403_p3, %p21400_p2 }
  0x2d   :  { %21408 = shalt.err (!%p21405_p4)
}
  0x2e   :  { %s21409_s16 = scalar_lea.vmem %s91_s14, 64  ;;  %p21414_p6 = scmp.lt.s32.totalorder %s91_s14, %s91_s14 }
  0x2f   :  { %p21410_p5 = scmp.ne.s32.totalorder %s91_s14, %s21409_s16  ;;  %p21415_p7 = scmp.lt.s32.totalorder %s21409_s16, %s21409_s16 }
  0x31   :  { %p21416_p8 = por %p21415_p7, %p21414_p6 }
  0x33   :  { %p21417_p9 = pnand %p21416_p8, %p21410_p5 }
  0x35   :  { %21420 = shalt.err (!%p21417_p9)
}
  0x36   :  { %93 = dma.hbm_to_vmem [thread:$0]  %s25437_s8, 64, %s91_s14, [#allocation12]  }
  0x37   :  { %s21570_s17 = smov [#allocation2]   ;;  %s21571_s20 = smov [#allocation7]  }
  0x38   :  { %s29_s19 = sshll.u32 %s21570_s17, 4  ;;  %s54_s21 = sshll.u32 %s21571_s20, 4  ;;  %s30_s19 = int_to_ptr.vmem [resolvable:$true] %s29_s19  ;;  %s55_s21 = int_to_ptr.vmem [resolvable:$true] %s54_s21 }
  0x39   :  { %s21421_s24 = scalar_lea.hbm %s25430_s1, 256 }
  0x3a   :  { %p21422_p10 = scmp.ne.s32.totalorder %s25430_s1, %s21421_s24  ;;  %p21425_p11 = scmp.lt.u32.totalorder %s21421_s24, %s25430_s1 }
  0x3c   :  { %p21427_p12 = pnand %p21425_p11, %p21422_p10 }
  0x3e   :  { %21430 = shalt.err (!%p21427_p12)
}
  0x3f   :  { %s21431_s8 = scalar_lea.vmem %s30_s19, 256  ;;  %p21436_p0 = scmp.lt.s32.totalorder %s30_s19, %s30_s19 }
  0x40   :  { %p21432_p13 = scmp.ne.s32.totalorder %s30_s19, %s21431_s8  ;;  %p21437_p1 = scmp.lt.s32.totalorder %s21431_s8, %s21431_s8 }
  0x42   :  { %p21438_p2 = por %p21437_p1, %p21436_p0 }
  0x44   :  { %p21439_p3 = pnand %p21438_p2, %p21432_p13 }
  0x46   :  { %21442 = shalt.err (!%p21439_p3)
}
  0x47   :  { %35 = dma.hbm_to_vmem [thread:$0]  %s25430_s1, 256, %s30_s19, [#allocation3], %s21568_s18, %s21568_s18, %s21569_s23  }
  0x48   :  { %s21443_s15 = scalar_lea.hbm %s25433_s4, 16 }
  0x49   :  { %p21444_p4 = scmp.ne.s32.totalorder %s25433_s4, %s21443_s15  ;;  %p21447_p5 = scmp.lt.u32.totalorder %s21443_s15, %s25433_s4 }
  0x4b   :  { %p21449_p6 = pnand %p21447_p5, %p21444_p4 }
  0x4d   :  { %21452 = shalt.err (!%p21449_p6)
}
  0x4e   :  { %s21453_s20 = scalar_lea.vmem %s55_s21, 16  ;;  %s21457_s22 = scalar_lea.vmem %s55_s21, 32 }
  0x4f   :  { %p21454_p7 = scmp.ne.s32.totalorder %s55_s21, %s21453_s20  ;;  %p21458_p8 = scmp.lt.s32.totalorder %s55_s21, %s55_s21 }
  0x50   :  { %p21459_p9 = scmp.lt.s32.totalorder %s21457_s22, %s21453_s20 }
  0x52   :  { %p21460_p10 = por %p21459_p9, %p21458_p8 }
  0x54   :  { %p21461_p11 = pnand %p21460_p10, %p21454_p7 }
  0x56   :  { %21464 = shalt.err (!%p21461_p11)
}
  0x57   :  { %57 = dma.hbm_to_vmem [thread:$0]  %s25433_s4, 16, %s55_s21, [#allocation6]  }
  0x58   :  { %s21572_s2 = smov [#allocation10]   ;;  %s21465_s27 = scalar_lea.hbm %s25436_s7, 65536 }
  0x59   :  { %s77_s24 = sshll.u32 %s21572_s2, 4  ;;  %p21466_p12 = scmp.ne.s32.totalorder %s25436_s7, %s21465_s27  ;;  %s78_s24 = int_to_ptr.vmem [resolvable:$true] %s77_s24 }
  0x5a   :  { %p21469_p13 = scmp.lt.u32.totalorder %s21465_s27, %s25436_s7 }
  0x5c   :  { %p21471_p0 = pnand %p21469_p13, %p21466_p12 }
  0x5e   :  { %21474 = shalt.err (!%p21471_p0)
}
  0x5f   :  { %s21475_s30 = scalar_lea.vmem %s78_s24, 65536  ;;  %p21480_p2 = scmp.lt.s32.totalorder %s78_s24, %s78_s24 }
  0x60   :  { %p21476_p1 = scmp.ne.s32.totalorder %s78_s24, %s21475_s30  ;;  %p21481_p3 = scmp.lt.s32.totalorder %s21475_s30, %s21475_s30 }
  0x62   :  { %p21482_p4 = por %p21481_p3, %p21480_p2 }
  0x64   :  { %p21483_p5 = pnand %p21482_p4, %p21476_p1 }
  0x66   :  { %21486 = shalt.err (!%p21483_p5)
}
  0x67   :  { %s21573_s4 = smov 256   ;;  %s21574_s21 = smov 16  }
  0x68   :  { %83 = dma.hbm_to_vmem [thread:$0]  %s25436_s7, 65536, %s78_s24, [#allocation9], %s21573_s4, %s21573_s4, %s21574_s21  }
  0x69   :  { %s21575_s16 = smov [#allocation13]   ;;  %s21576_s12 = smov [#allocation14]  }
  0x6a   :  { %s99_s6 = sshll.u32 %s21575_s16, 4  ;;  %s112_s17 = sshll.u32 %s21576_s12, 4  ;;  %s100_s6 = int_to_ptr.vmem [resolvable:$true] %s99_s6  ;;  %s113_s17 = int_to_ptr.vmem [resolvable:$true] %s112_s17 }
  0x6b   :  { %s21487_s1 = scalar_lea.hbm %s25438_s9, 4096 }
  0x6c   :  { %p21488_p6 = scmp.ne.s32.totalorder %s25438_s9, %s21487_s1  ;;  %p21491_p7 = scmp.lt.u32.totalorder %s21487_s1, %s25438_s9 }
  0x6e   :  { %p21493_p8 = pnand %p21491_p7, %p21488_p6 }
  0x70   :  { %21496 = shalt.err (!%p21493_p8)
}
  0x71   :  { %s21497_s7 = scalar_lea.vmem %s100_s6, 4096  ;;  %p21502_p10 = scmp.lt.s32.totalorder %s100_s6, %s100_s6 }
  0x72   :  { %p21498_p9 = scmp.ne.s32.totalorder %s100_s6, %s21497_s7  ;;  %p21503_p11 = scmp.lt.s32.totalorder %s21497_s7, %s21497_s7 }
  0x74   :  { %p21504_p12 = por %p21503_p11, %p21502_p10 }
  0x76   :  { %p21505_p13 = pnand %p21504_p12, %p21498_p9 }
  0x78   :  { %21508 = shalt.err (!%p21505_p13)
}
  0x79   :  { %105 = dma.hbm_to_vmem [thread:$0]  %s25438_s9, 4096, %s100_s6, [#allocation12], %s21568_s18, %s21568_s18, %s21569_s23  }
  0x7a   :  { %s21509_s14 = scalar_lea.hbm %s25439_s10, 16 }
  0x7b   :  { %p21510_p0 = scmp.ne.s32.totalorder %s25439_s10, %s21509_s14  ;;  %p21513_p1 = scmp.lt.u32.totalorder %s21509_s14, %s25439_s10 }
  0x7d   :  { %p21515_p2 = pnand %p21513_p1, %p21510_p0 }
  0x7f   :  { %21518 = shalt.err (!%p21515_p2)
}
  0x80   :  { %s21519_s13 = scalar_lea.vmem %s113_s17, 16  ;;  %s21523_s15 = scalar_lea.vmem %s113_s17, 32 }
  0x81   :  { %p21520_p3 = scmp.ne.s32.totalorder %s113_s17, %s21519_s13  ;;  %p21524_p4 = scmp.lt.s32.totalorder %s113_s17, %s113_s17 }
  0x82   :  { %p21525_p5 = scmp.lt.s32.totalorder %s21523_s15, %s21519_s13 }
  0x84   :  { %p21526_p6 = por %p21525_p5, %p21524_p4 }
  0x86   :  { %p21527_p7 = pnand %p21526_p6, %p21520_p3 }
  0x88   :  { %21530 = shalt.err (!%p21527_p7)
}
  0x89   :  { %115 = dma.hbm_to_vmem [thread:$0]  %s25439_s10, 16, %s113_s17, [#allocation15]  }
  0x8a   :  { %21553 = dma.done.wait [#allocation3], 256  }
  0x8b   :  { %21554 = vsyncadd [#allocation3], 4294967040 }
  0x8c   :  { %21555 = dma.done.wait [#allocation6], 32  }
  0x8d   :  { %21556 = vsyncadd [#allocation6], 4294967264 }
  0x8e   :  { %21557 = dma.done.wait [#allocation9], 65792  }
  0x8f   :  { %21558 = vsyncadd [#allocation9], 4294901504 }
  0x90   :  { %21559 = dma.done.wait [#allocation12], 4160  }
  0x91   :  { %21560 = vsyncadd [#allocation12], 4294963136 }
  0x92   :  { %21561 = dma.done.wait [#allocation15], 16  }
  0x93   :  { %21562 = vsyncadd [#allocation15], 4294967280  ;;  %v19954_v0 = vld [vmem:[#allocation2] sm:$0xff]   ;;  %v19955_v1 = vld [vmem:[#allocation2 + $0x8] sm:$0xff]   ;;  %vm668_vm0 = vcmask 261120   ;;  %v25441_v33 = vmov 0  }
  0x94   :  { %17934 = vmatprep.subr.bf16.mxu0 %v19954_v0  ;;  %v19956_v2 = vld [vmem:[%s25429_s0] sm:$0xff]   ;;  %v19957_v3 = vld [vmem:[%s25429_s0 + $0x8] sm:$0xff]   ;;  %v19958_v4 = vld [vmem:[%s25429_s0 + $0x10] sm:$0xff]   ;;  %3920 = vmatprep.subr.bf16.mxu1 %v25441_v33  ;;  %vm1782_vm1 = vcmask 1046528   ;;  %vm5480_vm2 = vcmask 1045504   ;;  %vm5731_vm3 = vcmask 1044480  }
  0x95   :  { %17935 = vmatpush3.bf16.msra.mxu0 %v19954_v0  ;;  %17938 = vmatprep.mubr.msk.bf16.mxu0 %vm668_vm0, %v19956_v2  ;;  %v19959_v5 = vld [vmem:[%s25429_s0 + $0x18] sm:$0xff]   ;;  %v19960_v6 = vld [vmem:[%s25429_s0 + $0x20] sm:$0xff]   ;;  %v19961_v7 = vld [vmem:[%s25429_s0 + $0x28] sm:$0xff]   ;;  %vm5982_vm4 = vcmask 1043456   ;;  %vm21579_vm5 = vmmov 0  }
  0x96   :  { %17936 = vmatprep.subr.bf16.mxu0 %v19955_v1  ;;  %v19962_v8 = vld [vmem:[%s25429_s0 + $0x30] sm:$0xff]   ;;  %v19963_v9 = vld [vmem:[%s25429_s0 + $0x38] sm:$0xff]   ;;  %v19964_v10 = vld [vmem:[%s25429_s0 + $0x40] sm:$0xff]  }
  0x97   :  { %v19965_v11 = vld [vmem:[%s25429_s0 + $0x48] sm:$0xff]   ;;  %v19966_v12 = vld [vmem:[%s25429_s0 + $0x50] sm:$0xff]   ;;  %v19967_v13 = vld [vmem:[%s25429_s0 + $0x58] sm:$0xff]  }
  0x98   :  { %v19968_v14 = vld [vmem:[%s25429_s0 + $0x60] sm:$0xff]   ;;  %v19969_v15 = vld [vmem:[%s25429_s0 + $0x68] sm:$0xff]   ;;  %v19970_v16 = vld [vmem:[%s25429_s0 + $0x70] sm:$0xff]  }
  0x99   :  { %17937 = vmatpush3.bf16.msra.mxu0 %v19955_v1  ;;  %v19971_v17 = vld [vmem:[%s25429_s0 + $0x78] sm:$0xff]   ;;  %v19972_v18 = vld [vmem:[%s25429_s0 + $0x80] sm:$0xff]   ;;  %v19973_v19 = vld [vmem:[%s25429_s0 + $0x88] sm:$0xff]  }
  0x9a   :  { %v19974_v20 = vld [vmem:[%s25429_s0 + $0x90] sm:$0xff]   ;;  %v19975_v21 = vld [vmem:[%s25429_s0 + $0x98] sm:$0xff]   ;;  %v19976_v22 = vld [vmem:[%s25429_s0 + $0xa0] sm:$0xff]  }
  0x9b   :  { %v19977_v23 = vld [vmem:[%s25429_s0 + $0xa8] sm:$0xff]   ;;  %v19978_v24 = vld [vmem:[%s25429_s0 + $0xb0] sm:$0xff]   ;;  %v19979_v25 = vld [vmem:[%s25429_s0 + $0xb8] sm:$0xff]  }
  0x9c   :  { %17939 = vmatmul.mubr.msk.bf16.vlgmr.msra.gmra.mrb[0].mxu0 %vm668_vm0, %v19957_v3  ;;  %v19980_v26 = vld [vmem:[%s25429_s0 + $0xc0] sm:$0xff]   ;;  %v19981_v27 = vld [vmem:[%s25429_s0 + $0xc8] sm:$0xff]   ;;  %v19982_v28 = vld [vmem:[%s25429_s0 + $0xd0] sm:$0xff]  }
  0x9d   :  { %17942 = vmatprep.mubr.msk.bf16.mxu0 %vm668_vm0, %v19958_v4  ;;  %v19983_v29 = vld [vmem:[%s25429_s0 + $0xd8] sm:$0xff]   ;;  %v19984_v30 = vld [vmem:[%s25429_s0 + $0xe0] sm:$0xff]   ;;  %v19985_v31 = vld [vmem:[%s25429_s0 + $0xe8] sm:$0xff]  }
  0x9e   :  { %v19986_v32 = vld [vmem:[%s25429_s0 + $0xf0] sm:$0xff]   ;;  %v19987_v34 = vld [vmem:[%s25429_s0 + $0xf8] sm:$0xff]   ;;  %v19988_v35 = vld [vmem:[%s25429_s0 + $0x100] sm:$0xff]  }
  0x9f   :  { %v19989_v36 = vld [vmem:[%s25429_s0 + $0x108] sm:$0xff]   ;;  %v19990_v37 = vld [vmem:[%s25429_s0 + $0x110] sm:$0xff]   ;;  %v19991_v38 = vld [vmem:[%s25429_s0 + $0x118] sm:$0xff]  }
  0xa0   :  { %v19992_v39 = vld [vmem:[%s25429_s0 + $0x120] sm:$0xff]   ;;  %v19993_v40 = vld [vmem:[%s25429_s0 + $0x128] sm:$0xff]   ;;  %v19994_v41 = vld [vmem:[%s25429_s0 + $0x130] sm:$0xff]  }
  0xa1   :  { %v19995_v42 = vld [vmem:[%s25429_s0 + $0x138] sm:$0xff]   ;;  %v19996_v43 = vld [vmem:[%s25429_s0 + $0x140] sm:$0xff]   ;;  %v19997_v44 = vld [vmem:[%s25429_s0 + $0x148] sm:$0xff]  }
  0xa2   :  { %v19998_v45 = vld [vmem:[%s25429_s0 + $0x150] sm:$0xff]   ;;  %v19999_v46 = vld [vmem:[%s25429_s0 + $0x158] sm:$0xff]   ;;  %v20000_v47 = vld [vmem:[%s25429_s0 + $0x160] sm:$0xff]  }
  0xa3   :  { %v20030_v48 = vld [vmem:[%s25434_s5 + $0x4] ss:$36 sps:$4 sm:$0xff]   ;;  %v20002_v50 = vld [vmem:[%s25429_s0 + $0x170] sm:$0xff]   ;;  %v20003_v51 = vld [vmem:[%s25429_s0 + $0x178] sm:$0xff]  }
  0xa4   :  { %17943 = vmatmul.mubr.msk.bf16.gmra.mrb[4].mxu0 %vm668_vm0, %v19959_v5  ;;  %v20001_v49 = vld [vmem:[%s25429_s0 + $0x168] sm:$0xff]   ;;  %3952 = vmatprep.mubr.bf16.mxu1 %v20030_v48  ;;  %v20004_v52 = vld [vmem:[%s25429_s0 + $0x180] sm:$0xff]   ;;  %v20006_v54 = vld [vmem:[%s25429_s0 + $0x190] sm:$0xff]  }
  0xa5   :  { %17946 = vmatprep.mubr.msk.bf16.mxu0 %vm668_vm0, %v19960_v6  ;;  %v20005_v53 = vld [vmem:[%s25429_s0 + $0x188] sm:$0xff]   ;;  %v20007_v55 = vld [vmem:[%s25429_s0 + $0x198] sm:$0xff]   ;;  %v20008_v56 = vld [vmem:[%s25429_s0 + $0x1a0] sm:$0xff]  }
  0xa6   :  { %v20009_v57 = vld [vmem:[%s25429_s0 + $0x1a8] sm:$0xff]   ;;  %v20010_v58 = vld [vmem:[%s25429_s0 + $0x1b0] sm:$0xff]   ;;  %v20011_v61 = vld [vmem:[%s25429_s0 + $0x1b8] sm:$0xff]  }
  0xa7   :  { %v21968_v59 = vld [vmem:[#allocation5] ss:$0 sm:$0xff]  ;;  %v20012_v0 = vld [vmem:[%s25429_s0 + $0x1c0] sm:$0xff]  }
  0xac   :  { %17947 = vmatmul.mubr.msk.bf16.gmra.mrb[8].mxu0 %vm668_vm0, %v19961_v7 }
  0xad   :  { %17950 = vmatprep.mubr.msk.bf16.mxu0 %vm668_vm0, %v19962_v8 }
  0xb4   :  { %17951 = vmatmul.mubr.msk.bf16.gmra.mrb[12].mxu0 %vm668_vm0, %v19963_v9 }
  0xb5   :  { %17954 = vmatprep.mubr.msk.bf16.mxu0 %vm668_vm0, %v19964_v10 }
  0xbc   :  { %17955 = vmatmul.mubr.msk.bf16.gmra.mrb[16].mxu0 %vm668_vm0, %v19965_v11 }
  0xbd   :  { %17958 = vmatprep.mubr.msk.bf16.mxu0 %vm668_vm0, %v19966_v12 }
  0xc4   :  { %17959 = vmatmul.mubr.msk.bf16.gmra.mrb[20].mxu0 %vm668_vm0, %v19967_v13 }
  0xc5   :  { %17962 = vmatprep.mubr.msk.bf16.mxu0 %vm668_vm0, %v19968_v14 }
  0xcc   :  { %17963 = vmatmul.mubr.msk.bf16.gmra.mrb[24].mxu0 %vm668_vm0, %v19969_v15  ;;  %v20013_v15 = vld [vmem:[%s25429_s0 + $0x1c8] sm:$0xff]  }
  0xcd   :  { %17966 = vmatprep.mubr.msk.bf16.mxu0 %vm668_vm0, %v19970_v16 }
  0xd4   :  { %17967 = vmatmul.mubr.msk.bf16.gmra.mrb[28].mxu0 %vm668_vm0, %v19971_v17 }
  0xd5   :  { %17970 = vmatprep.mubr.msk.bf16.mxu0 %vm668_vm0, %v19972_v18  ;;  %v20014_v18 = vld [vmem:[%s25429_s0 + $0x1d0] sm:$0xff]  }
  0xdc   :  { %17971 = vmatmul.mubr.msk.bf16.gmra.mrb[32].mxu0 %vm668_vm0, %v19973_v19 }
  0xdd   :  { %17974 = vmatprep.mubr.msk.bf16.mxu0 %vm668_vm0, %v19974_v20 }
  0xe4   :  { %17975 = vmatmul.mubr.msk.bf16.gmra.mrb[36].mxu0 %vm668_vm0, %v19975_v21 }
  0xe5   :  { %17978 = vmatprep.mubr.msk.bf16.mxu0 %vm668_vm0, %v19976_v22 }
  0xec   :  { %17979 = vmatmul.mubr.msk.bf16.gmra.mrb[40].mxu0 %vm668_vm0, %v19977_v23 }
  0xed   :  { %17982 = vmatprep.mubr.msk.bf16.mxu0 %vm668_vm0, %v19978_v24 }
  0xf4   :  { %17983 = vmatmul.mubr.msk.bf16.gmra.mrb[44].mxu0 %vm668_vm0, %v19979_v25 }
  0xf5   :  { %17986 = vmatprep.mubr.msk.bf16.mxu0 %vm668_vm0, %v19980_v26 }
  0xfc   :  { %17987 = vmatmul.mubr.msk.bf16.gmra.mrb[48].mxu0 %vm668_vm0, %v19981_v27 }
  0xfd   :  { %17990 = vmatprep.mubr.msk.bf16.mxu0 %vm668_vm0, %v19982_v28 }
 0x104   :  { %17991 = vmatmul.mubr.msk.bf16.gmra.mrb[52].mxu0 %vm668_vm0, %v19983_v29 }
 0x105   :  { %17994 = vmatprep.mubr.msk.bf16.mxu0 %vm668_vm0, %v19984_v30 }
 0x10c   :  { %17995 = vmatmul.mubr.msk.bf16.gmra.mrb[56].mxu0 %vm668_vm0, %v19985_v31 }
 0x10d   :  { %17998 = vmatprep.mubr.msk.bf16.mxu0 %vm668_vm0, %v19986_v32 }
 0x114   :  { %17999 = vmatmul.mubr.msk.bf16.gmra.mrb[60].mxu0 %vm668_vm0, %v19987_v34 }
 0x115   :  { %18002 = vmatprep.mubr.msk.bf16.mxu0 %vm668_vm0, %v19988_v35 }
 0x11c   :  { %18003 = vmatmul.mubr.msk.bf16.gmra.mrb[64].mxu0 %vm668_vm0, %v19989_v36 }
 0x11d   :  { %18006 = vmatprep.mubr.msk.bf16.mxu0 %vm668_vm0, %v19990_v37 }
 0x124   :  { %18007 = vmatmul.mubr.msk.bf16.gmra.mrb[68].mxu0 %vm668_vm0, %v19991_v38 }
 0x125   :  { %18010 = vmatprep.mubr.msk.bf16.mxu0 %vm668_vm0, %v19992_v39 }
 0x12c   :  { %18011 = vmatmul.mubr.msk.bf16.gmra.mrb[72].mxu0 %vm668_vm0, %v19993_v40  ;;  %v20015_v40 = vld [vmem:[%s25429_s0 + $0x1d8] sm:$0xff]  }
 0x12d   :  { %18014 = vmatprep.mubr.msk.bf16.mxu0 %vm668_vm0, %v19994_v41 }
 0x134   :  { %18015 = vmatmul.mubr.msk.bf16.gmra.mrb[76].mxu0 %vm668_vm0, %v19995_v42 }
 0x135   :  { %18018 = vmatprep.mubr.msk.bf16.mxu0 %vm668_vm0, %v19996_v43 }
 0x13c   :  { %18019 = vmatmul.mubr.msk.bf16.gmra.mrb[80].mxu0 %vm668_vm0, %v19997_v44 }
 0x13d   :  { %18022 = vmatprep.mubr.msk.bf16.mxu0 %vm668_vm0, %v19998_v45  ;;  %v20016_v45 = vld [vmem:[%s25429_s0 + $0x1e0] sm:$0xff]  }
 0x144   :  { %18023 = vmatmul.mubr.msk.bf16.gmra.mrb[84].mxu0 %vm668_vm0, %v19999_v46 }
 0x145   :  { %18026 = vmatprep.mubr.msk.bf16.mxu0 %vm668_vm0, %v20000_v47 }
 0x14c   :  { %18027 = vmatmul.mubr.msk.bf16.gmra.mrb[88].mxu0 %vm668_vm0, %v20001_v49 }
 0x14d   :  { %18030 = vmatprep.mubr.msk.bf16.mxu0 %vm668_vm0, %v20002_v50 }
 0x154   :  { %18031 = vmatmul.mubr.msk.bf16.gmra.mrb[92].mxu0 %vm668_vm0, %v20003_v51 }
 0x155   :  { %18034 = vmatprep.mubr.msk.bf16.mxu0 %vm668_vm0, %v20004_v52 }
 0x15c   :  { %18035 = vmatmul.mubr.msk.bf16.gmra.mrb[96].mxu0 %vm668_vm0, %v20005_v53 }
 0x15d   :  { %18038 = vmatprep.mubr.msk.bf16.mxu0 %vm668_vm0, %v20006_v54 }
 0x164   :  { %18039 = vmatmul.mubr.msk.bf16.gmra.mrb[100].mxu0 %vm668_vm0, %v20007_v55 }
 0x165   :  { %18042 = vmatprep.mubr.msk.bf16.mxu0 %vm668_vm0, %v20008_v56 }
 0x16c   :  { %18043 = vmatmul.mubr.msk.bf16.gmra.mrb[104].mxu0 %vm668_vm0, %v20009_v57 }
 0x16d   :  { %18046 = vmatprep.mubr.msk.bf16.mxu0 %vm668_vm0, %v20010_v58 }
 0x16f   :  { %v17940_v60 = vpop.f32.mrb[0].mxu0 }
 0x170   :  { %v928_v62 = vadd.f32 %v17940_v60, %v21968_v59  ;;  %v919_v63 = vpop.f32.mrb[1].mxu0 }
 0x171   :  { %v920_v1 = vadd.f32 %v21968_v59, %v919_v63  ;;  %v17941_v2 = vpop.f32.mrb[2].mxu0 }
 0x172   :  { %v1496_v3 = vmax.f32 %v928_v62, 0.0  ;;  %v931_v4 = vadd.f32 %v17941_v2, %v21968_v59  ;;  %v922_v5 = vpop.f32.mrb[3].mxu0 }
 0x173   :  { %v1494_v6 = vmax.f32 %v920_v1, 0.0  ;;  %v923_v7 = vadd.f32 %v21968_v59, %v922_v5 }
 0x174   :  { %v1497_v8 = vmax.f32 %v931_v4, 0.0  ;;  %18047 = vmatmul.mubr.msk.bf16.gmra.mrb[108].mxu0 %vm668_vm0, %v20011_v61  ;;  %v1786_v9 = vrot.slane %v1496_v3, 1 }
 0x175   :  { %v1495_v10 = vmax.f32 %v923_v7, 0.0  ;;  %18050 = vmatprep.mubr.msk.bf16.mxu0 %vm668_vm0, %v20012_v0  ;;  %v21984_v12 = vrot.slane %v1494_v6, 1 }
 0x176   :  { %v1788_v11 = vrot.slane %v1497_v8, 1 }
 0x177   :  { %v1784_v13 = vrot.slane %v1495_v10, 1  ;;  %v17944_v14 = vpop.f32.mrb[4].mxu0 }
 0x178   :  { %v944_v16 = vadd.f32 %v17944_v14, %v21968_v59  ;;  %v935_v17 = vpop.f32.mrb[5].mxu0  ;;  %v1789_v19 = vsel %vm1782_vm1, %v1786_v9, %v1788_v11 }
 0x179   :  { %v936_v20 = vadd.f32 %v21968_v59, %v935_v17  ;;  %v17945_v21 = vpop.f32.mrb[6].mxu0  ;;  %v1785_v22 = vsel %vm1782_vm1, %v21984_v12, %v1784_v13  ;;  %v1787_v23 = vsel %vm1782_vm1, %v1784_v13, %v1786_v9  ;;  %v21998_v24 = vmax.f32 %v1496_v3, %v1789_v19  ;;  %v20017_v9 = vld [vmem:[%s25429_s0 + $0x1e8] sm:$0xff]  }
 0x17a   :  { %v1500_v25 = vmax.f32 %v944_v16, 0.0  ;;  %v947_v26 = vadd.f32 %v17945_v21, %v21968_v59  ;;  %v938_v27 = vpop.f32.mrb[7].mxu0  ;;  %v22001_v28 = vmax.f32 %v1494_v6, %v1785_v22  ;;  %v22003_v29 = vmax.f32 %v1495_v10, %v1787_v23 }
 0x17b   :  { %v1498_v30 = vmax.f32 %v936_v20, 0.0  ;;  %v939_v31 = vadd.f32 %v21968_v59, %v938_v27 }
 0x17c   :  { %v1794_v32 = vrot.slane %v1500_v25, 1  ;;  %v1501_v34 = vmax.f32 %v947_v26, 0.0  ;;  %18051 = vmatmul.mubr.msk.bf16.gmra.mrb[112].mxu0 %vm668_vm0, %v20013_v15  ;;  %v20018_v15 = vld [vmem:[%s25429_s0 + $0x1f0] sm:$0xff]  }
 0x17d   :  { %v1790_v35 = vrot.slane %v1498_v30, 1  ;;  %v1499_v36 = vmax.f32 %v939_v31, 0.0  ;;  %18054 = vmatprep.mubr.msk.bf16.mxu0 %vm668_vm0, %v20014_v18 }
 0x17e   :  { %v1796_v37 = vrot.slane %v1501_v34, 1 }
 0x17f   :  { %v1792_v38 = vrot.slane %v1499_v36, 1  ;;  %v17948_v39 = vpop.f32.mrb[8].mxu0  ;;  %v1791_v41 = vsel %vm1782_vm1, %v1788_v11, %v1790_v35 }
 0x180   :  { %v960_v42 = vadd.f32 %v17948_v39, %v21968_v59  ;;  %v951_v43 = vpop.f32.mrb[9].mxu0  ;;  %v2219_v44 = vmax.f32 %v1497_v8, %v1791_v41  ;;  %v1797_v46 = vsel %vm1782_vm1, %v1794_v32, %v1796_v37 }
 0x181   :  { %v1795_v47 = vsel %vm1782_vm1, %v1792_v38, %v1794_v32  ;;  %v952_v48 = vadd.f32 %v21968_v59, %v951_v43  ;;  %v17949_v49 = vpop.f32.mrb[10].mxu0  ;;  %v1793_v50 = vsel %vm1782_vm1, %v1790_v35, %v1792_v38  ;;  %v2222_v51 = vmax.f32 %v1500_v25, %v1797_v46  ;;  %v20019_v46 = vld [vmem:[%s25429_s0 + $0x1f8] sm:$0xff]  }
 0x182   :  { %v2221_v52 = vmax.f32 %v1499_v36, %v1795_v47  ;;  %v1504_v53 = vmax.f32 %v960_v42, 0.0  ;;  %v22021_v54 = vadd.f32 %v17949_v49, %v21968_v59  ;;  %v954_v55 = vpop.f32.mrb[11].mxu0  ;;  %v2220_v56 = vmax.f32 %v1498_v30, %v1793_v50 }
 0x183   :  { %v1502_v57 = vmax.f32 %v952_v48, 0.0  ;;  %v955_v58 = vadd.f32 %v21968_v59, %v954_v55  ;;  %v2360_v60 = vmax.f32 %v22001_v28, %v2219_v44  ;;  %v2363_v61 = vmax.f32 %v2219_v44, %v2222_v51 }
 0x184   :  { %v1802_v62 = vrot.slane %v1504_v53, 1  ;;  %v1505_v63 = vmax.f32 %v22021_v54, 0.0  ;;  %18055 = vmatmul.mubr.msk.bf16.gmra.mrb[116].mxu0 %vm668_vm0, %v20015_v40  ;;  %v2361_v0 = vmax.f32 %v22003_v29, %v2220_v56  ;;  %v2362_v1 = vmax.f32 %v21998_v24, %v2221_v52 }
 0x185   :  { %v1798_v2 = vrot.slane %v1502_v57, 1  ;;  %v1503_v3 = vmax.f32 %v955_v58, 0.0  ;;  %18058 = vmatprep.mubr.msk.bf16.mxu0 %vm668_vm0, %v20016_v45 }
 0x186   :  { %v1804_v4 = vrot.slane %v1505_v63, 1  ;;  %v2744_v5 = vpack.c.bf16 %v2361_v0, %v2360_v60  ;;  %v2745_v6 = vpack.c.bf16 %v2363_v61, %v2362_v1 }
 0x187   :  { %v1800_v7 = vrot.slane %v1503_v3, 1  ;;  %v17952_v8 = vpop.f32.mrb[12].mxu0  ;;  %v1799_v10 = vsel %vm1782_vm1, %v1796_v37, %v1798_v2 }
 0x188   :  { %v976_v11 = vadd.f32 %v17952_v8, %v21968_v59  ;;  %v967_v13 = vpop.f32.mrb[13].mxu0  ;;  %3921 = vmatpush1.bf16.msra.mxu1 %v2744_v5  ;;  %v2223_v14 = vmax.f32 %v1501_v34, %v1799_v10  ;;  %v1805_v16 = vsel %vm1782_vm1, %v1802_v62, %v1804_v4 }
 0x189   :  { %v1803_v17 = vsel %vm1782_vm1, %v1800_v7, %v1802_v62  ;;  %v968_v18 = vadd.f32 %v21968_v59, %v967_v13  ;;  %v17953_v19 = vpop.f32.mrb[14].mxu0  ;;  %3922 = vmatprep.subr.bf16.mxu1 %v25441_v33  ;;  %v1801_v20 = vsel %vm1782_vm1, %v1798_v2, %v1800_v7  ;;  %v2226_v21 = vmax.f32 %v1504_v53, %v1805_v16  ;;  %v20021_v16 = vld [vmem:[%s25429_s0 + $0x208] sm:$0xff]  }
 0x18a   :  { %v2225_v22 = vmax.f32 %v1503_v3, %v1803_v17  ;;  %v1508_v23 = vmax.f32 %v976_v11, 0.0  ;;  %v22044_v25 = vadd.f32 %v17953_v19, %v21968_v59  ;;  %v970_v26 = vpop.f32.mrb[15].mxu0  ;;  %v2224_v27 = vmax.f32 %v1502_v57, %v1801_v20 }
 0x18b   :  { %v1506_v30 = vmax.f32 %v968_v18, 0.0  ;;  %v971_v31 = vadd.f32 %v21968_v59, %v970_v26  ;;  %v2364_v32 = vmax.f32 %v2220_v56, %v2223_v14  ;;  %v2367_v34 = vmax.f32 %v2223_v14, %v2226_v21 }
 0x18c   :  { %v1810_v35 = vrot.slane %v1508_v23, 1  ;;  %v1509_v36 = vmax.f32 %v22044_v25, 0.0  ;;  %18059 = vmatmul.mubr.msk.bf16.gmra.mrb[120].mxu0 %vm668_vm0, %v20017_v9  ;;  %3923 = vmatpush1.bf16.msra.mxu1 %v2745_v6  ;;  %v2365_v37 = vmax.f32 %v2221_v52, %v2224_v27  ;;  %v2366_v38 = vmax.f32 %v2222_v51, %v2225_v22  ;;  %v20020_v51 = vld [vmem:[%s25429_s0 + $0x200] sm:$0xff]  }
 0x18d   :  { %v1806_v39 = vrot.slane %v1506_v30, 1  ;;  %v1507_v40 = vmax.f32 %v971_v31, 0.0  ;;  %3924 = vmatprep.subr.bf16.mxu1 %v25441_v33  ;;  %18062 = vmatprep.mubr.msk.bf16.mxu0 %vm668_vm0, %v20018_v15 }
 0x18e   :  { %v1812_v41 = vrot.slane %v1509_v36, 1  ;;  %v2746_v42 = vpack.c.bf16 %v2365_v37, %v2364_v32  ;;  %v2747_v43 = vpack.c.bf16 %v2367_v34, %v2366_v38 }
 0x18f   :  { %v1808_v44 = vrot.slane %v1507_v40, 1  ;;  %v17956_v45 = vpop.f32.mrb[16].mxu0  ;;  %v1807_v47 = vsel %vm1782_vm1, %v1804_v4, %v1806_v39 }
 0x190   :  { %v992_v48 = vadd.f32 %v17956_v45, %v21968_v59  ;;  %v983_v49 = vpop.f32.mrb[17].mxu0  ;;  %3925 = vmatpush1.bf16.msra.mxu1 %v2746_v42  ;;  %v2227_v50 = vmax.f32 %v1505_v63, %v1807_v47  ;;  %v1813_v52 = vsel %vm1782_vm1, %v1810_v35, %v1812_v41 }
 0x191   :  { %v1811_v53 = vsel %vm1782_vm1, %v1808_v44, %v1810_v35  ;;  %v984_v54 = vadd.f32 %v21968_v59, %v983_v49  ;;  %v17957_v55 = vpop.f32.mrb[18].mxu0  ;;  %3926 = vmatprep.subr.bf16.mxu1 %v25441_v33  ;;  %v1809_v56 = vsel %vm1782_vm1, %v1806_v39, %v1808_v44  ;;  %v2230_v57 = vmax.f32 %v1508_v23, %v1813_v52  ;;  %v20023_v52 = vld [vmem:[%s25429_s0 + $0x218] sm:$0xff]  }
 0x192   :  { %v2229_v58 = vmax.f32 %v1507_v40, %v1811_v53  ;;  %v1512_v60 = vmax.f32 %v992_v48, 0.0  ;;  %v22065_v61 = vadd.f32 %v17957_v55, %v21968_v59  ;;  %v986_v62 = vpop.f32.mrb[19].mxu0  ;;  %v2228_v63 = vmax.f32 %v1506_v30, %v1809_v56 }
 0x193   :  { %v1510_v0 = vmax.f32 %v984_v54, 0.0  ;;  %v987_v1 = vadd.f32 %v21968_v59, %v986_v62  ;;  %v2368_v2 = vmax.f32 %v2224_v27, %v2227_v50  ;;  %v2371_v3 = vmax.f32 %v2227_v50, %v2230_v57 }
 0x194   :  { %v1818_v4 = vrot.slane %v1512_v60, 1  ;;  %v1513_v5 = vmax.f32 %v22065_v61, 0.0  ;;  %18063 = vmatmul.mubr.msk.bf16.gmra.mrb[124].mxu0 %vm668_vm0, %v20019_v46  ;;  %3927 = vmatpush1.bf16.msra.mxu1 %v2747_v43  ;;  %v2369_v6 = vmax.f32 %v2225_v22, %v2228_v63  ;;  %v2370_v7 = vmax.f32 %v2226_v21, %v2229_v58  ;;  %v20022_v21 = vld [vmem:[%s25429_s0 + $0x210] sm:$0xff]  }
 0x195   :  { %v1814_v8 = vrot.slane %v1510_v0, 1  ;;  %v1511_v9 = vmax.f32 %v987_v1, 0.0  ;;  %3928 = vmatprep.subr.bf16.mxu1 %v25441_v33  ;;  %18066 = vmatprep.mubr.msk.bf16.mxu0 %vm668_vm0, %v20020_v51 }
 0x196   :  { %v1820_v10 = vrot.slane %v1513_v5, 1  ;;  %v2748_v11 = vpack.c.bf16 %v2369_v6, %v2368_v2  ;;  %v2749_v13 = vpack.c.bf16 %v2371_v3, %v2370_v7 }
 0x197   :  { %v1816_v14 = vrot.slane %v1511_v9, 1  ;;  %v17960_v15 = vpop.f32.mrb[20].mxu0  ;;  %v1815_v17 = vsel %vm1782_vm1, %v1812_v41, %v1814_v8 }
 0x198   :  { %v1008_v18 = vadd.f32 %v17960_v15, %v21968_v59  ;;  %v999_v19 = vpop.f32.mrb[21].mxu0  ;;  %3929 = vmatpush1.bf16.msra.mxu1 %v2748_v11  ;;  %v2231_v20 = vmax.f32 %v1509_v36, %v1815_v17  ;;  %v1821_v22 = vsel %vm1782_vm1, %v1818_v4, %v1820_v10 }
 0x199   :  { %v1819_v23 = vsel %vm1782_vm1, %v1816_v14, %v1818_v4  ;;  %v1000_v25 = vadd.f32 %v21968_v59, %v999_v19  ;;  %v17961_v26 = vpop.f32.mrb[22].mxu0  ;;  %3930 = vmatprep.subr.bf16.mxu1 %v25441_v33  ;;  %v1817_v27 = vsel %vm1782_vm1, %v1814_v8, %v1816_v14  ;;  %v2234_v30 = vmax.f32 %v1512_v60, %v1821_v22  ;;  %v20025_v22 = vld [vmem:[%s25429_s0 + $0x228] sm:$0xff]  }
 0x19a   :  { %v2233_v31 = vmax.f32 %v1511_v9, %v1819_v23  ;;  %v1516_v32 = vmax.f32 %v1008_v18, 0.0  ;;  %v22086_v34 = vadd.f32 %v17961_v26, %v21968_v59  ;;  %v1002_v35 = vpop.f32.mrb[23].mxu0  ;;  %v2232_v36 = vmax.f32 %v1510_v0, %v1817_v27 }
 0x19b   :  { %v1514_v37 = vmax.f32 %v1000_v25, 0.0  ;;  %v1003_v38 = vadd.f32 %v21968_v59, %v1002_v35  ;;  %v2372_v39 = vmax.f32 %v2228_v63, %v2231_v20  ;;  %v2375_v40 = vmax.f32 %v2231_v20, %v2234_v30 }
 0x19c   :  { %v1826_v41 = vrot.slane %v1516_v32, 1  ;;  %v1517_v42 = vmax.f32 %v22086_v34, 0.0  ;;  %18067 = vmatmul.mubr.msk.bf16.gmra.mrb[128].mxu0 %vm668_vm0, %v20021_v16  ;;  %3931 = vmatpush1.bf16.msra.mxu1 %v2749_v13  ;;  %v2373_v43 = vmax.f32 %v2229_v58, %v2232_v36  ;;  %v2374_v44 = vmax.f32 %v2230_v57, %v2233_v31  ;;  %v20024_v57 = vld [vmem:[%s25429_s0 + $0x220] sm:$0xff]  }
 0x19d   :  { %v1822_v45 = vrot.slane %v1514_v37, 1  ;;  %v1515_v46 = vmax.f32 %v1003_v38, 0.0  ;;  %3932 = vmatprep.subr.bf16.mxu1 %v25441_v33  ;;  %18070 = vmatprep.mubr.msk.bf16.mxu0 %vm668_vm0, %v20022_v21 }
 0x19e   :  { %v1828_v47 = vrot.slane %v1517_v42, 1  ;;  %v2750_v48 = vpack.c.bf16 %v2373_v43, %v2372_v39  ;;  %v2751_v49 = vpack.c.bf16 %v2375_v40, %v2374_v44 }
 0x19f   :  { %v1824_v50 = vrot.slane %v1515_v46, 1  ;;  %v17964_v51 = vpop.f32.mrb[24].mxu0  ;;  %v1823_v53 = vsel %vm1782_vm1, %v1820_v10, %v1822_v45 }
 0x1a0   :  { %v1024_v54 = vadd.f32 %v17964_v51, %v21968_v59  ;;  %v1015_v55 = vpop.f32.mrb[25].mxu0  ;;  %3933 = vmatpush1.bf16.msra.mxu1 %v2750_v48  ;;  %v2235_v56 = vmax.f32 %v1513_v5, %v1823_v53  ;;  %v1829_v58 = vsel %vm1782_vm1, %v1826_v41, %v1828_v47 }
 0x1a1   :  { %v1827_v60 = vsel %vm1782_vm1, %v1824_v50, %v1826_v41  ;;  %v1016_v61 = vadd.f32 %v21968_v59, %v1015_v55  ;;  %v17965_v62 = vpop.f32.mrb[26].mxu0  ;;  %3934 = vmatprep.subr.bf16.mxu1 %v25441_v33  ;;  %v1825_v63 = vsel %vm1782_vm1, %v1822_v45, %v1824_v50  ;;  %v2238_v0 = vmax.f32 %v1516_v32, %v1829_v58 }
 0x1a2   :  { %v2237_v1 = vmax.f32 %v1515_v46, %v1827_v60  ;;  %v1520_v2 = vmax.f32 %v1024_v54, 0.0  ;;  %v22107_v3 = vadd.f32 %v17965_v62, %v21968_v59  ;;  %v1018_v4 = vpop.f32.mrb[27].mxu0  ;;  %v2236_v5 = vmax.f32 %v1514_v37, %v1825_v63  ;;  %v20027_v63 = vld [vmem:[%s25429_s0 + $0x238] sm:$0xff]  }
 0x1a3   :  { %v1518_v6 = vmax.f32 %v1016_v61, 0.0  ;;  %v1019_v7 = vadd.f32 %v21968_v59, %v1018_v4  ;;  %v2376_v8 = vmax.f32 %v2232_v36, %v2235_v56  ;;  %v2379_v9 = vmax.f32 %v2235_v56, %v2238_v0 }
 0x1a4   :  { %v1834_v10 = vrot.slane %v1520_v2, 1  ;;  %v1521_v11 = vmax.f32 %v22107_v3, 0.0  ;;  %18071 = vmatmul.mubr.msk.bf16.gmra.mrb[132].mxu0 %vm668_vm0, %v20023_v52  ;;  %3935 = vmatpush1.bf16.msra.mxu1 %v2751_v49  ;;  %v2377_v13 = vmax.f32 %v2233_v31, %v2236_v5  ;;  %v2378_v14 = vmax.f32 %v2234_v30, %v2237_v1  ;;  %v20026_v31 = vld [vmem:[%s25429_s0 + $0x230] sm:$0xff]  }
 0x1a5   :  { %v1830_v15 = vrot.slane %v1518_v6, 1  ;;  %v1519_v16 = vmax.f32 %v1019_v7, 0.0  ;;  %3936 = vmatprep.subr.bf16.mxu1 %v25441_v33  ;;  %18074 = vmatprep.mubr.msk.bf16.mxu0 %vm668_vm0, %v20024_v57 }
 0x1a6   :  { %v1836_v17 = vrot.slane %v1521_v11, 1  ;;  %v2752_v18 = vpack.c.bf16 %v2377_v13, %v2376_v8  ;;  %v2753_v19 = vpack.c.bf16 %v2379_v9, %v2378_v14 }
 0x1a7   :  { %v1832_v20 = vrot.slane %v1519_v16, 1  ;;  %v17968_v21 = vpop.f32.mrb[28].mxu0  ;;  %v1831_v23 = vsel %vm1782_vm1, %v1828_v47, %v1830_v15 }
 0x1a8   :  { %v1040_v25 = vadd.f32 %v17968_v21, %v21968_v59  ;;  %v1031_v26 = vpop.f32.mrb[29].mxu0  ;;  %3937 = vmatpush1.bf16.msra.mxu1 %v2752_v18  ;;  %v1837_v27 = vsel %vm1782_vm1, %v1834_v10, %v1836_v17  ;;  %v2239_v30 = vmax.f32 %v1517_v42, %v1831_v23 }
 0x1a9   :  { %v1835_v32 = vsel %vm1782_vm1, %v1832_v20, %v1834_v10  ;;  %v1032_v34 = vadd.f32 %v21968_v59, %v1031_v26  ;;  %v17969_v35 = vpop.f32.mrb[30].mxu0  ;;  %v2242_v36 = vmax.f32 %v1520_v2, %v1837_v27  ;;  %3938 = vmatprep.subr.bf16.mxu1 %v25441_v33  ;;  %v1833_v37 = vsel %vm1782_vm1, %v1830_v15, %v1832_v20 }
 0x1aa   :  { %v2241_v38 = vmax.f32 %v1519_v16, %v1835_v32  ;;  %v1524_v39 = vmax.f32 %v1040_v25, 0.0  ;;  %v22128_v40 = vadd.f32 %v17969_v35, %v21968_v59  ;;  %v1034_v41 = vpop.f32.mrb[31].mxu0  ;;  %v2240_v42 = vmax.f32 %v1518_v6, %v1833_v37 }
 0x1ab   :  { %v1522_v43 = vmax.f32 %v1032_v34, 0.0  ;;  %v1035_v44 = vadd.f32 %v21968_v59, %v1034_v41  ;;  %v2380_v45 = vmax.f32 %v2236_v5, %v2239_v30  ;;  %v2383_v46 = vmax.f32 %v2239_v30, %v2242_v36 }
 0x1ac   :  { %v1842_v47 = vrot.slane %v1524_v39, 1  ;;  %v1525_v48 = vmax.f32 %v22128_v40, 0.0  ;;  %18075 = vmatmul.mubr.msk.bf16.gmra.mrb[136].mxu0 %vm668_vm0, %v20025_v22  ;;  %3939 = vmatpush1.bf16.msra.mxu1 %v2753_v19  ;;  %v2381_v49 = vmax.f32 %v2237_v1, %v2240_v42  ;;  %v2382_v50 = vmax.f32 %v2238_v0, %v2241_v38 }
 0x1ad   :  { %v1838_v51 = vrot.slane %v1522_v43, 1  ;;  %v1523_v52 = vmax.f32 %v1035_v44, 0.0  ;;  %3940 = vmatprep.subr.bf16.mxu1 %v25441_v33  ;;  %18078 = vmatprep.mubr.msk.bf16.mxu0 %vm668_vm0, %v20026_v31 }
 0x1ae   :  { %v1844_v53 = vrot.slane %v1525_v48, 1  ;;  %v2754_v54 = vpack.c.bf16 %v2381_v49, %v2380_v45  ;;  %v2755_v55 = vpack.c.bf16 %v2383_v46, %v2382_v50 }
 0x1af   :  { %v1839_v56 = vsel %vm1782_vm1, %v1836_v17, %v1838_v51  ;;  %v1840_v57 = vrot.slane %v1523_v52, 1  ;;  %v17972_v58 = vpop.f32.mrb[32].mxu0 }
 0x1b0   :  { %v1845_v60 = vsel %vm1782_vm1, %v1842_v47, %v1844_v53  ;;  %v1056_v61 = vadd.f32 %v17972_v58, %v21968_v59  ;;  %v1047_v62 = vpop.f32.mrb[33].mxu0  ;;  %3941 = vmatpush1.bf16.msra.mxu1 %v2754_v54  ;;  %v2243_v0 = vmax.f32 %v1521_v11, %v1839_v56 }
 0x1b1   :  { %v1841_v1 = vsel %vm1782_vm1, %v1838_v51, %v1840_v57  ;;  %v1843_v2 = vsel %vm1782_vm1, %v1840_v57, %v1842_v47  ;;  %v1048_v3 = vadd.f32 %v21968_v59, %v1047_v62  ;;  %v17973_v4 = vpop.f32.mrb[34].mxu0  ;;  %v2246_v5 = vmax.f32 %v1524_v39, %v1845_v60  ;;  %3942 = vmatprep.subr.bf16.mxu1 %v25441_v33  ;;  %v22157_v47 = vld [vmem:[#allocation5] ss:$0 sm:$0xff] }
 0x1b2   :  { %v2245_v6 = vmax.f32 %v1523_v52, %v1843_v2  ;;  %v1528_v7 = vmax.f32 %v1056_v61, 0.0  ;;  %v1059_v8 = vadd.f32 %v17973_v4, %v21968_v59  ;;  %v1050_v9 = vpop.f32.mrb[35].mxu0  ;;  %v2244_v10 = vmax.f32 %v1522_v43, %v1841_v1 }
 0x1b3   :  { %v1526_v13 = vmax.f32 %v1048_v3, 0.0  ;;  %v1051_v14 = vadd.f32 %v21968_v59, %v1050_v9  ;;  %v2384_v11 = vmax.f32 %v2240_v42, %v2243_v0  ;;  %v2387_v15 = vmax.f32 %v2243_v0, %v2246_v5 }
 0x1b4   :  { %v2386_v16 = vmax.f32 %v2242_v36, %v2245_v6  ;;  %v1850_v17 = vrot.slane %v1528_v7, 1  ;;  %v1529_v18 = vmax.f32 %v1059_v8, 0.0  ;;  %18079 = vmatmul.mubr.msk.bf16.gmra.mrb[140].mxu0 %vm668_vm0, %v20027_v63  ;;  %3943 = vmatpush1.bf16.msra.mxu1 %v2755_v55  ;;  %v2385_v19 = vmax.f32 %v2241_v38, %v2244_v10 }
 0x1b5   :  { %v1846_v20 = vrot.slane %v1526_v13, 1  ;;  %v1527_v21 = vmax.f32 %v1051_v14, 0.0  ;;  %3944 = vmatprep.subr.bf16.mxu1 %v25441_v33  ;;  %v20031_v14 = vld [vmem:[%s25434_s5 + $0x4c] ss:$36 sps:$4 sm:$0xff]  }
 0x1b6   :  { %v1852_v22 = vrot.slane %v1529_v18, 1  ;;  %v2756_v23 = vpack.c.bf16 %v2385_v19, %v2384_v11  ;;  %v2757_v25 = vpack.c.bf16 %v2387_v15, %v2386_v16 }
 0x1b7   :  { %v1847_v26 = vsel %vm1782_vm1, %v1844_v53, %v1846_v20  ;;  %v1848_v27 = vrot.slane %v1527_v21, 1  ;;  %v17976_v30 = vpop.f32.mrb[36].mxu0 }
 0x1b8   :  { %v1853_v31 = vsel %vm1782_vm1, %v1850_v17, %v1852_v22  ;;  %v1072_v32 = vadd.f32 %v17976_v30, %v21968_v59  ;;  %v1063_v34 = vpop.f32.mrb[37].mxu0  ;;  %3945 = vmatpush1.bf16.msra.mxu1 %v2756_v23  ;;  %v2247_v35 = vmax.f32 %v1525_v48, %v1847_v26 }
 0x1b9   :  { %v1849_v36 = vsel %vm1782_vm1, %v1846_v20, %v1848_v27  ;;  %v1851_v37 = vsel %vm1782_vm1, %v1848_v27, %v1850_v17  ;;  %v1064_v38 = vadd.f32 %v21968_v59, %v1063_v34  ;;  %v17977_v39 = vpop.f32.mrb[38].mxu0  ;;  %v2250_v40 = vmax.f32 %v1528_v7, %v1853_v31  ;;  %3946 = vmatprep.subr.bf16.mxu1 %v25441_v33 }
 0x1ba   :  { %v2249_v41 = vmax.f32 %v1527_v21, %v1851_v37  ;;  %v1532_v42 = vmax.f32 %v1072_v32, 0.0  ;;  %v1075_v43 = vadd.f32 %v17977_v39, %v21968_v59  ;;  %v1066_v44 = vpop.f32.mrb[39].mxu0  ;;  %v2248_v45 = vmax.f32 %v1526_v13, %v1849_v36  ;;  %v20033_v39 = vld [vmem:[%s25434_s5 + $0x48] ss:$36 sps:$4 sm:$0xff]  }
 0x1bb   :  { %v1530_v46 = vmax.f32 %v1064_v38, 0.0  ;;  %v1067_v48 = vadd.f32 %v22157_v47, %v1066_v44  ;;  %v2388_v49 = vmax.f32 %v2244_v10, %v2247_v35  ;;  %v2391_v50 = vmax.f32 %v2247_v35, %v2250_v40 }
 0x1bc   :  { %v2390_v51 = vmax.f32 %v2246_v5, %v2249_v41  ;;  %v1858_v52 = vrot.slane %v1532_v42, 1  ;;  %v1533_v53 = vmax.f32 %v1075_v43, 0.0  ;;  %3947 = vmatpush1.bf16.msra.mxu1 %v2757_v25  ;;  %v2389_v54 = vmax.f32 %v2245_v6, %v2248_v45  ;;  %v20028_v6 = vld [vmem:[%s25434_s5] ss:$36 sps:$4 sm:$0xff]  }
 0x1bd   :  { %v1854_v55 = vrot.slane %v1530_v46, 1  ;;  %v1531_v56 = vmax.f32 %v1067_v48, 0.0  ;;  %3948 = vmatprep.subr.bf16.mxu1 %v25441_v33 }
 0x1be   :  { %v1860_v57 = vrot.slane %v1533_v53, 1  ;;  %v2758_v59 = vpack.c.bf16 %v2389_v54, %v2388_v49  ;;  %v2759_v58 = vpack.c.bf16 %v2391_v50, %v2390_v51 }
 0x1bf   :  { %v1855_v60 = vsel %vm1782_vm1, %v1852_v22, %v1854_v55  ;;  %v1856_v61 = vrot.slane %v1531_v56, 1  ;;  %v17980_v62 = vpop.f32.mrb[40].mxu0 }
 0x1c0   :  { %v2251_v63 = vmax.f32 %v1529_v18, %v1855_v60  ;;  %v1861_v0 = vsel %vm1782_vm1, %v1858_v52, %v1860_v57  ;;  %3949 = vmatpush1.bf16.msra.mxu1 %v2758_v59  ;;  %v1088_v1 = vadd.f32 %v22157_v47, %v17980_v62  ;;  %v1079_v2 = vpop.f32.mrb[41].mxu0 }
 0x1c1   :  { %v22164_v3 = vmax.f32 %v1532_v42, %v1861_v0  ;;  %v1857_v4 = vsel %vm1782_vm1, %v1854_v55, %v1856_v61  ;;  %v1859_v5 = vsel %vm1782_vm1, %v1856_v61, %v1858_v52  ;;  %3950 = vmatprep.subr.bf16.mxu1 %v25441_v33  ;;  %v1080_v7 = vadd.f32 %v22157_v47, %v1079_v2  ;;  %v17981_v8 = vpop.f32.mrb[42].mxu0 }
 0x1c2   :  { %v2252_v9 = vmax.f32 %v1530_v46, %v1857_v4  ;;  %v2253_v10 = vmax.f32 %v1531_v56, %v1859_v5  ;;  %v2392_v13 = vmax.f32 %v2248_v45, %v2251_v63  ;;  %v1536_v11 = vmax.f32 %v1088_v1, 0.0  ;;  %v1082_v15 = vpop.f32.mrb[43].mxu0  ;;  %v20034_v45 = vld [vmem:[%s25434_s5 + $0x94] ss:$36 sps:$4 sm:$0xff]  }
 0x1c3   :  { %v2395_v16 = vmax.f32 %v2251_v63, %v22164_v3  ;;  %v1534_v17 = vmax.f32 %v1080_v7, 0.0  ;;  %v1091_v18 = vadd.f32 %v22157_v47, %v17981_v8  ;;  %v1083_v19 = vadd.f32 %v22157_v47, %v1082_v15  ;;  %v20036_v8 = vld [vmem:[%s25434_s5 + $0x90] ss:$36 sps:$4 sm:$0xff]   ;;  %v20037_v15 = vld [vmem:[%s25434_s5 + $0xdc] ss:$36 sps:$4 sm:$0xff]  }
 0x1c4   :  { %v2394_v20 = vmax.f32 %v2250_v40, %v2253_v10  ;;  %3951 = vmatpush1.bf16.msra.mxu1 %v2759_v58  ;;  %v2393_v21 = vmax.f32 %v2249_v41, %v2252_v9  ;;  %v1866_v22 = vrot.slane %v1536_v11, 1 }
 0x1c5   :  { %4145 = vmatprep.subr.bf16.mxu1 %v25441_v33  ;;  %v1862_v23 = vrot.slane %v1534_v17, 1  ;;  %v1537_v25 = vmax.f32 %v1091_v18, 0.0  ;;  %v1535_v26 = vmax.f32 %v1083_v19, 0.0 }
 0x1c6   :  { %v2761_v27 = vpack.c.bf16 %v2395_v16, %v2394_v20  ;;  %v2760_v30 = vpack.c.bf16 %v2393_v21, %v2392_v13 }
 0x1c7   :  { %3953 = vmatmul.mubr.bf16.vlgmr.msra.gmra.mrb[0].mxu1 %v20028_v6  ;;  %v1863_v31 = vsel %vm1782_vm1, %v1860_v57, %v1862_v23  ;;  %v1868_v32 = vrot.slane %v1537_v25, 1  ;;  %v1864_v34 = vrot.slane %v1535_v26, 1  ;;  %v17984_v35 = vpop.f32.mrb[44].mxu0 }
 0x1c8   :  { %4146 = vmatpush1.bf16.msra.mxu1 %v2760_v30  ;;  %3960 = vmatprep.mubr.bf16.mxu1 %v20031_v14  ;;  %v2255_v36 = vmax.f32 %v1533_v53, %v1863_v31  ;;  %v1104_v37 = vadd.f32 %v22157_v47, %v17984_v35  ;;  %v1095_v38 = vpop.f32.mrb[45].mxu0 }
 0x1c9   :  { %4147 = vmatprep.subr.bf16.mxu1 %v25441_v33  ;;  %v1869_v40 = vsel %vm1782_vm1, %v1866_v22, %v1868_v32  ;;  %v1865_v41 = vsel %vm1782_vm1, %v1862_v23, %v1864_v34  ;;  %v1867_v42 = vsel %vm1782_vm1, %v1864_v34, %v1866_v22  ;;  %v1096_v43 = vadd.f32 %v22157_v47, %v1095_v38  ;;  %v17985_v44 = vpop.f32.mrb[46].mxu0 }
 0x1ca   :  { %v2258_v46 = vmax.f32 %v1536_v11, %v1869_v40  ;;  %v2256_v48 = vmax.f32 %v1534_v17, %v1865_v41  ;;  %v2257_v49 = vmax.f32 %v1535_v26, %v1867_v42  ;;  %v1540_v50 = vmax.f32 %v1104_v37, 0.0  ;;  %v1098_v51 = vpop.f32.mrb[47].mxu0 }
 0x1cb   :  { %v1538_v52 = vmax.f32 %v1096_v43, 0.0  ;;  %v1107_v53 = vadd.f32 %v22157_v47, %v17985_v44  ;;  %v1099_v54 = vadd.f32 %v22157_v47, %v1098_v51  ;;  %v2396_v55 = vmax.f32 %v2252_v9, %v2255_v36 }
 0x1cc   :  { %4148 = vmatpush1.bf16.msra.mxu1 %v2761_v27  ;;  %v2398_v56 = vmax.f32 %v22164_v3, %v2257_v49  ;;  %v2399_v57 = vmax.f32 %v2255_v36, %v2258_v46  ;;  %v1874_v59 = vrot.slane %v1540_v50, 1  ;;  %v2397_v58 = vmax.f32 %v2253_v10, %v2256_v48 }
 0x1cd   :  { %v1870_v60 = vrot.slane %v1538_v52, 1  ;;  %v1541_v61 = vmax.f32 %v1107_v53, 0.0  ;;  %v1539_v62 = vmax.f32 %v1099_v54, 0.0  ;;  %4149 = vmatprep.subr.bf16.mxu1 %v25441_v33 }
 0x1ce   :  { %v2763_v63 = vpack.c.bf16 %v2399_v57, %v2398_v56  ;;  %v2762_v0 = vpack.c.bf16 %v2397_v58, %v2396_v55 }
 0x1cf   :  { %3961 = vmatmul.mubr.bf16.gmra.mrb[4].mxu1 %v20033_v39  ;;  %v1871_v1 = vsel %vm1782_vm1, %v1868_v32, %v1870_v60  ;;  %v1876_v2 = vrot.slane %v1541_v61, 1  ;;  %v1872_v4 = vrot.slane %v1539_v62, 1  ;;  %v17988_v5 = vpop.f32.mrb[48].mxu0 }
 0x1d0   :  { %3968 = vmatprep.mubr.bf16.mxu1 %v20034_v45  ;;  %v2259_v6 = vmax.f32 %v1537_v25, %v1871_v1  ;;  %v1120_v3 = vadd.f32 %v22157_v47, %v17988_v5  ;;  %v1111_v7 = vpop.f32.mrb[49].mxu0  ;;  %4150 = vmatpush1.bf16.msra.mxu1 %v2762_v0  ;;  %v20039_v45 = vld [vmem:[%s25434_s5 + $0xd8] ss:$36 sps:$4 sm:$0xff]  }
 0x1d1   :  { %v1877_v9 = vsel %vm1782_vm1, %v1874_v59, %v1876_v2  ;;  %v1873_v10 = vsel %vm1782_vm1, %v1870_v60, %v1872_v4  ;;  %v1875_v13 = vsel %vm1782_vm1, %v1872_v4, %v1874_v59  ;;  %v1112_v14 = vadd.f32 %v22157_v47, %v1111_v7  ;;  %v17989_v11 = vpop.f32.mrb[50].mxu0  ;;  %4151 = vmatprep.subr.bf16.mxu1 %v25441_v33 }
 0x1d2   :  { %v2262_v16 = vmax.f32 %v1540_v50, %v1877_v9  ;;  %v2260_v17 = vmax.f32 %v1538_v52, %v1873_v10  ;;  %v2261_v18 = vmax.f32 %v1539_v62, %v1875_v13  ;;  %v1544_v19 = vmax.f32 %v1120_v3, 0.0  ;;  %v1114_v20 = vpop.f32.mrb[51].mxu0  ;;  %v20040_v52 = vld [vmem:[%s25434_s5 + $0x124] ss:$36 sps:$4 sm:$0xff]  }
 0x1d3   :  { %v1542_v21 = vmax.f32 %v1112_v14, 0.0  ;;  %v1123_v22 = vadd.f32 %v22157_v47, %v17989_v11  ;;  %v1115_v23 = vadd.f32 %v22157_v47, %v1114_v20  ;;  %v2400_v25 = vmax.f32 %v2256_v48, %v2259_v6 }
 0x1d4   :  { %v2402_v26 = vmax.f32 %v2258_v46, %v2261_v18  ;;  %v2403_v27 = vmax.f32 %v2259_v6, %v2262_v16  ;;  %v1882_v30 = vrot.slane %v1544_v19, 1  ;;  %4152 = vmatpush1.bf16.msra.mxu1 %v2763_v63  ;;  %v2401_v31 = vmax.f32 %v2257_v49, %v2260_v17 }
 0x1d5   :  { %v1878_v32 = vrot.slane %v1542_v21, 1  ;;  %v1545_v34 = vmax.f32 %v1123_v22, 0.0  ;;  %v1543_v35 = vmax.f32 %v1115_v23, 0.0  ;;  %4153 = vmatprep.subr.bf16.mxu1 %v25441_v33 }
 0x1d6   :  { %v2765_v36 = vpack.c.bf16 %v2403_v27, %v2402_v26  ;;  %v2764_v37 = vpack.c.bf16 %v2401_v31, %v2400_v25 }
 0x1d7   :  { %3969 = vmatmul.mubr.bf16.gmra.mrb[8].mxu1 %v20036_v8  ;;  %v1879_v38 = vsel %vm1782_vm1, %v1876_v2, %v1878_v32  ;;  %v1884_v39 = vrot.slane %v1545_v34, 1  ;;  %v1880_v40 = vrot.slane %v1543_v35, 1  ;;  %v17992_v41 = vpop.f32.mrb[52].mxu0 }
 0x1d8   :  { %3976 = vmatprep.mubr.bf16.mxu1 %v20037_v15  ;;  %v2263_v42 = vmax.f32 %v1541_v61, %v1879_v38  ;;  %v1136_v43 = vadd.f32 %v22157_v47, %v17992_v41  ;;  %v1127_v44 = vpop.f32.mrb[53].mxu0  ;;  %4154 = vmatpush1.bf16.msra.mxu1 %v2764_v37  ;;  %v20042_v15 = vld [vmem:[%s25434_s5 + $0x120] ss:$36 sps:$4 sm:$0xff]  }
 0x1d9   :  { %v1885_v46 = vsel %vm1782_vm1, %v1882_v30, %v1884_v39  ;;  %v1881_v48 = vsel %vm1782_vm1, %v1878_v32, %v1880_v40  ;;  %v1883_v49 = vsel %vm1782_vm1, %v1880_v40, %v1882_v30  ;;  %v1128_v50 = vadd.f32 %v22157_v47, %v1127_v44  ;;  %v17993_v51 = vpop.f32.mrb[54].mxu0  ;;  %4155 = vmatprep.subr.bf16.mxu1 %v25441_v33 }
 0x1da   :  { %v2266_v53 = vmax.f32 %v1544_v19, %v1885_v46  ;;  %v2264_v54 = vmax.f32 %v1542_v21, %v1881_v48  ;;  %v2265_v55 = vmax.f32 %v1543_v35, %v1883_v49  ;;  %v1548_v56 = vmax.f32 %v1136_v43, 0.0  ;;  %v1130_v57 = vpop.f32.mrb[55].mxu0  ;;  %v20043_v21 = vld [vmem:[%s25434_s5 + $0x16c] ss:$36 sps:$4 sm:$0xff]  }
 0x1db   :  { %v1546_v59 = vmax.f32 %v1128_v50, 0.0  ;;  %v1139_v58 = vadd.f32 %v22157_v47, %v17993_v51  ;;  %v1131_v60 = vadd.f32 %v22157_v47, %v1130_v57  ;;  %v2404_v61 = vmax.f32 %v2260_v17, %v2263_v42 }
 0x1dc   :  { %v2406_v62 = vmax.f32 %v2262_v16, %v2265_v55  ;;  %v2407_v63 = vmax.f32 %v2263_v42, %v2266_v53  ;;  %v1890_v0 = vrot.slane %v1548_v56, 1  ;;  %4156 = vmatpush1.bf16.msra.mxu1 %v2765_v36  ;;  %v2405_v1 = vmax.f32 %v2261_v18, %v2264_v54 }
 0x1dd   :  { %v1886_v2 = vrot.slane %v1546_v59, 1  ;;  %v1549_v4 = vmax.f32 %v1139_v58, 0.0  ;;  %v1547_v5 = vmax.f32 %v1131_v60, 0.0  ;;  %4157 = vmatprep.subr.bf16.mxu1 %v25441_v33 }
 0x1de   :  { %v2767_v6 = vpack.c.bf16 %v2407_v63, %v2406_v62  ;;  %v2766_v3 = vpack.c.bf16 %v2405_v1, %v2404_v61 }
 0x1df   :  { %3977 = vmatmul.mubr.bf16.gmra.mrb[12].mxu1 %v20039_v45  ;;  %v1887_v7 = vsel %vm1782_vm1, %v1884_v39, %v1886_v2  ;;  %v1892_v8 = vrot.slane %v1549_v4, 1  ;;  %v1888_v9 = vrot.slane %v1547_v5, 1  ;;  %v17996_v10 = vpop.f32.mrb[56].mxu0 }
 0x1e0   :  { %3984 = vmatprep.mubr.bf16.mxu1 %v20040_v52  ;;  %v2267_v13 = vmax.f32 %v1545_v34, %v1887_v7  ;;  %v1152_v14 = vadd.f32 %v22157_v47, %v17996_v10  ;;  %v1143_v11 = vpop.f32.mrb[57].mxu0  ;;  %4158 = vmatpush1.bf16.msra.mxu1 %v2766_v3  ;;  %v20045_v52 = vld [vmem:[%s25434_s5 + $0x168] ss:$36 sps:$4 sm:$0xff]  }
 0x1e1   :  { %v1893_v16 = vsel %vm1782_vm1, %v1890_v0, %v1892_v8  ;;  %v1889_v17 = vsel %vm1782_vm1, %v1886_v2, %v1888_v9  ;;  %v1891_v18 = vsel %vm1782_vm1, %v1888_v9, %v1890_v0  ;;  %v1144_v19 = vadd.f32 %v22157_v47, %v1143_v11  ;;  %v17997_v20 = vpop.f32.mrb[58].mxu0  ;;  %4159 = vmatprep.subr.bf16.mxu1 %v25441_v33 }
 0x1e2   :  { %v2270_v22 = vmax.f32 %v1548_v56, %v1893_v16  ;;  %v2268_v23 = vmax.f32 %v1546_v59, %v1889_v17  ;;  %v2269_v25 = vmax.f32 %v1547_v5, %v1891_v18  ;;  %v1552_v26 = vmax.f32 %v1152_v14, 0.0  ;;  %v1146_v27 = vpop.f32.mrb[59].mxu0  ;;  %v20046_v59 = vld [vmem:[%s25434_s5 + $0x1b4] ss:$36 sps:$4 sm:$0xff]  }
 0x1e3   :  { %v1550_v30 = vmax.f32 %v1144_v19, 0.0  ;;  %v1155_v31 = vadd.f32 %v22157_v47, %v17997_v20  ;;  %v1147_v32 = vadd.f32 %v22157_v47, %v1146_v27  ;;  %v2408_v34 = vmax.f32 %v2264_v54, %v2267_v13 }
 0x1e4   :  { %v2410_v35 = vmax.f32 %v2266_v53, %v2269_v25  ;;  %v2411_v36 = vmax.f32 %v2267_v13, %v2270_v22  ;;  %v1898_v37 = vrot.slane %v1552_v26, 1  ;;  %4160 = vmatpush1.bf16.msra.mxu1 %v2767_v6  ;;  %v2409_v38 = vmax.f32 %v2265_v55, %v2268_v23 }
 0x1e5   :  { %v1894_v39 = vrot.slane %v1550_v30, 1  ;;  %v1553_v40 = vmax.f32 %v1155_v31, 0.0  ;;  %v1551_v41 = vmax.f32 %v1147_v32, 0.0  ;;  %4161 = vmatprep.subr.bf16.mxu1 %v25441_v33 }
 0x1e6   :  { %v2769_v42 = vpack.c.bf16 %v2411_v36, %v2410_v35  ;;  %v2768_v43 = vpack.c.bf16 %v2409_v38, %v2408_v34 }
 0x1e7   :  { %3985 = vmatmul.mubr.bf16.gmra.mrb[16].mxu1 %v20042_v15  ;;  %v1895_v44 = vsel %vm1782_vm1, %v1892_v8, %v1894_v39  ;;  %v1900_v45 = vrot.slane %v1553_v40, 1  ;;  %v1896_v46 = vrot.slane %v1551_v41, 1  ;;  %v18000_v48 = vpop.f32.mrb[60].mxu0 }
 0x1e8   :  { %3992 = vmatprep.mubr.bf16.mxu1 %v20043_v21  ;;  %v2271_v49 = vmax.f32 %v1549_v4, %v1895_v44  ;;  %v1168_v50 = vadd.f32 %v22157_v47, %v18000_v48  ;;  %v1159_v51 = vpop.f32.mrb[61].mxu0  ;;  %4162 = vmatpush1.bf16.msra.mxu1 %v2768_v43  ;;  %v20048_v21 = vld [vmem:[%s25434_s5 + $0x1b0] ss:$36 sps:$4 sm:$0xff]  }
 0x1e9   :  { %v1901_v53 = vsel %vm1782_vm1, %v1898_v37, %v1900_v45  ;;  %v1897_v54 = vsel %vm1782_vm1, %v1894_v39, %v1896_v46  ;;  %v1899_v55 = vsel %vm1782_vm1, %v1896_v46, %v1898_v37  ;;  %v1160_v56 = vadd.f32 %v22157_v47, %v1159_v51  ;;  %v18001_v57 = vpop.f32.mrb[62].mxu0  ;;  %4163 = vmatprep.subr.bf16.mxu1 %v25441_v33 }
 0x1ea   :  { %v2274_v58 = vmax.f32 %v1552_v26, %v1901_v53  ;;  %v2272_v60 = vmax.f32 %v1550_v30, %v1897_v54  ;;  %v2273_v61 = vmax.f32 %v1551_v41, %v1899_v55  ;;  %v1556_v62 = vmax.f32 %v1168_v50, 0.0  ;;  %v1162_v63 = vpop.f32.mrb[63].mxu0  ;;  %v20049_v30 = vld [vmem:[%s25434_s5 + $0x1fc] ss:$36 sps:$4 sm:$0xff]  }
 0x1eb   :  { %v1554_v0 = vmax.f32 %v1160_v56, 0.0  ;;  %v1171_v1 = vadd.f32 %v22157_v47, %v18001_v57  ;;  %v1163_v2 = vadd.f32 %v22157_v47, %v1162_v63  ;;  %v2412_v4 = vmax.f32 %v2268_v23, %v2271_v49 }
 0x1ec   :  { %v2414_v5 = vmax.f32 %v2270_v22, %v2273_v61  ;;  %v2415_v6 = vmax.f32 %v2271_v49, %v2274_v58  ;;  %4164 = vmatpush1.bf16.msra.mxu1 %v2769_v42  ;;  %v2413_v3 = vmax.f32 %v2269_v25, %v2272_v60  ;;  %v1906_v7 = vrot.slane %v1556_v62, 1 }
 0x1ed   :  { %v1902_v8 = vrot.slane %v1554_v0, 1  ;;  %v1557_v9 = vmax.f32 %v1171_v1, 0.0  ;;  %v1555_v10 = vmax.f32 %v1163_v2, 0.0  ;;  %4165 = vmatprep.subr.bf16.mxu1 %v25441_v33 }
 0x1ee   :  { %v2771_v13 = vpack.c.bf16 %v2415_v6, %v2414_v5  ;;  %v2770_v14 = vpack.c.bf16 %v2413_v3, %v2412_v4 }
 0x1ef   :  { %3993 = vmatmul.mubr.bf16.gmra.mrb[20].mxu1 %v20045_v52  ;;  %v1903_v11 = vsel %vm1782_vm1, %v1900_v45, %v1902_v8  ;;  %v1908_v15 = vrot.slane %v1557_v9, 1  ;;  %v1904_v16 = vrot.slane %v1555_v10, 1  ;;  %v18004_v17 = vpop.f32.mrb[64].mxu0 }
 0x1f0   :  { %4000 = vmatprep.mubr.bf16.mxu1 %v20046_v59  ;;  %v2275_v18 = vmax.f32 %v1553_v40, %v1903_v11  ;;  %v1184_v19 = vadd.f32 %v22157_v47, %v18004_v17  ;;  %v1175_v20 = vpop.f32.mrb[65].mxu0  ;;  %4166 = vmatpush1.bf16.msra.mxu1 %v2770_v14  ;;  %v20051_v59 = vld [vmem:[%s25434_s5 + $0x1f8] ss:$36 sps:$4 sm:$0xff]  }
 0x1f1   :  { %v1909_v22 = vsel %vm1782_vm1, %v1906_v7, %v1908_v15  ;;  %v1905_v23 = vsel %vm1782_vm1, %v1902_v8, %v1904_v16  ;;  %v1907_v25 = vsel %vm1782_vm1, %v1904_v16, %v1906_v7  ;;  %v1176_v26 = vadd.f32 %v22157_v47, %v1175_v20  ;;  %v18005_v27 = vpop.f32.mrb[66].mxu0  ;;  %4167 = vmatprep.subr.bf16.mxu1 %v25441_v33 }
 0x1f2   :  { %v2278_v31 = vmax.f32 %v1556_v62, %v1909_v22  ;;  %v2276_v32 = vmax.f32 %v1554_v0, %v1905_v23  ;;  %v2277_v34 = vmax.f32 %v1555_v10, %v1907_v25  ;;  %v1560_v35 = vmax.f32 %v1184_v19, 0.0  ;;  %v1178_v36 = vpop.f32.mrb[67].mxu0  ;;  %v20052_v0 = vld [vmem:[%s25434_s5 + $0x244] ss:$36 sps:$4 sm:$0xff]  }
 0x1f3   :  { %v1558_v37 = vmax.f32 %v1176_v26, 0.0  ;;  %v1187_v38 = vadd.f32 %v22157_v47, %v18005_v27  ;;  %v1179_v39 = vadd.f32 %v22157_v47, %v1178_v36  ;;  %v2416_v40 = vmax.f32 %v2272_v60, %v2275_v18 }
 0x1f4   :  { %v2418_v41 = vmax.f32 %v2274_v58, %v2277_v34  ;;  %v2419_v42 = vmax.f32 %v2275_v18, %v2278_v31  ;;  %4168 = vmatpush1.bf16.msra.mxu1 %v2771_v13  ;;  %v2417_v43 = vmax.f32 %v2273_v61, %v2276_v32  ;;  %v1914_v44 = vrot.slane %v1560_v35, 1 }
 0x1f5   :  { %v1910_v45 = vrot.slane %v1558_v37, 1  ;;  %v1561_v46 = vmax.f32 %v1187_v38, 0.0  ;;  %v1559_v48 = vmax.f32 %v1179_v39, 0.0  ;;  %4169 = vmatprep.subr.bf16.mxu1 %v25441_v33 }
 0x1f6   :  { %v2773_v49 = vpack.c.bf16 %v2419_v42, %v2418_v41  ;;  %v2772_v50 = vpack.c.bf16 %v2417_v43, %v2416_v40 }
 0x1f7   :  { %4001 = vmatmul.mubr.bf16.gmra.mrb[24].mxu1 %v20048_v21  ;;  %v1911_v51 = vsel %vm1782_vm1, %v1908_v15, %v1910_v45  ;;  %v1916_v52 = vrot.slane %v1561_v46, 1  ;;  %v1912_v53 = vrot.slane %v1559_v48, 1  ;;  %v18008_v54 = vpop.f32.mrb[68].mxu0 }
 0x1f8   :  { %4008 = vmatprep.mubr.bf16.mxu1 %v20049_v30  ;;  %v2279_v55 = vmax.f32 %v1557_v9, %v1911_v51  ;;  %v1200_v56 = vadd.f32 %v22157_v47, %v18008_v54  ;;  %v1191_v57 = vpop.f32.mrb[69].mxu0  ;;  %4170 = vmatpush1.bf16.msra.mxu1 %v2772_v50  ;;  %v20054_v30 = vld [vmem:[%s25434_s5 + $0x240] ss:$36 sps:$4 sm:$0xff]  }
 0x1f9   :  { %v1917_v58 = vsel %vm1782_vm1, %v1914_v44, %v1916_v52  ;;  %v1913_v60 = vsel %vm1782_vm1, %v1910_v45, %v1912_v53  ;;  %v1915_v61 = vsel %vm1782_vm1, %v1912_v53, %v1914_v44  ;;  %v1192_v62 = vadd.f32 %v22157_v47, %v1191_v57  ;;  %v18009_v63 = vpop.f32.mrb[70].mxu0  ;;  %4171 = vmatprep.subr.bf16.mxu1 %v25441_v33  ;;  %v22310_v44 = vld [vmem:[#allocation5] ss:$0 sm:$0xff] }
 0x1fa   :  { %v2282_v1 = vmax.f32 %v1560_v35, %v1917_v58  ;;  %v2280_v2 = vmax.f32 %v1558_v37, %v1913_v60  ;;  %v2281_v4 = vmax.f32 %v1559_v48, %v1915_v61  ;;  %v1564_v5 = vmax.f32 %v1200_v56, 0.0  ;;  %v1194_v6 = vpop.f32.mrb[71].mxu0  ;;  %v20055_v37 = vld [vmem:[%s25434_s5 + $0x28c] ss:$36 sps:$4 sm:$0xff]  }
 0x1fb   :  { %v1562_v3 = vmax.f32 %v1192_v62, 0.0  ;;  %v1203_v7 = vadd.f32 %v22157_v47, %v18009_v63  ;;  %v1195_v8 = vadd.f32 %v22157_v47, %v1194_v6  ;;  %v2420_v9 = vmax.f32 %v2276_v32, %v2279_v55 }
 0x1fc   :  { %v2422_v10 = vmax.f32 %v2278_v31, %v2281_v4  ;;  %v2423_v13 = vmax.f32 %v2279_v55, %v2282_v1  ;;  %4172 = vmatpush1.bf16.msra.mxu1 %v2773_v49  ;;  %v2421_v14 = vmax.f32 %v2277_v34, %v2280_v2  ;;  %v1922_v11 = vrot.slane %v1564_v5, 1 }
 0x1fd   :  { %v1918_v15 = vrot.slane %v1562_v3, 1  ;;  %v1565_v16 = vmax.f32 %v1203_v7, 0.0  ;;  %v1563_v17 = vmax.f32 %v1195_v8, 0.0  ;;  %4173 = vmatprep.subr.bf16.mxu1 %v25441_v33 }
 0x1fe   :  { %v2775_v18 = vpack.c.bf16 %v2423_v13, %v2422_v10  ;;  %v2774_v19 = vpack.c.bf16 %v2421_v14, %v2420_v9 }
 0x1ff   :  { %4009 = vmatmul.mubr.bf16.gmra.mrb[28].mxu1 %v20051_v59  ;;  %v1919_v20 = vsel %vm1782_vm1, %v1916_v52, %v1918_v15  ;;  %v1924_v21 = vrot.slane %v1565_v16, 1  ;;  %v1920_v22 = vrot.slane %v1563_v17, 1  ;;  %v18012_v23 = vpop.f32.mrb[72].mxu0 }
 0x200   :  { %4016 = vmatprep.mubr.bf16.mxu1 %v20052_v0  ;;  %v2283_v25 = vmax.f32 %v1561_v46, %v1919_v20  ;;  %v1216_v26 = vadd.f32 %v22157_v47, %v18012_v23  ;;  %v1207_v27 = vpop.f32.mrb[73].mxu0  ;;  %4174 = vmatpush1.bf16.msra.mxu1 %v2774_v19  ;;  %v20057_v0 = vld [vmem:[%s25434_s5 + $0x288] ss:$36 sps:$4 sm:$0xff]  }
 0x201   :  { %v1925_v31 = vsel %vm1782_vm1, %v1922_v11, %v1924_v21  ;;  %v1921_v32 = vsel %vm1782_vm1, %v1918_v15, %v1920_v22  ;;  %v1923_v34 = vsel %vm1782_vm1, %v1920_v22, %v1922_v11  ;;  %v1208_v35 = vadd.f32 %v22157_v47, %v1207_v27  ;;  %v18013_v36 = vpop.f32.mrb[74].mxu0  ;;  %4175 = vmatprep.subr.bf16.mxu1 %v25441_v33 }
 0x202   :  { %v2286_v38 = vmax.f32 %v1564_v5, %v1925_v31  ;;  %v22306_v39 = vmax.f32 %v1562_v3, %v1921_v32  ;;  %v22308_v40 = vmax.f32 %v1563_v17, %v1923_v34  ;;  %v1568_v41 = vmax.f32 %v1216_v26, 0.0  ;;  %v1210_v42 = vpop.f32.mrb[75].mxu0  ;;  %v20058_v3 = vld [vmem:[%s25434_s5 + $0x2d4] ss:$36 sps:$4 sm:$0xff]  }
 0x203   :  { %v1566_v43 = vmax.f32 %v1208_v35, 0.0  ;;  %v1219_v45 = vadd.f32 %v22310_v44, %v18013_v36  ;;  %v1211_v47 = vadd.f32 %v22310_v44, %v1210_v42  ;;  %v2424_v46 = vmax.f32 %v2280_v2, %v2283_v25  ;;  %v20060_v34 = vld [vmem:[%s25434_s5 + $0x2d0] ss:$36 sps:$4 sm:$0xff]   ;;  %v20061_v42 = vld [vmem:[%s25434_s5 + $0x31c] ss:$36 sps:$4 sm:$0xff]  }
 0x204   :  { %v2426_v48 = vmax.f32 %v2282_v1, %v22308_v40  ;;  %v2427_v49 = vmax.f32 %v2283_v25, %v2286_v38  ;;  %4176 = vmatpush1.bf16.msra.mxu1 %v2775_v18  ;;  %v2425_v50 = vmax.f32 %v2281_v4, %v22306_v39  ;;  %v1930_v51 = vrot.slane %v1568_v41, 1 }
 0x205   :  { %v1926_v52 = vrot.slane %v1566_v43, 1  ;;  %v1569_v53 = vmax.f32 %v1219_v45, 0.0  ;;  %v1567_v54 = vmax.f32 %v1211_v47, 0.0  ;;  %4370 = vmatprep.subr.bf16.mxu1 %v25441_v33 }
 0x206   :  { %v22317_v55 = vpack.c.bf16 %v2427_v49, %v2426_v48  ;;  %v22319_v56 = vpack.c.bf16 %v2425_v50, %v2424_v46 }
 0x207   :  { %4017 = vmatmul.mubr.bf16.gmra.mrb[32].mxu1 %v20054_v30  ;;  %v1927_v57 = vsel %vm1782_vm1, %v1924_v21, %v1926_v52  ;;  %v1932_v59 = vrot.slane %v1569_v53, 1  ;;  %v1928_v58 = vrot.slane %v1567_v54, 1  ;;  %v18016_v60 = vpop.f32.mrb[76].mxu0 }
 0x208   :  { %4024 = vmatprep.mubr.bf16.mxu1 %v20055_v37  ;;  %v22322_v61 = vmax.f32 %v1565_v16, %v1927_v57  ;;  %v1232_v62 = vadd.f32 %v22310_v44, %v18016_v60  ;;  %v1223_v63 = vpop.f32.mrb[77].mxu0 }
 0x209   :  { %v1933_v1 = vsel %vm1782_vm1, %v1930_v51, %v1932_v59  ;;  %v1929_v2 = vsel %vm1782_vm1, %v1926_v52, %v1928_v58  ;;  %v1931_v4 = vsel %vm1782_vm1, %v1928_v58, %v1930_v51  ;;  %v1224_v5 = vadd.f32 %v22310_v44, %v1223_v63  ;;  %v18017_v6 = vpop.f32.mrb[78].mxu0 }
 0x20a   :  { %v2290_v7 = vmax.f32 %v1568_v41, %v1933_v1  ;;  %v22335_v8 = vmax.f32 %v1566_v43, %v1929_v2  ;;  %v22337_v9 = vmax.f32 %v1567_v54, %v1931_v4  ;;  %v1572_v10 = vmax.f32 %v1232_v62, 0.0  ;;  %v1226_v13 = vpop.f32.mrb[79].mxu0 }
 0x20b   :  { %v1570_v14 = vmax.f32 %v1224_v5, 0.0  ;;  %v1235_v11 = vadd.f32 %v22310_v44, %v18017_v6  ;;  %v1227_v15 = vadd.f32 %v22310_v44, %v1226_v13  ;;  %v20063_v6 = vld [vmem:[%s25434_s5 + $0x318] ss:$36 sps:$4 sm:$0xff]  }
 0x20c   :  { %v2430_v16 = vmax.f32 %v2286_v38, %v22337_v9  ;;  %v2431_v17 = vmax.f32 %v22322_v61, %v2290_v7  ;;  %v1938_v18 = vrot.slane %v1572_v10, 1 }
 0x20d   :  { %v1934_v19 = vrot.slane %v1570_v14, 1  ;;  %v1573_v20 = vmax.f32 %v1235_v11, 0.0  ;;  %v1571_v21 = vmax.f32 %v1227_v15, 0.0  ;;  %v20064_v11 = vld [vmem:[%s25434_s5 + $0x364] ss:$36 sps:$4 sm:$0xff]  }
 0x20e   :  { %v22343_v22 = vpack.c.bf16 %v2431_v17, %v2430_v16 }
 0x20f   :  { %4025 = vmatmul.mubr.bf16.gmra.mrb[36].mxu1 %v20057_v0  ;;  %v1935_v23 = vsel %vm1782_vm1, %v1932_v59, %v1934_v19  ;;  %v1940_v25 = vrot.slane %v1573_v20, 1  ;;  %v1936_v26 = vrot.slane %v1571_v21, 1  ;;  %v18020_v27 = vpop.f32.mrb[80].mxu0 }
 0x210   :  { %4032 = vmatprep.mubr.bf16.mxu1 %v20058_v3  ;;  %v22346_v30 = vmax.f32 %v1569_v53, %v1935_v23  ;;  %v1248_v31 = vadd.f32 %v22310_v44, %v18020_v27  ;;  %v1239_v32 = vpop.f32.mrb[81].mxu0 }
 0x211   :  { %v1941_v35 = vsel %vm1782_vm1, %v1938_v18, %v1940_v25  ;;  %v1937_v36 = vsel %vm1782_vm1, %v1934_v19, %v1936_v26  ;;  %v1939_v37 = vsel %vm1782_vm1, %v1936_v26, %v1938_v18  ;;  %v1240_v38 = vadd.f32 %v22310_v44, %v1239_v32  ;;  %v18021_v41 = vpop.f32.mrb[82].mxu0 }
 0x212   :  { %v2294_v43 = vmax.f32 %v1572_v10, %v1941_v35  ;;  %v22359_v45 = vmax.f32 %v1570_v14, %v1937_v36  ;;  %v22361_v47 = vmax.f32 %v1571_v21, %v1939_v37  ;;  %v1576_v46 = vmax.f32 %v1248_v31, 0.0  ;;  %v1242_v48 = vpop.f32.mrb[83].mxu0 }
 0x213   :  { %v1574_v49 = vmax.f32 %v1240_v38, 0.0  ;;  %v1251_v50 = vadd.f32 %v22310_v44, %v18021_v41  ;;  %v1243_v51 = vadd.f32 %v22310_v44, %v1242_v48  ;;  %v20066_v48 = vld [vmem:[%s25434_s5 + $0x360] ss:$36 sps:$4 sm:$0xff]  }
 0x214   :  { %v2434_v52 = vmax.f32 %v2290_v7, %v22361_v47  ;;  %v2435_v53 = vmax.f32 %v22346_v30, %v2294_v43  ;;  %v1946_v54 = vrot.slane %v1576_v46, 1 }
 0x215   :  { %v1942_v57 = vrot.slane %v1574_v49, 1  ;;  %v1577_v59 = vmax.f32 %v1251_v50, 0.0  ;;  %v1575_v58 = vmax.f32 %v1243_v51, 0.0 }
 0x216   :  { %v22367_v60 = vpack.c.bf16 %v2435_v53, %v2434_v52 }
 0x217   :  { %4033 = vmatmul.mubr.bf16.gmra.mrb[40].mxu1 %v20060_v34  ;;  %v1943_v62 = vsel %vm1782_vm1, %v1940_v25, %v1942_v57  ;;  %v1948_v63 = vrot.slane %v1577_v59, 1  ;;  %v1944_v0 = vrot.slane %v1575_v58, 1  ;;  %v18024_v1 = vpop.f32.mrb[84].mxu0 }
 0x218   :  { %4040 = vmatprep.mubr.bf16.mxu1 %v20061_v42  ;;  %v22370_v2 = vmax.f32 %v1573_v20, %v1943_v62  ;;  %v1264_v4 = vadd.f32 %v22310_v44, %v18024_v1  ;;  %v1255_v5 = vpop.f32.mrb[85].mxu0 }
 0x219   :  { %v1949_v3 = vsel %vm1782_vm1, %v1946_v54, %v1948_v63  ;;  %v1945_v7 = vsel %vm1782_vm1, %v1942_v57, %v1944_v0  ;;  %v1947_v10 = vsel %vm1782_vm1, %v1944_v0, %v1946_v54  ;;  %v1256_v13 = vadd.f32 %v22310_v44, %v1255_v5  ;;  %v18025_v14 = vpop.f32.mrb[86].mxu0  ;;  %v20067_v54 = vld [vmem:[%s25434_s5 + $0x3ac] ss:$36 sps:$4 sm:$0xff]  }
 0x21a   :  { %v2298_v15 = vmax.f32 %v1576_v46, %v1949_v3  ;;  %v22383_v16 = vmax.f32 %v1574_v49, %v1945_v7  ;;  %v22385_v17 = vmax.f32 %v1575_v58, %v1947_v10  ;;  %v1580_v18 = vmax.f32 %v1264_v4, 0.0  ;;  %v1258_v19 = vpop.f32.mrb[87].mxu0 }
 0x21b   :  { %v1578_v20 = vmax.f32 %v1256_v13, 0.0  ;;  %v1267_v21 = vadd.f32 %v22310_v44, %v18025_v14  ;;  %v1259_v23 = vadd.f32 %v22310_v44, %v1258_v19 }
 0x21c   :  { %v2438_v25 = vmax.f32 %v2294_v43, %v22385_v17  ;;  %v2439_v26 = vmax.f32 %v22370_v2, %v2298_v15  ;;  %v1954_v27 = vrot.slane %v1580_v18, 1 }
 0x21d   :  { %v1950_v31 = vrot.slane %v1578_v20, 1  ;;  %v1581_v32 = vmax.f32 %v1267_v21, 0.0  ;;  %v1579_v34 = vmax.f32 %v1259_v23, 0.0 }
 0x21e   :  { %v22391_v35 = vpack.c.bf16 %v2439_v26, %v2438_v25  ;;  %v20069_v25 = vld [vmem:[%s25434_s5 + $0x3a8] ss:$36 sps:$4 sm:$0xff]  }
 0x21f   :  { %4041 = vmatmul.mubr.bf16.gmra.mrb[44].mxu1 %v20063_v6  ;;  %v1951_v36 = vsel %vm1782_vm1, %v1948_v63, %v1950_v31  ;;  %v1956_v37 = vrot.slane %v1581_v32, 1  ;;  %v1952_v38 = vrot.slane %v1579_v34, 1  ;;  %v18028_v41 = vpop.f32.mrb[88].mxu0 }
 0x220   :  { %4048 = vmatprep.mubr.bf16.mxu1 %v20064_v11  ;;  %v22394_v42 = vmax.f32 %v1577_v59, %v1951_v36  ;;  %v1280_v46 = vadd.f32 %v22310_v44, %v18028_v41  ;;  %v1271_v43 = vpop.f32.mrb[89].mxu0 }
 0x221   :  { %v1957_v49 = vsel %vm1782_vm1, %v1954_v27, %v1956_v37  ;;  %v1953_v50 = vsel %vm1782_vm1, %v1950_v31, %v1952_v38  ;;  %v1955_v51 = vsel %vm1782_vm1, %v1952_v38, %v1954_v27  ;;  %v1272_v52 = vadd.f32 %v22310_v44, %v1271_v43  ;;  %v18029_v53 = vpop.f32.mrb[90].mxu0 }
 0x222   :  { %v2302_v57 = vmax.f32 %v1580_v18, %v1957_v49  ;;  %v22407_v59 = vmax.f32 %v1578_v20, %v1953_v50  ;;  %v22409_v58 = vmax.f32 %v1579_v34, %v1955_v51  ;;  %v1584_v62 = vmax.f32 %v1280_v46, 0.0  ;;  %v1274_v63 = vpop.f32.mrb[91].mxu0 }
 0x223   :  { %v1582_v0 = vmax.f32 %v1272_v52, 0.0  ;;  %v1283_v1 = vadd.f32 %v22310_v44, %v18029_v53  ;;  %v1275_v4 = vadd.f32 %v22310_v44, %v1274_v63 }
 0x224   :  { %v2442_v5 = vmax.f32 %v2298_v15, %v22409_v58  ;;  %v2443_v6 = vmax.f32 %v22394_v42, %v2302_v57  ;;  %v1962_v3 = vrot.slane %v1584_v62, 1 }
 0x225   :  { %v1958_v7 = vrot.slane %v1582_v0, 1  ;;  %v1585_v10 = vmax.f32 %v1283_v1, 0.0  ;;  %v1583_v13 = vmax.f32 %v1275_v4, 0.0 }
 0x226   :  { %v22415_v14 = vpack.c.bf16 %v2443_v6, %v2442_v5 }
 0x227   :  { %4049 = vmatmul.mubr.bf16.gmra.mrb[48].mxu1 %v20066_v48  ;;  %v1959_v11 = vsel %vm1782_vm1, %v1956_v37, %v1958_v7  ;;  %v1964_v18 = vrot.slane %v1585_v10, 1  ;;  %v1960_v19 = vrot.slane %v1583_v13, 1  ;;  %v18032_v20 = vpop.f32.mrb[92].mxu0 }
 0x228   :  { %4056 = vmatprep.mubr.bf16.mxu1 %v20067_v54  ;;  %v22418_v21 = vmax.f32 %v1581_v32, %v1959_v11  ;;  %v1296_v23 = vadd.f32 %v22310_v44, %v18032_v20  ;;  %v1287_v15 = vpop.f32.mrb[93].mxu0  ;;  %v20070_v32 = vld [vmem:[%s25434_s5 + $0x3f4] ss:$36 sps:$4 sm:$0xff]  }
 0x229   :  { %v1965_v26 = vsel %vm1782_vm1, %v1962_v3, %v1964_v18  ;;  %v1961_v27 = vsel %vm1782_vm1, %v1958_v7, %v1960_v19  ;;  %v1963_v31 = vsel %vm1782_vm1, %v1960_v19, %v1962_v3  ;;  %v1288_v34 = vadd.f32 %v22310_v44, %v1287_v15  ;;  %v18033_v36 = vpop.f32.mrb[94].mxu0 }
 0x22a   :  { %v2306_v37 = vmax.f32 %v1584_v62, %v1965_v26  ;;  %v22431_v38 = vmax.f32 %v1582_v0, %v1961_v27  ;;  %v22433_v41 = vmax.f32 %v1583_v13, %v1963_v31  ;;  %v1588_v46 = vmax.f32 %v1296_v23, 0.0  ;;  %v1290_v43 = vpop.f32.mrb[95].mxu0  ;;  %v20072_v13 = vld [vmem:[%s25434_s5 + $0x3f0] ss:$36 sps:$4 sm:$0xff]  }
 0x22b   :  { %v1586_v48 = vmax.f32 %v1288_v34, 0.0  ;;  %v1299_v49 = vadd.f32 %v22310_v44, %v18033_v36  ;;  %v1291_v50 = vadd.f32 %v22310_v44, %v1290_v43 }
 0x22c   :  { %v2446_v51 = vmax.f32 %v2302_v57, %v22433_v41  ;;  %v2447_v52 = vmax.f32 %v22418_v21, %v2306_v37  ;;  %v1970_v53 = vrot.slane %v1588_v46, 1 }
 0x22d   :  { %v1966_v54 = vrot.slane %v1586_v48, 1  ;;  %v1589_v63 = vmax.f32 %v1299_v49, 0.0  ;;  %v1587_v1 = vmax.f32 %v1291_v50, 0.0 }
 0x22e   :  { %v22439_v62 = vpack.c.bf16 %v2447_v52, %v2446_v51 }
 0x22f   :  { %4057 = vmatmul.mubr.bf16.gmra.mrb[52].mxu1 %v20069_v25  ;;  %v1967_v0 = vsel %vm1782_vm1, %v1964_v18, %v1966_v54  ;;  %v1972_v4 = vrot.slane %v1589_v63, 1  ;;  %v1968_v5 = vrot.slane %v1587_v1, 1  ;;  %v18036_v6 = vpop.f32.mrb[96].mxu0 }
 0x230   :  { %4064 = vmatprep.mubr.bf16.mxu1 %v20070_v32  ;;  %v22442_v3 = vmax.f32 %v1585_v10, %v1967_v0  ;;  %v1312_v7 = vadd.f32 %v22310_v44, %v18036_v6  ;;  %v1303_v57 = vpop.f32.mrb[97].mxu0  ;;  %v20073_v10 = vld [vmem:[%s25434_s5 + $0x43c] ss:$36 sps:$4 sm:$0xff]  }
 0x231   :  { %v1973_v11 = vsel %vm1782_vm1, %v1970_v53, %v1972_v4  ;;  %v1969_v19 = vsel %vm1782_vm1, %v1966_v54, %v1968_v5  ;;  %v1971_v20 = vsel %vm1782_vm1, %v1968_v5, %v1970_v53  ;;  %v1304_v18 = vadd.f32 %v22310_v44, %v1303_v57  ;;  %v18037_v23 = vpop.f32.mrb[98].mxu0 }
 0x232   :  { %v2310_v15 = vmax.f32 %v1588_v46, %v1973_v11  ;;  %v22455_v25 = vmax.f32 %v1586_v48, %v1969_v19  ;;  %v22457_v26 = vmax.f32 %v1587_v1, %v1971_v20  ;;  %v1592_v27 = vmax.f32 %v1312_v7, 0.0  ;;  %v1306_v31 = vpop.f32.mrb[99].mxu0  ;;  %v20075_v7 = vld [vmem:[%s25434_s5 + $0x438] ss:$36 sps:$4 sm:$0xff]  }
 0x233   :  { %v1590_v34 = vmax.f32 %v1304_v18, 0.0  ;;  %v1315_v36 = vadd.f32 %v22310_v44, %v18037_v23  ;;  %v1307_v32 = vadd.f32 %v22310_v44, %v1306_v31 }
 0x234   :  { %v2450_v43 = vmax.f32 %v2306_v37, %v22457_v26  ;;  %v2451_v49 = vmax.f32 %v22442_v3, %v2310_v15  ;;  %v1978_v50 = vrot.slane %v1592_v27, 1 }
 0x235   :  { %v1974_v51 = vrot.slane %v1590_v34, 1  ;;  %v1593_v52 = vmax.f32 %v1315_v36, 0.0  ;;  %v1591_v53 = vmax.f32 %v1307_v32, 0.0 }
 0x236   :  { %v22463_v46 = vpack.c.bf16 %v2451_v49, %v2450_v43 }
 0x237   :  { %4065 = vmatmul.mubr.bf16.gmra.mrb[56].mxu1 %v20072_v13  ;;  %v1975_v48 = vsel %vm1782_vm1, %v1972_v4, %v1974_v51  ;;  %v1980_v54 = vrot.slane %v1593_v52, 1  ;;  %v1976_v1 = vrot.slane %v1591_v53, 1  ;;  %v18040_v0 = vpop.f32.mrb[100].mxu0 }
 0x238   :  { %25558 = vst [vmem:[#allocation23_spill] sm:$0xff] %v22463_v46  ;;  %4072 = vmatprep.mubr.bf16.mxu1 %v20073_v10  ;;  %v22466_v5 = vmax.f32 %v1589_v63, %v1975_v48  ;;  %v1328_v6 = vadd.f32 %v22310_v44, %v18040_v0  ;;  %v1319_v37 = vpop.f32.mrb[101].mxu0  ;;  %v20076_v63 = vld [vmem:[%s25434_s5 + $0x484] ss:$36 sps:$4 sm:$0xff]  }
 0x239   :  { %v1981_v57 = vsel %vm1782_vm1, %v1978_v50, %v1980_v54  ;;  %v1977_v11 = vsel %vm1782_vm1, %v1974_v51, %v1976_v1  ;;  %v1979_v13 = vsel %vm1782_vm1, %v1976_v1, %v1978_v50  ;;  %v1320_v4 = vadd.f32 %v22310_v44, %v1319_v37  ;;  %v18041_v19 = vpop.f32.mrb[102].mxu0 }
 0x23a   :  { %v2314_v20 = vmax.f32 %v1592_v27, %v1981_v57  ;;  %v22479_v18 = vmax.f32 %v1590_v34, %v1977_v11  ;;  %v22481_v23 = vmax.f32 %v1591_v53, %v1979_v13  ;;  %v1596_v10 = vmax.f32 %v1328_v6, 0.0  ;;  %v1322_v31 = vpop.f32.mrb[103].mxu0  ;;  %v20078_v13 = vld [vmem:[%s25434_s5 + $0x480] ss:$36 sps:$4 sm:$0xff]  }
 0x23b   :  { %v1594_v36 = vmax.f32 %v1320_v4, 0.0  ;;  %v1331_v32 = vadd.f32 %v22310_v44, %v18041_v19  ;;  %v1323_v43 = vadd.f32 %v22310_v44, %v1322_v31 }
 0x23c   :  { %25559 = vst [vmem:[#allocation24_spill] sm:$0xff] %v22481_v23  ;;  %v2454_v49 = vmax.f32 %v2310_v15, %v22481_v23  ;;  %v2455_v50 = vmax.f32 %v22466_v5, %v2314_v20  ;;  %v1986_v51 = vrot.slane %v1596_v10, 1 }
 0x23d   :  { %v1982_v48 = vrot.slane %v1594_v36, 1  ;;  %v1597_v1 = vmax.f32 %v1331_v32, 0.0  ;;  %v1595_v0 = vmax.f32 %v1323_v43, 0.0 }
 0x23e   :  { %v22487_v27 = vpack.c.bf16 %v2455_v50, %v2454_v49 }
 0x23f   :  { %4073 = vmatmul.mubr.bf16.gmra.mrb[60].mxu1 %v20075_v7  ;;  %v1983_v34 = vsel %vm1782_vm1, %v1980_v54, %v1982_v48  ;;  %v1988_v53 = vrot.slane %v1597_v1, 1  ;;  %v1984_v6 = vrot.slane %v1595_v0, 1  ;;  %v18044_v37 = vpop.f32.mrb[104].mxu0 }
 0x240   :  { %25560 = vst [vmem:[#allocation25_spill] sm:$0xff] %v22487_v27  ;;  %4080 = vmatprep.mubr.bf16.mxu1 %v20076_v63  ;;  %v22490_v57 = vmax.f32 %v1593_v52, %v1983_v34  ;;  %v1344_v11 = vadd.f32 %v22310_v44, %v18044_v37  ;;  %v1335_v15 = vpop.f32.mrb[105].mxu0  ;;  %v20079_v52 = vld [vmem:[%s25434_s5 + $0x4cc] ss:$36 sps:$4 sm:$0xff]  }
 0x241   :  { %v1989_v4 = vsel %vm1782_vm1, %v1986_v51, %v1988_v53  ;;  %v1985_v19 = vsel %vm1782_vm1, %v1982_v48, %v1984_v6  ;;  %v1987_v7 = vsel %vm1782_vm1, %v1984_v6, %v1986_v51  ;;  %v1336_v54 = vadd.f32 %v22310_v44, %v1335_v15  ;;  %v18045_v31 = vpop.f32.mrb[106].mxu0 }
 0x242   :  { %v2318_v63 = vmax.f32 %v1596_v10, %v1989_v4  ;;  %v22503_v32 = vmax.f32 %v1594_v36, %v1985_v19  ;;  %v22505_v43 = vmax.f32 %v1595_v0, %v1987_v7  ;;  %v1600_v49 = vmax.f32 %v1344_v11, 0.0  ;;  %v1338_v50 = vpop.f32.mrb[107].mxu0 }
 0x243   :  { %v1598_v34 = vmax.f32 %v1336_v54, 0.0  ;;  %v1347_v37 = vadd.f32 %v22310_v44, %v18045_v31  ;;  %v1339_v48 = vadd.f32 %v22310_v44, %v1338_v50  ;;  %v20081_v54 = vld [vmem:[%s25434_s5 + $0x4c8] ss:$36 sps:$4 sm:$0xff]  }
 0x244   :  { %25561 = vst [vmem:[#allocation26_spill] sm:$0xff] %v22503_v32  ;;  %25562 = vst [vmem:[#allocation27_spill] sm:$0xff] %v22505_v43  ;;  %v2458_v51 = vmax.f32 %v2314_v20, %v22505_v43  ;;  %v2459_v6 = vmax.f32 %v22490_v57, %v2318_v63  ;;  %v1994_v15 = vrot.slane %v1600_v49, 1 }
 0x245   :  { %v1990_v33 = vrot.slane %v1598_v34, 1  ;;  %v1601_v27 = vmax.f32 %v1347_v37, 0.0  ;;  %v1599_v46 = vmax.f32 %v1339_v48, 0.0 }
 0x246   :  { %v22511_v10 = vpack.c.bf16 %v2459_v6, %v2458_v51 }
 0x247   :  { %4081 = vmatmul.mubr.bf16.gmra.mrb[64].mxu1 %v20078_v13  ;;  %v1991_v36 = vsel %vm1782_vm1, %v1988_v53, %v1990_v33  ;;  %v1996_v0 = vrot.slane %v1601_v27, 1  ;;  %v1992_v11 = vrot.slane %v1599_v46, 1  ;;  %v18048_v4 = vpop.f32.mrb[108].mxu0 }
 0x248   :  { %25563 = vst [vmem:[#allocation28_spill] sm:$0xff] %v22511_v10  ;;  %4088 = vmatprep.mubr.bf16.mxu1 %v20079_v52  ;;  %v22514_v19 = vmax.f32 %v1597_v1, %v1991_v36  ;;  %v1360_v7 = vadd.f32 %v22310_v44, %v18048_v4  ;;  %v1351_v20 = vpop.f32.mrb[109].mxu0  ;;  %v20082_v1 = vld [vmem:[%s25434_s5 + $0x514] ss:$36 sps:$4 sm:$0xff]  }
 0x249   :  { %v1997_v31 = vsel %vm1782_vm1, %v1994_v15, %v1996_v0  ;;  %v1993_v50 = vsel %vm1782_vm1, %v1990_v33, %v1992_v11  ;;  %v1995_v13 = vsel %vm1782_vm1, %v1992_v11, %v1994_v15  ;;  %v1352_v53 = vadd.f32 %v22310_v44, %v1351_v20  ;;  %v18049_v37 = vpop.f32.mrb[110].mxu0 }
 0x24a   :  { %v2322_v52 = vmax.f32 %v1600_v49, %v1997_v31  ;;  %v22527_v48 = vmax.f32 %v1598_v34, %v1993_v50  ;;  %v22529_v51 = vmax.f32 %v1599_v46, %v1995_v13  ;;  %v1604_v6 = vmax.f32 %v1360_v7, 0.0  ;;  %v1354_v36 = vpop.f32.mrb[111].mxu0 }
 0x24b   :  { %v1602_v4 = vmax.f32 %v1352_v53, 0.0  ;;  %v1363_v10 = vadd.f32 %v22310_v44, %v18049_v37  ;;  %v1355_v33 = vadd.f32 %v22310_v44, %v1354_v36  ;;  %v20084_v53 = vld [vmem:[%s25434_s5 + $0x510] ss:$36 sps:$4 sm:$0xff]  }
 0x24c   :  { %25564 = vst [vmem:[#allocation29_spill] sm:$0xff] %v22529_v51  ;;  %v2462_v15 = vmax.f32 %v2318_v63, %v22529_v51  ;;  %v2463_v11 = vmax.f32 %v22514_v19, %v2322_v52  ;;  %v2002_v20 = vrot.slane %v1604_v6, 1 }
 0x24d   :  { %v1998_v43 = vrot.slane %v1602_v4, 1  ;;  %v1605_v23 = vmax.f32 %v1363_v10, 0.0  ;;  %v1603_v32 = vmax.f32 %v1355_v33, 0.0 }
 0x24e   :  { %v22535_v49 = vpack.c.bf16 %v2463_v11, %v2462_v15 }
 0x24f   :  { %4089 = vmatmul.mubr.bf16.gmra.mrb[68].mxu1 %v20081_v54  ;;  %v1999_v46 = vsel %vm1782_vm1, %v1996_v0, %v1998_v43  ;;  %v2004_v34 = vrot.slane %v1605_v23, 1  ;;  %v2000_v7 = vrot.slane %v1603_v32, 1  ;;  %v18052_v31 = vpop.f32.mrb[112].mxu0 }
 0x250   :  { %25565 = vst [vmem:[#allocation30_spill] sm:$0xff] %v22535_v49  ;;  %4096 = vmatprep.mubr.bf16.mxu1 %v20082_v1  ;;  %v22538_v50 = vmax.f32 %v1601_v27, %v1999_v46  ;;  %v1376_v13 = vadd.f32 %v22310_v44, %v18052_v31  ;;  %v1367_v63 = vpop.f32.mrb[113].mxu0  ;;  %v20085_v27 = vld [vmem:[%s25434_s5 + $0x55c] ss:$36 sps:$4 sm:$0xff]   ;;  %v22555_v49 = vld [vmem:[#allocation5] ss:$0 sm:$0xff] }
 0x251   :  { %v2005_v10 = vsel %vm1782_vm1, %v2002_v20, %v2004_v34  ;;  %v2001_v37 = vsel %vm1782_vm1, %v1998_v43, %v2000_v7  ;;  %v2003_v54 = vsel %vm1782_vm1, %v2000_v7, %v2002_v20  ;;  %v1368_v0 = vadd.f32 %v22310_v44, %v1367_v63  ;;  %v18053_v36 = vpop.f32.mrb[114].mxu0 }
 0x252   :  { %25566 = vst [vmem:[#allocation31_spill] sm:$0xff] %v22538_v50  ;;  %v2326_v1 = vmax.f32 %v1604_v6, %v2005_v10  ;;  %v22551_v33 = vmax.f32 %v1602_v4, %v2001_v37  ;;  %v22553_v15 = vmax.f32 %v1603_v32, %v2003_v54  ;;  %v1608_v11 = vmax.f32 %v1376_v13, 0.0  ;;  %v1370_v46 = vpop.f32.mrb[115].mxu0 }
 0x253   :  { %v1606_v31 = vmax.f32 %v1368_v0, 0.0  ;;  %v1379_v43 = vadd.f32 %v22555_v49, %v18053_v36  ;;  %v1371_v20 = vadd.f32 %v22555_v49, %v1370_v46  ;;  %v20087_v46 = vld [vmem:[%s25434_s5 + $0x558] ss:$36 sps:$4 sm:$0xff]  }
 0x254   :  { %25567 = vst [vmem:[#allocation32_spill] sm:$0xff] %v22551_v33  ;;  %25568 = vst [vmem:[#allocation33_spill] sm:$0xff] %v22553_v15  ;;  %v2466_v44 = vmax.f32 %v2322_v52, %v22553_v15  ;;  %v2467_v7 = vmax.f32 %v22538_v50, %v2326_v1  ;;  %v2010_v63 = vrot.slane %v1608_v11, 1 }
 0x255   :  { %v2006_v51 = vrot.slane %v1606_v31, 1  ;;  %v1609_v6 = vmax.f32 %v1379_v43, 0.0  ;;  %v1607_v4 = vmax.f32 %v1371_v20, 0.0 }
 0x256   :  { %v22561_v10 = vpack.c.bf16 %v2467_v7, %v2466_v44 }
 0x257   :  { %4097 = vmatmul.mubr.bf16.gmra.mrb[72].mxu1 %v20084_v53  ;;  %v2007_v32 = vsel %vm1782_vm1, %v2004_v34, %v2006_v51  ;;  %v2012_v13 = vrot.slane %v1609_v6, 1  ;;  %v2008_v37 = vrot.slane %v1607_v4, 1  ;;  %v18056_v54 = vpop.f32.mrb[116].mxu0 }
 0x258   :  { %25569 = vst [vmem:[#allocation34_spill] sm:$0xff] %v22561_v10  ;;  %4104 = vmatprep.mubr.bf16.mxu1 %v20085_v27  ;;  %v22564_v0 = vmax.f32 %v1605_v23, %v2007_v32  ;;  %v1392_v36 = vadd.f32 %v22555_v49, %v18056_v54  ;;  %v1383_v52 = vpop.f32.mrb[117].mxu0  ;;  %v20088_v32 = vld [vmem:[%s25434_s5 + $0x5a4] ss:$36 sps:$4 sm:$0xff]  }
 0x259   :  { %v2013_v43 = vsel %vm1782_vm1, %v2010_v63, %v2012_v13  ;;  %v2009_v20 = vsel %vm1782_vm1, %v2006_v51, %v2008_v37  ;;  %v2011_v53 = vsel %vm1782_vm1, %v2008_v37, %v2010_v63  ;;  %v1384_v34 = vadd.f32 %v22555_v49, %v1383_v52  ;;  %v18057_v44 = vpop.f32.mrb[118].mxu0 }
 0x25a   :  { %25570 = vst [vmem:[#allocation35_spill] sm:$0xff] %v22564_v0  ;;  %v2330_v7 = vmax.f32 %v1608_v11, %v2013_v43  ;;  %v22574_v27 = vmax.f32 %v1606_v31, %v2009_v20  ;;  %v22576_v23 = vmax.f32 %v1607_v4, %v2011_v53  ;;  %v1612_v54 = vmax.f32 %v1392_v36, 0.0  ;;  %v1386_v10 = vpop.f32.mrb[119].mxu0 }
 0x25b   :  { %v1610_v15 = vmax.f32 %v1384_v34, 0.0  ;;  %v1395_v33 = vadd.f32 %v22555_v49, %v18057_v44  ;;  %v1387_v51 = vadd.f32 %v22555_v49, %v1386_v10 }
 0x25c   :  { %25571 = vst [vmem:[#allocation36_spill] sm:$0xff] %v22574_v27  ;;  %25572 = vst [vmem:[#allocation37_spill] sm:$0xff] %v22576_v23  ;;  %v2470_v63 = vmax.f32 %v2326_v1, %v22576_v23  ;;  %v2471_v37 = vmax.f32 %v22564_v0, %v2330_v7  ;;  %v2018_v11 = vrot.slane %v1612_v54, 1  ;;  %v20090_v23 = vld [vmem:[%s25434_s5 + $0x5a0] ss:$36 sps:$4 sm:$0xff]  }
 0x25d   :  { %v2014_v31 = vrot.slane %v1610_v15, 1  ;;  %v1613_v52 = vmax.f32 %v1395_v33, 0.0  ;;  %v1611_v4 = vmax.f32 %v1387_v51, 0.0 }
 0x25e   :  { %v22585_v43 = vpack.c.bf16 %v2471_v37, %v2470_v63 }
 0x25f   :  { %4105 = vmatmul.mubr.bf16.gmra.mrb[76].mxu1 %v20087_v46  ;;  %v2015_v20 = vsel %vm1782_vm1, %v2012_v13, %v2014_v31  ;;  %v2020_v36 = vrot.slane %v1613_v52, 1  ;;  %v2016_v53 = vrot.slane %v1611_v4, 1  ;;  %v18060_v34 = vpop.f32.mrb[120].mxu0 }
 0x260   :  { %25573 = vst [vmem:[#allocation38_spill] sm:$0xff] %v22585_v43  ;;  %4112 = vmatprep.mubr.bf16.mxu1 %v20088_v32  ;;  %v22588_v44 = vmax.f32 %v1609_v6, %v2015_v20  ;;  %v1408_v10 = vadd.f32 %v22555_v49, %v18060_v34  ;;  %v1399_v1 = vpop.f32.mrb[121].mxu0  ;;  %v20091_v43 = vld [vmem:[%s25434_s5 + $0x5ec] ss:$36 sps:$4 sm:$0xff]  }
 0x261   :  { %v2021_v33 = vsel %vm1782_vm1, %v2018_v11, %v2020_v36  ;;  %v2017_v51 = vsel %vm1782_vm1, %v2014_v31, %v2016_v53  ;;  %v2019_v46 = vsel %vm1782_vm1, %v2016_v53, %v2018_v11  ;;  %v1400_v13 = vadd.f32 %v22555_v49, %v1399_v1  ;;  %v18061_v63 = vpop.f32.mrb[122].mxu0 }
 0x262   :  { %25574 = vst [vmem:[#allocation39_spill] sm:$0xff] %v22588_v44  ;;  %v2334_v37 = vmax.f32 %v1612_v54, %v2021_v33  ;;  %v22598_v32 = vmax.f32 %v1610_v15, %v2017_v51  ;;  %v22600_v6 = vmax.f32 %v1611_v4, %v2019_v46  ;;  %v1616_v20 = vmax.f32 %v1408_v10, 0.0  ;;  %v1402_v34 = vpop.f32.mrb[123].mxu0 }
 0x263   :  { %v1614_v27 = vmax.f32 %v1400_v13, 0.0  ;;  %v1411_v0 = vadd.f32 %v22555_v49, %v18061_v63  ;;  %v1403_v31 = vadd.f32 %v22555_v49, %v1402_v34 }
 0x264   :  { %25575 = vst [vmem:[#allocation40_spill] sm:$0xff] %v22598_v32  ;;  %25576 = vst [vmem:[#allocation41_spill] sm:$0xff] %v22600_v6  ;;  %v2474_v11 = vmax.f32 %v2330_v7, %v22600_v6  ;;  %v2475_v53 = vmax.f32 %v22588_v44, %v2334_v37  ;;  %v2026_v54 = vrot.slane %v1616_v20, 1 }
 0x265   :  { %v2022_v15 = vrot.slane %v1614_v27, 1  ;;  %v1617_v1 = vmax.f32 %v1411_v0, 0.0  ;;  %v1615_v4 = vmax.f32 %v1403_v31, 0.0 }
 0x266   :  { %v22609_v33 = vpack.c.bf16 %v2475_v53, %v2474_v11 }
 0x267   :  { %4113 = vmatmul.mubr.bf16.gmra.mrb[80].mxu1 %v20090_v23  ;;  %v2023_v10 = vsel %vm1782_vm1, %v2020_v36, %v2022_v15  ;;  %v2028_v51 = vrot.slane %v1617_v1, 1  ;;  %v2024_v46 = vrot.slane %v1615_v4, 1  ;;  %v18064_v13 = vpop.f32.mrb[124].mxu0  ;;  %v20093_v23 = vld [vmem:[%s25434_s5 + $0x5e8] ss:$36 sps:$4 sm:$0xff]  }
 0x268   :  { %25577 = vst [vmem:[#allocation42_spill] sm:$0xff] %v22609_v33  ;;  %v22612_v32 = vmax.f32 %v1613_v52, %v2023_v10  ;;  %4120 = vmatprep.mubr.bf16.mxu1 %v20091_v43  ;;  %v1424_v63 = vadd.f32 %v22555_v49, %v18064_v13  ;;  %v1415_v7 = vpop.f32.mrb[125].mxu0 }
 0x269   :  { %v2029_v34 = vsel %vm1782_vm1, %v2026_v54, %v2028_v51  ;;  %v2025_v6 = vsel %vm1782_vm1, %v2022_v15, %v2024_v46  ;;  %v2027_v0 = vsel %vm1782_vm1, %v2024_v46, %v2026_v54  ;;  %v1416_v36 = vadd.f32 %v22555_v49, %v1415_v7  ;;  %v18065_v31 = vpop.f32.mrb[126].mxu0  ;;  %v20094_v15 = vld [vmem:[%s25434_s5 + $0x634] ss:$36 sps:$4 sm:$0xff]  }
 0x26a   :  { %25578 = vst [vmem:[#allocation43_spill] sm:$0xff] %v22612_v32  ;;  %v2338_v11 = vmax.f32 %v1616_v20, %v2029_v34  ;;  %v22622_v52 = vmax.f32 %v1614_v27, %v2025_v6  ;;  %v22624_v43 = vmax.f32 %v1615_v4, %v2027_v0  ;;  %v1620_v53 = vmax.f32 %v1424_v63, 0.0  ;;  %v1418_v10 = vpop.f32.mrb[127].mxu0 }
 0x26b   :  { %v1618_v13 = vmax.f32 %v1416_v36, 0.0  ;;  %v1427_v54 = vadd.f32 %v22555_v49, %v18065_v31  ;;  %v1419_v46 = vadd.f32 %v22555_v49, %v1418_v10 }
 0x26c   :  { %25579 = vst [vmem:[#allocation44_spill] sm:$0xff] %v22622_v52  ;;  %25580 = vst [vmem:[#allocation45_spill] sm:$0xff] %v22624_v43  ;;  %v2478_v33 = vmax.f32 %v2334_v37, %v22624_v43  ;;  %v2479_v7 = vmax.f32 %v22612_v32, %v2338_v11  ;;  %v2034_v20 = vrot.slane %v1620_v53, 1 }
 0x26d   :  { %v2030_v27 = vrot.slane %v1618_v13, 1  ;;  %v1621_v6 = vmax.f32 %v1427_v54, 0.0  ;;  %v1619_v4 = vmax.f32 %v1419_v46, 0.0 }
 0x26e   :  { %v22633_v34 = vpack.c.bf16 %v2479_v7, %v2478_v33 }
 0x26f   :  { %4121 = vmatmul.mubr.bf16.gmra.mrb[84].mxu1 %v20093_v23  ;;  %v2031_v63 = vsel %vm1782_vm1, %v2028_v51, %v2030_v27  ;;  %v2036_v0 = vrot.slane %v1621_v6, 1  ;;  %v2032_v52 = vrot.slane %v1619_v4, 1  ;;  %v18068_v36 = vpop.f32.mrb[128].mxu0  ;;  %v20096_v51 = vld [vmem:[%s25434_s5 + $0x630] ss:$36 sps:$4 sm:$0xff]  }
 0x270   :  { %25581 = vst [vmem:[#allocation46_spill] sm:$0xff] %v22633_v34  ;;  %v22636_v44 = vmax.f32 %v1617_v1, %v2031_v63  ;;  %v1440_v31 = vadd.f32 %v22555_v49, %v18068_v36  ;;  %v1431_v10 = vpop.f32.mrb[129].mxu0  ;;  %4128 = vmatprep.mubr.bf16.mxu1 %v20094_v15 }
 0x271   :  { %v2037_v37 = vsel %vm1782_vm1, %v2034_v20, %v2036_v0  ;;  %v2033_v43 = vsel %vm1782_vm1, %v2030_v27, %v2032_v52  ;;  %v2035_v54 = vsel %vm1782_vm1, %v2032_v52, %v2034_v20  ;;  %v1432_v33 = vadd.f32 %v22555_v49, %v1431_v10  ;;  %v18069_v23 = vpop.f32.mrb[130].mxu0  ;;  %v20097_v27 = vld [vmem:[%s25434_s5 + $0x67c] ss:$36 sps:$4 sm:$0xff]  }
 0x272   :  { %25582 = vst [vmem:[#allocation47_spill] sm:$0xff] %v22636_v44  ;;  %v2342_v46 = vmax.f32 %v1620_v53, %v2037_v37  ;;  %v22646_v1 = vmax.f32 %v1618_v13, %v2033_v43  ;;  %v22648_v7 = vmax.f32 %v1619_v4, %v2035_v54  ;;  %v1624_v63 = vmax.f32 %v1440_v31, 0.0  ;;  %v1434_v15 = vpop.f32.mrb[131].mxu0 }
 0x273   :  { %v1622_v36 = vmax.f32 %v1432_v33, 0.0  ;;  %v1443_v52 = vadd.f32 %v22555_v49, %v18069_v23  ;;  %v1435_v20 = vadd.f32 %v22555_v49, %v1434_v15 }
 0x274   :  { %25583 = vst [vmem:[#allocation48_spill] sm:$0xff] %v22646_v1  ;;  %25584 = vst [vmem:[#allocation49_spill] sm:$0xff] %v22648_v7  ;;  %v2482_v10 = vmax.f32 %v2338_v11, %v22648_v7  ;;  %v2483_v34 = vmax.f32 %v22636_v44, %v2342_v46  ;;  %v2042_v53 = vrot.slane %v1624_v63, 1  ;;  %v2428_v11 = vmax.f32 %v22306_v39, %v22322_v61 }
 0x275   :  { %v2038_v43 = vrot.slane %v1622_v36, 1  ;;  %v1625_v13 = vmax.f32 %v1443_v52, 0.0  ;;  %v1623_v4 = vmax.f32 %v1435_v20, 0.0  ;;  %v2429_v52 = vmax.f32 %v22308_v40, %v22335_v8  ;;  %v20102_v40 = vld [vmem:[%s25434_s5 + $0xc] ss:$36 sps:$4 sm:$0xff]  }
 0x276   :  { %v22657_v37 = vpack.c.bf16 %v2483_v34, %v2482_v10 }
 0x277   :  { %v2039_v31 = vsel %vm1782_vm1, %v2036_v0, %v2038_v43  ;;  %v2044_v54 = vrot.slane %v1625_v13, 1  ;;  %v2040_v1 = vrot.slane %v1623_v4, 1  ;;  %v18072_v32 = vpop.f32.mrb[132].mxu0  ;;  %4129 = vmatmul.mubr.bf16.gmra.mrb[88].mxu1 %v20096_v51 }
 0x278   :  { %25585 = vst [vmem:[#allocation50_spill] sm:$0xff] %v22657_v37  ;;  %v22660_v33 = vmax.f32 %v1621_v6, %v2039_v31  ;;  %v1456_v23 = vadd.f32 %v22555_v49, %v18072_v32  ;;  %v1447_v15 = vpop.f32.mrb[133].mxu0  ;;  %4136 = vmatprep.mubr.bf16.mxu1 %v20097_v27  ;;  %v20099_v32 = vld [vmem:[%s25434_s5 + $0x678] ss:$36 sps:$4 sm:$0xff]  }
 0x279   :  { %v2045_v34 = vsel %vm1782_vm1, %v2042_v53, %v2044_v54  ;;  %v2041_v0 = vsel %vm1782_vm1, %v2038_v43, %v2040_v1  ;;  %v2043_v20 = vsel %vm1782_vm1, %v2040_v1, %v2042_v53  ;;  %v1448_v51 = vadd.f32 %v22555_v49, %v1447_v15  ;;  %v18073_v6 = vpop.f32.mrb[134].mxu0 }
 0x27a   :  { %v2346_v27 = vmax.f32 %v1624_v63, %v2045_v34  ;;  %v2345_v10 = vmax.f32 %v1623_v4, %v2043_v20  ;;  %v1628_v31 = vmax.f32 %v1456_v23, 0.0  ;;  %v1459_v39 = vadd.f32 %v22555_v49, %v18073_v6  ;;  %v1450_v61 = vpop.f32.mrb[135].mxu0 }
 0x27b   :  { %v1626_v43 = vmax.f32 %v1448_v51, 0.0  ;;  %v1451_v1 = vadd.f32 %v22555_v49, %v1450_v61  ;;  %v22679_v53 = vmax.f32 %v1622_v36, %v2041_v0  ;;  %v22681_v15 = vpack.c.bf16 %v2429_v52, %v2428_v11 }
 0x27c   :  { %v2486_v37 = vmax.f32 %v2342_v46, %v2345_v10  ;;  %v2487_v7 = vmax.f32 %v22660_v33, %v2346_v27  ;;  %v2050_v63 = vrot.slane %v1628_v31, 1  ;;  %v1629_v4 = vmax.f32 %v1459_v39, 0.0 }
 0x27d   :  { %v2046_v23 = vrot.slane %v1626_v43, 1  ;;  %v1627_v34 = vmax.f32 %v1451_v1, 0.0  ;;  %v2432_v0 = vmax.f32 %v22335_v8, %v22346_v30 }
 0x27e   :  { %v22684_v20 = vpack.c.bf16 %v2487_v7, %v2486_v37  ;;  %v2052_v6 = vrot.slane %v1629_v4, 1 }
 0x27f   :  { %v2047_v44 = vsel %vm1782_vm1, %v2044_v54, %v2046_v23  ;;  %v2048_v50 = vrot.slane %v1627_v34, 1  ;;  %v18076_v51 = vpop.f32.mrb[136].mxu0  ;;  %4137 = vmatmul.mubr.bf16.gmra.mrb[92].mxu1 %v20099_v32  ;;  %v20100_v32 = vld [vmem:[%s25434_s5 + $0x8] ss:$36 sps:$4 sm:$0xff]  }
 0x280   :  { %25586 = vst [vmem:[#allocation51_spill] sm:$0xff] %v22684_v20  ;;  %v2053_v36 = vsel %vm1782_vm1, %v2050_v63, %v2052_v6  ;;  %v1472_v11 = vadd.f32 %v22555_v49, %v18076_v51  ;;  %v1463_v52 = vpop.f32.mrb[137].mxu0  ;;  %4177 = vmatprep.mubr.bf16.mxu1 %v20102_v40  ;;  %v2347_v46 = vmax.f32 %v1625_v13, %v2047_v44 }
 0x281   :  { %v2049_v39 = vsel %vm1782_vm1, %v2046_v23, %v2048_v50  ;;  %v2051_v7 = vsel %vm1782_vm1, %v2048_v50, %v2050_v63  ;;  %v1464_v37 = vadd.f32 %v22555_v49, %v1463_v52  ;;  %v18077_v54 = vpop.f32.mrb[138].mxu0  ;;  %v22694_v61 = vmax.f32 %v1628_v31, %v2053_v36 }
 0x282   :  { %v22699_v1 = vmax.f32 %v1627_v34, %v2051_v7  ;;  %v1632_v40 = vmax.f32 %v1472_v11, 0.0  ;;  %v22702_v44 = vadd.f32 %v22555_v49, %v18077_v54  ;;  %v1466_v8 = vpop.f32.mrb[139].mxu0  ;;  %v2348_v30 = vmax.f32 %v1626_v43, %v2049_v39 }
 0x283   :  { %v1630_v13 = vmax.f32 %v1464_v37, 0.0  ;;  %v1467_v50 = vadd.f32 %v22555_v49, %v1466_v8  ;;  %v2488_v63 = vmax.f32 %v22679_v53, %v2347_v46  ;;  %v2491_v31 = vmax.f32 %v2347_v46, %v22694_v61 }
 0x284   :  { %v2490_v23 = vmax.f32 %v2346_v27, %v22699_v1  ;;  %v2058_v51 = vrot.slane %v1632_v40, 1  ;;  %v1633_v36 = vmax.f32 %v22702_v44, 0.0  ;;  %v2489_v34 = vmax.f32 %v2345_v10, %v2348_v30  ;;  %v20103_v27 = vld [vmem:[%s25434_s5 + $0x54] ss:$36 sps:$4 sm:$0xff]  }
 0x285   :  { %v2054_v52 = vrot.slane %v1630_v13, 1  ;;  %v1631_v11 = vmax.f32 %v1467_v50, 0.0  ;;  %v2433_v7 = vmax.f32 %v22337_v9, %v22359_v45 }
 0x286   :  { %v2060_v54 = vrot.slane %v1633_v36, 1  ;;  %v2808_v43 = vpack.c.bf16 %v2489_v34, %v2488_v63  ;;  %v2809_v39 = vpack.c.bf16 %v2491_v31, %v2490_v23 }
 0x287   :  { %v2055_v37 = vsel %vm1782_vm1, %v2052_v6, %v2054_v52  ;;  %v2056_v8 = vrot.slane %v1631_v11, 1  ;;  %v18080_v20 = vpop.f32.mrb[140].mxu0  ;;  %4178 = vmatmul.mubr.bf16.vlgmr.msra.gmra.mrb[0].mxu1 %v20100_v32  ;;  %v22715_v46 = vpack.c.bf16 %v2433_v7, %v2432_v0  ;;  %v20105_v0 = vld [vmem:[%s25434_s5 + $0x50] ss:$36 sps:$4 sm:$0xff]  }
 0x288   :  { %v2061_v10 = vsel %vm1782_vm1, %v2058_v51, %v2060_v54  ;;  %v1488_v44 = vadd.f32 %v22555_v49, %v18080_v20  ;;  %4371 = vmatpush1.bf16.msra.mxu1 %v22319_v56  ;;  %v1479_v9 = vpop.f32.mrb[141].mxu0  ;;  %18082 = vmatprep.subr.bf16.mxu0 %v2808_v43  ;;  %v2351_v50 = vmax.f32 %v1629_v4, %v2055_v37  ;;  %v25587_v4 = vmov 0  }
 0x289   :  { %v2057_v6 = vsel %vm1782_vm1, %v2054_v52, %v2056_v8  ;;  %v2059_v63 = vsel %vm1782_vm1, %v2056_v8, %v2058_v51  ;;  %v1480_v32 = vadd.f32 %v22555_v49, %v1479_v9  ;;  %v18081_v31 = vpop.f32.mrb[142].mxu0  ;;  %18083 = vmatpush3.bf16.msra.mxu0 %v2808_v43  ;;  %v22723_v23 = vmax.f32 %v1632_v40, %v2061_v10  ;;  %v20106_v51 = vld [vmem:[%s25434_s5 + $0x9c] ss:$36 sps:$4 sm:$0xff]  }
 0x28a   :  { %v2353_v20 = vmax.f32 %v1631_v11, %v2059_v63  ;;  %v1636_v34 = vmax.f32 %v1488_v44, 0.0  ;;  %v1491_v56 = vadd.f32 %v22555_v49, %v18081_v31  ;;  %v1482_v7 = vpop.f32.mrb[143].mxu0  ;;  %4372 = vmatprep.subr.bf16.mxu1 %v25587_v4  ;;  %18084 = vmatprep.subr.bf16.mxu0 %v2809_v39  ;;  %v2352_v52 = vmax.f32 %v1630_v13, %v2057_v6 }
 0x28b   :  { %v1634_v43 = vmax.f32 %v1480_v32, 0.0  ;;  %v1483_v40 = vadd.f32 %v22555_v49, %v1482_v7  ;;  %4185 = vmatprep.mubr.bf16.mxu1 %v20103_v27  ;;  %v2492_v37 = vmax.f32 %v2348_v30, %v2351_v50  ;;  %v2495_v8 = vmax.f32 %v2351_v50, %v22723_v23 }
 0x28c   :  { %v2494_v11 = vmax.f32 %v22694_v61, %v2353_v20  ;;  %v2066_v10 = vrot.slane %v1636_v34, 1  ;;  %v1637_v44 = vmax.f32 %v1491_v56, 0.0  ;;  %4373 = vmatpush1.bf16.msra.mxu1 %v22317_v55  ;;  %v2493_v9 = vmax.f32 %v22699_v1, %v2352_v52 }
 0x28d   :  { %v2062_v13 = vrot.slane %v1634_v43, 1  ;;  %v1635_v6 = vmax.f32 %v1483_v40, 0.0  ;;  %18085 = vmatpush3.bf16.msra.mxu0 %v2809_v39  ;;  %4374 = vmatprep.subr.bf16.mxu1 %v25587_v4  ;;  %v2436_v49 = vmax.f32 %v22359_v45, %v22370_v2  ;;  %v2437_v30 = vmax.f32 %v22361_v47, %v22383_v16 }
 0x28e   :  { %v2068_v27 = vrot.slane %v1637_v44, 1  ;;  %v2810_v50 = vpack.c.bf16 %v2493_v9, %v2492_v37  ;;  %v2811_v61 = vpack.c.bf16 %v2495_v8, %v2494_v11 }
 0x28f   :  { %v2063_v63 = vsel %vm1782_vm1, %v2060_v54, %v2062_v13  ;;  %v2064_v32 = vrot.slane %v1635_v6, 1  ;;  %4186 = vmatmul.mubr.bf16.gmra.mrb[4].mxu1 %v20105_v0  ;;  %v2782_v55 = vpack.c.bf16 %v2437_v30, %v2436_v49  ;;  %v20108_v54 = vld [vmem:[%s25434_s5 + $0x98] ss:$36 sps:$4 sm:$0xff]   ;;  %v20123_v49 = vld [vmem:[%s25434_s5 + $0x200] ss:$36 sps:$4 sm:$0xff]   ;;  %v25590_v30 = vld [vmem:[#allocation23_spill] sm:$0xff] }
 0x290   :  { %v2069_v1 = vsel %vm1782_vm1, %v2066_v10, %v2068_v27  ;;  %v2215_v39 = vsel %vm1782_vm1, %v2068_v27, %v21984_v12  ;;  %18086 = vmatprep.subr.bf16.mxu0 %v2810_v50  ;;  %4193 = vmatprep.mubr.bf16.mxu1 %v20106_v51  ;;  %v2355_v31 = vmax.f32 %v1633_v36, %v2063_v63  ;;  %v20109_v12 = vld [vmem:[%s25434_s5 + $0xe4] ss:$36 sps:$4 sm:$0xff]   ;;  %v25591_v27 = vld [vmem:[#allocation25_spill] sm:$0xff] }
 0x291   :  { %v2359_v45 = vmax.f32 %v1637_v44, %v2215_v39  ;;  %v2065_v2 = vsel %vm1782_vm1, %v2062_v13, %v2064_v32  ;;  %v2067_v47 = vsel %vm1782_vm1, %v2064_v32, %v2066_v10  ;;  %18087 = vmatpush3.bf16.msra.mxu0 %v2810_v50  ;;  %v2358_v0 = vmax.f32 %v1636_v34, %v2069_v1  ;;  %v20129_v50 = vld [vmem:[%s25434_s5 + $0x290] ss:$36 sps:$4 sm:$0xff]   ;;  %v20132_v63 = vld [vmem:[%s25434_s5 + $0x2d8] ss:$36 sps:$4 sm:$0xff]   ;;  %v20133_v32 = vld [vmem:[%s25434_s5 + $0x324] ss:$36 sps:$4 sm:$0xff]  }
 0x292   :  { %v2357_v56 = vmax.f32 %v1635_v6, %v2067_v47  ;;  %18088 = vmatprep.subr.bf16.mxu0 %v2811_v61  ;;  %v2356_v7 = vmax.f32 %v1634_v43, %v2065_v2  ;;  %v2496_v40 = vmax.f32 %v2352_v52, %v2355_v31  ;;  %4375 = vmatpush1.bf16.msra.mxu1 %v22681_v15  ;;  %v20136_v1 = vld [vmem:[%s25434_s5 + $0x36c] ss:$36 sps:$4 sm:$0xff]   ;;  %v20142_v2 = vld [vmem:[%s25434_s5 + $0x3fc] ss:$36 sps:$4 sm:$0xff]  }
 0x293   :  { %v2503_v36 = vmax.f32 %v2359_v45, %v21998_v24  ;;  %v2499_v51 = vmax.f32 %v2355_v31, %v2358_v0  ;;  %v2502_v37 = vmax.f32 %v2358_v0, %v22003_v29  ;;  %4376 = vmatprep.subr.bf16.mxu1 %v25587_v4  ;;  %v2440_v34 = vmax.f32 %v22383_v16, %v22394_v42  ;;  %v20138_v39 = vld [vmem:[%s25434_s5 + $0x368] ss:$36 sps:$4 sm:$0xff]   ;;  %v20139_v31 = vld [vmem:[%s25434_s5 + $0x3b4] ss:$36 sps:$4 sm:$0xff]   ;;  %v20147_v0 = vld [vmem:[%s25434_s5 + $0x440] ss:$36 sps:$4 sm:$0xff]  }
 0x294   :  { %v2498_v8 = vmax.f32 %v22723_v23, %v2357_v56  ;;  %v2501_v52 = vmax.f32 %v2357_v56, %v22001_v28  ;;  %v2497_v43 = vmax.f32 %v2353_v20, %v2356_v7  ;;  %v2500_v11 = vmax.f32 %v2356_v7, %v2359_v45  ;;  %v20118_v23 = vld [vmem:[%s25434_s5 + $0x1bc] ss:$36 sps:$4 sm:$0xff]   ;;  %v25589_v20 = vld [vmem:[#allocation24_spill] sm:$0xff]  ;;  %v20148_v56 = vld [vmem:[%s25434_s5 + $0x48c] ss:$36 sps:$4 sm:$0xff]  }
 0x295   :  { %18089 = vmatpush3.bf16.msra.mxu0 %v2811_v61  ;;  %v2815_v10 = vpack.c.bf16 %v2503_v36, %v2502_v37  ;;  %v2441_v15 = vmax.f32 %v22385_v17, %v22407_v59  ;;  %v2444_v28 = vmax.f32 %v22407_v59, %v22418_v21  ;;  %v2445_v16 = vmax.f32 %v22409_v58, %v22431_v38  ;;  %v20111_v17 = vld [vmem:[%s25434_s5 + $0xe0] ss:$36 sps:$4 sm:$0xff]   ;;  %v20114_v21 = vld [vmem:[%s25434_s5 + $0x128] ss:$36 sps:$4 sm:$0xff]   ;;  %v20141_v45 = vld [vmem:[%s25434_s5 + $0x3b0] ss:$36 sps:$4 sm:$0xff]  }
 0x296   :  { %v2812_v24 = vpack.c.bf16 %v2497_v43, %v2496_v40  ;;  %v2813_v44 = vpack.c.bf16 %v2499_v51, %v2498_v8  ;;  %v2814_v9 = vpack.c.bf16 %v2501_v52, %v2500_v11  ;;  %4377 = vmatpush1.bf16.msra.mxu1 %v22343_v22  ;;  %v20112_v22 = vld [vmem:[%s25434_s5 + $0x12c] ss:$36 sps:$4 sm:$0xff]   ;;  %v2448_v59 = vmax.f32 %v22431_v38, %v22442_v3  ;;  %v20130_v61 = vld [vmem:[%s25434_s5 + $0x2dc] ss:$36 sps:$4 sm:$0xff]   ;;  %v20151_v40 = vld [vmem:[%s25434_s5 + $0x4d4] ss:$36 sps:$4 sm:$0xff]  }
 0x297   :  { %4194 = vmatmul.mubr.bf16.gmra.mrb[8].mxu1 %v20108_v54  ;;  %4378 = vmatprep.subr.bf16.mxu1 %v25587_v4  ;;  %v2784_v29 = vpack.c.bf16 %v2441_v15, %v2440_v34  ;;  %v2786_v42 = vpack.c.bf16 %v2445_v16, %v2444_v28  ;;  %v2449_v58 = vmax.f32 %v22433_v41, %v22455_v25  ;;  %v20117_v3 = vld [vmem:[%s25434_s5 + $0x170] ss:$36 sps:$4 sm:$0xff]   ;;  %v20144_v47 = vld [vmem:[%s25434_s5 + $0x3f8] ss:$36 sps:$4 sm:$0xff]   ;;  %v20145_v54 = vld [vmem:[%s25434_s5 + $0x444] ss:$36 sps:$4 sm:$0xff]  }
 0x298   :  { %18090 = vmatprep.subr.bf16.mxu0 %v2812_v24  ;;  %4201 = vmatprep.mubr.bf16.mxu1 %v20109_v12  ;;  %v2452_v38 = vmax.f32 %v22455_v25, %v22466_v5  ;;  %v2453_v41 = vmax.f32 %v22457_v26, %v22479_v18  ;;  %v20120_v25 = vld [vmem:[%s25434_s5 + $0x1b8] ss:$36 sps:$4 sm:$0xff]   ;;  %v20121_v26 = vld [vmem:[%s25434_s5 + $0x204] ss:$36 sps:$4 sm:$0xff]   ;;  %v25592_v36 = vld [vmem:[#allocation27_spill] sm:$0xff] }
 0x299   :  { %18091 = vmatpush3.bf16.msra.mxu0 %v2812_v24  ;;  %v25588_v5 = vld [vmem:[#allocation26_spill] sm:$0xff]  ;;  %v2461_v51 = vmax.f32 %v25592_v36, %v22527_v48  ;;  %v20153_v34 = vld [vmem:[%s25434_s5 + $0x4d0] ss:$36 sps:$4 sm:$0xff]   ;;  %v20154_v8 = vld [vmem:[%s25434_s5 + $0x51c] ss:$36 sps:$4 sm:$0xff]  }
 0x29a   :  { %18092 = vmatprep.subr.bf16.mxu0 %v2813_v44  ;;  %4379 = vmatpush1.bf16.msra.mxu1 %v22715_v46  ;;  %v2788_v46 = vpack.c.bf16 %v2449_v58, %v2448_v59  ;;  %v2457_v13 = vmax.f32 %v25589_v20, %v25588_v5  ;;  %v20150_v7 = vld [vmem:[%s25434_s5 + $0x488] ss:$36 sps:$4 sm:$0xff]   ;;  %v2460_v12 = vmax.f32 %v25588_v5, %v22514_v19  ;;  %v25594_v11 = vld [vmem:[#allocation32_spill] sm:$0xff]  ;;  %v25598_v16 = vld [vmem:[#allocation33_spill] sm:$0xff] }
 0x29b   :  { %4380 = vmatprep.subr.bf16.mxu1 %v25587_v4  ;;  %v25593_v52 = vld [vmem:[#allocation31_spill] sm:$0xff]  ;;  %v20156_v24 = vld [vmem:[%s25434_s5 + $0x518] ss:$36 sps:$4 sm:$0xff]  }
 0x29c   :  { %v2794_v37 = vpack.c.bf16 %v2461_v51, %v2460_v12  ;;  %v2464_v43 = vmax.f32 %v22527_v48, %v25593_v52  ;;  %v25597_v28 = vld [vmem:[#allocation36_spill] sm:$0xff]  ;;  %v25599_v59 = vld [vmem:[#allocation39_spill] sm:$0xff]  ;;  %v20187_v36 = vld [vmem:[%s25434_s5 + $0x17c] ss:$36 sps:$4 sm:$0xff]  }
 0x29d   :  { %18093 = vmatpush3.bf16.msra.mxu0 %v2813_v44  ;;  %v20157_v44 = vld [vmem:[%s25434_s5 + $0x564] ss:$36 sps:$4 sm:$0xff]   ;;  %v2469_v48 = vmax.f32 %v25598_v16, %v25597_v28  ;;  %v2472_v58 = vmax.f32 %v25597_v28, %v25599_v59  ;;  %v20165_v20 = vld [vmem:[%s25434_s5 + $0x5f0] ss:$36 sps:$4 sm:$0xff]   ;;  %v20201_v16 = vld [vmem:[%s25434_s5 + $0x298] ss:$36 sps:$4 sm:$0xff]  }
 0x29e   :  { %18094 = vmatprep.subr.bf16.mxu0 %v2814_v9  ;;  %4381 = vmatpush1.bf16.msra.mxu1 %v22367_v60  ;;  %v20115_v60 = vld [vmem:[%s25434_s5 + $0x174] ss:$36 sps:$4 sm:$0xff]   ;;  %v25612_v51 = vld [vmem:[#allocation38_spill] sm:$0xff]  ;;  %v25616_v28 = vld [vmem:[#allocation51_spill] sm:$0xff] }
 0x29f   :  { %4202 = vmatmul.mubr.bf16.gmra.mrb[12].mxu1 %v20111_v17  ;;  %4382 = vmatprep.subr.bf16.mxu1 %v25587_v4  ;;  %v20186_v12 = vld [vmem:[%s25434_s5 + $0x130] ss:$36 sps:$4 sm:$0xff]   ;;  %v20192_v52 = vld [vmem:[%s25434_s5 + $0x1c0] ss:$36 sps:$4 sm:$0xff]  }
 0x2a0   :  { %4209 = vmatprep.mubr.bf16.mxu1 %v20112_v22  ;;  %v20159_v22 = vld [vmem:[%s25434_s5 + $0x560] ss:$36 sps:$4 sm:$0xff]   ;;  %v20205_v59 = vld [vmem:[%s25434_s5 + $0x32c] ss:$36 sps:$4 sm:$0xff]  }
 0x2a1   :  { %18095 = vmatpush3.bf16.msra.mxu0 %v2814_v9  ;;  %v25596_v9 = vld [vmem:[#allocation35_spill] sm:$0xff] }
 0x2a2   :  { %18096 = vmatprep.subr.bf16.mxu0 %v2815_v10  ;;  %4383 = vmatpush1.bf16.msra.mxu1 %v2782_v55  ;;  %v20135_v55 = vld [vmem:[%s25434_s5 + $0x320] ss:$36 sps:$4 sm:$0xff]  }
 0x2a3   :  { %4384 = vmatprep.subr.bf16.mxu1 %v25587_v4 }
 0x2a5   :  { %18097 = vmatpush3.bf16.msra.mxu0 %v2815_v10  ;;  %v25595_v10 = vld [vmem:[#allocation29_spill] sm:$0xff] }
 0x2a6   :  { %4385 = vmatpush1.bf16.msra.mxu1 %v22391_v35  ;;  %v2790_v35 = vpack.c.bf16 %v2453_v41, %v2452_v38  ;;  %v2465_v19 = vmax.f32 %v25595_v10, %v25594_v11  ;;  %v20162_v41 = vld [vmem:[%s25434_s5 + $0x5a8] ss:$36 sps:$4 sm:$0xff]  }
 0x2a7   :  { %4210 = vmatmul.mubr.bf16.gmra.mrb[16].mxu1 %v20114_v21  ;;  %4386 = vmatprep.subr.bf16.mxu1 %v25587_v4  ;;  %v25600_v21 = vld [vmem:[#allocation40_spill] sm:$0xff]  ;;  %v20195_v10 = vld [vmem:[%s25434_s5 + $0x208] ss:$36 sps:$4 sm:$0xff]  }
 0x2a8   :  { %4217 = vmatprep.mubr.bf16.mxu1 %v20115_v60  ;;  %v2796_v15 = vpack.c.bf16 %v2465_v19, %v2464_v43  ;;  %v25601_v60 = vld [vmem:[#allocation37_spill] sm:$0xff]  ;;  %v20193_v43 = vld [vmem:[%s25434_s5 + $0x20c] ss:$36 sps:$4 sm:$0xff]   ;;  %v20196_v19 = vld [vmem:[%s25434_s5 + $0x254] ss:$36 sps:$4 sm:$0xff]  }
 0x2aa   :  { %4387 = vmatpush1.bf16.msra.mxu1 %v2784_v29  ;;  %v2468_v29 = vmax.f32 %v25594_v11, %v25596_v9  ;;  %v25614_v11 = vld [vmem:[#allocation46_spill] sm:$0xff]  ;;  %v20198_v9 = vld [vmem:[%s25434_s5 + $0x250] ss:$36 sps:$4 sm:$0xff]  }
 0x2ab   :  { %4388 = vmatprep.subr.bf16.mxu1 %v25587_v4 }
 0x2ac   :  { %v2798_v17 = vpack.c.bf16 %v2469_v48, %v2468_v29  ;;  %v20199_v29 = vld [vmem:[%s25434_s5 + $0x29c] ss:$36 sps:$4 sm:$0xff]   ;;  %v20202_v48 = vld [vmem:[%s25434_s5 + $0x2e4] ss:$36 sps:$4 sm:$0xff]  }
 0x2ae   :  { %4389 = vmatpush1.bf16.msra.mxu1 %v22415_v14  ;;  %v2456_v14 = vmax.f32 %v22479_v18, %v22490_v57  ;;  %v20126_v18 = vld [vmem:[%s25434_s5 + $0x248] ss:$36 sps:$4 sm:$0xff]   ;;  %v20127_v57 = vld [vmem:[%s25434_s5 + $0x294] ss:$36 sps:$4 sm:$0xff]  }
 0x2af   :  { %4218 = vmatmul.mubr.bf16.gmra.mrb[20].mxu1 %v20117_v3  ;;  %4390 = vmatprep.subr.bf16.mxu1 %v25587_v4  ;;  %v20163_v3 = vld [vmem:[%s25434_s5 + $0x5f4] ss:$36 sps:$4 sm:$0xff]  }
 0x2b0   :  { %4225 = vmatprep.mubr.bf16.mxu1 %v20118_v23  ;;  %v22820_v6 = vpack.c.bf16 %v2457_v13, %v2456_v14  ;;  %v25602_v23 = vld [vmem:[#allocation43_spill] sm:$0xff]  ;;  %v20166_v13 = vld [vmem:[%s25434_s5 + $0x63c] ss:$36 sps:$4 sm:$0xff]  }
 0x2b2   :  { %4391 = vmatpush1.bf16.msra.mxu1 %v2786_v42  ;;  %v20160_v42 = vld [vmem:[%s25434_s5 + $0x5ac] ss:$36 sps:$4 sm:$0xff]  }
 0x2b3   :  { %4392 = vmatprep.subr.bf16.mxu1 %v25587_v4 }
 0x2b6   :  { %4393 = vmatpush1.bf16.msra.mxu1 %v22439_v62  ;;  %v20124_v62 = vld [vmem:[%s25434_s5 + $0x24c] ss:$36 sps:$4 sm:$0xff]  }
 0x2b7   :  { %4226 = vmatmul.mubr.bf16.gmra.mrb[24].mxu1 %v20120_v25  ;;  %4394 = vmatprep.subr.bf16.mxu1 %v25587_v4  ;;  %v25603_v25 = vld [vmem:[#allocation44_spill] sm:$0xff] }
 0x2b8   :  { %4233 = vmatprep.mubr.bf16.mxu1 %v20121_v26  ;;  %v25604_v26 = vld [vmem:[#allocation41_spill] sm:$0xff] }
 0x2b9   :  { %v2477_v14 = vmax.f32 %v25604_v26, %v25603_v25  ;;  %v20216_v26 = vld [vmem:[%s25434_s5 + $0x400] ss:$36 sps:$4 sm:$0xff]  }
 0x2ba   :  { %4395 = vmatpush1.bf16.msra.mxu1 %v2788_v46  ;;  %v2473_v46 = vmax.f32 %v25601_v60, %v25600_v21  ;;  %v20260_v60 = vld [vmem:[%s25434_s5 + $0x140] ss:$36 sps:$4 sm:$0xff]  }
 0x2bb   :  { %4396 = vmatprep.subr.bf16.mxu1 %v25587_v4 }
 0x2bc   :  { %v2800_v38 = vpack.c.bf16 %v2473_v46, %v2472_v58  ;;  %v20207_v58 = vld [vmem:[%s25434_s5 + $0x328] ss:$36 sps:$4 sm:$0xff]  }
 0x2bd   :  { %v20263_v46 = vld [vmem:[%s25434_s5 + $0x188] ss:$36 sps:$4 sm:$0xff]  }
 0x2be   :  { %4397 = vmatpush1.bf16.msra.mxu1 %v25590_v30  ;;  %v25606_v30 = vld [vmem:[#allocation48_spill] sm:$0xff] }
 0x2bf   :  { %4234 = vmatmul.mubr.bf16.gmra.mrb[28].mxu1 %v20123_v49  ;;  %4398 = vmatprep.subr.bf16.mxu1 %v25587_v4  ;;  %v25605_v49 = vld [vmem:[#allocation47_spill] sm:$0xff] }
 0x2c0   :  { %4241 = vmatprep.mubr.bf16.mxu1 %v20124_v62  ;;  %v2480_v62 = vmax.f32 %v25603_v25, %v25605_v49  ;;  %v20271_v25 = vld [vmem:[%s25434_s5 + $0x218] ss:$36 sps:$4 sm:$0xff]   ;;  %v20279_v49 = vld [vmem:[%s25434_s5 + $0x2a8] ss:$36 sps:$4 sm:$0xff]  }
 0x2c2   :  { %4399 = vmatpush1.bf16.msra.mxu1 %v2790_v35  ;;  %v2476_v35 = vmax.f32 %v25600_v21, %v25602_v23  ;;  %v20208_v21 = vld [vmem:[%s25434_s5 + $0x374] ss:$36 sps:$4 sm:$0xff]   ;;  %v20214_v23 = vld [vmem:[%s25434_s5 + $0x404] ss:$36 sps:$4 sm:$0xff]  }
 0x2c3   :  { %4400 = vmatprep.subr.bf16.mxu1 %v25587_v4 }
 0x2c4   :  { %v2802_v5 = vpack.c.bf16 %v2477_v14, %v2476_v35  ;;  %v20268_v35 = vld [vmem:[%s25434_s5 + $0x1d0] ss:$36 sps:$4 sm:$0xff]  }
 0x2c5   :  { %v20217_v14 = vld [vmem:[%s25434_s5 + $0x44c] ss:$36 sps:$4 sm:$0xff]  }
 0x2c6   :  { %4401 = vmatpush1.bf16.msra.mxu1 %v25591_v27 }
 0x2c7   :  { %4242 = vmatmul.mubr.bf16.gmra.mrb[32].mxu1 %v20126_v18  ;;  %4595 = vmatprep.subr.bf16.mxu1 %v25587_v4  ;;  %v25607_v18 = vld [vmem:[#allocation45_spill] sm:$0xff] }
 0x2c8   :  { %4249 = vmatprep.mubr.bf16.mxu1 %v20127_v57  ;;  %v2481_v57 = vmax.f32 %v25607_v18, %v25606_v30  ;;  %v20225_v18 = vld [vmem:[%s25434_s5 + $0x4d8] ss:$36 sps:$4 sm:$0xff]  }
 0x2ca   :  { %v22942_v27 = vpack.c.bf16 %v2481_v57, %v2480_v62  ;;  %v20222_v62 = vld [vmem:[%s25434_s5 + $0x490] ss:$36 sps:$4 sm:$0xff]   ;;  %v20226_v57 = vld [vmem:[%s25434_s5 + $0x524] ss:$36 sps:$4 sm:$0xff]  }
 0x2cf   :  { %4250 = vmatmul.mubr.bf16.gmra.mrb[36].mxu1 %v20129_v50  ;;  %v20168_v50 = vld [vmem:[%s25434_s5 + $0x638] ss:$36 sps:$4 sm:$0xff]  }
 0x2d0   :  { %4257 = vmatprep.mubr.bf16.mxu1 %v20130_v61  ;;  %v20169_v61 = vld [vmem:[%s25434_s5 + $0x684] ss:$36 sps:$4 sm:$0xff]  }
 0x2d7   :  { %4258 = vmatmul.mubr.bf16.gmra.mrb[40].mxu1 %v20132_v63  ;;  %v2484_v63 = vmax.f32 %v25606_v30, %v22660_v33  ;;  %v20172_v33 = vld [vmem:[%s25434_s5 + $0x10] ss:$36 sps:$4 sm:$0xff]   ;;  %v20223_v30 = vld [vmem:[%s25434_s5 + $0x4dc] ss:$36 sps:$4 sm:$0xff]  }
 0x2d8   :  { %4265 = vmatprep.mubr.bf16.mxu1 %v20133_v32  ;;  %v25608_v32 = vld [vmem:[#allocation49_spill] sm:$0xff] }
 0x2df   :  { %4266 = vmatmul.mubr.bf16.gmra.mrb[44].mxu1 %v20135_v55  ;;  %v2485_v55 = vmax.f32 %v25608_v32, %v22679_v53  ;;  %v20175_v53 = vld [vmem:[%s25434_s5 + $0x5c] ss:$36 sps:$4 sm:$0xff]   ;;  %v20231_v32 = vld [vmem:[%s25434_s5 + $0x568] ss:$36 sps:$4 sm:$0xff]  }
 0x2e0   :  { %4273 = vmatprep.mubr.bf16.mxu1 %v20136_v1 }
 0x2e1   :  { %v22954_v1 = vpack.c.bf16 %v2485_v55, %v2484_v63  ;;  %v20229_v63 = vld [vmem:[%s25434_s5 + $0x56c] ss:$36 sps:$4 sm:$0xff]   ;;  %v20232_v55 = vld [vmem:[%s25434_s5 + $0x5b4] ss:$36 sps:$4 sm:$0xff]  }
 0x2e7   :  { %4274 = vmatmul.mubr.bf16.gmra.mrb[48].mxu1 %v20138_v39  ;;  %v20171_v39 = vld [vmem:[%s25434_s5 + $0x680] ss:$36 sps:$4 sm:$0xff]  }
 0x2e8   :  { %4281 = vmatprep.mubr.bf16.mxu1 %v20139_v31  ;;  %v20174_v31 = vld [vmem:[%s25434_s5 + $0x14] ss:$36 sps:$4 sm:$0xff]  }
 0x2ef   :  { %4282 = vmatmul.mubr.bf16.gmra.mrb[52].mxu1 %v20141_v45  ;;  %v20177_v45 = vld [vmem:[%s25434_s5 + $0x58] ss:$36 sps:$4 sm:$0xff]  }
 0x2f0   :  { %4289 = vmatprep.mubr.bf16.mxu1 %v20142_v2  ;;  %v25609_v2 = vld [vmem:[#allocation28_spill] sm:$0xff] }
 0x2f7   :  { %4290 = vmatmul.mubr.bf16.gmra.mrb[56].mxu1 %v20144_v47  ;;  %v20178_v47 = vld [vmem:[%s25434_s5 + $0xa4] ss:$36 sps:$4 sm:$0xff]  }
 0x2f8   :  { %4297 = vmatprep.mubr.bf16.mxu1 %v20145_v54  ;;  %v20181_v54 = vld [vmem:[%s25434_s5 + $0xec] ss:$36 sps:$4 sm:$0xff]  }
 0x2ff   :  { %4298 = vmatmul.mubr.bf16.gmra.mrb[60].mxu1 %v20147_v0  ;;  %v25610_v0 = vld [vmem:[#allocation30_spill] sm:$0xff] }
 0x300   :  { %4305 = vmatprep.mubr.bf16.mxu1 %v20148_v56  ;;  %v20183_v56 = vld [vmem:[%s25434_s5 + $0xe8] ss:$36 sps:$4 sm:$0xff]  }
 0x307   :  { %4306 = vmatmul.mubr.bf16.gmra.mrb[64].mxu1 %v20150_v7  ;;  %v20184_v7 = vld [vmem:[%s25434_s5 + $0x134] ss:$36 sps:$4 sm:$0xff]  }
 0x308   :  { %4313 = vmatprep.mubr.bf16.mxu1 %v20151_v40  ;;  %v25611_v40 = vld [vmem:[#allocation34_spill] sm:$0xff] }
 0x30f   :  { %4314 = vmatmul.mubr.bf16.gmra.mrb[68].mxu1 %v20153_v34  ;;  %v20190_v34 = vld [vmem:[%s25434_s5 + $0x1c4] ss:$36 sps:$4 sm:$0xff]  }
 0x310   :  { %4321 = vmatprep.mubr.bf16.mxu1 %v20154_v8  ;;  %v25613_v8 = vld [vmem:[#allocation42_spill] sm:$0xff] }
 0x317   :  { %4322 = vmatmul.mubr.bf16.gmra.mrb[72].mxu1 %v20156_v24  ;;  %v20244_v24 = vld [vmem:[%s25434_s5 + $0x20] ss:$36 sps:$4 sm:$0xff]  }
 0x318   :  { %4329 = vmatprep.mubr.bf16.mxu1 %v20157_v44  ;;  %v20248_v44 = vld [vmem:[%s25434_s5 + $0x68] ss:$36 sps:$4 sm:$0xff]   ;;  %18098 = vmatprep.mubr.bf16.mxu0 %v20244_v24  ;;  %v20264_v24 = vld [vmem:[%s25434_s5 + $0x138] ss:$36 sps:$4 sm:$0xff]  }
 0x319   :  { %18099 = vmatmul.mubr.bf16.vlgmr.msra.gmra.mrb[144].mxu0 %v20248_v44  ;;  %v20265_v44 = vld [vmem:[%s25434_s5 + $0x184] ss:$36 sps:$4 sm:$0xff]  }
 0x31f   :  { %4330 = vmatmul.mubr.bf16.gmra.mrb[76].mxu1 %v20159_v22  ;;  %v20255_v22 = vld [vmem:[%s25434_s5 + $0xf8] ss:$36 sps:$4 sm:$0xff]  }
 0x320   :  { %4337 = vmatprep.mubr.bf16.mxu1 %v20160_v42  ;;  %v20204_v42 = vld [vmem:[%s25434_s5 + $0x2e0] ss:$36 sps:$4 sm:$0xff]  }
 0x327   :  { %4338 = vmatmul.mubr.bf16.gmra.mrb[80].mxu1 %v20162_v41  ;;  %v20211_v41 = vld [vmem:[%s25434_s5 + $0x3bc] ss:$36 sps:$4 sm:$0xff]  }
 0x328   :  { %4345 = vmatprep.mubr.bf16.mxu1 %v20163_v3  ;;  %v20213_v3 = vld [vmem:[%s25434_s5 + $0x3b8] ss:$36 sps:$4 sm:$0xff]  }
 0x32f   :  { %4346 = vmatmul.mubr.bf16.gmra.mrb[84].mxu1 %v20165_v20  ;;  %v20220_v20 = vld [vmem:[%s25434_s5 + $0x494] ss:$36 sps:$4 sm:$0xff]  }
 0x330   :  { %4353 = vmatprep.mubr.bf16.mxu1 %v20166_v13  ;;  %v20276_v13 = vld [vmem:[%s25434_s5 + $0x260] ss:$36 sps:$4 sm:$0xff]  }
 0x337   :  { %4354 = vmatmul.mubr.bf16.gmra.mrb[88].mxu1 %v20168_v50  ;;  %v20287_v50 = vld [vmem:[%s25434_s5 + $0x338] ss:$36 sps:$4 sm:$0xff]  }
 0x338   :  { %4361 = vmatprep.mubr.bf16.mxu1 %v20169_v61  ;;  %v20228_v61 = vld [vmem:[%s25434_s5 + $0x520] ss:$36 sps:$4 sm:$0xff]  }
 0x33f   :  { %4362 = vmatmul.mubr.bf16.gmra.mrb[92].mxu1 %v20171_v39  ;;  %v20295_v39 = vld [vmem:[%s25434_s5 + $0x3c8] ss:$36 sps:$4 sm:$0xff]  }
 0x340   :  { %4402 = vmatprep.mubr.bf16.mxu1 %v20174_v31  ;;  %v20234_v31 = vld [vmem:[%s25434_s5 + $0x5b0] ss:$36 sps:$4 sm:$0xff]  }
 0x347   :  { %4403 = vmatmul.mubr.bf16.vlgmr.msra.gmra.mrb[0].mxu1 %v20172_v33  ;;  %v20235_v33 = vld [vmem:[%s25434_s5 + $0x5fc] ss:$36 sps:$4 sm:$0xff]  }
 0x348   :  { %4596 = vmatpush1.bf16.msra.mxu1 %v22820_v6  ;;  %4410 = vmatprep.mubr.bf16.mxu1 %v20175_v53  ;;  %v20180_v6 = vld [vmem:[%s25434_s5 + $0xa0] ss:$36 sps:$4 sm:$0xff]   ;;  %v20237_v53 = vld [vmem:[%s25434_s5 + $0x5f8] ss:$36 sps:$4 sm:$0xff]  }
 0x349   :  { %4597 = vmatprep.subr.bf16.mxu1 %v25587_v4 }
 0x34c   :  { %4598 = vmatpush1.bf16.msra.mxu1 %v25609_v2  ;;  %v20300_v2 = vld [vmem:[%s25434_s5 + $0x410] ss:$36 sps:$4 sm:$0xff]  }
 0x34d   :  { %4599 = vmatprep.subr.bf16.mxu1 %v25587_v4 }
 0x34f   :  { %4411 = vmatmul.mubr.bf16.gmra.mrb[4].mxu1 %v20177_v45  ;;  %v20238_v45 = vld [vmem:[%s25434_s5 + $0x644] ss:$36 sps:$4 sm:$0xff]  }
 0x350   :  { %4418 = vmatprep.mubr.bf16.mxu1 %v20178_v47  ;;  %4600 = vmatpush1.bf16.msra.mxu1 %v2794_v37  ;;  %v20189_v37 = vld [vmem:[%s25434_s5 + $0x178] ss:$36 sps:$4 sm:$0xff]  }
 0x351   :  { %4601 = vmatprep.subr.bf16.mxu1 %v25587_v4  ;;  %v20303_v47 = vld [vmem:[%s25434_s5 + $0x458] ss:$36 sps:$4 sm:$0xff]  }
 0x354   :  { %4602 = vmatpush1.bf16.msra.mxu1 %v25610_v0  ;;  %v20243_v0 = vld [vmem:[%s25434_s5 + $0x688] ss:$36 sps:$4 sm:$0xff]  }
 0x355   :  { %4603 = vmatprep.subr.bf16.mxu1 %v25587_v4 }
 0x357   :  { %4419 = vmatmul.mubr.bf16.gmra.mrb[8].mxu1 %v20180_v6  ;;  %v20240_v6 = vld [vmem:[%s25434_s5 + $0x640] ss:$36 sps:$4 sm:$0xff]  }
 0x358   :  { %4426 = vmatprep.mubr.bf16.mxu1 %v20181_v54  ;;  %4604 = vmatpush1.bf16.msra.mxu1 %v2796_v15  ;;  %v25615_v15 = vld [vmem:[#allocation50_spill] sm:$0xff]  ;;  %v20241_v54 = vld [vmem:[%s25434_s5 + $0x68c] ss:$36 sps:$4 sm:$0xff]  }
 0x359   :  { %4605 = vmatprep.subr.bf16.mxu1 %v25587_v4 }
 0x35c   :  { %4606 = vmatpush1.bf16.msra.mxu1 %v25611_v40  ;;  %v20311_v40 = vld [vmem:[%s25434_s5 + $0x4e8] ss:$36 sps:$4 sm:$0xff]  }
 0x35d   :  { %4607 = vmatprep.subr.bf16.mxu1 %v25587_v4 }
 0x35f   :  { %4427 = vmatmul.mubr.bf16.gmra.mrb[12].mxu1 %v20183_v56  ;;  %v20247_v56 = vld [vmem:[%s25434_s5 + $0x1c] ss:$36 sps:$4 sm:$0xff]  }
 0x360   :  { %4434 = vmatprep.mubr.bf16.mxu1 %v20184_v7  ;;  %4608 = vmatpush1.bf16.msra.mxu1 %v2798_v17  ;;  %v20252_v17 = vld [vmem:[%s25434_s5 + $0xb0] ss:$36 sps:$4 sm:$0xff]   ;;  %v20308_v7 = vld [vmem:[%s25434_s5 + $0x4a0] ss:$36 sps:$4 sm:$0xff]  }
 0x361   :  { %4609 = vmatprep.subr.bf16.mxu1 %v25587_v4  ;;  %18102 = vmatprep.mubr.bf16.mxu0 %v20252_v17  ;;  %v20273_v17 = vld [vmem:[%s25434_s5 + $0x214] ss:$36 sps:$4 sm:$0xff]  }
 0x362   :  { %18103 = vmatmul.mubr.bf16.gmra.mrb[148].mxu0 %v20255_v22  ;;  %v20275_v22 = vld [vmem:[%s25434_s5 + $0x210] ss:$36 sps:$4 sm:$0xff]  }
 0x363   :  { %18106 = vmatprep.mubr.bf16.mxu0 %v20260_v60  ;;  %v20285_v60 = vld [vmem:[%s25434_s5 + $0x2ec] ss:$36 sps:$4 sm:$0xff]  }
 0x364   :  { %4610 = vmatpush1.bf16.msra.mxu1 %v25612_v51  ;;  %v20251_v51 = vld [vmem:[%s25434_s5 + $0x60] ss:$36 sps:$4 sm:$0xff]  }
 0x365   :  { %4611 = vmatprep.subr.bf16.mxu1 %v25587_v4 }
 0x367   :  { %4435 = vmatmul.mubr.bf16.gmra.mrb[16].mxu1 %v20186_v12  ;;  %v20245_v12 = vld [vmem:[%s25434_s5 + $0x18] ss:$36 sps:$4 sm:$0xff]  }
 0x368   :  { %4442 = vmatprep.mubr.bf16.mxu1 %v20187_v36  ;;  %4612 = vmatpush1.bf16.msra.mxu1 %v2800_v38  ;;  %v20210_v38 = vld [vmem:[%s25434_s5 + $0x370] ss:$36 sps:$4 sm:$0xff]   ;;  %v20249_v36 = vld [vmem:[%s25434_s5 + $0x64] ss:$36 sps:$4 sm:$0xff]  }
 0x369   :  { %4613 = vmatprep.subr.bf16.mxu1 %v25587_v4 }
 0x36a   :  { %18107 = vmatmul.mubr.bf16.gmra.mrb[152].mxu0 %v20263_v46  ;;  %v20288_v46 = vld [vmem:[%s25434_s5 + $0x2e8] ss:$36 sps:$4 sm:$0xff]  }
 0x36b   :  { %18110 = vmatprep.mubr.bf16.mxu0 %v20268_v35 }
 0x36c   :  { %4614 = vmatpush1.bf16.msra.mxu1 %v25613_v8  ;;  %v20319_v8 = vld [vmem:[%s25434_s5 + $0x578] ss:$36 sps:$4 sm:$0xff]  }
 0x36d   :  { %4615 = vmatprep.subr.bf16.mxu1 %v25587_v4 }
 0x36f   :  { %4443 = vmatmul.mubr.bf16.gmra.mrb[20].mxu1 %v20189_v37  ;;  %v20253_v37 = vld [vmem:[%s25434_s5 + $0xac] ss:$36 sps:$4 sm:$0xff]  }
 0x370   :  { %4450 = vmatprep.mubr.bf16.mxu1 %v20190_v34  ;;  %4616 = vmatpush1.bf16.msra.mxu1 %v2802_v5  ;;  %v20219_v5 = vld [vmem:[%s25434_s5 + $0x448] ss:$36 sps:$4 sm:$0xff]   ;;  %v20316_v34 = vld [vmem:[%s25434_s5 + $0x530] ss:$36 sps:$4 sm:$0xff]  }
 0x371   :  { %4617 = vmatprep.subr.bf16.mxu1 %v25587_v4 }
 0x372   :  { %18111 = vmatmul.mubr.bf16.gmra.mrb[156].mxu0 %v20271_v25  ;;  %v20340_v25 = vld [vmem:[%s25432_s3 + $0x40] sm:$0xff]  }
 0x373   :  { %18114 = vmatprep.mubr.bf16.mxu0 %v20276_v13  ;;  %18146 = vmatprep.subr.bf16.mxu0 %v20340_v25  ;;  %v20342_v13 = vld [vmem:[%s25432_s3 + $0x50] sm:$0xff]  }
 0x374   :  { %4618 = vmatpush1.bf16.msra.mxu1 %v25614_v11  ;;  %v20259_v11 = vld [vmem:[%s25434_s5 + $0xf0] ss:$36 sps:$4 sm:$0xff]   ;;  %18147 = vmatpush3.bf16.msra.mxu0 %v20340_v25 }
 0x375   :  { %4619 = vmatprep.subr.bf16.mxu1 %v25587_v4 }
 0x377   :  { %4451 = vmatmul.mubr.bf16.gmra.mrb[24].mxu1 %v20192_v52  ;;  %v20256_v52 = vld [vmem:[%s25434_s5 + $0xa8] ss:$36 sps:$4 sm:$0xff]  }
 0x378   :  { %4458 = vmatprep.mubr.bf16.mxu1 %v20193_v43  ;;  %4620 = vmatpush1.bf16.msra.mxu1 %v22942_v27  ;;  %v20284_v27 = vld [vmem:[%s25434_s5 + $0x2f0] ss:$36 sps:$4 sm:$0xff]  }
 0x379   :  { %4621 = vmatprep.subr.bf16.mxu1 %v25587_v4  ;;  %v20257_v43 = vld [vmem:[%s25434_s5 + $0xf4] ss:$36 sps:$4 sm:$0xff]  }
 0x37a   :  { %18115 = vmatmul.mubr.bf16.gmra.mrb[160].mxu0 %v20279_v49  ;;  %v20297_v49 = vld [vmem:[%s25434_s5 + $0x3c4] ss:$36 sps:$4 sm:$0xff]  }
 0x37b   :  { %18118 = vmatprep.mubr.bf16.mxu0 %v20284_v27 }
 0x37c   :  { %4622 = vmatpush1.bf16.msra.mxu1 %v25615_v15  ;;  %v20327_v15 = vld [vmem:[%s25434_s5 + $0x608] ss:$36 sps:$4 sm:$0xff]  }
 0x37d   :  { %4623 = vmatprep.subr.bf16.mxu1 %v25587_v4 }
 0x37f   :  { %4459 = vmatmul.mubr.bf16.gmra.mrb[28].mxu1 %v20195_v10  ;;  %v20261_v10 = vld [vmem:[%s25434_s5 + $0x13c] ss:$36 sps:$4 sm:$0xff]  }
 0x380   :  { %4466 = vmatprep.mubr.bf16.mxu1 %v20196_v19  ;;  %4624 = vmatpush1.bf16.msra.mxu1 %v22954_v1  ;;  %v20292_v1 = vld [vmem:[%s25434_s5 + $0x380] ss:$36 sps:$4 sm:$0xff]  }
 0x381   :  { %4625 = vmatprep.subr.bf16.mxu1 %v25587_v4  ;;  %v20324_v19 = vld [vmem:[%s25434_s5 + $0x5c0] ss:$36 sps:$4 sm:$0xff]  }
 0x382   :  { %18119 = vmatmul.mubr.bf16.gmra.mrb[164].mxu0 %v20287_v50  ;;  %v20344_v50 = vld [vmem:[%s25432_s3 + $0x60] sm:$0xff]  }
 0x383   :  { %18122 = vmatprep.mubr.bf16.mxu0 %v20292_v1  ;;  %v20346_v1 = vld [vmem:[%s25432_s3 + $0x70] sm:$0xff]  }
 0x384   :  { %4626 = vmatpush1.bf16.msra.mxu1 %v25616_v28  ;;  %v20332_v28 = vld [vmem:[%s25434_s5 + $0x650] ss:$36 sps:$4 sm:$0xff]  }
 0x387   :  { %4467 = vmatmul.mubr.bf16.gmra.mrb[32].mxu1 %v20198_v9  ;;  %v20267_v9 = vld [vmem:[%s25434_s5 + $0x180] ss:$36 sps:$4 sm:$0xff]  }
 0x388   :  { %4474 = vmatprep.mubr.bf16.mxu1 %v20199_v29  ;;  %v20269_v29 = vld [vmem:[%s25434_s5 + $0x1cc] ss:$36 sps:$4 sm:$0xff]  }
 0x38a   :  { %18123 = vmatmul.mubr.bf16.gmra.mrb[168].mxu0 %v20295_v39  ;;  %v20305_v39 = vld [vmem:[%s25434_s5 + $0x454] ss:$36 sps:$4 sm:$0xff]  }
 0x38b   :  { %18126 = vmatprep.mubr.bf16.mxu0 %v20300_v2 }
 0x38f   :  { %4475 = vmatmul.mubr.bf16.gmra.mrb[36].mxu1 %v20201_v16  ;;  %v20335_v16 = vld [vmem:[%s25434_s5 + $0x698] ss:$36 sps:$4 sm:$0xff]  }
 0x390   :  { %4482 = vmatprep.mubr.bf16.mxu1 %v20202_v48  ;;  %v20272_v48 = vld [vmem:[%s25434_s5 + $0x1c8] ss:$36 sps:$4 sm:$0xff]  }
 0x392   :  { %18127 = vmatmul.mubr.bf16.gmra.mrb[172].mxu0 %v20303_v47  ;;  %v20309_v47 = vld [vmem:[%s25434_s5 + $0x49c] ss:$36 sps:$4 sm:$0xff]  }
 0x393   :  { %18130 = vmatprep.mubr.bf16.mxu0 %v20308_v7 }
 0x397   :  { %4483 = vmatmul.mubr.bf16.gmra.mrb[40].mxu1 %v20204_v42  ;;  %v20277_v42 = vld [vmem:[%s25434_s5 + $0x25c] ss:$36 sps:$4 sm:$0xff]  }
 0x398   :  { %4490 = vmatprep.mubr.bf16.mxu1 %v20205_v59  ;;  %v20280_v59 = vld [vmem:[%s25434_s5 + $0x258] ss:$36 sps:$4 sm:$0xff]  }
 0x39a   :  { %18131 = vmatmul.mubr.bf16.gmra.mrb[176].mxu0 %v20311_v40  ;;  %v20315_v40 = vld [vmem:[%s25434_s5 + $0x4e0] ss:$36 sps:$4 sm:$0xff]  }
 0x39b   :  { %18134 = vmatprep.mubr.bf16.mxu0 %v20316_v34  ;;  %v20321_v34 = vld [vmem:[%s25434_s5 + $0x574] ss:$36 sps:$4 sm:$0xff]  }
 0x39f   :  { %4491 = vmatmul.mubr.bf16.gmra.mrb[44].mxu1 %v20207_v58  ;;  %v20281_v58 = vld [vmem:[%s25434_s5 + $0x2a4] ss:$36 sps:$4 sm:$0xff]  }
 0x3a0   :  { %4498 = vmatprep.mubr.bf16.mxu1 %v20208_v21  ;;  %v20283_v21 = vld [vmem:[%s25434_s5 + $0x2a0] ss:$36 sps:$4 sm:$0xff]  }
 0x3a2   :  { %18135 = vmatmul.mubr.bf16.gmra.mrb[180].mxu0 %v20319_v8 }
 0x3a3   :  { %18138 = vmatprep.mubr.bf16.mxu0 %v20324_v19 }
 0x3a7   :  { %4499 = vmatmul.mubr.bf16.gmra.mrb[48].mxu1 %v20210_v38  ;;  %v20289_v38 = vld [vmem:[%s25434_s5 + $0x334] ss:$36 sps:$4 sm:$0xff]  }
 0x3a8   :  { %4506 = vmatprep.mubr.bf16.mxu1 %v20211_v41 }
 0x3aa   :  { %18139 = vmatmul.mubr.bf16.gmra.mrb[184].mxu0 %v20327_v15  ;;  %v20328_v15 = vld [vmem:[%s25434_s5 + $0x5b8] ss:$36 sps:$4 sm:$0xff]  }
 0x3ab   :  { %18142 = vmatprep.mubr.bf16.mxu0 %v20332_v28 }
 0x3af   :  { %4507 = vmatmul.mubr.bf16.gmra.mrb[52].mxu1 %v20213_v3 }
 0x3b0   :  { %4514 = vmatprep.mubr.bf16.mxu1 %v20214_v23  ;;  %v20291_v23 = vld [vmem:[%s25434_s5 + $0x330] ss:$36 sps:$4 sm:$0xff]  }
 0x3b2   :  { %18143 = vmatmul.mubr.bf16.gmra.mrb[188].mxu0 %v20335_v16  ;;  %v20333_v16 = vld [vmem:[%s25434_s5 + $0x64c] ss:$36 sps:$4 sm:$0xff]  }
 0x3b7   :  { %4515 = vmatmul.mubr.bf16.gmra.mrb[56].mxu1 %v20216_v26  ;;  %v20293_v26 = vld [vmem:[%s25434_s5 + $0x37c] ss:$36 sps:$4 sm:$0xff]  }
 0x3b8   :  { %4522 = vmatprep.mubr.bf16.mxu1 %v20217_v14 }
 0x3bf   :  { %4523 = vmatmul.mubr.bf16.gmra.mrb[60].mxu1 %v20219_v5  ;;  %v20341_v5 = vld [vmem:[%s25432_s3 + $0x48] sm:$0xff]  }
 0x3c0   :  { %4530 = vmatprep.mubr.bf16.mxu1 %v20220_v20  ;;  %18148 = vmatprep.subr.bf16.mxu0 %v20341_v5  ;;  %v20296_v20 = vld [vmem:[%s25434_s5 + $0x378] ss:$36 sps:$4 sm:$0xff]  }
 0x3c1   :  { %18149 = vmatpush3.bf16.msra.mxu0 %v20341_v5 }
 0x3c2   :  { %18150 = vmatprep.subr.bf16.mxu0 %v20342_v13 }
 0x3c5   :  { %18151 = vmatpush3.bf16.msra.mxu0 %v20342_v13 }
 0x3c7   :  { %4531 = vmatmul.mubr.bf16.gmra.mrb[64].mxu1 %v20222_v62  ;;  %v20343_v62 = vld [vmem:[%s25432_s3 + $0x58] sm:$0xff]  }
 0x3c8   :  { %4538 = vmatprep.mubr.bf16.mxu1 %v20223_v30  ;;  %18152 = vmatprep.subr.bf16.mxu0 %v20343_v62 }
 0x3c9   :  { %18153 = vmatpush3.bf16.msra.mxu0 %v20343_v62 }
 0x3ca   :  { %18154 = vmatprep.subr.bf16.mxu0 %v20344_v50 }
 0x3cd   :  { %18155 = vmatpush3.bf16.msra.mxu0 %v20344_v50 }
 0x3cf   :  { %4539 = vmatmul.mubr.bf16.gmra.mrb[68].mxu1 %v20225_v18 }
 0x3d0   :  { %4546 = vmatprep.mubr.bf16.mxu1 %v20226_v57  ;;  %v20299_v57 = vld [vmem:[%s25434_s5 + $0x3c0] ss:$36 sps:$4 sm:$0xff]  }
 0x3d7   :  { %4547 = vmatmul.mubr.bf16.gmra.mrb[72].mxu1 %v20228_v61  ;;  %v20301_v61 = vld [vmem:[%s25434_s5 + $0x40c] ss:$36 sps:$4 sm:$0xff]  }
 0x3d8   :  { %4554 = vmatprep.mubr.bf16.mxu1 %v20229_v63 }
 0x3df   :  { %4555 = vmatmul.mubr.bf16.gmra.mrb[76].mxu1 %v20231_v32  ;;  %v20345_v32 = vld [vmem:[%s25432_s3 + $0x68] sm:$0xff]  }
 0x3e0   :  { %4562 = vmatprep.mubr.bf16.mxu1 %v20232_v55  ;;  %18156 = vmatprep.subr.bf16.mxu0 %v20345_v32  ;;  %v20304_v55 = vld [vmem:[%s25434_s5 + $0x408] ss:$36 sps:$4 sm:$0xff]  }
 0x3e1   :  { %18157 = vmatpush3.bf16.msra.mxu0 %v20345_v32 }
 0x3e2   :  { %18158 = vmatprep.subr.bf16.mxu0 %v20346_v1 }
 0x3e5   :  { %18159 = vmatpush3.bf16.msra.mxu0 %v20346_v1 }
 0x3e7   :  { %4563 = vmatmul.mubr.bf16.gmra.mrb[80].mxu1 %v20234_v31  ;;  %v20347_v31 = vld [vmem:[%s25432_s3 + $0x78] sm:$0xff]  }
 0x3e8   :  { %4570 = vmatprep.mubr.bf16.mxu1 %v20235_v33  ;;  %18160 = vmatprep.subr.bf16.mxu0 %v20347_v31 }
 0x3e9   :  { %18161 = vmatpush3.bf16.msra.mxu0 %v20347_v31 }
 0x3ec   :  { %v23270_v41 = vpop.f32.mrb[144].mxu0 }
 0x3ed   :  { %v23272_v3 = vpop.f32.mrb[145].mxu0 }
 0x3ee   :  { %v23277_v35 = vpop.f32.mrb[146].mxu0 }
 0x3ef   :  { %4571 = vmatmul.mubr.bf16.gmra.mrb[84].mxu1 %v20237_v53  ;;  %v23285_v14 = vpop.f32.mrb[147].mxu0 }
 0x3f0   :  { %4578 = vmatprep.mubr.bf16.mxu1 %v20238_v45  ;;  %v20307_v45 = vld [vmem:[%s25434_s5 + $0x450] ss:$36 sps:$4 sm:$0xff]  }
 0x3f7   :  { %4579 = vmatmul.mubr.bf16.gmra.mrb[88].mxu1 %v20240_v6 }
 0x3f8   :  { %4586 = vmatprep.mubr.bf16.mxu1 %v20241_v54  ;;  %v20312_v54 = vld [vmem:[%s25434_s5 + $0x498] ss:$36 sps:$4 sm:$0xff]  }
 0x3ff   :  { %4587 = vmatmul.mubr.bf16.gmra.mrb[92].mxu1 %v20243_v0  ;;  %v20313_v0 = vld [vmem:[%s25434_s5 + $0x4e4] ss:$36 sps:$4 sm:$0xff]  }
 0x400   :  { %4627 = vmatprep.mubr.bf16.mxu1 %v20247_v56 }
 0x407   :  { %4628 = vmatmul.mubr.bf16.vlgmr.msra.gmra.mrb[0].mxu1 %v20245_v12 }
 0x408   :  { %4635 = vmatprep.mubr.bf16.mxu1 %v20249_v36  ;;  %v20317_v36 = vld [vmem:[%s25434_s5 + $0x52c] ss:$36 sps:$4 sm:$0xff]  }
 0x40f   :  { %4636 = vmatmul.mubr.bf16.gmra.mrb[4].mxu1 %v20251_v51 }
 0x410   :  { %4643 = vmatprep.mubr.bf16.mxu1 %v20253_v37  ;;  %v20320_v37 = vld [vmem:[%s25434_s5 + $0x528] ss:$36 sps:$4 sm:$0xff]  }
 0x417   :  { %4644 = vmatmul.mubr.bf16.gmra.mrb[8].mxu1 %v20256_v52 }
 0x418   :  { %4651 = vmatprep.mubr.bf16.mxu1 %v20257_v43  ;;  %v20323_v43 = vld [vmem:[%s25434_s5 + $0x570] ss:$36 sps:$4 sm:$0xff]  }
 0x41f   :  { %4652 = vmatmul.mubr.bf16.gmra.mrb[12].mxu1 %v20259_v11 }
 0x420   :  { %4659 = vmatprep.mubr.bf16.mxu1 %v20261_v10  ;;  %v20325_v10 = vld [vmem:[%s25434_s5 + $0x5bc] ss:$36 sps:$4 sm:$0xff]  }
 0x427   :  { %4660 = vmatmul.mubr.bf16.gmra.mrb[16].mxu1 %v20264_v24  ;;  %v20329_v24 = vld [vmem:[%s25434_s5 + $0x604] ss:$36 sps:$4 sm:$0xff]  }
 0x428   :  { %4667 = vmatprep.mubr.bf16.mxu1 %v20265_v44 }
 0x42f   :  { %4668 = vmatmul.mubr.bf16.gmra.mrb[20].mxu1 %v20267_v9 }
 0x430   :  { %4675 = vmatprep.mubr.bf16.mxu1 %v20269_v29  ;;  %v20331_v29 = vld [vmem:[%s25434_s5 + $0x600] ss:$36 sps:$4 sm:$0xff]  }
 0x435   :  { %v23302_v30 = vpop.f32.mrb[148].mxu0 }
 0x436   :  { %v23304_v18 = vpop.f32.mrb[149].mxu0 }
 0x437   :  { %4676 = vmatmul.mubr.bf16.gmra.mrb[24].mxu1 %v20272_v48  ;;  %v23309_v27 = vpop.f32.mrb[150].mxu0 }
 0x438   :  { %4683 = vmatprep.mubr.bf16.mxu1 %v20273_v17  ;;  %v23317_v63 = vpop.f32.mrb[151].mxu0  ;;  %v20336_v17 = vld [vmem:[%s25434_s5 + $0x648] ss:$36 sps:$4 sm:$0xff]  }
 0x43d   :  { %v23334_v33 = vpop.f32.mrb[152].mxu0 }
 0x43e   :  { %v23336_v53 = vpop.f32.mrb[153].mxu0 }
 0x43f   :  { %4684 = vmatmul.mubr.bf16.gmra.mrb[28].mxu1 %v20275_v22  ;;  %v23341_v2 = vpop.f32.mrb[154].mxu0  ;;  %v20337_v22 = vld [vmem:[%s25434_s5 + $0x694] ss:$36 sps:$4 sm:$0xff]  }
 0x440   :  { %4691 = vmatprep.mubr.bf16.mxu1 %v20277_v42  ;;  %v23346_v6 = vpop.f32.mrb[155].mxu0 }
 0x445   :  { %v23354_v56 = vpop.f32.mrb[156].mxu0 }
 0x446   :  { %v23356_v7 = vpop.f32.mrb[157].mxu0 }
 0x447   :  { %4692 = vmatmul.mubr.bf16.gmra.mrb[32].mxu1 %v20280_v59  ;;  %v23361_v12 = vpop.f32.mrb[158].mxu0 }
 0x448   :  { %4699 = vmatprep.mubr.bf16.mxu1 %v20281_v58  ;;  %v23366_v51 = vpop.f32.mrb[159].mxu0  ;;  %v20339_v58 = vld [vmem:[%s25434_s5 + $0x690] ss:$36 sps:$4 sm:$0xff]  }
 0x44d   :  { %v23374_v8 = vpop.f32.mrb[160].mxu0 }
 0x44e   :  { %v23376_v52 = vpop.f32.mrb[161].mxu0 }
 0x44f   :  { %4700 = vmatmul.mubr.bf16.gmra.mrb[36].mxu1 %v20283_v21  ;;  %v23381_v11 = vpop.f32.mrb[162].mxu0 }
 0x450   :  { %4707 = vmatprep.mubr.bf16.mxu1 %v20285_v60  ;;  %v23386_v19 = vpop.f32.mrb[163].mxu0 }
 0x455   :  { %v23394_v44 = vpop.f32.mrb[164].mxu0 }
 0x456   :  { %v23396_v9 = vpop.f32.mrb[165].mxu0 }
 0x457   :  { %4708 = vmatmul.mubr.bf16.gmra.mrb[40].mxu1 %v20288_v46  ;;  %v23401_v28 = vpop.f32.mrb[166].mxu0 }
 0x458   :  { %4715 = vmatprep.mubr.bf16.mxu1 %v20289_v38  ;;  %v23406_v48 = vpop.f32.mrb[167].mxu0 }
 0x45d   :  { %v23414_v42 = vpop.f32.mrb[168].mxu0 }
 0x45e   :  { %v23416_v59 = vpop.f32.mrb[169].mxu0 }
 0x45f   :  { %4716 = vmatmul.mubr.bf16.gmra.mrb[44].mxu1 %v20291_v23  ;;  %v23421_v21 = vpop.f32.mrb[170].mxu0 }
 0x460   :  { %4723 = vmatprep.mubr.bf16.mxu1 %v20293_v26  ;;  %v23423_v60 = vpop.f32.mrb[171].mxu0 }
 0x465   :  { %v23425_v46 = vpop.f32.mrb[172].mxu0 }
 0x466   :  { %v23427_v38 = vpop.f32.mrb[173].mxu0 }
 0x467   :  { %4724 = vmatmul.mubr.bf16.gmra.mrb[48].mxu1 %v20296_v20  ;;  %v23429_v23 = vpop.f32.mrb[174].mxu0 }
 0x468   :  { %4731 = vmatprep.mubr.bf16.mxu1 %v20297_v49  ;;  %v23431_v25 = vpop.f32.mrb[175].mxu0 }
 0x46d   :  { %v23433_v26 = vpop.f32.mrb[176].mxu0 }
 0x46e   :  { %v23435_v20 = vpop.f32.mrb[177].mxu0 }
 0x46f   :  { %4732 = vmatmul.mubr.bf16.gmra.mrb[52].mxu1 %v20299_v57  ;;  %v23440_v62 = vpop.f32.mrb[178].mxu0 }
 0x470   :  { %4739 = vmatprep.mubr.bf16.mxu1 %v20301_v61  ;;  %v23442_v50 = vpop.f32.mrb[179].mxu0 }
 0x477   :  { %4740 = vmatmul.mubr.bf16.gmra.mrb[56].mxu1 %v20304_v55 }
 0x478   :  { %4747 = vmatprep.mubr.bf16.mxu1 %v20305_v39 }
 0x47f   :  { %4748 = vmatmul.mubr.bf16.gmra.mrb[60].mxu1 %v20307_v45 }
 0x480   :  { %4755 = vmatprep.mubr.bf16.mxu1 %v20309_v47 }
 0x487   :  { %4756 = vmatmul.mubr.bf16.gmra.mrb[64].mxu1 %v20312_v54 }
 0x488   :  { %4763 = vmatprep.mubr.bf16.mxu1 %v20313_v0 }
 0x48f   :  { %4764 = vmatmul.mubr.bf16.gmra.mrb[68].mxu1 %v20315_v40 }
 0x490   :  { %4771 = vmatprep.mubr.bf16.mxu1 %v20317_v36 }
 0x497   :  { %4772 = vmatmul.mubr.bf16.gmra.mrb[72].mxu1 %v20320_v37 }
 0x498   :  { %4779 = vmatprep.mubr.bf16.mxu1 %v20321_v34 }
 0x49f   :  { %4780 = vmatmul.mubr.bf16.gmra.mrb[76].mxu1 %v20323_v43 }
 0x4a0   :  { %4787 = vmatprep.mubr.bf16.mxu1 %v20325_v10  ;;  %v23465_v10 = vld [vmem:[%s25432_s3] sm:$0xff]  }
 0x4a1   :  { %18178 = vmatprep.subr.bf16.mxu0 %v23465_v10 }
 0x4a7   :  { %4788 = vmatmul.mubr.bf16.gmra.mrb[80].mxu1 %v20328_v15 }
 0x4a8   :  { %4795 = vmatprep.mubr.bf16.mxu1 %v20329_v24 }
 0x4af   :  { %4796 = vmatmul.mubr.bf16.gmra.mrb[84].mxu1 %v20331_v29 }
 0x4b0   :  { %4803 = vmatprep.mubr.bf16.mxu1 %v20333_v16 }
 0x4b7   :  { %4804 = vmatmul.mubr.bf16.gmra.mrb[88].mxu1 %v20336_v17 }
 0x4b8   :  { %4811 = vmatprep.mubr.bf16.mxu1 %v20337_v22 }
 0x4bf   :  { %4812 = vmatmul.mubr.bf16.gmra.mrb[92].mxu1 %v20339_v58 }
 0x4da   :  { %v4629_v5 = vpop.f32.mrb[0].mxu1 }
 0x4db   :  { %v23438_v13 = vadd.f32 %v23272_v3, %v4629_v5  ;;  %v4631_v49 = vpop.f32.mrb[1].mxu1 }
 0x4dc   :  { %v4632_v57 = vpop.f32.mrb[2].mxu1 }
 0x4dd   :  { %v4858_v61 = vadd.f32 %v23285_v14, %v4632_v57  ;;  %v4634_v32 = vpop.f32.mrb[3].mxu1  ;;  %v5101_v55 = vrot.slane %v23438_v13, 1  ;;  %v5481_v1 = vrot.slane %v23438_v13, 2  ;;  %v5732_v39 = vrot.slane %v23438_v13, 3 }
 0x4de   :  { %v5983_v3 = vrot.slane %v23438_v13, 4  ;;  %v23475_v32 = vpop.f32.mrb[180].mxu0 }
 0x4df   :  { %v5102_v31 = vrot.slane %v4858_v61, 1  ;;  %v5482_v45 = vrot.slane %v4858_v61, 2  ;;  %v5733_v47 = vrot.slane %v4858_v61, 3  ;;  %v5984_v54 = vrot.slane %v4858_v61, 4 }
 0x4e1   :  { %v5103_v0 = vsel %vm1782_vm1, %v5101_v55, %v5102_v31  ;;  %v23451_v14 = vsel %vm5480_vm2, %v5481_v1, %v5482_v45  ;;  %v23454_v40 = vsel %vm5731_vm3, %v5732_v39, %v5733_v47  ;;  %v23457_v36 = vsel %vm5982_vm4, %v5983_v3, %v5984_v54  ;;  %v23490_v45 = vpop.f32.mrb[181].mxu0 }
 0x4e2   :  { %25617 = vst [vmem:[#allocation26_spill] sm:$0xff] %v23454_v40  ;;  %25618 = vst [vmem:[#allocation24_spill] sm:$0xff] %v23457_v36  ;;  %v4637_v37 = vpop.f32.mrb[4].mxu1 }
 0x4e3   :  { %v23460_v34 = vadd.f32 %v23270_v41, %v4637_v37  ;;  %v4639_v43 = vpop.f32.mrb[5].mxu1 }
 0x4e4   :  { %v4640_v15 = vpop.f32.mrb[6].mxu1 }
 0x4e5   :  { %v4866_v24 = vadd.f32 %v23277_v35, %v4640_v15  ;;  %v4642_v29 = vpop.f32.mrb[7].mxu1  ;;  %v5104_v17 = vrot.slane %v23460_v34, 1  ;;  %v5484_v41 = vrot.slane %v23460_v34, 2  ;;  %v5735_v22 = vrot.slane %v23460_v34, 3 }
 0x4e6   :  { %v5986_v58 = vrot.slane %v23460_v34, 4 }
 0x4e7   :  { %v5105_v5 = vrot.slane %v4866_v24, 1  ;;  %v5485_v49 = vrot.slane %v4866_v24, 2  ;;  %v5736_v57 = vrot.slane %v4866_v24, 3  ;;  %v5987_v61 = vrot.slane %v4866_v24, 4  ;;  %v23501_v24 = vpop.f32.mrb[182].mxu0 }
 0x4e9   :  { %v23478_v35 = vsel %vm1782_vm1, %v5104_v17, %v5105_v5  ;;  %v23481_v55 = vsel %vm5480_vm2, %v5484_v41, %v5485_v49  ;;  %v23484_v1 = vsel %vm5731_vm3, %v5735_v22, %v5736_v57  ;;  %v23487_v39 = vsel %vm5982_vm4, %v5986_v58, %v5987_v61 }
 0x4ea   :  { %25619 = vst [vmem:[#allocation23_spill] sm:$0xff] %v23478_v35  ;;  %25620 = vst [vmem:[#allocation25_spill] sm:$0xff] %v23484_v1  ;;  %v4645_v3 = vpop.f32.mrb[8].mxu1  ;;  %v5165_v31 = vpack.c.bf16 %v23478_v35, %v5103_v0  ;;  %v23503_v0 = vpop.f32.mrb[183].mxu0 }
 0x4eb   :  { %25621 = vst [vmem:[#allocation27_spill] sm:$0xff] %v23487_v39  ;;  %v23499_v43 = vadd.f32 %v23304_v18, %v4645_v3  ;;  %v4647_v15 = vpop.f32.mrb[9].mxu1  ;;  %v23537_v36 = vpop.f32.mrb[184].mxu0 }
 0x4ec   :  { %v4648_v29 = vpop.f32.mrb[10].mxu1  ;;  %18162 = vmatprep.mubr.bf16.mxu0 %v5165_v31 }
 0x4ed   :  { %25622 = vst [vmem:[#allocation31_spill] sm:$0xff] %v23499_v43  ;;  %v4874_v17 = vadd.f32 %v23317_v63, %v4648_v29  ;;  %v4650_v41 = vpop.f32.mrb[11].mxu1  ;;  %v5107_v22 = vrot.slane %v23499_v43, 1  ;;  %v5487_v58 = vrot.slane %v23499_v43, 2  ;;  %v5738_v5 = vrot.slane %v23499_v43, 3 }
 0x4ee   :  { %v5989_v49 = vrot.slane %v23499_v43, 4 }
 0x4ef   :  { %v5108_v57 = vrot.slane %v4874_v17, 1  ;;  %v5488_v61 = vrot.slane %v4874_v17, 2  ;;  %v5739_v3 = vrot.slane %v4874_v17, 3  ;;  %v5990_v31 = vrot.slane %v4874_v17, 4 }
 0x4f1   :  { %v23513_v15 = vsel %vm1782_vm1, %v5107_v22, %v5108_v57  ;;  %v23516_v63 = vsel %vm5480_vm2, %v5487_v58, %v5488_v61  ;;  %v23519_v29 = vsel %vm5731_vm3, %v5738_v5, %v5739_v3  ;;  %v23522_v41 = vsel %vm5982_vm4, %v5989_v49, %v5990_v31  ;;  %v20349_v22 = vld [vmem:[%s25432_s3 + $0x8] sm:$0xff]  }
 0x4f2   :  { %25623 = vst [vmem:[#allocation32_spill] sm:$0xff] %v23513_v15  ;;  %25624 = vst [vmem:[#allocation29_spill] sm:$0xff] %v23516_v63  ;;  %v4653_v37 = vpop.f32.mrb[12].mxu1 }
 0x4f3   :  { %25625 = vst [vmem:[#allocation35_spill] sm:$0xff] %v23519_v29  ;;  %25626 = vst [vmem:[#allocation36_spill] sm:$0xff] %v23522_v41  ;;  %v4879_v58 = vadd.f32 %v23302_v30, %v4653_v37  ;;  %v4655_v5 = vpop.f32.mrb[13].mxu1 }
 0x4f4   :  { %v4656_v57 = vpop.f32.mrb[14].mxu1 }
 0x4f5   :  { %v4882_v49 = vadd.f32 %v23309_v27, %v4656_v57  ;;  %v4658_v61 = vpop.f32.mrb[15].mxu1  ;;  %v23535_v3 = vpack.c.bf16 %v4879_v58, %v23499_v43  ;;  %v5110_v31 = vrot.slane %v4879_v58, 1  ;;  %v5490_v18 = vrot.slane %v4879_v58, 2  ;;  %v23549_v43 = vpop.f32.mrb[185].mxu0 }
 0x4f6   :  { %v5741_v47 = vrot.slane %v4879_v58, 3  ;;  %v5992_v54 = vrot.slane %v4879_v58, 4 }
 0x4f7   :  { %v5111_v16 = vrot.slane %v4882_v49, 1  ;;  %v5491_v4 = vrot.slane %v4882_v49, 2  ;;  %v5742_v17 = vrot.slane %v4882_v49, 3  ;;  %v5993_v35 = vrot.slane %v4882_v49, 4 }
 0x4f9   :  { %v5112_v30 = vsel %vm1782_vm1, %v5110_v31, %v5111_v16  ;;  %v5492_v37 = vsel %vm5480_vm2, %v5490_v18, %v5491_v4  ;;  %v5743_v27 = vsel %vm5731_vm3, %v5741_v47, %v5742_v17  ;;  %v5994_v5 = vsel %vm5982_vm4, %v5992_v54, %v5993_v35  ;;  %v23561_v54 = vpop.f32.mrb[186].mxu0 }
 0x4fa   :  { %v4661_v57 = vpop.f32.mrb[16].mxu1  ;;  %v23544_v61 = vpack.c.bf16 %v5112_v30, %v23513_v15  ;;  %v23552_v49 = vpack.c.bf16 %v5492_v37, %v23516_v63  ;;  %v23555_v16 = vpack.c.bf16 %v5743_v27, %v23519_v29  ;;  %v23558_v4 = vpack.c.bf16 %v5994_v5, %v23522_v41  ;;  %v23564_v17 = vpop.f32.mrb[187].mxu0  ;;  %v20350_v41 = vld [vmem:[%s25432_s3 + $0x10] sm:$0xff]  }
 0x4fb   :  { %v4887_v35 = vadd.f32 %v23336_v53, %v4661_v57  ;;  %v4663_v47 = vpop.f32.mrb[17].mxu1 }
 0x4fc   :  { %25627 = vst [vmem:[#allocation33_spill] sm:$0xff] %v23544_v61  ;;  %25628 = vst [vmem:[#allocation39_spill] sm:$0xff] %v23552_v49  ;;  %v4664_v18 = vpop.f32.mrb[18].mxu1  ;;  %18163 = vmatmul.mubr.bf16.vlgmr.msra.gmra.mrb[192].mxu0 %v23544_v61 }
 0x4fd   :  { %25629 = vst [vmem:[#allocation40_spill] sm:$0xff] %v23555_v16  ;;  %25630 = vst [vmem:[#allocation37_spill] sm:$0xff] %v23558_v4  ;;  %v4890_v31 = vadd.f32 %v23346_v6, %v4664_v18  ;;  %v4666_v63 = vpop.f32.mrb[19].mxu1  ;;  %v5113_v15 = vrot.slane %v4887_v35, 1  ;;  %18179 = vmatpush3.bf16.msra.mxu0 %v23465_v10  ;;  %v5493_v53 = vrot.slane %v4887_v35, 2  ;;  %v5744_v57 = vrot.slane %v4887_v35, 3 }
 0x4fe   :  { %18180 = vmatprep.subr.bf16.mxu0 %v20349_v22  ;;  %v5995_v47 = vrot.slane %v4887_v35, 4  ;;  %v23571_v29 = vpack.c.bf16 %v4887_v35, %v4879_v58  ;;  %v20351_v58 = vld [vmem:[%s25432_s3 + $0x18] sm:$0xff]  }
 0x4ff   :  { %v5114_v4 = vrot.slane %v4890_v31, 1  ;;  %v5494_v61 = vrot.slane %v4890_v31, 2  ;;  %v5745_v39 = vrot.slane %v4890_v31, 3  ;;  %v5996_v16 = vrot.slane %v4890_v31, 4 }
 0x500   :  { %25631 = vst [vmem:[#allocation43_spill] sm:$0xff] %v23571_v29 }
 0x501   :  { %v5115_v6 = vsel %vm1782_vm1, %v5113_v15, %v5114_v4  ;;  %18181 = vmatpush3.bf16.msra.mxu0 %v20349_v22  ;;  %v5495_v63 = vsel %vm5480_vm2, %v5493_v53, %v5494_v61  ;;  %v5746_v10 = vsel %vm5731_vm3, %v5744_v57, %v5745_v39  ;;  %v5997_v18 = vsel %vm5982_vm4, %v5995_v47, %v5996_v16 }
 0x502   :  { %v4669_v40 = vpop.f32.mrb[20].mxu1  ;;  %v23577_v1 = vpack.c.bf16 %v5115_v6, %v5112_v30  ;;  %18182 = vmatprep.subr.bf16.mxu0 %v20350_v41  ;;  %v23582_v29 = vpack.c.bf16 %v5495_v63, %v5492_v37  ;;  %v23584_v31 = vpack.c.bf16 %v5746_v10, %v5743_v27  ;;  %v23586_v15 = vpack.c.bf16 %v5997_v18, %v5994_v5  ;;  %v20352_v37 = vld [vmem:[%s25432_s3 + $0x20] sm:$0xff]  }
 0x503   :  { %v4895_v22 = vadd.f32 %v23334_v33, %v4669_v40  ;;  %v4671_v61 = vpop.f32.mrb[21].mxu1 }
 0x504   :  { %25632 = vst [vmem:[#allocation44_spill] sm:$0xff] %v23577_v1  ;;  %25633 = vst [vmem:[#allocation41_spill] sm:$0xff] %v23582_v29  ;;  %v4672_v39 = vpop.f32.mrb[22].mxu1  ;;  %v23595_v61 = vpop.f32.mrb[188].mxu0  ;;  %v20353_v29 = vld [vmem:[%s25432_s3 + $0x28] sm:$0xff]  }
 0x505   :  { %25634 = vst [vmem:[#allocation47_spill] sm:$0xff] %v23584_v31  ;;  %25635 = vst [vmem:[#allocation48_spill] sm:$0xff] %v23586_v15  ;;  %v4898_v16 = vadd.f32 %v23341_v2, %v4672_v39  ;;  %v4674_v4 = vpop.f32.mrb[23].mxu1  ;;  %18183 = vmatpush3.bf16.msra.mxu0 %v20350_v41  ;;  %v23590_v30 = vpack.c.bf16 %v4895_v22, %v4887_v35  ;;  %v5116_v53 = vrot.slane %v4895_v22, 1  ;;  %v5496_v27 = vrot.slane %v4895_v22, 2 }
 0x506   :  { %18184 = vmatprep.subr.bf16.mxu0 %v20351_v58  ;;  %v5747_v57 = vrot.slane %v4895_v22, 3  ;;  %v5998_v5 = vrot.slane %v4895_v22, 4 }
 0x507   :  { %v5117_v47 = vrot.slane %v4898_v16, 1  ;;  %v5497_v15 = vrot.slane %v4898_v16, 2  ;;  %v5748_v33 = vrot.slane %v4898_v16, 3  ;;  %v5999_v40 = vrot.slane %v4898_v16, 4  ;;  %v23606_v16 = vpop.f32.mrb[189].mxu0 }
 0x509   :  { %v5118_v2 = vsel %vm1782_vm1, %v5116_v53, %v5117_v47  ;;  %18185 = vmatpush3.bf16.msra.mxu0 %v20351_v58  ;;  %v5498_v41 = vsel %vm5480_vm2, %v5496_v27, %v5497_v15  ;;  %v5749_v35 = vsel %vm5731_vm3, %v5747_v57, %v5748_v33  ;;  %v6000_v39 = vsel %vm5982_vm4, %v5998_v5, %v5999_v40  ;;  %v23615_v57 = vpop.f32.mrb[190].mxu0 }
 0x50a   :  { %v4677_v4 = vpop.f32.mrb[24].mxu1  ;;  %v23601_v31 = vpack.c.bf16 %v5118_v2, %v5115_v6  ;;  %18186 = vmatprep.subr.bf16.mxu0 %v20352_v37  ;;  %v23608_v1 = vpack.c.bf16 %v5498_v41, %v5495_v63  ;;  %v23610_v53 = vpack.c.bf16 %v5749_v35, %v5746_v10  ;;  %v23612_v58 = vpack.c.bf16 %v6000_v39, %v5997_v18  ;;  %v23618_v5 = vpop.f32.mrb[191].mxu0  ;;  %v20354_v63 = vld [vmem:[%s25432_s3 + $0x30] sm:$0xff]  }
 0x50b   :  { %v4903_v15 = vadd.f32 %v23356_v7, %v4677_v4  ;;  %v4679_v27 = vpop.f32.mrb[25].mxu1 }
 0x50c   :  { %25636 = vst [vmem:[#allocation45_spill] sm:$0xff] %v23601_v31  ;;  %25637 = vst [vmem:[#allocation49_spill] sm:$0xff] %v23608_v1  ;;  %v4680_v6 = vpop.f32.mrb[26].mxu1  ;;  %18166 = vmatprep.mubr.bf16.mxu0 %v23601_v31 }
 0x50d   :  { %25638 = vst [vmem:[#allocation28_spill] sm:$0xff] %v23610_v53  ;;  %25639 = vst [vmem:[#allocation30_spill] sm:$0xff] %v23612_v58  ;;  %v4906_v47 = vadd.f32 %v23366_v51, %v4680_v6  ;;  %v4682_v33 = vpop.f32.mrb[27].mxu1  ;;  %v5119_v40 = vrot.slane %v4903_v15, 1  ;;  %18187 = vmatpush3.bf16.msra.mxu0 %v20352_v37  ;;  %v5499_v10 = vrot.slane %v4903_v15, 2  ;;  %v5750_v7 = vrot.slane %v4903_v15, 3 }
 0x50e   :  { %18188 = vmatprep.subr.bf16.mxu0 %v20353_v29  ;;  %v6001_v18 = vrot.slane %v4903_v15, 4  ;;  %v23624_v4 = vpack.c.bf16 %v4903_v15, %v4895_v22  ;;  %v20355_v22 = vld [vmem:[%s25432_s3 + $0x38] sm:$0xff]  }
 0x50f   :  { %v5120_v27 = vrot.slane %v4906_v47, 1  ;;  %v5500_v58 = vrot.slane %v4906_v47, 2  ;;  %v5751_v31 = vrot.slane %v4906_v47, 3  ;;  %v6002_v53 = vrot.slane %v4906_v47, 4 }
 0x510   :  { %25640 = vst [vmem:[#allocation34_spill] sm:$0xff] %v23624_v4 }
 0x511   :  { %v5121_v1 = vsel %vm1782_vm1, %v5119_v40, %v5120_v27  ;;  %18189 = vmatpush3.bf16.msra.mxu0 %v20353_v29  ;;  %v5501_v51 = vsel %vm5480_vm2, %v5499_v10, %v5500_v58  ;;  %v5752_v37 = vsel %vm5731_vm3, %v5750_v7, %v5751_v31  ;;  %v6003_v6 = vsel %vm5982_vm4, %v6001_v18, %v6002_v53 }
 0x512   :  { %v4685_v33 = vpop.f32.mrb[28].mxu1  ;;  %18190 = vmatprep.subr.bf16.mxu0 %v20354_v63  ;;  %v23633_v4 = vpack.c.bf16 %v5121_v1, %v5118_v2  ;;  %v23635_v49 = vpack.c.bf16 %v5501_v51, %v5498_v41  ;;  %v23637_v47 = vpack.c.bf16 %v5752_v37, %v5749_v35  ;;  %v23639_v40 = vpack.c.bf16 %v6003_v6, %v6000_v39  ;;  %v23648_v2 = vld [vmem:[%s25432_s3 + $0x80] sm:$0xff]  }
 0x513   :  { %v4911_v29 = vadd.f32 %v23354_v56, %v4685_v33  ;;  %v4687_v58 = vpop.f32.mrb[29].mxu1 }
 0x514   :  { %25641 = vst [vmem:[#allocation38_spill] sm:$0xff] %v23633_v4  ;;  %25642 = vst [vmem:[#allocation42_spill] sm:$0xff] %v23635_v49  ;;  %v4688_v31 = vpop.f32.mrb[30].mxu1 }
 0x515   :  { %25643 = vst [vmem:[#allocation46_spill] sm:$0xff] %v23637_v47  ;;  %25644 = vst [vmem:[#allocation50_spill] sm:$0xff] %v23639_v40  ;;  %v4914_v53 = vadd.f32 %v23361_v12, %v4688_v31  ;;  %v4690_v10 = vpop.f32.mrb[31].mxu1  ;;  %18191 = vmatpush3.bf16.msra.mxu0 %v20354_v63  ;;  %v23643_v7 = vpack.c.bf16 %v4911_v29, %v4903_v15  ;;  %v5122_v18 = vrot.slane %v4911_v29, 1  ;;  %v5502_v41 = vrot.slane %v4911_v29, 2 }
 0x516   :  { %18192 = vmatprep.subr.bf16.mxu0 %v20355_v22  ;;  %v5753_v35 = vrot.slane %v4911_v29, 3  ;;  %v6004_v39 = vrot.slane %v4911_v29, 4 }
 0x517   :  { %v5123_v27 = vrot.slane %v4914_v53, 1  ;;  %v5503_v56 = vrot.slane %v4914_v53, 2  ;;  %v5754_v33 = vrot.slane %v4914_v53, 3  ;;  %v6005_v58 = vrot.slane %v4914_v53, 4 }
 0x519   :  { %v5124_v12 = vsel %vm1782_vm1, %v5122_v18, %v5123_v27  ;;  %18193 = vmatpush3.bf16.msra.mxu0 %v20355_v22  ;;  %v5504_v15 = vsel %vm5480_vm2, %v5502_v41, %v5503_v56  ;;  %v5755_v63 = vsel %vm5731_vm3, %v5753_v35, %v5754_v33  ;;  %v6006_v31 = vsel %vm5982_vm4, %v6004_v39, %v6005_v58 }
 0x51a   :  { %v4693_v10 = vpop.f32.mrb[32].mxu1  ;;  %v23654_v40 = vpack.c.bf16 %v5124_v12, %v5121_v1  ;;  %18210 = vmatprep.subr.bf16.mxu0 %v23648_v2  ;;  %v23657_v47 = vpack.c.bf16 %v5504_v15, %v5501_v51  ;;  %v23659_v49 = vpack.c.bf16 %v5755_v63, %v5752_v37  ;;  %v23661_v4 = vpack.c.bf16 %v6006_v31, %v6003_v6 }
 0x51b   :  { %v4919_v53 = vadd.f32 %v23376_v52, %v4693_v10  ;;  %v4695_v22 = vpop.f32.mrb[33].mxu1 }
 0x51c   :  { %25645 = vst [vmem:[#allocation51_spill] sm:$0xff] %v23654_v40  ;;  %25646 = vst [vmem:[#allocation52_spill] sm:$0xff] %v23661_v4  ;;  %v4696_v18 = vpop.f32.mrb[34].mxu1  ;;  %18167 = vmatmul.mubr.bf16.gmra.mrb[196].mxu0 %v23654_v40 }
 0x51d   :  { %v4922_v41 = vadd.f32 %v23386_v19, %v4696_v18  ;;  %v4698_v35 = vpop.f32.mrb[35].mxu1  ;;  %v23666_v39 = vpack.c.bf16 %v4919_v53, %v4911_v29  ;;  %v6423_v1 = vrot.slane %v4919_v53, 1  ;;  %v6617_v27 = vrot.slane %v4919_v53, 2 }
 0x51e   :  { %v6811_v56 = vrot.slane %v4919_v53, 3  ;;  %v7005_v51 = vrot.slane %v4919_v53, 4 }
 0x51f   :  { %25647 = vst [vmem:[#allocation53_spill] sm:$0xff] %v23666_v39  ;;  %v6424_v33 = vrot.slane %v4922_v41, 1  ;;  %v6618_v37 = vrot.slane %v4922_v41, 2  ;;  %v6812_v58 = vrot.slane %v4922_v41, 3  ;;  %v7006_v6 = vrot.slane %v4922_v41, 4 }
 0x521   :  { %v6425_v4 = vsel %vm1782_vm1, %v6423_v1, %v6424_v33  ;;  %v6619_v52 = vsel %vm5480_vm2, %v6617_v27, %v6618_v37  ;;  %v6813_v10 = vsel %vm5731_vm3, %v6811_v56, %v6812_v58  ;;  %v7007_v22 = vsel %vm5982_vm4, %v7005_v51, %v7006_v6 }
 0x522   :  { %v4701_v19 = vpop.f32.mrb[36].mxu1  ;;  %v23672_v18 = vpack.c.bf16 %v6425_v4, %v5124_v12  ;;  %v23674_v29 = vpack.c.bf16 %v6619_v52, %v5504_v15  ;;  %v23676_v35 = vpack.c.bf16 %v6813_v10, %v5755_v63  ;;  %v23678_v40 = vpack.c.bf16 %v7007_v22, %v6006_v31 }
 0x523   :  { %v23681_v39 = vadd.f32 %v23374_v8, %v4701_v19  ;;  %v4703_v41 = vpop.f32.mrb[37].mxu1 }
 0x524   :  { %25648 = vst [vmem:[#allocation54_spill] sm:$0xff] %v23672_v18  ;;  %25649 = vst [vmem:[#allocation55_spill] sm:$0xff] %v23674_v29  ;;  %v4704_v1 = vpop.f32.mrb[38].mxu1 }
 0x525   :  { %25650 = vst [vmem:[#allocation56_spill] sm:$0xff] %v23676_v35  ;;  %25651 = vst [vmem:[#allocation57_spill] sm:$0xff] %v23678_v40  ;;  %v4930_v27 = vadd.f32 %v23381_v11, %v4704_v1  ;;  %v4706_v33 = vpop.f32.mrb[39].mxu1  ;;  %v23685_v56 = vpack.c.bf16 %v23681_v39, %v4919_v53  ;;  %v7383_v12 = vrot.slane %v23681_v39, 1  ;;  %v7571_v15 = vrot.slane %v23681_v39, 2 }
 0x526   :  { %25652 = vst [vmem:[#allocation58_spill] sm:$0xff] %v23681_v39  ;;  %v7759_v63 = vrot.slane %v23681_v39, 3  ;;  %v7947_v31 = vrot.slane %v23681_v39, 4 }
 0x527   :  { %25653 = vst [vmem:[#allocation59_spill] sm:$0xff] %v23685_v56  ;;  %v7384_v51 = vrot.slane %v4930_v27, 1  ;;  %v7572_v37 = vrot.slane %v4930_v27, 2  ;;  %v7760_v8 = vrot.slane %v4930_v27, 3  ;;  %v7948_v58 = vrot.slane %v4930_v27, 4 }
 0x529   :  { %v23692_v6 = vsel %vm1782_vm1, %v7383_v12, %v7384_v51  ;;  %v23695_v11 = vsel %vm5480_vm2, %v7571_v15, %v7572_v37  ;;  %v23698_v53 = vsel %vm5731_vm3, %v7759_v63, %v7760_v8  ;;  %v23701_v19 = vsel %vm5982_vm4, %v7947_v31, %v7948_v58 }
 0x52a   :  { %25654 = vst [vmem:[#allocation60_spill] sm:$0xff] %v23692_v6  ;;  %25655 = vst [vmem:[#allocation61_spill] sm:$0xff] %v23695_v11  ;;  %v4709_v41 = vpop.f32.mrb[40].mxu1  ;;  %v23704_v1 = vpack.c.bf16 %v23692_v6, %v6425_v4  ;;  %v23707_v33 = vpack.c.bf16 %v23695_v11, %v6619_v52  ;;  %v23710_v27 = vpack.c.bf16 %v23698_v53, %v6813_v10 }
 0x52b   :  { %25656 = vst [vmem:[#allocation62_spill] sm:$0xff] %v23698_v53  ;;  %25657 = vst [vmem:[#allocation63_spill] sm:$0xff] %v23701_v19  ;;  %v23713_v12 = vpack.c.bf16 %v23701_v19, %v7007_v22  ;;  %v23716_v15 = vadd.f32 %v23396_v9, %v4709_v41  ;;  %v4711_v63 = vpop.f32.mrb[41].mxu1 }
 0x52c   :  { %25658 = vst [vmem:[#allocation64_spill] sm:$0xff] %v23704_v1  ;;  %25659 = vst [vmem:[#allocation65_spill] sm:$0xff] %v23707_v33  ;;  %v4712_v51 = vpop.f32.mrb[42].mxu1 }
 0x52d   :  { %25660 = vst [vmem:[#allocation66_spill] sm:$0xff] %v23710_v27  ;;  %25661 = vst [vmem:[#allocation67_spill] sm:$0xff] %v23713_v12  ;;  %v4938_v31 = vadd.f32 %v23406_v48, %v4712_v51  ;;  %v4714_v37 = vpop.f32.mrb[43].mxu1  ;;  %v8319_v52 = vrot.slane %v23716_v15, 1  ;;  %v8507_v8 = vrot.slane %v23716_v15, 2  ;;  %v8695_v10 = vrot.slane %v23716_v15, 3 }
 0x52e   :  { %25662 = vst [vmem:[#allocation68_spill] sm:$0xff] %v23716_v15  ;;  %v8883_v22 = vrot.slane %v23716_v15, 4 }
 0x52f   :  { %v8320_v58 = vrot.slane %v4938_v31, 1  ;;  %v8508_v12 = vrot.slane %v4938_v31, 2  ;;  %v8696_v9 = vrot.slane %v4938_v31, 3  ;;  %v8884_v41 = vrot.slane %v4938_v31, 4 }
 0x531   :  { %v23726_v63 = vsel %vm1782_vm1, %v8319_v52, %v8320_v58  ;;  %v23729_v48 = vsel %vm5480_vm2, %v8507_v8, %v8508_v12  ;;  %v23732_v51 = vsel %vm5731_vm3, %v8695_v10, %v8696_v9  ;;  %v23735_v37 = vsel %vm5982_vm4, %v8883_v22, %v8884_v41 }
 0x532   :  { %25663 = vst [vmem:[#allocation69_spill] sm:$0xff] %v23726_v63  ;;  %25664 = vst [vmem:[#allocation70_spill] sm:$0xff] %v23729_v48  ;;  %v4717_v4 = vpop.f32.mrb[44].mxu1 }
 0x533   :  { %25665 = vst [vmem:[#allocation71_spill] sm:$0xff] %v23732_v51  ;;  %25666 = vst [vmem:[#allocation72_spill] sm:$0xff] %v23735_v37  ;;  %v23746_v52 = vadd.f32 %v23394_v44, %v4717_v4  ;;  %v4719_v8 = vpop.f32.mrb[45].mxu1 }
 0x534   :  { %v4720_v10 = vpop.f32.mrb[46].mxu1 }
 0x535   :  { %25667 = vst [vmem:[#allocation73_spill] sm:$0xff] %v23746_v52  ;;  %v4946_v22 = vadd.f32 %v23401_v28, %v4720_v10  ;;  %v4722_v58 = vpop.f32.mrb[47].mxu1  ;;  %v9255_v41 = vrot.slane %v23746_v52, 1  ;;  %v9443_v27 = vrot.slane %v23746_v52, 2  ;;  %v9631_v31 = vrot.slane %v23746_v52, 3 }
 0x536   :  { %v9819_v39 = vrot.slane %v23746_v52, 4 }
 0x537   :  { %v9256_v12 = vrot.slane %v4946_v22, 1  ;;  %v9444_v19 = vrot.slane %v4946_v22, 2  ;;  %v9632_v44 = vrot.slane %v4946_v22, 3  ;;  %v9820_v4 = vrot.slane %v4946_v22, 4 }
 0x539   :  { %v23756_v8 = vsel %vm1782_vm1, %v9255_v41, %v9256_v12  ;;  %v23759_v28 = vsel %vm5480_vm2, %v9443_v27, %v9444_v19  ;;  %v23762_v10 = vsel %vm5731_vm3, %v9631_v31, %v9632_v44  ;;  %v23765_v58 = vsel %vm5982_vm4, %v9819_v39, %v9820_v4 }
 0x53a   :  { %25668 = vst [vmem:[#allocation74_spill] sm:$0xff] %v23756_v8  ;;  %25669 = vst [vmem:[#allocation75_spill] sm:$0xff] %v23759_v28  ;;  %v4725_v9 = vpop.f32.mrb[48].mxu1 }
 0x53b   :  { %25670 = vst [vmem:[#allocation76_spill] sm:$0xff] %v23762_v10  ;;  %25671 = vst [vmem:[#allocation77_spill] sm:$0xff] %v23765_v58  ;;  %v23776_v27 = vadd.f32 %v23416_v59, %v4725_v9  ;;  %v4727_v31 = vpop.f32.mrb[49].mxu1 }
 0x53c   :  { %v4728_v22 = vpop.f32.mrb[50].mxu1 }
 0x53d   :  { %v4954_v39 = vadd.f32 %v23423_v60, %v4728_v22  ;;  %v4730_v41 = vpop.f32.mrb[51].mxu1  ;;  %v5125_v44 = vrot.slane %v23776_v27, 1  ;;  %v5505_v4 = vrot.slane %v23776_v27, 2  ;;  %v5756_v53 = vrot.slane %v23776_v27, 3 }
 0x53e   :  { %v6007_v52 = vrot.slane %v23776_v27, 4 }
 0x53f   :  { %v5126_v12 = vrot.slane %v4954_v39, 1  ;;  %v5506_v10 = vrot.slane %v4954_v39, 2  ;;  %v5757_v28 = vrot.slane %v4954_v39, 3  ;;  %v6008_v19 = vrot.slane %v4954_v39, 4 }
 0x541   :  { %v5127_v59 = vsel %vm1782_vm1, %v5125_v44, %v5126_v12  ;;  %v23785_v9 = vsel %vm5480_vm2, %v5505_v4, %v5506_v10  ;;  %v23788_v60 = vsel %vm5731_vm3, %v5756_v53, %v5757_v28  ;;  %v23791_v31 = vsel %vm5982_vm4, %v6007_v52, %v6008_v19 }
 0x542   :  { %v4733_v22 = vpop.f32.mrb[52].mxu1 }
 0x543   :  { %v23794_v41 = vadd.f32 %v23414_v42, %v4733_v22  ;;  %v4735_v58 = vpop.f32.mrb[53].mxu1 }
 0x544   :  { %v4736_v8 = vpop.f32.mrb[54].mxu1 }
 0x545   :  { %v4962_v37 = vadd.f32 %v23421_v21, %v4736_v8  ;;  %v4738_v39 = vpop.f32.mrb[55].mxu1  ;;  %v5128_v10 = vrot.slane %v23794_v41, 1  ;;  %v5508_v53 = vrot.slane %v23794_v41, 2  ;;  %v5759_v28 = vrot.slane %v23794_v41, 3 }
 0x546   :  { %v6010_v52 = vrot.slane %v23794_v41, 4 }
 0x547   :  { %v5129_v19 = vrot.slane %v4962_v37, 1  ;;  %v5509_v44 = vrot.slane %v4962_v37, 2  ;;  %v5760_v42 = vrot.slane %v4962_v37, 3  ;;  %v6011_v4 = vrot.slane %v4962_v37, 4 }
 0x549   :  { %v23804_v58 = vsel %vm1782_vm1, %v5128_v10, %v5129_v19  ;;  %v23807_v21 = vsel %vm5480_vm2, %v5508_v53, %v5509_v44  ;;  %v23810_v8 = vsel %vm5731_vm3, %v5759_v28, %v5760_v42  ;;  %v23813_v22 = vsel %vm5982_vm4, %v6010_v52, %v6011_v4 }
 0x54a   :  { %25672 = vst [vmem:[#allocation78_spill] sm:$0xff] %v23804_v58  ;;  %v4741_v39 = vpop.f32.mrb[56].mxu1  ;;  %v5169_v12 = vpack.c.bf16 %v23804_v58, %v5127_v59 }
 0x54b   :  { %v23823_v53 = vadd.f32 %v23427_v38, %v4741_v39  ;;  %v4743_v28 = vpop.f32.mrb[57].mxu1 }
 0x54c   :  { %v4744_v19 = vpop.f32.mrb[58].mxu1  ;;  %18170 = vmatprep.mubr.bf16.mxu0 %v5169_v12 }
 0x54d   :  { %v4970_v52 = vadd.f32 %v23431_v25, %v4744_v19  ;;  %v4746_v44 = vpop.f32.mrb[59].mxu1  ;;  %v5131_v59 = vrot.slane %v23823_v53, 1  ;;  %v5511_v42 = vrot.slane %v23823_v53, 2  ;;  %v5762_v4 = vrot.slane %v23823_v53, 3 }
 0x54e   :  { %v6013_v37 = vrot.slane %v23823_v53, 4 }
 0x54f   :  { %v5132_v51 = vrot.slane %v4970_v52, 1  ;;  %v5512_v38 = vrot.slane %v4970_v52, 2  ;;  %v5763_v39 = vrot.slane %v4970_v52, 3  ;;  %v6014_v28 = vrot.slane %v4970_v52, 4 }
 0x551   :  { %v23833_v12 = vsel %vm1782_vm1, %v5131_v59, %v5132_v51  ;;  %v23836_v25 = vsel %vm5480_vm2, %v5511_v42, %v5512_v38  ;;  %v23839_v19 = vsel %vm5731_vm3, %v5762_v4, %v5763_v39  ;;  %v23842_v44 = vsel %vm5982_vm4, %v6013_v37, %v6014_v28 }
 0x552   :  { %25673 = vst [vmem:[#allocation79_spill] sm:$0xff] %v23833_v12  ;;  %25674 = vst [vmem:[#allocation80_spill] sm:$0xff] %v23836_v25  ;;  %v4749_v11 = vpop.f32.mrb[60].mxu1 }
 0x553   :  { %25675 = vst [vmem:[#allocation81_spill] sm:$0xff] %v23839_v19  ;;  %25676 = vst [vmem:[#allocation82_spill] sm:$0xff] %v23842_v44  ;;  %v4975_v59 = vadd.f32 %v23425_v46, %v4749_v11  ;;  %v4751_v42 = vpop.f32.mrb[61].mxu1 }
 0x554   :  { %v4752_v4 = vpop.f32.mrb[62].mxu1 }
 0x555   :  { %v4978_v37 = vadd.f32 %v23429_v23, %v4752_v4  ;;  %v4754_v38 = vpop.f32.mrb[63].mxu1  ;;  %v23855_v39 = vpack.c.bf16 %v4975_v59, %v23823_v53  ;;  %v5134_v28 = vrot.slane %v4975_v59, 1  ;;  %v5514_v10 = vrot.slane %v4975_v59, 2 }
 0x556   :  { %v5765_v6 = vrot.slane %v4975_v59, 3  ;;  %v6016_v48 = vrot.slane %v4975_v59, 4 }
 0x557   :  { %v5135_v63 = vrot.slane %v4978_v37, 1  ;;  %v5515_v15 = vrot.slane %v4978_v37, 2  ;;  %v5766_v51 = vrot.slane %v4978_v37, 3  ;;  %v6017_v33 = vrot.slane %v4978_v37, 4 }
 0x559   :  { %v5136_v52 = vsel %vm1782_vm1, %v5134_v28, %v5135_v63  ;;  %v5516_v46 = vsel %vm5480_vm2, %v5514_v10, %v5515_v15  ;;  %v5767_v11 = vsel %vm5731_vm3, %v5765_v6, %v5766_v51  ;;  %v6018_v23 = vsel %vm5982_vm4, %v6016_v48, %v6017_v33 }
 0x55a   :  { %v4757_v42 = vpop.f32.mrb[64].mxu1  ;;  %v23862_v4 = vpack.c.bf16 %v5136_v52, %v23833_v12  ;;  %v23865_v38 = vpack.c.bf16 %v5516_v46, %v23836_v25  ;;  %v23868_v1 = vpack.c.bf16 %v5767_v11, %v23839_v19  ;;  %v23871_v37 = vpack.c.bf16 %v6018_v23, %v23842_v44 }
 0x55b   :  { %v4983_v63 = vadd.f32 %v23435_v20, %v4757_v42  ;;  %v4759_v15 = vpop.f32.mrb[65].mxu1 }
 0x55c   :  { %25677 = vst [vmem:[#allocation83_spill] sm:$0xff] %v23862_v4  ;;  %v4760_v10 = vpop.f32.mrb[66].mxu1  ;;  %18171 = vmatmul.mubr.bf16.gmra.mrb[200].mxu0 %v23862_v4 }
 0x55d   :  { %v4986_v6 = vadd.f32 %v23442_v50, %v4760_v10  ;;  %v4762_v33 = vpop.f32.mrb[67].mxu1  ;;  %v5137_v48 = vrot.slane %v4983_v63, 1  ;;  %v5517_v51 = vrot.slane %v4983_v63, 2  ;;  %v5768_v28 = vrot.slane %v4983_v63, 3 }
 0x55e   :  { %v6019_v56 = vrot.slane %v4983_v63, 4  ;;  %v23876_v40 = vpack.c.bf16 %v4983_v63, %v4975_v59 }
 0x55f   :  { %v5138_v19 = vrot.slane %v4986_v6, 1  ;;  %v5518_v35 = vrot.slane %v4986_v6, 2  ;;  %v5769_v25 = vrot.slane %v4986_v6, 3  ;;  %v6020_v44 = vrot.slane %v4986_v6, 4 }
 0x561   :  { %v5139_v29 = vsel %vm1782_vm1, %v5137_v48, %v5138_v19  ;;  %v5519_v20 = vsel %vm5480_vm2, %v5517_v51, %v5518_v35  ;;  %v5770_v42 = vsel %vm5731_vm3, %v5768_v28, %v5769_v25  ;;  %v6021_v15 = vsel %vm5982_vm4, %v6019_v56, %v6020_v44 }
 0x562   :  { %v4765_v50 = vpop.f32.mrb[68].mxu1  ;;  %v23882_v10 = vpack.c.bf16 %v5139_v29, %v5136_v52  ;;  %v23884_v33 = vpack.c.bf16 %v5519_v20, %v5516_v46  ;;  %v23886_v4 = vpack.c.bf16 %v5770_v42, %v5767_v11  ;;  %v23888_v59 = vpack.c.bf16 %v6021_v15, %v6018_v23 }
 0x563   :  { %v4991_v58 = vadd.f32 %v23433_v26, %v4765_v50  ;;  %v4767_v6 = vpop.f32.mrb[69].mxu1 }
 0x564   :  { %25678 = vst [vmem:[#allocation84_spill] sm:$0xff] %v23882_v10  ;;  %25679 = vst [vmem:[#allocation85_spill] sm:$0xff] %v23884_v33  ;;  %v4768_v12 = vpop.f32.mrb[70].mxu1 }
 0x565   :  { %25680 = vst [vmem:[#allocation86_spill] sm:$0xff] %v23886_v4  ;;  %25681 = vst [vmem:[#allocation87_spill] sm:$0xff] %v23888_v59  ;;  %v4994_v19 = vadd.f32 %v23440_v62, %v4768_v12  ;;  %v4770_v35 = vpop.f32.mrb[71].mxu1  ;;  %v23892_v48 = vpack.c.bf16 %v4991_v58, %v4983_v63  ;;  %v5140_v25 = vrot.slane %v4991_v58, 1  ;;  %v5520_v56 = vrot.slane %v4991_v58, 2 }
 0x566   :  { %v5771_v44 = vrot.slane %v4991_v58, 3  ;;  %v6022_v52 = vrot.slane %v4991_v58, 4 }
 0x567   :  { %v5141_v51 = vrot.slane %v4994_v19, 1  ;;  %v5521_v46 = vrot.slane %v4994_v19, 2  ;;  %v5772_v28 = vrot.slane %v4994_v19, 3  ;;  %v6023_v11 = vrot.slane %v4994_v19, 4 }
 0x569   :  { %v5142_v23 = vsel %vm1782_vm1, %v5140_v25, %v5141_v51  ;;  %v5522_v59 = vsel %vm5480_vm2, %v5520_v56, %v5521_v46  ;;  %v5773_v26 = vsel %vm5731_vm3, %v5771_v44, %v5772_v28  ;;  %v6024_v50 = vsel %vm5982_vm4, %v6022_v52, %v6023_v11 }
 0x56a   :  { %v4773_v62 = vpop.f32.mrb[72].mxu1  ;;  %v23898_v12 = vpack.c.bf16 %v5142_v23, %v5139_v29  ;;  %v23900_v63 = vpack.c.bf16 %v5522_v59, %v5519_v20  ;;  %v23902_v6 = vpack.c.bf16 %v5773_v26, %v5770_v42  ;;  %v23904_v35 = vpack.c.bf16 %v6024_v50, %v6021_v15 }
 0x56b   :  { %v4999_v4 = vadd.f32 %v23490_v45, %v4773_v62  ;;  %v4775_v19 = vpop.f32.mrb[73].mxu1 }
 0x56c   :  { %25682 = vst [vmem:[#allocation88_spill] sm:$0xff] %v23898_v12  ;;  %v4776_v33 = vpop.f32.mrb[74].mxu1  ;;  %18174 = vmatprep.mubr.bf16.mxu0 %v23898_v12 }
 0x56d   :  { %v5002_v25 = vadd.f32 %v23503_v0, %v4776_v33  ;;  %v4778_v56 = vpop.f32.mrb[75].mxu1  ;;  %v5143_v44 = vrot.slane %v4999_v4, 1  ;;  %v5523_v52 = vrot.slane %v4999_v4, 2  ;;  %v5774_v51 = vrot.slane %v4999_v4, 3 }
 0x56e   :  { %v6025_v29 = vrot.slane %v4999_v4, 4  ;;  %v23909_v46 = vpack.c.bf16 %v4999_v4, %v4991_v58 }
 0x56f   :  { %v5144_v20 = vrot.slane %v5002_v25, 1  ;;  %v5524_v42 = vrot.slane %v5002_v25, 2  ;;  %v5775_v28 = vrot.slane %v5002_v25, 3  ;;  %v6026_v15 = vrot.slane %v5002_v25, 4 }
 0x571   :  { %v5145_v11 = vsel %vm1782_vm1, %v5143_v44, %v5144_v20  ;;  %v5525_v45 = vsel %vm5480_vm2, %v5523_v52, %v5524_v42  ;;  %v5776_v62 = vsel %vm5731_vm3, %v5774_v51, %v5775_v28  ;;  %v6027_v19 = vsel %vm5982_vm4, %v6025_v29, %v6026_v15 }
 0x572   :  { %v4781_v0 = vpop.f32.mrb[76].mxu1  ;;  %v23915_v33 = vpack.c.bf16 %v5145_v11, %v5142_v23  ;;  %v23917_v56 = vpack.c.bf16 %v5525_v45, %v5522_v59  ;;  %v23919_v12 = vpack.c.bf16 %v5776_v62, %v5773_v26  ;;  %v23921_v58 = vpack.c.bf16 %v6027_v19, %v6024_v50 }
 0x573   :  { %v5007_v10 = vadd.f32 %v23475_v32, %v4781_v0  ;;  %v4783_v25 = vpop.f32.mrb[77].mxu1 }
 0x574   :  { %25683 = vst [vmem:[#allocation89_spill] sm:$0xff] %v23917_v56  ;;  %25684 = vst [vmem:[#allocation90_spill] sm:$0xff] %v23919_v12  ;;  %v4784_v18 = vpop.f32.mrb[78].mxu1 }
 0x575   :  { %25685 = vst [vmem:[#allocation91_spill] sm:$0xff] %v23921_v58  ;;  %v5010_v44 = vadd.f32 %v23501_v24, %v4784_v18  ;;  %v4786_v52 = vpop.f32.mrb[79].mxu1  ;;  %v23925_v20 = vpack.c.bf16 %v5007_v10, %v4999_v4  ;;  %v5146_v51 = vrot.slane %v5007_v10, 1  ;;  %v5526_v29 = vrot.slane %v5007_v10, 2 }
 0x576   :  { %v5777_v42 = vrot.slane %v5007_v10, 3  ;;  %v6028_v23 = vrot.slane %v5007_v10, 4 }
 0x577   :  { %v5147_v28 = vrot.slane %v5010_v44, 1  ;;  %v5527_v59 = vrot.slane %v5010_v44, 2  ;;  %v5778_v15 = vrot.slane %v5010_v44, 3  ;;  %v6029_v26 = vrot.slane %v5010_v44, 4 }
 0x579   :  { %v5148_v50 = vsel %vm1782_vm1, %v5146_v51, %v5147_v28  ;;  %v5528_v58 = vsel %vm5480_vm2, %v5526_v29, %v5527_v59  ;;  %v5779_v32 = vsel %vm5731_vm3, %v5777_v42, %v5778_v15  ;;  %v6030_v0 = vsel %vm5982_vm4, %v6028_v23, %v6029_v26 }
 0x57a   :  { %v4789_v24 = vpop.f32.mrb[80].mxu1  ;;  %v23931_v18 = vpack.c.bf16 %v5148_v50, %v5145_v11  ;;  %v23933_v4 = vpack.c.bf16 %v5528_v58, %v5525_v45  ;;  %v23935_v25 = vpack.c.bf16 %v5779_v32, %v5776_v62  ;;  %v23937_v52 = vpack.c.bf16 %v6030_v0, %v6027_v19 }
 0x57b   :  { %v5015_v12 = vadd.f32 %v23549_v43, %v4789_v24  ;;  %v4791_v44 = vpop.f32.mrb[81].mxu1  ;;  %v25687_v42 = vpack.c.bf16 %v23460_v34, %v23438_v13 }
 0x57c   :  { %25686 = vst [vmem:[#allocation92_spill] sm:$0xff] %v23931_v18  ;;  %v4792_v56 = vpop.f32.mrb[82].mxu1  ;;  %18175 = vmatmul.mubr.bf16.gmra.mrb[204].mxu0 %v23931_v18  ;;  %v20359_v18 = vld [vmem:[%s25432_s3 + $0x98] sm:$0xff]  }
 0x57d   :  { %v5018_v51 = vadd.f32 %v23564_v17, %v4792_v56  ;;  %v4794_v29 = vpop.f32.mrb[83].mxu1  ;;  %18194 = vmatprep.mubr.bf16.mxu0 %v25687_v42  ;;  %v23945_v11 = vpack.c.bf16 %v5015_v12, %v5007_v10  ;;  %v6426_v45 = vrot.slane %v5015_v12, 1  ;;  %v6620_v62 = vrot.slane %v5015_v12, 2  ;;  %v20357_v10 = vld [vmem:[%s25432_s3 + $0x88] sm:$0xff]  }
 0x57e   :  { %v6814_v23 = vrot.slane %v5015_v12, 3  ;;  %v7008_v19 = vrot.slane %v5015_v12, 4 }
 0x57f   :  { %v6427_v28 = vrot.slane %v5018_v51, 1  ;;  %v6621_v59 = vrot.slane %v5018_v51, 2  ;;  %v6815_v43 = vrot.slane %v5018_v51, 3  ;;  %v7009_v15 = vrot.slane %v5018_v51, 4 }
 0x581   :  { %v6428_v26 = vsel %vm1782_vm1, %v6426_v45, %v6427_v28  ;;  %v6622_v24 = vsel %vm5480_vm2, %v6620_v62, %v6621_v59  ;;  %v6816_v17 = vsel %vm5731_vm3, %v6814_v23, %v6815_v43  ;;  %v7010_v56 = vsel %vm5982_vm4, %v7008_v19, %v7009_v15 }
 0x582   :  { %v4797_v13 = vpop.f32.mrb[84].mxu1  ;;  %v23954_v44 = vpack.c.bf16 %v6428_v26, %v5148_v50  ;;  %v23956_v29 = vpack.c.bf16 %v6622_v24, %v5528_v58  ;;  %v23958_v42 = vpack.c.bf16 %v6816_v17, %v5779_v32  ;;  %v23960_v51 = vpack.c.bf16 %v7010_v56, %v6030_v0 }
 0x583   :  { %v23963_v45 = vadd.f32 %v23537_v36, %v4797_v13  ;;  %v4799_v62 = vpop.f32.mrb[85].mxu1  ;;  %v20358_v36 = vld [vmem:[%s25432_s3 + $0x90] sm:$0xff]  }
 0x584   :  { %v4800_v23 = vpop.f32.mrb[86].mxu1  ;;  %18195 = vmatmul.mubr.bf16.vlgmr.msra.gmra.mrb[192].mxu0 %v23535_v3 }
 0x585   :  { %25688 = vst [vmem:[#allocation93_spill] sm:$0xff] %v23963_v45  ;;  %v5026_v19 = vadd.f32 %v23561_v54, %v4800_v23  ;;  %v4802_v28 = vpop.f32.mrb[87].mxu1  ;;  %18198 = vmatprep.mubr.bf16.mxu0 %v23590_v30  ;;  %18211 = vmatpush3.bf16.msra.mxu0 %v23648_v2  ;;  %v23970_v58 = vpack.c.bf16 %v23963_v45, %v5015_v12  ;;  %v7386_v50 = vrot.slane %v23963_v45, 1  ;;  %v7574_v32 = vrot.slane %v23963_v45, 2 }
 0x586   :  { %18212 = vmatprep.subr.bf16.mxu0 %v20357_v10  ;;  %v7762_v0 = vrot.slane %v23963_v45, 3  ;;  %v7950_v54 = vrot.slane %v23963_v45, 4 }
 0x587   :  { %v7387_v59 = vrot.slane %v5026_v19, 1  ;;  %v7575_v43 = vrot.slane %v5026_v19, 2  ;;  %v7763_v15 = vrot.slane %v5026_v19, 3  ;;  %v7951_v2 = vrot.slane %v5026_v19, 4 }
 0x589   :  { %18213 = vmatpush3.bf16.msra.mxu0 %v20357_v10  ;;  %v23980_v12 = vsel %vm1782_vm1, %v7386_v50, %v7387_v59  ;;  %v23983_v13 = vsel %vm5480_vm2, %v7574_v32, %v7575_v43  ;;  %v23986_v62 = vsel %vm5731_vm3, %v7762_v0, %v7763_v15  ;;  %v23989_v23 = vsel %vm5982_vm4, %v7950_v54, %v7951_v2 }
 0x58a   :  { %25689 = vst [vmem:[#allocation94_spill] sm:$0xff] %v23983_v13  ;;  %25690 = vst [vmem:[#allocation95_spill] sm:$0xff] %v23986_v62  ;;  %v4805_v28 = vpop.f32.mrb[88].mxu1  ;;  %18214 = vmatprep.subr.bf16.mxu0 %v20358_v36  ;;  %v23995_v10 = vpack.c.bf16 %v23980_v12, %v6428_v26  ;;  %v23998_v19 = vpack.c.bf16 %v23983_v13, %v6622_v24  ;;  %v24001_v50 = vpack.c.bf16 %v23986_v62, %v6816_v17  ;;  %v25741_v62 = vld [vmem:[#allocation85_spill] sm:$0xff]  ;;  %v25746_v13 = vld [vmem:[#allocation46_spill] sm:$0xff] }
 0x58b   :  { %25691 = vst [vmem:[#allocation96_spill] sm:$0xff] %v23989_v23  ;;  %v24004_v32 = vpack.c.bf16 %v23989_v23, %v7010_v56  ;;  %v24007_v0 = vadd.f32 %v23606_v16, %v4805_v28  ;;  %v4807_v54 = vpop.f32.mrb[89].mxu1  ;;  %v25693_v24 = vpack.c.bf16 %v23794_v41, %v23776_v27  ;;  %v20360_v16 = vld [vmem:[%s25432_s3 + $0xa0] sm:$0xff]  }
 0x58c   :  { %v4808_v59 = vpop.f32.mrb[90].mxu1  ;;  %18199 = vmatmul.mubr.bf16.gmra.mrb[196].mxu0 %v23643_v7 }
 0x58d   :  { %25692 = vst [vmem:[#allocation97_spill] sm:$0xff] %v24004_v32  ;;  %v5034_v43 = vadd.f32 %v23618_v5, %v4808_v59  ;;  %v4810_v26 = vpop.f32.mrb[91].mxu1  ;;  %18202 = vmatprep.mubr.bf16.mxu0 %v25693_v24  ;;  %18215 = vmatpush3.bf16.msra.mxu0 %v20358_v36  ;;  %v8322_v56 = vrot.slane %v24007_v0, 1  ;;  %v8510_v15 = vrot.slane %v24007_v0, 2  ;;  %v8698_v5 = vrot.slane %v24007_v0, 3  ;;  %v20361_v32 = vld [vmem:[%s25432_s3 + $0xa8] sm:$0xff]  }
 0x58e   :  { %18216 = vmatprep.subr.bf16.mxu0 %v20359_v18  ;;  %v8886_v2 = vrot.slane %v24007_v0, 4 }
 0x58f   :  { %v8323_v28 = vrot.slane %v5034_v43, 1  ;;  %v8511_v27 = vrot.slane %v5034_v43, 2  ;;  %v8699_v54 = vrot.slane %v5034_v43, 3  ;;  %v8887_v36 = vrot.slane %v5034_v43, 4 }
 0x591   :  { %18217 = vmatpush3.bf16.msra.mxu0 %v20359_v18  ;;  %v24024_v59 = vsel %vm1782_vm1, %v8322_v56, %v8323_v28  ;;  %v24027_v26 = vsel %vm5480_vm2, %v8510_v15, %v8511_v27  ;;  %v24030_v24 = vsel %vm5731_vm3, %v8698_v5, %v8699_v54  ;;  %v24033_v17 = vsel %vm5982_vm4, %v8886_v2, %v8887_v36  ;;  %v20362_v15 = vld [vmem:[%s25432_s3 + $0xb0] sm:$0xff]  }
 0x592   :  { %25694 = vst [vmem:[#allocation98_spill] sm:$0xff] %v24030_v24  ;;  %25695 = vst [vmem:[#allocation99_spill] sm:$0xff] %v24033_v17  ;;  %v4813_v45 = vpop.f32.mrb[92].mxu1  ;;  %18218 = vmatprep.subr.bf16.mxu0 %v20360_v16  ;;  %v25737_v17 = vld [vmem:[#allocation42_spill] sm:$0xff]  ;;  %v25742_v24 = vld [vmem:[#allocation89_spill] sm:$0xff] }
 0x593   :  { %v24047_v5 = vadd.f32 %v23595_v61, %v4813_v45  ;;  %v4815_v2 = vpop.f32.mrb[93].mxu1 }
 0x594   :  { %v4816_v28 = vpop.f32.mrb[94].mxu1  ;;  %18203 = vmatmul.mubr.bf16.gmra.mrb[200].mxu0 %v23855_v39 }
 0x595   :  { %25696 = vst [vmem:[#allocation100_spill] sm:$0xff] %v24047_v5  ;;  %v5042_v27 = vadd.f32 %v23615_v57, %v4816_v28  ;;  %v4818_v54 = vpop.f32.mrb[95].mxu1  ;;  %18206 = vmatprep.mubr.bf16.mxu0 %v23892_v48  ;;  %18219 = vmatpush3.bf16.msra.mxu0 %v20360_v16  ;;  %v9258_v61 = vrot.slane %v24047_v5, 1  ;;  %v9446_v45 = vrot.slane %v24047_v5, 2  ;;  %v9634_v2 = vrot.slane %v24047_v5, 3 }
 0x596   :  { %18220 = vmatprep.subr.bf16.mxu0 %v20361_v32  ;;  %v9822_v57 = vrot.slane %v24047_v5, 4  ;;  %v20363_v5 = vld [vmem:[%s25432_s3 + $0xb8] sm:$0xff]  }
 0x597   :  { %v9259_v28 = vrot.slane %v5042_v27, 1  ;;  %v9447_v54 = vrot.slane %v5042_v27, 2  ;;  %v9635_v56 = vrot.slane %v5042_v27, 3  ;;  %v9823_v16 = vrot.slane %v5042_v27, 4  ;;  %v25715_v27 = vld [vmem:[#allocation30_spill] sm:$0xff] }
 0x599   :  { %18221 = vmatpush3.bf16.msra.mxu0 %v20361_v32  ;;  %v24062_v36 = vsel %vm1782_vm1, %v9258_v61, %v9259_v28  ;;  %v24065_v43 = vsel %vm5480_vm2, %v9446_v45, %v9447_v54  ;;  %v24068_v18 = vsel %vm5731_vm3, %v9634_v2, %v9635_v56  ;;  %v24071_v23 = vsel %vm5982_vm4, %v9822_v57, %v9823_v16  ;;  %v20364_v2 = vld [vmem:[%s25432_s3 + $0xc0] sm:$0xff]   ;;  %v20365_v57 = vld [vmem:[%s25432_s3 + $0xc8] sm:$0xff]   ;;  %v25709_v56 = vld [vmem:[#allocation28_spill] sm:$0xff] }
 0x59a   :  { %25697 = vst [vmem:[#allocation101_spill] sm:$0xff] %v24062_v36  ;;  %25698 = vst [vmem:[#allocation102_spill] sm:$0xff] %v24065_v43  ;;  %18222 = vmatprep.subr.bf16.mxu0 %v20362_v15  ;;  %v25701_v45 = vpack.c.bf16 %v23481_v55, %v23451_v14  ;;  %v25702_v28 = vld [vmem:[#allocation39_spill] sm:$0xff]  ;;  %v25703_v54 = vld [vmem:[#allocation49_spill] sm:$0xff] }
 0x59b   :  { %25699 = vst [vmem:[#allocation103_spill] sm:$0xff] %v24068_v18  ;;  %25700 = vst [vmem:[#allocation104_spill] sm:$0xff] %v24071_v23  ;;  %v20366_v14 = vld [vmem:[%s25432_s3 + $0xd0] sm:$0xff]   ;;  %v20368_v16 = vld [vmem:[%s25432_s3 + $0xe0] sm:$0xff]  }
 0x59c   :  { %18207 = vmatmul.mubr.bf16.gmra.mrb[204].mxu0 %v23925_v20  ;;  %v25714_v61 = vld [vmem:[#allocation37_spill] sm:$0xff]  ;;  %v25720_v32 = vld [vmem:[#allocation43_spill] sm:$0xff]  ;;  %v25721_v23 = vld [vmem:[#allocation34_spill] sm:$0xff] }
 0x59d   :  { %18223 = vmatpush3.bf16.msra.mxu0 %v20362_v15  ;;  %18226 = vmatprep.mubr.bf16.mxu0 %v25701_v45  ;;  %v20367_v15 = vld [vmem:[%s25432_s3 + $0xd8] sm:$0xff]   ;;  %v20369_v45 = vld [vmem:[%s25432_s3 + $0xe8] sm:$0xff]  }
 0x59e   :  { %18224 = vmatprep.subr.bf16.mxu0 %v20363_v5  ;;  %v25728_v18 = vld [vmem:[#allocation38_spill] sm:$0xff]  ;;  %v25733_v36 = vld [vmem:[#allocation84_spill] sm:$0xff] }
 0x5a1   :  { %18225 = vmatpush3.bf16.msra.mxu0 %v20363_v5  ;;  %v25704_v5 = vpack.c.bf16 %v23807_v21, %v23785_v9  ;;  %v20370_v9 = vld [vmem:[%s25432_s3 + $0xf0] sm:$0xff]  }
 0x5a2   :  { %18242 = vmatprep.subr.bf16.mxu0 %v20364_v2 }
 0x5a4   :  { %18227 = vmatmul.mubr.bf16.vlgmr.msra.gmra.mrb[192].mxu0 %v25702_v28 }
 0x5a5   :  { %18230 = vmatprep.mubr.bf16.mxu0 %v25703_v54  ;;  %18243 = vmatpush3.bf16.msra.mxu0 %v20364_v2  ;;  %v20371_v2 = vld [vmem:[%s25432_s3 + $0xf8] sm:$0xff]  }
 0x5a6   :  { %18244 = vmatprep.subr.bf16.mxu0 %v20365_v57 }
 0x5a9   :  { %18245 = vmatpush3.bf16.msra.mxu0 %v20365_v57  ;;  %v25705_v57 = vld [vmem:[#allocation25_spill] sm:$0xff] }
 0x5aa   :  { %18246 = vmatprep.subr.bf16.mxu0 %v20366_v14 }
 0x5ac   :  { %18231 = vmatmul.mubr.bf16.gmra.mrb[196].mxu0 %v23657_v47 }
 0x5ad   :  { %18234 = vmatprep.mubr.bf16.mxu0 %v25704_v5  ;;  %18247 = vmatpush3.bf16.msra.mxu0 %v20366_v14  ;;  %v25706_v14 = vld [vmem:[#allocation26_spill] sm:$0xff] }
 0x5ae   :  { %18248 = vmatprep.subr.bf16.mxu0 %v20367_v15  ;;  %v20372_v5 = vld [vmem:[%s25432_s3 + $0x100] sm:$0xff]  }
 0x5b1   :  { %18249 = vmatpush3.bf16.msra.mxu0 %v20367_v15  ;;  %v25707_v15 = vpack.c.bf16 %v25705_v57, %v25706_v14  ;;  %v25710_v14 = vpack.c.bf16 %v23810_v8, %v23788_v60  ;;  %v20378_v60 = vld [vmem:[%s25432_s3 + $0x130] sm:$0xff]  }
 0x5b2   :  { %18250 = vmatprep.subr.bf16.mxu0 %v20368_v16 }
 0x5b4   :  { %18235 = vmatmul.mubr.bf16.gmra.mrb[200].mxu0 %v23865_v38 }
 0x5b5   :  { %18238 = vmatprep.mubr.bf16.mxu0 %v23900_v63  ;;  %18251 = vmatpush3.bf16.msra.mxu0 %v20368_v16  ;;  %v20373_v16 = vld [vmem:[%s25432_s3 + $0x108] sm:$0xff]  }
 0x5b6   :  { %18252 = vmatprep.subr.bf16.mxu0 %v20369_v45 }
 0x5b9   :  { %18253 = vmatpush3.bf16.msra.mxu0 %v20369_v45  ;;  %v25708_v45 = vld [vmem:[#allocation40_spill] sm:$0xff] }
 0x5ba   :  { %18254 = vmatprep.subr.bf16.mxu0 %v20370_v9 }
 0x5bc   :  { %18239 = vmatmul.mubr.bf16.gmra.mrb[204].mxu0 %v23933_v4 }
 0x5bd   :  { %18255 = vmatpush3.bf16.msra.mxu0 %v20370_v9  ;;  %18258 = vmatprep.mubr.bf16.mxu0 %v25707_v15  ;;  %v20374_v9 = vld [vmem:[%s25432_s3 + $0x110] sm:$0xff]   ;;  %v20376_v15 = vld [vmem:[%s25432_s3 + $0x120] sm:$0xff]  }
 0x5be   :  { %18256 = vmatprep.subr.bf16.mxu0 %v20371_v2 }
 0x5c1   :  { %18257 = vmatpush3.bf16.msra.mxu0 %v20371_v2  ;;  %v20375_v2 = vld [vmem:[%s25432_s3 + $0x118] sm:$0xff]  }
 0x5c2   :  { %18274 = vmatprep.subr.bf16.mxu0 %v20372_v5 }
 0x5c4   :  { %18259 = vmatmul.mubr.bf16.vlgmr.msra.gmra.mrb[192].mxu0 %v25708_v45 }
 0x5c5   :  { %18262 = vmatprep.mubr.bf16.mxu0 %v25709_v56  ;;  %18275 = vmatpush3.bf16.msra.mxu0 %v20372_v5  ;;  %v20377_v5 = vld [vmem:[%s25432_s3 + $0x128] sm:$0xff]  }
 0x5c6   :  { %18276 = vmatprep.subr.bf16.mxu0 %v20373_v16 }
 0x5c9   :  { %18277 = vmatpush3.bf16.msra.mxu0 %v20373_v16  ;;  %v20379_v16 = vld [vmem:[%s25432_s3 + $0x138] sm:$0xff]  }
 0x5ca   :  { %18278 = vmatprep.subr.bf16.mxu0 %v20374_v9 }
 0x5cc   :  { %18263 = vmatmul.mubr.bf16.gmra.mrb[196].mxu0 %v23659_v49 }
 0x5cd   :  { %18266 = vmatprep.mubr.bf16.mxu0 %v25710_v14  ;;  %18279 = vmatpush3.bf16.msra.mxu0 %v20374_v9  ;;  %v25711_v9 = vld [vmem:[#allocation27_spill] sm:$0xff] }
 0x5ce   :  { %18280 = vmatprep.subr.bf16.mxu0 %v20375_v2 }
 0x5d1   :  { %18281 = vmatpush3.bf16.msra.mxu0 %v20375_v2  ;;  %v25712_v2 = vld [vmem:[#allocation24_spill] sm:$0xff] }
 0x5d2   :  { %18282 = vmatprep.subr.bf16.mxu0 %v20376_v15  ;;  %v25713_v14 = vpack.c.bf16 %v25711_v9, %v25712_v2  ;;  %v25716_v2 = vld [vmem:[#allocation52_spill] sm:$0xff] }
 0x5d4   :  { %18267 = vmatmul.mubr.bf16.gmra.mrb[200].mxu0 %v23868_v1 }
 0x5d5   :  { %18270 = vmatprep.mubr.bf16.mxu0 %v23902_v6  ;;  %18283 = vmatpush3.bf16.msra.mxu0 %v20376_v15  ;;  %v20380_v15 = vld [vmem:[%s25432_s3 + $0x140] sm:$0xff]  }
 0x5d6   :  { %18284 = vmatprep.subr.bf16.mxu0 %v20377_v5 }
 0x5d9   :  { %18285 = vmatpush3.bf16.msra.mxu0 %v20377_v5  ;;  %v20381_v5 = vld [vmem:[%s25432_s3 + $0x148] sm:$0xff]  }
 0x5da   :  { %18286 = vmatprep.subr.bf16.mxu0 %v20378_v60 }
 0x5dc   :  { %18271 = vmatmul.mubr.bf16.gmra.mrb[204].mxu0 %v23935_v25 }
 0x5dd   :  { %18287 = vmatpush3.bf16.msra.mxu0 %v20378_v60  ;;  %18290 = vmatprep.mubr.bf16.mxu0 %v25713_v14  ;;  %v20382_v60 = vld [vmem:[%s25432_s3 + $0x150] sm:$0xff]   ;;  %v25717_v14 = vpack.c.bf16 %v23813_v22, %v23791_v31 }
 0x5de   :  { %18288 = vmatprep.subr.bf16.mxu0 %v20379_v16  ;;  %v20386_v31 = vld [vmem:[%s25432_s3 + $0x170] sm:$0xff]  }
 0x5e1   :  { %18289 = vmatpush3.bf16.msra.mxu0 %v20379_v16  ;;  %v20383_v16 = vld [vmem:[%s25432_s3 + $0x158] sm:$0xff]  }
 0x5e2   :  { %18306 = vmatprep.subr.bf16.mxu0 %v20380_v15 }
 0x5e4   :  { %18291 = vmatmul.mubr.bf16.vlgmr.msra.gmra.mrb[192].mxu0 %v25714_v61 }
 0x5e5   :  { %18294 = vmatprep.mubr.bf16.mxu0 %v25715_v27  ;;  %18307 = vmatpush3.bf16.msra.mxu0 %v20380_v15  ;;  %v20384_v15 = vld [vmem:[%s25432_s3 + $0x160] sm:$0xff]  }
 0x5e6   :  { %18308 = vmatprep.subr.bf16.mxu0 %v20381_v5 }
 0x5e9   :  { %18309 = vmatpush3.bf16.msra.mxu0 %v20381_v5  ;;  %v20385_v5 = vld [vmem:[%s25432_s3 + $0x168] sm:$0xff]  }
 0x5ea   :  { %18310 = vmatprep.subr.bf16.mxu0 %v20382_v60 }
 0x5ec   :  { %18295 = vmatmul.mubr.bf16.gmra.mrb[196].mxu0 %v25716_v2 }
 0x5ed   :  { %18298 = vmatprep.mubr.bf16.mxu0 %v25717_v14  ;;  %18311 = vmatpush3.bf16.msra.mxu0 %v20382_v60  ;;  %v20387_v60 = vld [vmem:[%s25432_s3 + $0x178] sm:$0xff]  }
 0x5ee   :  { %18312 = vmatprep.subr.bf16.mxu0 %v20383_v16 }
 0x5f1   :  { %18313 = vmatpush3.bf16.msra.mxu0 %v20383_v16  ;;  %v25718_v16 = vld [vmem:[#allocation31_spill] sm:$0xff] }
 0x5f2   :  { %18314 = vmatprep.subr.bf16.mxu0 %v20384_v15  ;;  %v25719_v14 = vpack.c.bf16 %v25718_v16, %v23460_v34  ;;  %v20390_v34 = vld [vmem:[%s25432_s3 + $0x190] sm:$0xff]   ;;  %v25723_v16 = vpack.c.bf16 %v23823_v53, %v23794_v41  ;;  %v20395_v53 = vld [vmem:[%s25432_s3 + $0x1b8] sm:$0xff]  }
 0x5f3   :  { %v20394_v41 = vld [vmem:[%s25432_s3 + $0x1b0] sm:$0xff]  }
 0x5f4   :  { %18299 = vmatmul.mubr.bf16.gmra.mrb[200].mxu0 %v23871_v37 }
 0x5f5   :  { %18302 = vmatprep.mubr.bf16.mxu0 %v23904_v35  ;;  %18315 = vmatpush3.bf16.msra.mxu0 %v20384_v15  ;;  %v20388_v15 = vld [vmem:[%s25432_s3 + $0x180] sm:$0xff]  }
 0x5f6   :  { %18316 = vmatprep.subr.bf16.mxu0 %v20385_v5 }
 0x5f9   :  { %18317 = vmatpush3.bf16.msra.mxu0 %v20385_v5  ;;  %v20389_v5 = vld [vmem:[%s25432_s3 + $0x188] sm:$0xff]  }
 0x5fa   :  { %18318 = vmatprep.subr.bf16.mxu0 %v20386_v31 }
 0x5fc   :  { %18303 = vmatmul.mubr.bf16.gmra.mrb[204].mxu0 %v23937_v52 }
 0x5fd   :  { %18319 = vmatpush3.bf16.msra.mxu0 %v20386_v31  ;;  %18322 = vmatprep.mubr.bf16.mxu0 %v25719_v14  ;;  %v20391_v31 = vld [vmem:[%s25432_s3 + $0x198] sm:$0xff]   ;;  %v20392_v14 = vld [vmem:[%s25432_s3 + $0x1a0] sm:$0xff]  }
 0x5fe   :  { %18320 = vmatprep.subr.bf16.mxu0 %v20387_v60 }
 0x601   :  { %18321 = vmatpush3.bf16.msra.mxu0 %v20387_v60  ;;  %v25722_v60 = vld [vmem:[#allocation53_spill] sm:$0xff] }
 0x602   :  { %18338 = vmatprep.subr.bf16.mxu0 %v20388_v15 }
 0x604   :  { %18323 = vmatmul.mubr.bf16.vlgmr.msra.gmra.mrb[192].mxu0 %v25720_v32 }
 0x605   :  { %18326 = vmatprep.mubr.bf16.mxu0 %v25721_v23  ;;  %18339 = vmatpush3.bf16.msra.mxu0 %v20388_v15  ;;  %v20393_v15 = vld [vmem:[%s25432_s3 + $0x1a8] sm:$0xff]  }
 0x606   :  { %18340 = vmatprep.subr.bf16.mxu0 %v20389_v5 }
 0x609   :  { %18341 = vmatpush3.bf16.msra.mxu0 %v20389_v5  ;;  %v25724_v5 = vld [vmem:[#allocation32_spill] sm:$0xff] }
 0x60a   :  { %18342 = vmatprep.subr.bf16.mxu0 %v20390_v34 }
 0x60c   :  { %18327 = vmatmul.mubr.bf16.gmra.mrb[196].mxu0 %v25722_v60 }
 0x60d   :  { %18330 = vmatprep.mubr.bf16.mxu0 %v25723_v16  ;;  %18343 = vmatpush3.bf16.msra.mxu0 %v20390_v34  ;;  %v25725_v34 = vld [vmem:[#allocation23_spill] sm:$0xff]  ;;  %v20396_v16 = vld [vmem:[%s25432_s3 + $0x1c0] sm:$0xff]  }
 0x60e   :  { %18344 = vmatprep.subr.bf16.mxu0 %v20391_v31 }
 0x611   :  { %18345 = vmatpush3.bf16.msra.mxu0 %v20391_v31  ;;  %v25726_v31 = vpack.c.bf16 %v25724_v5, %v25725_v34  ;;  %v25729_v5 = vld [vmem:[#allocation54_spill] sm:$0xff]  ;;  %v25730_v34 = vld [vmem:[#allocation79_spill] sm:$0xff] }
 0x612   :  { %18346 = vmatprep.subr.bf16.mxu0 %v20392_v14 }
 0x614   :  { %18331 = vmatmul.mubr.bf16.gmra.mrb[200].mxu0 %v23876_v40 }
 0x615   :  { %18334 = vmatprep.mubr.bf16.mxu0 %v23909_v46  ;;  %18347 = vmatpush3.bf16.msra.mxu0 %v20392_v14  ;;  %v20397_v14 = vld [vmem:[%s25432_s3 + $0x1c8] sm:$0xff]  }
 0x616   :  { %18348 = vmatprep.subr.bf16.mxu0 %v20393_v15 }
 0x619   :  { %18349 = vmatpush3.bf16.msra.mxu0 %v20393_v15  ;;  %v25727_v15 = vld [vmem:[#allocation44_spill] sm:$0xff] }
 0x61a   :  { %18350 = vmatprep.subr.bf16.mxu0 %v20394_v41 }
 0x61c   :  { %18335 = vmatmul.mubr.bf16.gmra.mrb[204].mxu0 %v23945_v11 }
 0x61d   :  { %18351 = vmatpush3.bf16.msra.mxu0 %v20394_v41  ;;  %18354 = vmatprep.mubr.bf16.mxu0 %v25726_v31  ;;  %v20398_v41 = vld [vmem:[%s25432_s3 + $0x1d0] sm:$0xff]   ;;  %v25731_v31 = vld [vmem:[#allocation78_spill] sm:$0xff] }
 0x61e   :  { %18352 = vmatprep.subr.bf16.mxu0 %v20395_v53  ;;  %v25732_v43 = vpack.c.bf16 %v25730_v34, %v25731_v31  ;;  %v20404_v31 = vld [vmem:[%s25432_s3 + $0x200] sm:$0xff]  }
 0x621   :  { %18353 = vmatpush3.bf16.msra.mxu0 %v20395_v53  ;;  %v20399_v53 = vld [vmem:[%s25432_s3 + $0x1d8] sm:$0xff]  }
 0x622   :  { %18370 = vmatprep.subr.bf16.mxu0 %v20396_v16 }
 0x624   :  { %18355 = vmatmul.mubr.bf16.vlgmr.msra.gmra.mrb[192].mxu0 %v25727_v15 }
 0x625   :  { %18358 = vmatprep.mubr.bf16.mxu0 %v25728_v18  ;;  %18371 = vmatpush3.bf16.msra.mxu0 %v20396_v16  ;;  %v20400_v16 = vld [vmem:[%s25432_s3 + $0x1e0] sm:$0xff]  }
 0x626   :  { %18372 = vmatprep.subr.bf16.mxu0 %v20397_v14 }
 0x629   :  { %18373 = vmatpush3.bf16.msra.mxu0 %v20397_v14  ;;  %v20401_v14 = vld [vmem:[%s25432_s3 + $0x1e8] sm:$0xff]  }
 0x62a   :  { %18374 = vmatprep.subr.bf16.mxu0 %v20398_v41 }
 0x62c   :  { %18359 = vmatmul.mubr.bf16.gmra.mrb[196].mxu0 %v25729_v5 }
 0x62d   :  { %18362 = vmatprep.mubr.bf16.mxu0 %v25732_v43  ;;  %18375 = vmatpush3.bf16.msra.mxu0 %v20398_v41  ;;  %v20402_v43 = vld [vmem:[%s25432_s3 + $0x1f0] sm:$0xff]   ;;  %v20403_v41 = vld [vmem:[%s25432_s3 + $0x1f8] sm:$0xff]  }
 0x62e   :  { %18376 = vmatprep.subr.bf16.mxu0 %v20399_v53 }
 0x631   :  { %18377 = vmatpush3.bf16.msra.mxu0 %v20399_v53  ;;  %v25734_v53 = vld [vmem:[#allocation29_spill] sm:$0xff] }
 0x632   :  { %18378 = vmatprep.subr.bf16.mxu0 %v20400_v16  ;;  %v25735_v34 = vpack.c.bf16 %v25734_v53, %v23481_v55  ;;  %v20406_v55 = vld [vmem:[%s25432_s3 + $0x210] sm:$0xff]  }
 0x633   :  { %v25739_v53 = vld [vmem:[#allocation80_spill] sm:$0xff] }
 0x634   :  { %18363 = vmatmul.mubr.bf16.gmra.mrb[200].mxu0 %v25733_v36 }
 0x635   :  { %18366 = vmatprep.mubr.bf16.mxu0 %v23915_v33  ;;  %18379 = vmatpush3.bf16.msra.mxu0 %v20400_v16  ;;  %v20405_v16 = vld [vmem:[%s25432_s3 + $0x208] sm:$0xff]  }
 0x636   :  { %18380 = vmatprep.subr.bf16.mxu0 %v20401_v14 }
 0x639   :  { %18381 = vmatpush3.bf16.msra.mxu0 %v20401_v14  ;;  %v25736_v14 = vld [vmem:[#allocation41_spill] sm:$0xff] }
 0x63a   :  { %18382 = vmatprep.subr.bf16.mxu0 %v20402_v43 }
 0x63c   :  { %18367 = vmatmul.mubr.bf16.gmra.mrb[204].mxu0 %v23954_v44 }
 0x63d   :  { %18383 = vmatpush3.bf16.msra.mxu0 %v20402_v43  ;;  %18386 = vmatprep.mubr.bf16.mxu0 %v25735_v34  ;;  %v20407_v43 = vld [vmem:[%s25432_s3 + $0x218] sm:$0xff]   ;;  %v25740_v34 = vpack.c.bf16 %v25739_v53, %v23807_v21  ;;  %v20410_v21 = vld [vmem:[%s25432_s3 + $0x230] sm:$0xff]  }
 0x63e   :  { %18384 = vmatprep.subr.bf16.mxu0 %v20403_v41 }
 0x641   :  { %18385 = vmatpush3.bf16.msra.mxu0 %v20403_v41  ;;  %v25738_v41 = vld [vmem:[#allocation55_spill] sm:$0xff] }
 0x642   :  { %18402 = vmatprep.subr.bf16.mxu0 %v20404_v31 }
 0x644   :  { %18387 = vmatmul.mubr.bf16.vlgmr.msra.gmra.mrb[192].mxu0 %v25736_v14 }
 0x645   :  { %18390 = vmatprep.mubr.bf16.mxu0 %v25737_v17  ;;  %18403 = vmatpush3.bf16.msra.mxu0 %v20404_v31  ;;  %v20408_v31 = vld [vmem:[%s25432_s3 + $0x220] sm:$0xff]  }
 0x646   :  { %18404 = vmatprep.subr.bf16.mxu0 %v20405_v16 }
 0x649   :  { %18405 = vmatpush3.bf16.msra.mxu0 %v20405_v16  ;;  %v20409_v16 = vld [vmem:[%s25432_s3 + $0x228] sm:$0xff]  }
 0x64a   :  { %18406 = vmatprep.subr.bf16.mxu0 %v20406_v55 }
 0x64c   :  { %18391 = vmatmul.mubr.bf16.gmra.mrb[196].mxu0 %v25738_v41 }
 0x64d   :  { %18394 = vmatprep.mubr.bf16.mxu0 %v25740_v34  ;;  %18407 = vmatpush3.bf16.msra.mxu0 %v20406_v55  ;;  %v20411_v55 = vld [vmem:[%s25432_s3 + $0x238] sm:$0xff]   ;;  %v20412_v34 = vld [vmem:[%s25432_s3 + $0x240] sm:$0xff]  }
 0x64e   :  { %18408 = vmatprep.subr.bf16.mxu0 %v20407_v43 }
 0x651   :  { %18409 = vmatpush3.bf16.msra.mxu0 %v20407_v43  ;;  %v25743_v43 = vld [vmem:[#allocation35_spill] sm:$0xff] }
 0x652   :  { %18410 = vmatprep.subr.bf16.mxu0 %v20408_v31  ;;  %v25744_v53 = vpack.c.bf16 %v25743_v43, %v25705_v57  ;;  %v20414_v57 = vld [vmem:[%s25432_s3 + $0x250] sm:$0xff]   ;;  %v25748_v43 = vld [vmem:[#allocation81_spill] sm:$0xff] }
 0x654   :  { %18395 = vmatmul.mubr.bf16.gmra.mrb[200].mxu0 %v25741_v62 }
 0x655   :  { %18398 = vmatprep.mubr.bf16.mxu0 %v25742_v24  ;;  %18411 = vmatpush3.bf16.msra.mxu0 %v20408_v31  ;;  %v20413_v31 = vld [vmem:[%s25432_s3 + $0x248] sm:$0xff]  }
 0x656   :  { %18412 = vmatprep.subr.bf16.mxu0 %v20409_v16 }
 0x659   :  { %18413 = vmatpush3.bf16.msra.mxu0 %v20409_v16  ;;  %v25745_v16 = vld [vmem:[#allocation47_spill] sm:$0xff] }
 0x65a   :  { %18414 = vmatprep.subr.bf16.mxu0 %v20410_v21 }
 0x65c   :  { %18399 = vmatmul.mubr.bf16.gmra.mrb[204].mxu0 %v23956_v29 }
 0x65d   :  { %18415 = vmatpush3.bf16.msra.mxu0 %v20410_v21  ;;  %18418 = vmatprep.mubr.bf16.mxu0 %v25744_v53  ;;  %v20415_v21 = vld [vmem:[%s25432_s3 + $0x258] sm:$0xff]   ;;  %v25749_v53 = vpack.c.bf16 %v25748_v43, %v23810_v8  ;;  %v20418_v8 = vld [vmem:[%s25432_s3 + $0x270] sm:$0xff]  }
 0x65e   :  { %18416 = vmatprep.subr.bf16.mxu0 %v20411_v55 }
 0x661   :  { %18417 = vmatpush3.bf16.msra.mxu0 %v20411_v55  ;;  %v25747_v55 = vld [vmem:[#allocation56_spill] sm:$0xff] }
 0x662   :  { %18434 = vmatprep.subr.bf16.mxu0 %v20412_v34 }
 0x664   :  { %18419 = vmatmul.mubr.bf16.vlgmr.msra.gmra.mrb[192].mxu0 %v25745_v16  ;;  %v25751_v16 = vld [vmem:[#allocation90_spill] sm:$0xff] }
 0x665   :  { %18422 = vmatprep.mubr.bf16.mxu0 %v25746_v13  ;;  %18435 = vmatpush3.bf16.msra.mxu0 %v20412_v34  ;;  %v20416_v34 = vld [vmem:[%s25432_s3 + $0x260] sm:$0xff]  }
 0x666   :  { %18436 = vmatprep.subr.bf16.mxu0 %v20413_v31  ;;  %v25750_v13 = vld [vmem:[#allocation86_spill] sm:$0xff] }
 0x669   :  { %18437 = vmatpush3.bf16.msra.mxu0 %v20413_v31  ;;  %v20417_v31 = vld [vmem:[%s25432_s3 + $0x268] sm:$0xff]  }
 0x66a   :  { %18438 = vmatprep.subr.bf16.mxu0 %v20414_v57 }
 0x66c   :  { %18423 = vmatmul.mubr.bf16.gmra.mrb[196].mxu0 %v25747_v55 }
 0x66d   :  { %18426 = vmatprep.mubr.bf16.mxu0 %v25749_v53  ;;  %18439 = vmatpush3.bf16.msra.mxu0 %v20414_v57  ;;  %v20419_v57 = vld [vmem:[%s25432_s3 + $0x278] sm:$0xff]   ;;  %v20420_v53 = vld [vmem:[%s25432_s3 + $0x280] sm:$0xff]  }
 0x66e   :  { %18440 = vmatprep.subr.bf16.mxu0 %v20415_v21 }
 0x671   :  { %18441 = vmatpush3.bf16.msra.mxu0 %v20415_v21  ;;  %v25752_v21 = vld [vmem:[#allocation36_spill] sm:$0xff] }
 0x672   :  { %18442 = vmatprep.subr.bf16.mxu0 %v20416_v34  ;;  %v25753_v43 = vpack.c.bf16 %v25752_v21, %v25711_v9  ;;  %v20422_v9 = vld [vmem:[%s25432_s3 + $0x290] sm:$0xff]   ;;  %v25757_v21 = vld [vmem:[#allocation82_spill] sm:$0xff] }
 0x674   :  { %18427 = vmatmul.mubr.bf16.gmra.mrb[200].mxu0 %v25750_v13 }
 0x675   :  { %18430 = vmatprep.mubr.bf16.mxu0 %v25751_v16  ;;  %18443 = vmatpush3.bf16.msra.mxu0 %v20416_v34  ;;  %v20421_v34 = vld [vmem:[%s25432_s3 + $0x288] sm:$0xff]  }
 0x676   :  { %18444 = vmatprep.subr.bf16.mxu0 %v20417_v31  ;;  %v25755_v16 = vld [vmem:[#allocation50_spill] sm:$0xff] }
 0x679   :  { %18445 = vmatpush3.bf16.msra.mxu0 %v20417_v31  ;;  %v25754_v31 = vld [vmem:[#allocation48_spill] sm:$0xff] }
 0x67a   :  { %18446 = vmatprep.subr.bf16.mxu0 %v20418_v8 }
 0x67c   :  { %18431 = vmatmul.mubr.bf16.gmra.mrb[204].mxu0 %v23958_v42 }
 0x67d   :  { %18447 = vmatpush3.bf16.msra.mxu0 %v20418_v8  ;;  %18450 = vmatprep.mubr.bf16.mxu0 %v25753_v43  ;;  %v20423_v8 = vld [vmem:[%s25432_s3 + $0x298] sm:$0xff]   ;;  %v25758_v43 = vpack.c.bf16 %v25757_v21, %v23813_v22  ;;  %v20426_v22 = vld [vmem:[%s25432_s3 + $0x2b0] sm:$0xff]   ;;  %v20429_v21 = vld [vmem:[%s25432_s3 + $0x2c8] sm:$0xff]  }
 0x67e   :  { %18448 = vmatprep.subr.bf16.mxu0 %v20419_v57 }
 0x681   :  { %18449 = vmatpush3.bf16.msra.mxu0 %v20419_v57  ;;  %v25756_v57 = vld [vmem:[#allocation57_spill] sm:$0xff] }
 0x682   :  { %18466 = vmatprep.subr.bf16.mxu0 %v20420_v53 }
 0x684   :  { %18451 = vmatmul.mubr.bf16.vlgmr.msra.gmra.mrb[192].mxu0 %v25754_v31  ;;  %v25760_v31 = vld [vmem:[#allocation91_spill] sm:$0xff] }
 0x685   :  { %18454 = vmatprep.mubr.bf16.mxu0 %v25755_v16  ;;  %18467 = vmatpush3.bf16.msra.mxu0 %v20420_v53  ;;  %v20424_v53 = vld [vmem:[%s25432_s3 + $0x2a0] sm:$0xff]   ;;  %v25759_v16 = vld [vmem:[#allocation87_spill] sm:$0xff] }
 0x686   :  { %18468 = vmatprep.subr.bf16.mxu0 %v20421_v34 }
 0x689   :  { %18469 = vmatpush3.bf16.msra.mxu0 %v20421_v34  ;;  %v20425_v34 = vld [vmem:[%s25432_s3 + $0x2a8] sm:$0xff]  }
 0x68a   :  { %18470 = vmatprep.subr.bf16.mxu0 %v20422_v9 }
 0x68c   :  { %18455 = vmatmul.mubr.bf16.gmra.mrb[196].mxu0 %v25756_v57 }
 0x68d   :  { %18458 = vmatprep.mubr.bf16.mxu0 %v25758_v43  ;;  %18471 = vmatpush3.bf16.msra.mxu0 %v20422_v9  ;;  %v20427_v9 = vld [vmem:[%s25432_s3 + $0x2b8] sm:$0xff]  }
 0x68e   :  { %18472 = vmatprep.subr.bf16.mxu0 %v20423_v8  ;;  %v20431_v43 = vld [vmem:[%s25432_s3 + $0x2d8] sm:$0xff]  }
 0x691   :  { %18473 = vmatpush3.bf16.msra.mxu0 %v20423_v8  ;;  %v20428_v8 = vld [vmem:[%s25432_s3 + $0x2c0] sm:$0xff]  }
 0x692   :  { %18474 = vmatprep.subr.bf16.mxu0 %v20424_v53 }
 0x694   :  { %18459 = vmatmul.mubr.bf16.gmra.mrb[200].mxu0 %v25759_v16 }
 0x695   :  { %18462 = vmatprep.mubr.bf16.mxu0 %v25760_v31  ;;  %18475 = vmatpush3.bf16.msra.mxu0 %v20424_v53  ;;  %v25761_v53 = vld [vmem:[#allocation59_spill] sm:$0xff] }
 0x696   :  { %18476 = vmatprep.subr.bf16.mxu0 %v20425_v34 }
 0x699   :  { %18477 = vmatpush3.bf16.msra.mxu0 %v20425_v34  ;;  %v20432_v34 = vld [vmem:[%s25432_s3 + $0x2e0] sm:$0xff]  }
 0x69a   :  { %18478 = vmatprep.subr.bf16.mxu0 %v20426_v22 }
 0x69c   :  { %18463 = vmatmul.mubr.bf16.gmra.mrb[204].mxu0 %v23960_v51 }
 0x69d   :  { %18479 = vmatpush3.bf16.msra.mxu0 %v20426_v22  ;;  %18482 = vmatprep.mubr.bf16.mxu0 %v23535_v3  ;;  %v20430_v3 = vld [vmem:[%s25432_s3 + $0x2d0] sm:$0xff]   ;;  %v20433_v22 = vld [vmem:[%s25432_s3 + $0x2e8] sm:$0xff]  }
 0x69e   :  { %18480 = vmatprep.subr.bf16.mxu0 %v20427_v9 }
 0x6a1   :  { %18481 = vmatpush3.bf16.msra.mxu0 %v20427_v9  ;;  %v20435_v9 = vld [vmem:[%s25432_s3 + $0x2f8] sm:$0xff]  }
 0x6a2   :  { %18498 = vmatprep.subr.bf16.mxu0 %v20428_v8 }
 0x6a4   :  { %18483 = vmatmul.mubr.bf16.vlgmr.msra.gmra.mrb[192].mxu0 %v23590_v30 }
 0x6a5   :  { %18486 = vmatprep.mubr.bf16.mxu0 %v23643_v7  ;;  %18499 = vmatpush3.bf16.msra.mxu0 %v20428_v8  ;;  %v25762_v8 = vld [vmem:[#allocation33_spill] sm:$0xff] }
 0x6a6   :  { %18500 = vmatprep.subr.bf16.mxu0 %v20429_v21 }
 0x6a9   :  { %18501 = vmatpush3.bf16.msra.mxu0 %v20429_v21  ;;  %v20436_v21 = vld [vmem:[%s25432_s3 + $0x300] sm:$0xff]  }
 0x6aa   :  { %18502 = vmatprep.subr.bf16.mxu0 %v20430_v3 }
 0x6ac   :  { %18487 = vmatmul.mubr.bf16.gmra.mrb[196].mxu0 %v25761_v53 }
 0x6ad   :  { %18490 = vmatprep.mubr.bf16.mxu0 %v23855_v39  ;;  %18503 = vmatpush3.bf16.msra.mxu0 %v20430_v3  ;;  %v20434_v39 = vld [vmem:[%s25432_s3 + $0x2f0] sm:$0xff]   ;;  %v20437_v3 = vld [vmem:[%s25432_s3 + $0x308] sm:$0xff]  }
 0x6ae   :  { %18504 = vmatprep.subr.bf16.mxu0 %v20431_v43 }
 0x6b1   :  { %18505 = vmatpush3.bf16.msra.mxu0 %v20431_v43  ;;  %v25763_v43 = vld [vmem:[#allocation45_spill] sm:$0xff] }
 0x6b2   :  { %18506 = vmatprep.subr.bf16.mxu0 %v20432_v34 }
 0x6b4   :  { %18491 = vmatmul.mubr.bf16.gmra.mrb[200].mxu0 %v23892_v48 }
 0x6b5   :  { %18494 = vmatprep.mubr.bf16.mxu0 %v23925_v20  ;;  %18507 = vmatpush3.bf16.msra.mxu0 %v20432_v34  ;;  %v25764_v34 = vld [vmem:[#allocation51_spill] sm:$0xff] }
 0x6b6   :  { %18508 = vmatprep.subr.bf16.mxu0 %v20433_v22 }
 0x6b9   :  { %18509 = vmatpush3.bf16.msra.mxu0 %v20433_v22  ;;  %v20438_v22 = vld [vmem:[%s25432_s3 + $0x310] sm:$0xff]  }
 0x6ba   :  { %18510 = vmatprep.subr.bf16.mxu0 %v20434_v39 }
 0x6bc   :  { %18495 = vmatmul.mubr.bf16.gmra.mrb[204].mxu0 %v23970_v58 }
 0x6bd   :  { %18511 = vmatpush3.bf16.msra.mxu0 %v20434_v39  ;;  %18514 = vmatprep.mubr.bf16.mxu0 %v25762_v8  ;;  %v20439_v39 = vld [vmem:[%s25432_s3 + $0x318] sm:$0xff]   ;;  %v25766_v8 = vld [vmem:[#allocation83_spill] sm:$0xff] }
 0x6be   :  { %18512 = vmatprep.subr.bf16.mxu0 %v20435_v9 }
 0x6c1   :  { %18513 = vmatpush3.bf16.msra.mxu0 %v20435_v9  ;;  %v25765_v9 = vld [vmem:[#allocation64_spill] sm:$0xff] }
 0x6c2   :  { %18530 = vmatprep.subr.bf16.mxu0 %v20436_v21 }
 0x6c4   :  { %18515 = vmatmul.mubr.bf16.vlgmr.msra.gmra.mrb[192].mxu0 %v25763_v43  ;;  %v25768_v43 = vld [vmem:[#allocation92_spill] sm:$0xff] }
 0x6c5   :  { %18518 = vmatprep.mubr.bf16.mxu0 %v25764_v34  ;;  %18531 = vmatpush3.bf16.msra.mxu0 %v20436_v21  ;;  %v20440_v21 = vld [vmem:[%s25432_s3 + $0x320] sm:$0xff]   ;;  %v25767_v34 = vld [vmem:[#allocation88_spill] sm:$0xff] }
 0x6c6   :  { %18532 = vmatprep.subr.bf16.mxu0 %v20437_v3 }
 0x6c9   :  { %18533 = vmatpush3.bf16.msra.mxu0 %v20437_v3  ;;  %v20441_v3 = vld [vmem:[%s25432_s3 + $0x328] sm:$0xff]  }
 0x6ca   :  { %18534 = vmatprep.subr.bf16.mxu0 %v20438_v22 }
 0x6cc   :  { %18519 = vmatmul.mubr.bf16.gmra.mrb[196].mxu0 %v25765_v9 }
 0x6cd   :  { %18522 = vmatprep.mubr.bf16.mxu0 %v25766_v8  ;;  %18535 = vmatpush3.bf16.msra.mxu0 %v20438_v22  ;;  %v20442_v22 = vld [vmem:[%s25432_s3 + $0x330] sm:$0xff]   ;;  %v20444_v8 = vld [vmem:[%s25432_s3 + $0x340] sm:$0xff]  }
 0x6ce   :  { %18536 = vmatprep.subr.bf16.mxu0 %v20439_v39 }
 0x6d1   :  { %18537 = vmatpush3.bf16.msra.mxu0 %v20439_v39  ;;  %v20443_v39 = vld [vmem:[%s25432_s3 + $0x338] sm:$0xff]  }
 0x6d2   :  { %18538 = vmatprep.subr.bf16.mxu0 %v20440_v21 }
 0x6d4   :  { %18523 = vmatmul.mubr.bf16.gmra.mrb[200].mxu0 %v25767_v34 }
 0x6d5   :  { %18526 = vmatprep.mubr.bf16.mxu0 %v25768_v43  ;;  %18539 = vmatpush3.bf16.msra.mxu0 %v20440_v21  ;;  %v20445_v21 = vld [vmem:[%s25432_s3 + $0x348] sm:$0xff]  }
 0x6d6   :  { %18540 = vmatprep.subr.bf16.mxu0 %v20441_v3 }
 0x6d9   :  { %18541 = vmatpush3.bf16.msra.mxu0 %v20441_v3  ;;  %v20447_v3 = vld [vmem:[%s25432_s3 + $0x358] sm:$0xff]  }
 0x6da   :  { %18542 = vmatprep.subr.bf16.mxu0 %v20442_v22 }
 0x6dc   :  { %18527 = vmatmul.mubr.bf16.gmra.mrb[204].mxu0 %v23995_v10 }
 0x6dd   :  { %18543 = vmatpush3.bf16.msra.mxu0 %v20442_v22  ;;  %18546 = vmatprep.mubr.bf16.mxu0 %v25702_v28  ;;  %v20446_v28 = vld [vmem:[%s25432_s3 + $0x350] sm:$0xff]   ;;  %v25769_v22 = vld [vmem:[#allocation65_spill] sm:$0xff] }
 0x6de   :  { %18544 = vmatprep.subr.bf16.mxu0 %v20443_v39 }
 0x6e1   :  { %18545 = vmatpush3.bf16.msra.mxu0 %v20443_v39  ;;  %v20448_v39 = vld [vmem:[%s25432_s3 + $0x360] sm:$0xff]  }
 0x6e2   :  { %18562 = vmatprep.subr.bf16.mxu0 %v20444_v8 }
 0x6e4   :  { %18547 = vmatmul.mubr.bf16.vlgmr.msra.gmra.mrb[192].mxu0 %v25703_v54 }
 0x6e5   :  { %18550 = vmatprep.mubr.bf16.mxu0 %v23657_v47  ;;  %18563 = vmatpush3.bf16.msra.mxu0 %v20444_v8  ;;  %v20449_v8 = vld [vmem:[%s25432_s3 + $0x368] sm:$0xff]  }
 0x6e6   :  { %18564 = vmatprep.subr.bf16.mxu0 %v20445_v21 }
 0x6e9   :  { %18565 = vmatpush3.bf16.msra.mxu0 %v20445_v21  ;;  %v20451_v21 = vld [vmem:[%s25432_s3 + $0x378] sm:$0xff]  }
 0x6ea   :  { %18566 = vmatprep.subr.bf16.mxu0 %v20446_v28 }
 0x6ec   :  { %18551 = vmatmul.mubr.bf16.gmra.mrb[196].mxu0 %v25769_v22 }
 0x6ed   :  { %18554 = vmatprep.mubr.bf16.mxu0 %v23865_v38  ;;  %18567 = vmatpush3.bf16.msra.mxu0 %v20446_v28  ;;  %v20450_v38 = vld [vmem:[%s25432_s3 + $0x370] sm:$0xff]   ;;  %v20452_v28 = vld [vmem:[%s25432_s3 + $0x380] sm:$0xff]  }
 0x6ee   :  { %18568 = vmatprep.subr.bf16.mxu0 %v20447_v3 }
 0x6f1   :  { %18569 = vmatpush3.bf16.msra.mxu0 %v20447_v3  ;;  %v20453_v3 = vld [vmem:[%s25432_s3 + $0x388] sm:$0xff]  }
 0x6f2   :  { %18570 = vmatprep.subr.bf16.mxu0 %v20448_v39 }
 0x6f4   :  { %18555 = vmatmul.mubr.bf16.gmra.mrb[200].mxu0 %v23900_v63 }
 0x6f5   :  { %18558 = vmatprep.mubr.bf16.mxu0 %v23933_v4  ;;  %18571 = vmatpush3.bf16.msra.mxu0 %v20448_v39  ;;  %v20455_v39 = vld [vmem:[%s25432_s3 + $0x398] sm:$0xff]  }
 0x6f6   :  { %18572 = vmatprep.subr.bf16.mxu0 %v20449_v8 }
 0x6f9   :  { %18573 = vmatpush3.bf16.msra.mxu0 %v20449_v8  ;;  %v25770_v8 = vld [vmem:[#allocation66_spill] sm:$0xff] }
 0x6fa   :  { %18574 = vmatprep.subr.bf16.mxu0 %v20450_v38 }
 0x6fc   :  { %18559 = vmatmul.mubr.bf16.gmra.mrb[204].mxu0 %v23998_v19 }
 0x6fd   :  { %18575 = vmatpush3.bf16.msra.mxu0 %v20450_v38  ;;  %18578 = vmatprep.mubr.bf16.mxu0 %v25708_v45  ;;  %v20454_v45 = vld [vmem:[%s25432_s3 + $0x390] sm:$0xff]   ;;  %v20456_v38 = vld [vmem:[%s25432_s3 + $0x3a0] sm:$0xff]  }
 0x6fe   :  { %18576 = vmatprep.subr.bf16.mxu0 %v20451_v21 }
 0x701   :  { %18577 = vmatpush3.bf16.msra.mxu0 %v20451_v21  ;;  %v20457_v21 = vld [vmem:[%s25432_s3 + $0x3a8] sm:$0xff]  }
 0x702   :  { %18594 = vmatprep.subr.bf16.mxu0 %v20452_v28 }
 0x704   :  { %18579 = vmatmul.mubr.bf16.vlgmr.msra.gmra.mrb[192].mxu0 %v25709_v56 }
 0x705   :  { %18582 = vmatprep.mubr.bf16.mxu0 %v23659_v49  ;;  %18595 = vmatpush3.bf16.msra.mxu0 %v20452_v28  ;;  %v20459_v28 = vld [vmem:[%s25432_s3 + $0x3b8] sm:$0xff]  }
 0x706   :  { %18596 = vmatprep.subr.bf16.mxu0 %v20453_v3 }
 0x709   :  { %18597 = vmatpush3.bf16.msra.mxu0 %v20453_v3  ;;  %v20460_v3 = vld [vmem:[%s25432_s3 + $0x3c0] sm:$0xff]  }
 0x70a   :  { %18598 = vmatprep.subr.bf16.mxu0 %v20454_v45 }
 0x70c   :  { %18583 = vmatmul.mubr.bf16.gmra.mrb[196].mxu0 %v25770_v8 }
 0x70d   :  { %18586 = vmatprep.mubr.bf16.mxu0 %v23868_v1  ;;  %18599 = vmatpush3.bf16.msra.mxu0 %v20454_v45  ;;  %v20458_v1 = vld [vmem:[%s25432_s3 + $0x3b0] sm:$0xff]   ;;  %v20461_v45 = vld [vmem:[%s25432_s3 + $0x3c8] sm:$0xff]  }
 0x70e   :  { %18600 = vmatprep.subr.bf16.mxu0 %v20455_v39 }
 0x711   :  { %18601 = vmatpush3.bf16.msra.mxu0 %v20455_v39  ;;  %v20463_v39 = vld [vmem:[%s25432_s3 + $0x3d8] sm:$0xff]  }
 0x712   :  { %18602 = vmatprep.subr.bf16.mxu0 %v20456_v38 }
 0x714   :  { %18587 = vmatmul.mubr.bf16.gmra.mrb[200].mxu0 %v23902_v6 }
 0x715   :  { %18590 = vmatprep.mubr.bf16.mxu0 %v23935_v25  ;;  %18603 = vmatpush3.bf16.msra.mxu0 %v20456_v38  ;;  %v25771_v38 = vld [vmem:[#allocation67_spill] sm:$0xff] }
 0x716   :  { %18604 = vmatprep.subr.bf16.mxu0 %v20457_v21 }
 0x719   :  { %18605 = vmatpush3.bf16.msra.mxu0 %v20457_v21  ;;  %v20464_v21 = vld [vmem:[%s25432_s3 + $0x3e0] sm:$0xff]  }
 0x71a   :  { %18606 = vmatprep.subr.bf16.mxu0 %v20458_v1 }
 0x71c   :  { %18591 = vmatmul.mubr.bf16.gmra.mrb[204].mxu0 %v24001_v50 }
 0x71d   :  { %18607 = vmatpush3.bf16.msra.mxu0 %v20458_v1  ;;  %18610 = vmatprep.mubr.bf16.mxu0 %v25714_v61  ;;  %v20462_v61 = vld [vmem:[%s25432_s3 + $0x3d0] sm:$0xff]   ;;  %v20465_v1 = vld [vmem:[%s25432_s3 + $0x3e8] sm:$0xff]  }
 0x71e   :  { %18608 = vmatprep.subr.bf16.mxu0 %v20459_v28 }
 0x721   :  { %18609 = vmatpush3.bf16.msra.mxu0 %v20459_v28  ;;  %v20467_v28 = vld [vmem:[%s25432_s3 + $0x3f8] sm:$0xff]  }
 0x722   :  { %18626 = vmatprep.subr.bf16.mxu0 %v20460_v3 }
 0x724   :  { %18611 = vmatmul.mubr.bf16.vlgmr.msra.gmra.mrb[192].mxu0 %v25715_v27 }
 0x725   :  { %18614 = vmatprep.mubr.bf16.mxu0 %v25716_v2  ;;  %18627 = vmatpush3.bf16.msra.mxu0 %v20460_v3  ;;  %v25772_v3 = vld [vmem:[#allocation97_spill] sm:$0xff] }
 0x726   :  { %18628 = vmatprep.subr.bf16.mxu0 %v20461_v45 }
 0x729   :  { %18629 = vmatpush3.bf16.msra.mxu0 %v20461_v45  ;;  %v20468_v45 = vld [vmem:[%s25432_s3 + $0x400] sm:$0xff]  }
 0x72a   :  { %18630 = vmatprep.subr.bf16.mxu0 %v20462_v61 }
 0x72c   :  { %18615 = vmatmul.mubr.bf16.gmra.mrb[196].mxu0 %v25771_v38 }
 0x72d   :  { %18618 = vmatprep.mubr.bf16.mxu0 %v23871_v37  ;;  %18631 = vmatpush3.bf16.msra.mxu0 %v20462_v61  ;;  %v20466_v37 = vld [vmem:[%s25432_s3 + $0x3f0] sm:$0xff]   ;;  %v20469_v61 = vld [vmem:[%s25432_s3 + $0x408] sm:$0xff]  }
 0x72e   :  { %18632 = vmatprep.subr.bf16.mxu0 %v20463_v39 }
 0x731   :  { %18633 = vmatpush3.bf16.msra.mxu0 %v20463_v39  ;;  %v20471_v39 = vld [vmem:[%s25432_s3 + $0x418] sm:$0xff]  }
 0x732   :  { %18634 = vmatprep.subr.bf16.mxu0 %v20464_v21 }
 0x734   :  { %18619 = vmatmul.mubr.bf16.gmra.mrb[200].mxu0 %v23904_v35 }
 0x735   :  { %18622 = vmatprep.mubr.bf16.mxu0 %v23937_v52  ;;  %18635 = vmatpush3.bf16.msra.mxu0 %v20464_v21  ;;  %v25773_v21 = vld [vmem:[#allocation68_spill] sm:$0xff] }
 0x736   :  { %18636 = vmatprep.subr.bf16.mxu0 %v20465_v1 }
 0x739   :  { %18637 = vmatpush3.bf16.msra.mxu0 %v20465_v1  ;;  %v25774_v1 = vld [vmem:[#allocation58_spill] sm:$0xff] }
 0x73a   :  { %18638 = vmatprep.subr.bf16.mxu0 %v20466_v37 }
 0x73c   :  { %18623 = vmatmul.mubr.bf16.gmra.mrb[204].mxu0 %v25772_v3 }
 0x73d   :  { %18639 = vmatpush3.bf16.msra.mxu0 %v20466_v37  ;;  %18642 = vmatprep.mubr.bf16.mxu0 %v25720_v32  ;;  %v20470_v32 = vld [vmem:[%s25432_s3 + $0x410] sm:$0xff]   ;;  %v25775_v37 = vpack.c.bf16 %v25773_v21, %v25774_v1 }
 0x73e   :  { %18640 = vmatprep.subr.bf16.mxu0 %v20467_v28  ;;  %v25779_v1 = vld [vmem:[#allocation60_spill] sm:$0xff] }
 0x741   :  { %18641 = vmatpush3.bf16.msra.mxu0 %v20467_v28  ;;  %v20475_v28 = vld [vmem:[%s25432_s3 + $0x438] sm:$0xff]  }
 0x742   :  { %18658 = vmatprep.subr.bf16.mxu0 %v20468_v45 }
 0x744   :  { %18643 = vmatmul.mubr.bf16.vlgmr.msra.gmra.mrb[192].mxu0 %v25721_v23  ;;  %v20472_v23 = vld [vmem:[%s25432_s3 + $0x420] sm:$0xff]  }
 0x745   :  { %18646 = vmatprep.mubr.bf16.mxu0 %v25722_v60  ;;  %18659 = vmatpush3.bf16.msra.mxu0 %v20468_v45  ;;  %v20473_v60 = vld [vmem:[%s25432_s3 + $0x428] sm:$0xff]   ;;  %v25776_v45 = vld [vmem:[#allocation93_spill] sm:$0xff] }
 0x746   :  { %18660 = vmatprep.subr.bf16.mxu0 %v20469_v61 }
 0x749   :  { %18661 = vmatpush3.bf16.msra.mxu0 %v20469_v61  ;;  %v25777_v61 = vpack.c.bf16 %v24007_v0, %v25776_v45 }
 0x74a   :  { %18662 = vmatprep.subr.bf16.mxu0 %v20470_v32 }
 0x74c   :  { %18647 = vmatmul.mubr.bf16.gmra.mrb[196].mxu0 %v25775_v37 }
 0x74d   :  { %18650 = vmatprep.mubr.bf16.mxu0 %v23876_v40  ;;  %18663 = vmatpush3.bf16.msra.mxu0 %v20470_v32  ;;  %v20474_v40 = vld [vmem:[%s25432_s3 + $0x430] sm:$0xff]   ;;  %v20479_v32 = vld [vmem:[%s25432_s3 + $0x458] sm:$0xff]  }
 0x74e   :  { %18664 = vmatprep.subr.bf16.mxu0 %v20471_v39 }
 0x751   :  { %18665 = vmatpush3.bf16.msra.mxu0 %v20471_v39  ;;  %v25778_v39 = vld [vmem:[#allocation69_spill] sm:$0xff] }
 0x752   :  { %18666 = vmatprep.subr.bf16.mxu0 %v20472_v23  ;;  %v25780_v37 = vpack.c.bf16 %v25778_v39, %v25779_v1  ;;  %v20494_v1 = vld [vmem:[%s25432_s3 + $0x4d0] sm:$0xff]  }
 0x754   :  { %18651 = vmatmul.mubr.bf16.gmra.mrb[200].mxu0 %v23909_v46  ;;  %v20476_v46 = vld [vmem:[%s25432_s3 + $0x440] sm:$0xff]  }
 0x755   :  { %18654 = vmatprep.mubr.bf16.mxu0 %v23945_v11  ;;  %18667 = vmatpush3.bf16.msra.mxu0 %v20472_v23  ;;  %v20477_v11 = vld [vmem:[%s25432_s3 + $0x448] sm:$0xff]   ;;  %v20483_v23 = vld [vmem:[%s25432_s3 + $0x478] sm:$0xff]  }
 0x756   :  { %18668 = vmatprep.subr.bf16.mxu0 %v20473_v60 }
 0x759   :  { %18669 = vmatpush3.bf16.msra.mxu0 %v20473_v60  ;;  %v25781_v60 = vpack.c.bf16 %v24024_v59, %v23980_v12  ;;  %v20486_v12 = vld [vmem:[%s25432_s3 + $0x490] sm:$0xff]  }
 0x75a   :  { %18670 = vmatprep.subr.bf16.mxu0 %v20474_v40 }
 0x75c   :  { %18655 = vmatmul.mubr.bf16.gmra.mrb[204].mxu0 %v25777_v61  ;;  %v20491_v61 = vld [vmem:[%s25432_s3 + $0x4b8] sm:$0xff]  }
 0x75d   :  { %18671 = vmatpush3.bf16.msra.mxu0 %v20474_v40  ;;  %18674 = vmatprep.mubr.bf16.mxu0 %v25727_v15  ;;  %v20478_v15 = vld [vmem:[%s25432_s3 + $0x450] sm:$0xff]   ;;  %v25782_v40 = vld [vmem:[#allocation70_spill] sm:$0xff] }
 0x75e   :  { %18672 = vmatprep.subr.bf16.mxu0 %v20475_v28 }
 0x761   :  { %18673 = vmatpush3.bf16.msra.mxu0 %v20475_v28  ;;  %v25783_v28 = vld [vmem:[#allocation61_spill] sm:$0xff] }
 0x762   :  { %18690 = vmatprep.subr.bf16.mxu0 %v20476_v46  ;;  %v25784_v45 = vpack.c.bf16 %v25782_v40, %v25783_v28  ;;  %v25796_v28 = vld [vmem:[#allocation48_spill] sm:$0xff] }
 0x764   :  { %18675 = vmatmul.mubr.bf16.vlgmr.msra.gmra.mrb[192].mxu0 %v25728_v18  ;;  %v20480_v18 = vld [vmem:[%s25432_s3 + $0x460] sm:$0xff]  }
 0x765   :  { %18678 = vmatprep.mubr.bf16.mxu0 %v25729_v5  ;;  %18691 = vmatpush3.bf16.msra.mxu0 %v20476_v46  ;;  %v20481_v5 = vld [vmem:[%s25432_s3 + $0x468] sm:$0xff]  }
 0x766   :  { %18692 = vmatprep.subr.bf16.mxu0 %v20477_v11  ;;  %v25785_v46 = vld [vmem:[#allocation94_spill] sm:$0xff] }
 0x769   :  { %18693 = vmatpush3.bf16.msra.mxu0 %v20477_v11  ;;  %v25786_v11 = vpack.c.bf16 %v24027_v26, %v25785_v46  ;;  %v25799_v46 = vld [vmem:[#allocation63_spill] sm:$0xff] }
 0x76a   :  { %18694 = vmatprep.subr.bf16.mxu0 %v20478_v15 }
 0x76c   :  { %18679 = vmatmul.mubr.bf16.gmra.mrb[196].mxu0 %v25780_v37  ;;  %v20495_v37 = vld [vmem:[%s25432_s3 + $0x4d8] sm:$0xff]  }
 0x76d   :  { %18682 = vmatprep.mubr.bf16.mxu0 %v25733_v36  ;;  %18695 = vmatpush3.bf16.msra.mxu0 %v20478_v15  ;;  %v20482_v36 = vld [vmem:[%s25432_s3 + $0x470] sm:$0xff]   ;;  %v20493_v15 = vld [vmem:[%s25432_s3 + $0x4c8] sm:$0xff]  }
 0x76e   :  { %18696 = vmatprep.subr.bf16.mxu0 %v20479_v32 }
 0x771   :  { %18697 = vmatpush3.bf16.msra.mxu0 %v20479_v32  ;;  %v25788_v32 = vld [vmem:[#allocation46_spill] sm:$0xff] }
 0x772   :  { %18698 = vmatprep.subr.bf16.mxu0 %v20480_v18 }
 0x774   :  { %18683 = vmatmul.mubr.bf16.gmra.mrb[200].mxu0 %v23915_v33  ;;  %v20484_v33 = vld [vmem:[%s25432_s3 + $0x480] sm:$0xff]  }
 0x775   :  { %18686 = vmatprep.mubr.bf16.mxu0 %v23954_v44  ;;  %18699 = vmatpush3.bf16.msra.mxu0 %v20480_v18  ;;  %v20485_v44 = vld [vmem:[%s25432_s3 + $0x488] sm:$0xff]  }
 0x776   :  { %18700 = vmatprep.subr.bf16.mxu0 %v20481_v5  ;;  %v25789_v18 = vld [vmem:[#allocation71_spill] sm:$0xff] }
 0x779   :  { %18701 = vmatpush3.bf16.msra.mxu0 %v20481_v5  ;;  %v25790_v5 = vld [vmem:[#allocation62_spill] sm:$0xff] }
 0x77a   :  { %18702 = vmatprep.subr.bf16.mxu0 %v20482_v36 }
 0x77c   :  { %18687 = vmatmul.mubr.bf16.gmra.mrb[204].mxu0 %v25781_v60  ;;  %v25792_v60 = vld [vmem:[#allocation90_spill] sm:$0xff] }
 0x77d   :  { %18703 = vmatpush3.bf16.msra.mxu0 %v20482_v36  ;;  %18706 = vmatprep.mubr.bf16.mxu0 %v25736_v14  ;;  %v20487_v14 = vld [vmem:[%s25432_s3 + $0x498] sm:$0xff]   ;;  %v25791_v36 = vpack.c.bf16 %v25789_v18, %v25790_v5 }
 0x77e   :  { %18704 = vmatprep.subr.bf16.mxu0 %v20483_v23  ;;  %v25804_v5 = vld [vmem:[#allocation73_spill] sm:$0xff] }
 0x781   :  { %18705 = vmatpush3.bf16.msra.mxu0 %v20483_v23  ;;  %v20497_v23 = vld [vmem:[%s25432_s3 + $0x4e8] sm:$0xff]  }
 0x782   :  { %18722 = vmatprep.subr.bf16.mxu0 %v20484_v33 }
 0x784   :  { %18707 = vmatmul.mubr.bf16.vlgmr.msra.gmra.mrb[192].mxu0 %v25737_v17  ;;  %v20488_v17 = vld [vmem:[%s25432_s3 + $0x4a0] sm:$0xff]  }
 0x785   :  { %18710 = vmatprep.mubr.bf16.mxu0 %v25738_v41  ;;  %18723 = vmatpush3.bf16.msra.mxu0 %v20484_v33  ;;  %v20489_v41 = vld [vmem:[%s25432_s3 + $0x4a8] sm:$0xff]   ;;  %v20499_v33 = vld [vmem:[%s25432_s3 + $0x4f8] sm:$0xff]  }
 0x786   :  { %18724 = vmatprep.subr.bf16.mxu0 %v20485_v44 }
 0x789   :  { %18725 = vmatpush3.bf16.msra.mxu0 %v20485_v44  ;;  %v25793_v44 = vld [vmem:[#allocation98_spill] sm:$0xff] }
 0x78a   :  { %18726 = vmatprep.subr.bf16.mxu0 %v20486_v12 }
 0x78c   :  { %18711 = vmatmul.mubr.bf16.gmra.mrb[196].mxu0 %v25784_v45  ;;  %v20501_v45 = vld [vmem:[%s25432_s3 + $0x508] sm:$0xff]  }
 0x78d   :  { %18714 = vmatprep.mubr.bf16.mxu0 %v25741_v62  ;;  %18727 = vmatpush3.bf16.msra.mxu0 %v20486_v12  ;;  %v20490_v62 = vld [vmem:[%s25432_s3 + $0x4b0] sm:$0xff]  }
 0x78e   :  { %18728 = vmatprep.subr.bf16.mxu0 %v20487_v14  ;;  %v25794_v12 = vld [vmem:[#allocation95_spill] sm:$0xff] }
 0x791   :  { %18729 = vmatpush3.bf16.msra.mxu0 %v20487_v14  ;;  %v25795_v14 = vpack.c.bf16 %v25793_v44, %v25794_v12  ;;  %v25810_v12 = vld [vmem:[#allocation74_spill] sm:$0xff] }
 0x792   :  { %18730 = vmatprep.subr.bf16.mxu0 %v20488_v17 }
 0x794   :  { %18715 = vmatmul.mubr.bf16.gmra.mrb[200].mxu0 %v25742_v24  ;;  %v25787_v24 = vld [vmem:[#allocation47_spill] sm:$0xff] }
 0x795   :  { %18718 = vmatprep.mubr.bf16.mxu0 %v23956_v29  ;;  %18731 = vmatpush3.bf16.msra.mxu0 %v20488_v17  ;;  %v20492_v29 = vld [vmem:[%s25432_s3 + $0x4c0] sm:$0xff]  }
 0x796   :  { %18732 = vmatprep.subr.bf16.mxu0 %v20489_v41  ;;  %v25797_v17 = vld [vmem:[#allocation50_spill] sm:$0xff] }
 0x799   :  { %18733 = vmatpush3.bf16.msra.mxu0 %v20489_v41  ;;  %v20502_v41 = vld [vmem:[%s25432_s3 + $0x510] sm:$0xff]  }
 0x79a   :  { %18734 = vmatprep.subr.bf16.mxu0 %v20490_v62 }
 0x79c   :  { %18719 = vmatmul.mubr.bf16.gmra.mrb[204].mxu0 %v25786_v11 }
 0x79d   :  { %18735 = vmatpush3.bf16.msra.mxu0 %v20490_v62  ;;  %18738 = vmatprep.mubr.bf16.mxu0 %v25787_v24  ;;  %v20503_v62 = vld [vmem:[%s25432_s3 + $0x518] sm:$0xff]   ;;  %v20505_v24 = vld [vmem:[%s25432_s3 + $0x528] sm:$0xff]  }
 0x79e   :  { %18736 = vmatprep.subr.bf16.mxu0 %v20491_v61 }
 0x7a1   :  { %18737 = vmatpush3.bf16.msra.mxu0 %v20491_v61  ;;  %v25798_v61 = vld [vmem:[#allocation72_spill] sm:$0xff] }
 0x7a2   :  { %18754 = vmatprep.subr.bf16.mxu0 %v20492_v29  ;;  %v25800_v11 = vpack.c.bf16 %v25798_v61, %v25799_v46 }
 0x7a4   :  { %18739 = vmatmul.mubr.bf16.vlgmr.msra.gmra.mrb[192].mxu0 %v25788_v32  ;;  %v25802_v32 = vld [vmem:[#allocation96_spill] sm:$0xff] }
 0x7a5   :  { %18742 = vmatprep.mubr.bf16.mxu0 %v25747_v55  ;;  %18755 = vmatpush3.bf16.msra.mxu0 %v20492_v29  ;;  %v20496_v55 = vld [vmem:[%s25432_s3 + $0x4e0] sm:$0xff]   ;;  %v20507_v29 = vld [vmem:[%s25432_s3 + $0x538] sm:$0xff]  }
 0x7a6   :  { %18756 = vmatprep.subr.bf16.mxu0 %v20493_v15 }
 0x7a9   :  { %18757 = vmatpush3.bf16.msra.mxu0 %v20493_v15  ;;  %v25801_v15 = vld [vmem:[#allocation99_spill] sm:$0xff] }
 0x7aa   :  { %18758 = vmatprep.subr.bf16.mxu0 %v20494_v1 }
 0x7ac   :  { %18743 = vmatmul.mubr.bf16.gmra.mrb[196].mxu0 %v25791_v36  ;;  %v25805_v36 = vpack.c.bf16 %v25804_v5, %v25773_v21  ;;  %v20515_v21 = vld [vmem:[%s25432_s3 + $0x578] sm:$0xff]  }
 0x7ad   :  { %18746 = vmatprep.mubr.bf16.mxu0 %v25750_v13  ;;  %18759 = vmatpush3.bf16.msra.mxu0 %v20494_v1  ;;  %v20498_v13 = vld [vmem:[%s25432_s3 + $0x4f0] sm:$0xff]   ;;  %v25803_v1 = vpack.c.bf16 %v25801_v15, %v25802_v32 }
 0x7ae   :  { %18760 = vmatprep.subr.bf16.mxu0 %v20495_v37 }
 0x7b1   :  { %18761 = vmatpush3.bf16.msra.mxu0 %v20495_v37  ;;  %v20511_v37 = vld [vmem:[%s25432_s3 + $0x558] sm:$0xff]  }
 0x7b2   :  { %18762 = vmatprep.subr.bf16.mxu0 %v20496_v55 }
 0x7b4   :  { %18747 = vmatmul.mubr.bf16.gmra.mrb[200].mxu0 %v25792_v60  ;;  %v20517_v60 = vld [vmem:[%s25432_s3 + $0x588] sm:$0xff]  }
 0x7b5   :  { %18750 = vmatprep.mubr.bf16.mxu0 %v23958_v42  ;;  %18763 = vmatpush3.bf16.msra.mxu0 %v20496_v55  ;;  %v20500_v42 = vld [vmem:[%s25432_s3 + $0x500] sm:$0xff]   ;;  %v25806_v55 = vld [vmem:[#allocation100_spill] sm:$0xff] }
 0x7b6   :  { %18764 = vmatprep.subr.bf16.mxu0 %v20497_v23 }
 0x7b9   :  { %18765 = vmatpush3.bf16.msra.mxu0 %v20497_v23  ;;  %v25807_v23 = vpack.c.bf16 %v25806_v55, %v24007_v0  ;;  %v20518_v0 = vld [vmem:[%s25432_s3 + $0x590] sm:$0xff]  }
 0x7ba   :  { %18766 = vmatprep.subr.bf16.mxu0 %v20498_v13 }
 0x7bc   :  { %18751 = vmatmul.mubr.bf16.gmra.mrb[204].mxu0 %v25795_v14  ;;  %v25811_v14 = vpack.c.bf16 %v25810_v12, %v25778_v39  ;;  %v20523_v39 = vld [vmem:[%s25432_s3 + $0x5b8] sm:$0xff]  }
 0x7bd   :  { %18767 = vmatpush3.bf16.msra.mxu0 %v20498_v13  ;;  %18770 = vmatprep.mubr.bf16.mxu0 %v25796_v28  ;;  %v25809_v13 = vld [vmem:[#allocation51_spill] sm:$0xff] }
 0x7be   :  { %18768 = vmatprep.subr.bf16.mxu0 %v20499_v33  ;;  %v20521_v28 = vld [vmem:[%s25432_s3 + $0x5a8] sm:$0xff]  }
 0x7c1   :  { %18769 = vmatpush3.bf16.msra.mxu0 %v20499_v33  ;;  %v20519_v33 = vld [vmem:[%s25432_s3 + $0x598] sm:$0xff]  }
 0x7c2   :  { %18786 = vmatprep.subr.bf16.mxu0 %v20500_v42 }
 0x7c4   :  { %18771 = vmatmul.mubr.bf16.vlgmr.msra.gmra.mrb[192].mxu0 %v25797_v17  ;;  %v25814_v17 = vld [vmem:[#allocation75_spill] sm:$0xff] }
 0x7c5   :  { %18774 = vmatprep.mubr.bf16.mxu0 %v25756_v57  ;;  %18787 = vmatpush3.bf16.msra.mxu0 %v20500_v42  ;;  %v20504_v57 = vld [vmem:[%s25432_s3 + $0x520] sm:$0xff]  }
 0x7c6   :  { %18788 = vmatprep.subr.bf16.mxu0 %v20501_v45  ;;  %v25812_v42 = vld [vmem:[#allocation101_spill] sm:$0xff] }
 0x7c9   :  { %18789 = vmatpush3.bf16.msra.mxu0 %v20501_v45  ;;  %v25813_v45 = vpack.c.bf16 %v25812_v42, %v24024_v59  ;;  %v20526_v59 = vld [vmem:[%s25432_s3 + $0x5d0] sm:$0xff]  }
 0x7ca   :  { %18790 = vmatprep.subr.bf16.mxu0 %v20502_v41 }
 0x7cc   :  { %18775 = vmatmul.mubr.bf16.gmra.mrb[196].mxu0 %v25800_v11  ;;  %v25818_v11 = vld [vmem:[#allocation76_spill] sm:$0xff] }
 0x7cd   :  { %18778 = vmatprep.mubr.bf16.mxu0 %v25759_v16  ;;  %18791 = vmatpush3.bf16.msra.mxu0 %v20502_v41  ;;  %v20506_v16 = vld [vmem:[%s25432_s3 + $0x530] sm:$0xff]   ;;  %v25815_v41 = vpack.c.bf16 %v25814_v17, %v25782_v40  ;;  %v20531_v40 = vld [vmem:[%s25432_s3 + $0x5f8] sm:$0xff]  }
 0x7ce   :  { %18792 = vmatprep.subr.bf16.mxu0 %v20503_v62 }
 0x7d1   :  { %18793 = vmatpush3.bf16.msra.mxu0 %v20503_v62  ;;  %v25816_v62 = vld [vmem:[#allocation102_spill] sm:$0xff] }
 0x7d2   :  { %18794 = vmatprep.subr.bf16.mxu0 %v20504_v57  ;;  %v25817_v46 = vpack.c.bf16 %v25816_v62, %v24027_v26  ;;  %v20534_v26 = vld [vmem:[%s25432_s3 + $0x610] sm:$0xff]  }
 0x7d4   :  { %18779 = vmatmul.mubr.bf16.gmra.mrb[200].mxu0 %v25760_v31  ;;  %v20509_v31 = vld [vmem:[%s25432_s3 + $0x548] sm:$0xff]  }
 0x7d5   :  { %18782 = vmatprep.mubr.bf16.mxu0 %v23960_v51  ;;  %18795 = vmatpush3.bf16.msra.mxu0 %v20504_v57  ;;  %v20508_v51 = vld [vmem:[%s25432_s3 + $0x540] sm:$0xff]   ;;  %v25819_v57 = vpack.c.bf16 %v25818_v11, %v25789_v18  ;;  %v20539_v18 = vld [vmem:[%s25432_s3 + $0x638] sm:$0xff]  }
 0x7d6   :  { %18796 = vmatprep.subr.bf16.mxu0 %v20505_v24 }
 0x7d9   :  { %18797 = vmatpush3.bf16.msra.mxu0 %v20505_v24  ;;  %v25820_v24 = vld [vmem:[#allocation103_spill] sm:$0xff] }
 0x7da   :  { %18798 = vmatprep.subr.bf16.mxu0 %v20506_v16 }
 0x7dc   :  { %18783 = vmatmul.mubr.bf16.gmra.mrb[204].mxu0 %v25803_v1 }
 0x7dd   :  { %18799 = vmatpush3.bf16.msra.mxu0 %v20506_v16  ;;  %18802 = vmatprep.mubr.bf16.mxu0 %v23590_v30  ;;  %v20510_v30 = vld [vmem:[%s25432_s3 + $0x550] sm:$0xff]   ;;  %v25821_v16 = vpack.c.bf16 %v25820_v24, %v25793_v44 }
 0x7de   :  { %18800 = vmatprep.subr.bf16.mxu0 %v20507_v29  ;;  %v25824_v44 = vld [vmem:[#allocation104_spill] sm:$0xff] }
 0x7e1   :  { %18801 = vmatpush3.bf16.msra.mxu0 %v20507_v29  ;;  %v25825_v29 = vpack.c.bf16 %v25824_v44, %v25801_v15 }
 0x7e2   :  { %18818 = vmatprep.subr.bf16.mxu0 %v20508_v51 }
 0x7e4   :  { %18803 = vmatmul.mubr.bf16.vlgmr.msra.gmra.mrb[192].mxu0 %v23643_v7  ;;  %v20512_v7 = vld [vmem:[%s25432_s3 + $0x560] sm:$0xff]  }
 0x7e5   :  { %18806 = vmatprep.mubr.bf16.mxu0 %v25761_v53  ;;  %18819 = vmatpush3.bf16.msra.mxu0 %v20508_v51  ;;  %v20513_v53 = vld [vmem:[%s25432_s3 + $0x568] sm:$0xff]  }
 0x7e6   :  { %18820 = vmatprep.subr.bf16.mxu0 %v20509_v31 }
 0x7e9   :  { %18821 = vmatpush3.bf16.msra.mxu0 %v20509_v31 }
 0x7ea   :  { %18822 = vmatprep.subr.bf16.mxu0 %v20510_v30 }
 0x7ec   :  { %18807 = vmatmul.mubr.bf16.gmra.mrb[196].mxu0 %v25805_v36 }
 0x7ed   :  { %18810 = vmatprep.mubr.bf16.mxu0 %v23892_v48  ;;  %18823 = vmatpush3.bf16.msra.mxu0 %v20510_v30  ;;  %v20514_v48 = vld [vmem:[%s25432_s3 + $0x570] sm:$0xff]  }
 0x7ee   :  { %18824 = vmatprep.subr.bf16.mxu0 %v20511_v37 }
 0x7f1   :  { %18825 = vmatpush3.bf16.msra.mxu0 %v20511_v37 }
 0x7f2   :  { %18826 = vmatprep.subr.bf16.mxu0 %v20512_v7 }
 0x7f4   :  { %18811 = vmatmul.mubr.bf16.gmra.mrb[200].mxu0 %v23925_v20  ;;  %v25808_v20 = vld [vmem:[#allocation45_spill] sm:$0xff] }
 0x7f5   :  { %18814 = vmatprep.mubr.bf16.mxu0 %v23970_v58  ;;  %18827 = vmatpush3.bf16.msra.mxu0 %v20512_v7  ;;  %v20516_v58 = vld [vmem:[%s25432_s3 + $0x580] sm:$0xff]  }
 0x7f6   :  { %18828 = vmatprep.subr.bf16.mxu0 %v20513_v53 }
 0x7f9   :  { %18829 = vmatpush3.bf16.msra.mxu0 %v20513_v53 }
 0x7fa   :  { %18830 = vmatprep.subr.bf16.mxu0 %v20514_v48 }
 0x7fc   :  { %18815 = vmatmul.mubr.bf16.gmra.mrb[204].mxu0 %v25807_v23 }
 0x7fd   :  { %18831 = vmatpush3.bf16.msra.mxu0 %v20514_v48  ;;  %18834 = vmatprep.mubr.bf16.mxu0 %v25808_v20 }
 0x7fe   :  { %18832 = vmatprep.subr.bf16.mxu0 %v20515_v21 }
 0x801   :  { %18833 = vmatpush3.bf16.msra.mxu0 %v20515_v21 }
 0x802   :  { %18850 = vmatprep.subr.bf16.mxu0 %v20516_v58 }
 0x804   :  { %18835 = vmatmul.mubr.bf16.vlgmr.msra.gmra.mrb[192].mxu0 %v25809_v13 }
 0x805   :  { %18838 = vmatprep.mubr.bf16.mxu0 %v25765_v9  ;;  %18851 = vmatpush3.bf16.msra.mxu0 %v20516_v58  ;;  %v20520_v9 = vld [vmem:[%s25432_s3 + $0x5a0] sm:$0xff]  }
 0x806   :  { %18852 = vmatprep.subr.bf16.mxu0 %v20517_v60 }
 0x809   :  { %18853 = vmatpush3.bf16.msra.mxu0 %v20517_v60 }
 0x80a   :  { %18854 = vmatprep.subr.bf16.mxu0 %v20518_v0 }
 0x80c   :  { %18839 = vmatmul.mubr.bf16.gmra.mrb[196].mxu0 %v25811_v14 }
 0x80d   :  { %18842 = vmatprep.mubr.bf16.mxu0 %v25767_v34  ;;  %18855 = vmatpush3.bf16.msra.mxu0 %v20518_v0  ;;  %v20522_v34 = vld [vmem:[%s25432_s3 + $0x5b0] sm:$0xff]  }
 0x80e   :  { %18856 = vmatprep.subr.bf16.mxu0 %v20519_v33 }
 0x811   :  { %18857 = vmatpush3.bf16.msra.mxu0 %v20519_v33 }
 0x812   :  { %18858 = vmatprep.subr.bf16.mxu0 %v20520_v9 }
 0x814   :  { %18843 = vmatmul.mubr.bf16.gmra.mrb[200].mxu0 %v25768_v43  ;;  %v20525_v43 = vld [vmem:[%s25432_s3 + $0x5c8] sm:$0xff]  }
 0x815   :  { %18846 = vmatprep.mubr.bf16.mxu0 %v23995_v10  ;;  %18859 = vmatpush3.bf16.msra.mxu0 %v20520_v9  ;;  %v20524_v10 = vld [vmem:[%s25432_s3 + $0x5c0] sm:$0xff]  }
 0x816   :  { %18860 = vmatprep.subr.bf16.mxu0 %v20521_v28 }
 0x819   :  { %18861 = vmatpush3.bf16.msra.mxu0 %v20521_v28 }
 0x81a   :  { %18862 = vmatprep.subr.bf16.mxu0 %v20522_v34 }
 0x81c   :  { %18847 = vmatmul.mubr.bf16.gmra.mrb[204].mxu0 %v25813_v45 }
 0x81d   :  { %18863 = vmatpush3.bf16.msra.mxu0 %v20522_v34  ;;  %18866 = vmatprep.mubr.bf16.mxu0 %v25703_v54  ;;  %v20527_v54 = vld [vmem:[%s25432_s3 + $0x5d8] sm:$0xff]  }
 0x81e   :  { %18864 = vmatprep.subr.bf16.mxu0 %v20523_v39 }
 0x821   :  { %18865 = vmatpush3.bf16.msra.mxu0 %v20523_v39 }
 0x822   :  { %18882 = vmatprep.subr.bf16.mxu0 %v20524_v10 }
 0x824   :  { %18867 = vmatmul.mubr.bf16.vlgmr.msra.gmra.mrb[192].mxu0 %v23657_v47  ;;  %v20528_v47 = vld [vmem:[%s25432_s3 + $0x5e0] sm:$0xff]  }
 0x825   :  { %18870 = vmatprep.mubr.bf16.mxu0 %v25769_v22  ;;  %18883 = vmatpush3.bf16.msra.mxu0 %v20524_v10  ;;  %v20529_v22 = vld [vmem:[%s25432_s3 + $0x5e8] sm:$0xff]  }
 0x826   :  { %18884 = vmatprep.subr.bf16.mxu0 %v20525_v43 }
 0x829   :  { %18885 = vmatpush3.bf16.msra.mxu0 %v20525_v43 }
 0x82a   :  { %18886 = vmatprep.subr.bf16.mxu0 %v20526_v59 }
 0x82c   :  { %18871 = vmatmul.mubr.bf16.gmra.mrb[196].mxu0 %v25815_v41 }
 0x82d   :  { %18874 = vmatprep.mubr.bf16.mxu0 %v23900_v63  ;;  %18887 = vmatpush3.bf16.msra.mxu0 %v20526_v59  ;;  %v20530_v63 = vld [vmem:[%s25432_s3 + $0x5f0] sm:$0xff]  }
 0x82e   :  { %18888 = vmatprep.subr.bf16.mxu0 %v20527_v54 }
 0x831   :  { %18889 = vmatpush3.bf16.msra.mxu0 %v20527_v54 }
 0x832   :  { %18890 = vmatprep.subr.bf16.mxu0 %v20528_v47 }
 0x834   :  { %18875 = vmatmul.mubr.bf16.gmra.mrb[200].mxu0 %v23933_v4  ;;  %v20532_v4 = vld [vmem:[%s25432_s3 + $0x600] sm:$0xff]  }
 0x835   :  { %18878 = vmatprep.mubr.bf16.mxu0 %v23998_v19  ;;  %18891 = vmatpush3.bf16.msra.mxu0 %v20528_v47  ;;  %v20533_v19 = vld [vmem:[%s25432_s3 + $0x608] sm:$0xff]  }
 0x836   :  { %18892 = vmatprep.subr.bf16.mxu0 %v20529_v22 }
 0x839   :  { %18893 = vmatpush3.bf16.msra.mxu0 %v20529_v22 }
 0x83a   :  { %18894 = vmatprep.subr.bf16.mxu0 %v20530_v63 }
 0x83c   :  { %18879 = vmatmul.mubr.bf16.gmra.mrb[204].mxu0 %v25817_v46 }
 0x83d   :  { %18895 = vmatpush3.bf16.msra.mxu0 %v20530_v63  ;;  %18898 = vmatprep.mubr.bf16.mxu0 %v25709_v56  ;;  %v20535_v56 = vld [vmem:[%s25432_s3 + $0x618] sm:$0xff]  }
 0x83e   :  { %18896 = vmatprep.subr.bf16.mxu0 %v20531_v40 }
 0x841   :  { %18897 = vmatpush3.bf16.msra.mxu0 %v20531_v40 }
 0x842   :  { %18914 = vmatprep.subr.bf16.mxu0 %v20532_v4 }
 0x844   :  { %18899 = vmatmul.mubr.bf16.vlgmr.msra.gmra.mrb[192].mxu0 %v23659_v49  ;;  %v20536_v49 = vld [vmem:[%s25432_s3 + $0x620] sm:$0xff]  }
 0x845   :  { %18902 = vmatprep.mubr.bf16.mxu0 %v25770_v8  ;;  %18915 = vmatpush3.bf16.msra.mxu0 %v20532_v4  ;;  %v20537_v8 = vld [vmem:[%s25432_s3 + $0x628] sm:$0xff]  }
 0x846   :  { %18916 = vmatprep.subr.bf16.mxu0 %v20533_v19 }
 0x849   :  { %18917 = vmatpush3.bf16.msra.mxu0 %v20533_v19 }
 0x84a   :  { %18918 = vmatprep.subr.bf16.mxu0 %v20534_v26 }
 0x84c   :  { %18903 = vmatmul.mubr.bf16.gmra.mrb[196].mxu0 %v25819_v57 }
 0x84d   :  { %18906 = vmatprep.mubr.bf16.mxu0 %v23902_v6  ;;  %18919 = vmatpush3.bf16.msra.mxu0 %v20534_v26  ;;  %v20538_v6 = vld [vmem:[%s25432_s3 + $0x630] sm:$0xff]   ;;  %s21580_s3 = smov [#allocation16]  }
 0x84e   :  { %18920 = vmatprep.subr.bf16.mxu0 %v20535_v56  ;;  %s15722_s24 = sshll.u32 %s21580_s3, 4  ;;  %s15723_s24 = int_to_ptr.vmem [resolvable:$true] %s15722_s24 }
 0x84f   :  { %s21531_s27 = scalar_lea.vmem %s15723_s24, 32  ;;  %p21536_p9 = scmp.lt.s32.totalorder %s15723_s24, %s15723_s24 }
 0x850   :  { %p21532_p8 = scmp.ne.s32.totalorder %s15723_s24, %s21531_s27  ;;  %p21537_p10 = scmp.lt.s32.totalorder %s21531_s27, %s21531_s27 }
 0x851   :  { %18921 = vmatpush3.bf16.msra.mxu0 %v20535_v56 }
 0x852   :  { %18922 = vmatprep.subr.bf16.mxu0 %v20536_v49  ;;  %p21538_p11 = por %p21537_p10, %p21536_p9 }
 0x854   :  { %18907 = vmatmul.mubr.bf16.gmra.mrb[200].mxu0 %v23935_v25  ;;  %v25822_v25 = vld [vmem:[#allocation77_spill] sm:$0xff]  ;;  %p21539_p12 = pnand %p21538_p11, %p21532_p8 }
 0x855   :  { %18910 = vmatprep.mubr.bf16.mxu0 %v24001_v50  ;;  %18923 = vmatpush3.bf16.msra.mxu0 %v20536_v49  ;;  %v25823_v50 = vpack.c.bf16 %v25822_v25, %v25798_v61 }
 0x856   :  { %18924 = vmatprep.subr.bf16.mxu0 %v20537_v8 }
 0x859   :  { %18925 = vmatpush3.bf16.msra.mxu0 %v20537_v8 }
 0x85a   :  { %18926 = vmatprep.subr.bf16.mxu0 %v20538_v6 }
 0x85c   :  { %18911 = vmatmul.mubr.bf16.gmra.mrb[204].mxu0 %v25821_v16 }
 0x85d   :  { %18927 = vmatpush3.bf16.msra.mxu0 %v20538_v6  ;;  %18930 = vmatprep.mubr.bf16.mxu0 %v25715_v27  ;;  %v21578_v27 = vmov 0.0  }
 0x85e   :  { %18928 = vmatprep.subr.bf16.mxu0 %v20539_v18  ;;  %18946 = vmatprep.subr.bf16.mxu1 %v21578_v27 }
 0x85f   :  { %18962 = vmatprep.mubr.msk.bf16.mxu1 %vm21579_vm5, %v21578_v27 }
 0x861   :  { %18929 = vmatpush3.bf16.msra.mxu0 %v20539_v18 }
 0x862   :  { %19026 = vmatprep.subr.bf16.mxu0 %v21578_v27 }
 0x864   :  { %18931 = vmatmul.mubr.bf16.vlgmr.msra.gmra.mrb[192].mxu0 %v25716_v2 }
 0x865   :  { %18934 = vmatprep.mubr.bf16.mxu0 %v25771_v38 }
 0x86c   :  { %18935 = vmatmul.mubr.bf16.gmra.mrb[196].mxu0 %v25823_v50 }
 0x86d   :  { %18938 = vmatprep.mubr.bf16.mxu0 %v23904_v35  ;;  %v24875_v35 = vld [vmem:[#allocation7] ss:$0 sm:$0xff] }
 0x874   :  { %18939 = vmatmul.mubr.bf16.gmra.mrb[200].mxu0 %v23937_v52 }
 0x875   :  { %18942 = vmatprep.mubr.bf16.mxu0 %v25772_v3 }
 0x87c   :  { %18943 = vmatmul.mubr.bf16.gmra.mrb[204].mxu0 %v25825_v29 }
 0x87d   :  { %19042 = vmatprep.mubr.msk.bf16.mxu0 %vm21579_vm5, %v21578_v27 }
 0x937   :  { %v18932_v52 = vpop.f32.mrb[192].mxu0 }
 0x938   :  { %v10016_v2 = vadd.f32 %v18932_v52, %v24875_v35  ;;  %v9928_v38 = vpop.f32.mrb[193].mxu0 }
 0x939   :  { %v10014_v3 = vadd.f32 %v24875_v35, %v9928_v38  ;;  %v18933_v61 = vpop.f32.mrb[194].mxu0 }
 0x93a   :  { %v10032_v15 = vmax.f32 %v10016_v2, 0.0  ;;  %v10017_v32 = vadd.f32 %v18933_v61, %v24875_v35  ;;  %v9931_v1 = vpop.f32.mrb[195].mxu0 }
 0x93b   :  { %v10030_v51 = vmax.f32 %v10014_v3, 0.0  ;;  %v10015_v31 = vadd.f32 %v24875_v35, %v9931_v1 }
 0x93c   :  { %v10033_v30 = vmax.f32 %v10017_v32, 0.0  ;;  %v10065_v5 = vrot.slane %v10032_v15, 1 }
 0x93d   :  { %v10031_v37 = vmax.f32 %v10015_v31, 0.0  ;;  %v24881_v7 = vrot.slane %v10030_v51, 1 }
 0x93e   :  { %v10067_v36 = vrot.slane %v10033_v30, 1 }
 0x93f   :  { %v10063_v53 = vrot.slane %v10031_v37, 1  ;;  %v18936_v48 = vpop.f32.mrb[196].mxu0 }
 0x940   :  { %v10068_v21 = vsel %vm1782_vm1, %v10065_v5, %v10067_v36  ;;  %v10020_v55 = vadd.f32 %v18936_v48, %v24875_v35  ;;  %v9944_v23 = vpop.f32.mrb[197].mxu0 }
 0x941   :  { %v10064_v20 = vsel %vm1782_vm1, %v24881_v7, %v10063_v53  ;;  %v10066_v58 = vsel %vm1782_vm1, %v10063_v53, %v10065_v5  ;;  %v10113_v60 = vmax.f32 %v10032_v15, %v10068_v21  ;;  %v10018_v13 = vadd.f32 %v24875_v35, %v9944_v23  ;;  %v18937_v0 = vpop.f32.mrb[198].mxu0 }
 0x942   :  { %v24889_v33 = vmax.f32 %v10030_v51, %v10064_v20  ;;  %v10112_v12 = vmax.f32 %v10031_v37, %v10066_v58  ;;  %v10036_v14 = vmax.f32 %v10020_v55, 0.0  ;;  %v10021_v9 = vadd.f32 %v18937_v0, %v24875_v35  ;;  %v9947_v28 = vpop.f32.mrb[199].mxu0 }
 0x943   :  { %v10034_v34 = vmax.f32 %v10018_v13, 0.0  ;;  %v10019_v39 = vadd.f32 %v24875_v35, %v9947_v28 }
 0x944   :  { %v10127_v42 = vmax.f32 %v24889_v33, %v10112_v12  ;;  %v10128_v45 = vmax.f32 %v10112_v12, %v10113_v60  ;;  %v10037_v10 = vmax.f32 %v10021_v9, 0.0  ;;  %v10073_v17 = vrot.slane %v10036_v14, 1 }
 0x945   :  { %v10069_v43 = vrot.slane %v10034_v34, 1  ;;  %v10035_v59 = vmax.f32 %v10019_v39, 0.0 }
 0x946   :  { %v24894_v54 = vpack.c.bf16 %v10128_v45, %v10127_v42  ;;  %v10075_v41 = vrot.slane %v10037_v10, 1 }
 0x947   :  { %v10070_v47 = vsel %vm1782_vm1, %v10067_v36, %v10069_v43  ;;  %v10071_v22 = vrot.slane %v10035_v59, 1  ;;  %v18940_v63 = vpop.f32.mrb[200].mxu0 }
 0x948   :  { %v10114_v40 = vmax.f32 %v10033_v30, %v10070_v47  ;;  %v10076_v62 = vsel %vm1782_vm1, %v10073_v17, %v10075_v41  ;;  %v10024_v46 = vadd.f32 %v18940_v63, %v24875_v35  ;;  %v9960_v4 = vpop.f32.mrb[201].mxu0  ;;  %18947 = vmatpush3.bf16.msra.mxu1 %v24894_v54  ;;  %19027 = vmatpush3.bf16.msra.mxu0 %v24894_v54 }
 0x949   :  { %v10072_v19 = vsel %vm1782_vm1, %v10069_v43, %v10071_v22  ;;  %v10074_v26 = vsel %vm1782_vm1, %v10071_v22, %v10073_v17  ;;  %v10117_v56 = vmax.f32 %v10036_v14, %v10076_v62  ;;  %v10022_v11 = vadd.f32 %v24875_v35, %v9960_v4  ;;  %v18941_v57 = vpop.f32.mrb[202].mxu0  ;;  %18948 = vmatprep.subr.bf16.mxu1 %v21578_v27 }
 0x94a   :  { %v10129_v49 = vmax.f32 %v10113_v60, %v10114_v40  ;;  %v10115_v8 = vmax.f32 %v10034_v34, %v10072_v19  ;;  %v10116_v6 = vmax.f32 %v10035_v59, %v10074_v26  ;;  %v9963_v18 = vpop.f32.mrb[203].mxu0  ;;  %19028 = vmatprep.subr.bf16.mxu0 %v21578_v27  ;;  %v10040_v24 = vmax.f32 %v10024_v46, 0.0 }
 0x94b   :  { %v10038_v16 = vmax.f32 %v10022_v11, 0.0  ;;  %v10025_v25 = vadd.f32 %v18941_v57, %v24875_v35  ;;  %v10023_v50 = vadd.f32 %v24875_v35, %v9963_v18 }
 0x94c   :  { %v10130_v44 = vmax.f32 %v10114_v40, %v10115_v8  ;;  %v10131_v29 = vmax.f32 %v10115_v8, %v10116_v6  ;;  %v10132_v52 = vmax.f32 %v10116_v6, %v10117_v56  ;;  %v10081_v32 = vrot.slane %v10040_v24, 1 }
 0x94d   :  { %v10077_v2 = vrot.slane %v10038_v16, 1  ;;  %v10041_v38 = vmax.f32 %v10025_v25, 0.0  ;;  %v10039_v3 = vmax.f32 %v10023_v50, 0.0  ;;  %v20540_v50 = vld [vmem:[#allocation8] ss:$0 sps:$4 sm:$0x22]  }
 0x94e   :  { %v24908_v61 = vpack.c.bf16 %v10130_v44, %v10129_v49  ;;  %v24910_v15 = vpack.c.bf16 %v10132_v52, %v10131_v29  ;;  %v20543_v44 = vld [vmem:[#allocation10 + $0x104] ss:$16 sps:$4 sm:$0xff]   ;;  %v10229_v29 = vrot.slane %v20540_v50, 1  ;;  %v20541_v52 = vld [vmem:[#allocation10 + $0x100] ss:$16 sps:$4 sm:$0xff]  }
 0x94f   :  { %v10078_v1 = vsel %vm1782_vm1, %v10075_v41, %v10077_v2  ;;  %v10083_v51 = vrot.slane %v10041_v38, 1  ;;  %v10079_v31 = vrot.slane %v10039_v3, 1  ;;  %v18944_v30 = vpop.f32.mrb[204].mxu0  ;;  %v20604_v50 = vld [vmem:[#allocation10 + $0xa0] ss:$16 sps:$4 sm:$0xff]  }
 0x950   :  { %v10118_v37 = vmax.f32 %v10037_v10, %v10078_v1  ;;  %v10028_v5 = vadd.f32 %v18944_v30, %v24875_v35  ;;  %v9976_v36 = vpop.f32.mrb[205].mxu0  ;;  %18949 = vmatpush3.bf16.msra.mxu1 %v24908_v61  ;;  %19029 = vmatpush3.bf16.msra.mxu0 %v24908_v61  ;;  %v20547_v1 = vld [vmem:[#allocation10 + $0x140] ss:$16 sps:$4 sm:$0xff]   ;;  %v20555_v30 = vld [vmem:[#allocation10 + $0x184] ss:$16 sps:$4 sm:$0xff]  }
 0x951   :  { %v10084_v53 = vsel %vm1782_vm1, %v10081_v32, %v10083_v51  ;;  %v10080_v48 = vsel %vm1782_vm1, %v10077_v2, %v10079_v31  ;;  %v10082_v21 = vsel %vm1782_vm1, %v10079_v31, %v10081_v32  ;;  %v10026_v55 = vadd.f32 %v24875_v35, %v9976_v36  ;;  %v18945_v23 = vpop.f32.mrb[206].mxu0  ;;  %18950 = vmatprep.subr.bf16.mxu1 %v21578_v27  ;;  %v20546_v2 = vld [vmem:[#allocation10 + $0x124] ss:$16 sps:$4 sm:$0xff]   ;;  %v20550_v31 = vld [vmem:[#allocation10 + $0x160] ss:$16 sps:$4 sm:$0xff]  }
 0x952   :  { %v10133_v20 = vmax.f32 %v10117_v56, %v10118_v37  ;;  %v10119_v58 = vmax.f32 %v10038_v16, %v10080_v48  ;;  %v10120_v60 = vmax.f32 %v10039_v3, %v10082_v21  ;;  %v10121_v13 = vmax.f32 %v10040_v24, %v10084_v53  ;;  %v9979_v0 = vpop.f32.mrb[207].mxu0  ;;  %19030 = vmatprep.subr.bf16.mxu0 %v21578_v27  ;;  %v20549_v32 = vld [vmem:[#allocation10 + $0x144] ss:$16 sps:$4 sm:$0xff]   ;;  %v20556_v36 = vld [vmem:[#allocation10 + $0x1a0] ss:$16 sps:$4 sm:$0xff]  }
 0x953   :  { %v10044_v12 = vmax.f32 %v10028_v5, 0.0  ;;  %v10042_v14 = vmax.f32 %v10026_v55, 0.0  ;;  %v10029_v9 = vadd.f32 %v18945_v23, %v24875_v35  ;;  %v10027_v28 = vadd.f32 %v24875_v35, %v9979_v0  ;;  %v20558_v5 = vld [vmem:[#allocation10 + $0x1a4] ss:$16 sps:$4 sm:$0xff]   ;;  %v20559_v48 = vld [vmem:[#allocation10 + $0x1c0] ss:$16 sps:$4 sm:$0xff]  }
 0x954   :  { %v10134_v34 = vmax.f32 %v10118_v37, %v10119_v58  ;;  %v10135_v39 = vmax.f32 %v10119_v58, %v10120_v60  ;;  %v10136_v42 = vmax.f32 %v10120_v60, %v10121_v13  ;;  %18951 = vmatpush3.bf16.msra.mxu1 %v24910_v15  ;;  %19031 = vmatpush3.bf16.msra.mxu0 %v24910_v15  ;;  %v25826_v3 = vmov 0   ;;  %v20553_v37 = vld [vmem:[#allocation10 + $0x180] ss:$16 sps:$4 sm:$0xff]   ;;  %v20561_v53 = vld [vmem:[#allocation10 + $0x1c4] ss:$16 sps:$4 sm:$0xff]  }
 0x955   :  { %v10085_v45 = vrot.slane %v10042_v14, 1  ;;  %v10045_v10 = vmax.f32 %v10029_v9, 0.0  ;;  %v10043_v43 = vmax.f32 %v10027_v28, 0.0  ;;  %18952 = vmatprep.subr.bf16.mxu1 %v21578_v27  ;;  %19032 = vmatprep.subr.bf16.mxu0 %v21578_v27  ;;  %v10089_v41 = vrot.slane %v10044_v12, 1  ;;  %v20562_v21 = vld [vmem:[#allocation10 + $0x1e0] ss:$16 sps:$4 sm:$0xff]  }
 0x956   :  { %v24928_v59 = vpack.c.bf16 %v10134_v34, %v10133_v20  ;;  %v24930_v17 = vpack.c.bf16 %v10136_v42, %v10135_v39  ;;  %v20564_v55 = vld [vmem:[#allocation10 + $0x1e4] ss:$16 sps:$4 sm:$0xff]   ;;  %v20567_v23 = vld [vmem:[#allocation10 + $0x10c] ss:$16 sps:$4 sm:$0xff]   ;;  %v20568_v42 = vld [vmem:[#allocation10 + $0x128] ss:$16 sps:$4 sm:$0xff]  }
 0x957   :  { %v10086_v35 = vsel %vm1782_vm1, %v10083_v51, %v10085_v45  ;;  %v10091_v47 = vrot.slane %v10045_v10, 1  ;;  %v10087_v22 = vrot.slane %v10043_v43, 1  ;;  %v20552_v51 = vld [vmem:[#allocation10 + $0x164] ss:$16 sps:$4 sm:$0xff]   ;;  %v20570_v9 = vld [vmem:[#allocation10 + $0x12c] ss:$16 sps:$4 sm:$0xff]  }
 0x958   :  { %v10122_v63 = vmax.f32 %v10041_v38, %v10086_v35  ;;  %18953 = vmatpush3.bf16.msra.mxu1 %v24928_v59  ;;  %19033 = vmatpush3.bf16.msra.mxu0 %v24928_v59  ;;  %v20544_v38 = vld [vmem:[#allocation10 + $0x120] ss:$16 sps:$4 sm:$0xff]   ;;  %v20579_v35 = vld [vmem:[#allocation10 + $0x18c] ss:$16 sps:$4 sm:$0xff]  }
 0x959   :  { %v10092_v40 = vsel %vm1782_vm1, %v10089_v41, %v10091_v47  ;;  %v10110_v62 = vsel %vm1782_vm1, %v10091_v47, %v24881_v7  ;;  %v10088_v46 = vsel %vm1782_vm1, %v10085_v45, %v10087_v22  ;;  %v10090_v4 = vsel %vm1782_vm1, %v10087_v22, %v10089_v41  ;;  %18954 = vmatprep.subr.bf16.mxu1 %v21578_v27  ;;  %v20573_v45 = vld [vmem:[#allocation10 + $0x14c] ss:$16 sps:$4 sm:$0xff]   ;;  %v20574_v41 = vld [vmem:[#allocation10 + $0x168] ss:$16 sps:$4 sm:$0xff]  }
 0x95a   :  { %v10137_v19 = vmax.f32 %v10121_v13, %v10122_v63  ;;  %v10125_v26 = vmax.f32 %v10044_v12, %v10092_v40  ;;  %v10126_v56 = vmax.f32 %v10045_v10, %v10110_v62  ;;  %v10123_v11 = vmax.f32 %v10042_v14, %v10088_v46  ;;  %19034 = vmatprep.subr.bf16.mxu0 %v21578_v27  ;;  %v20565_v12 = vld [vmem:[#allocation10 + $0x108] ss:$16 sps:$4 sm:$0xff]   ;;  %v20582_v22 = vld [vmem:[#allocation10 + $0x1ac] ss:$16 sps:$4 sm:$0xff]  }
 0x95b   :  { %v10124_v57 = vmax.f32 %v10043_v43, %v10090_v4  ;;  %v20571_v10 = vld [vmem:[#allocation10 + $0x148] ss:$16 sps:$4 sm:$0xff]   ;;  %v20576_v43 = vld [vmem:[#allocation10 + $0x16c] ss:$16 sps:$4 sm:$0xff]  }
 0x95c   :  { %v10141_v49 = vmax.f32 %v10125_v26, %v10126_v56  ;;  %v10142_v8 = vmax.f32 %v10126_v56, %v24889_v33  ;;  %v10138_v6 = vmax.f32 %v10122_v63, %v10123_v11  ;;  %18955 = vmatpush3.bf16.msra.mxu1 %v24930_v17  ;;  %19035 = vmatpush3.bf16.msra.mxu0 %v24930_v17  ;;  %v10151_v33 = vld [vmem:[#allocation8] sm:$0x1]  ;;  %v20577_v47 = vld [vmem:[#allocation10 + $0x188] ss:$16 sps:$4 sm:$0xff]   ;;  %v20585_v40 = vld [vmem:[#allocation10 + $0x1cc] ss:$16 sps:$4 sm:$0xff]  }
 0x95d   :  { %v10139_v7 = vmax.f32 %v10123_v11, %v10124_v57  ;;  %v10140_v18 = vmax.f32 %v10124_v57, %v10125_v26  ;;  %18956 = vmatprep.subr.bf16.mxu1 %v21578_v27  ;;  %19036 = vmatprep.subr.bf16.mxu0 %v21578_v27  ;;  %v20580_v63 = vld [vmem:[#allocation10 + $0x1a8] ss:$16 sps:$4 sm:$0xff]   ;;  %v20588_v46 = vld [vmem:[#allocation10 + $0x1ec] ss:$16 sps:$4 sm:$0xff]   ;;  %v20589_v26 = vld [vmem:[#allocation10] ss:$16 sps:$4 sm:$0xff]  }
 0x95e   :  { %v24947_v24 = vpack.c.bf16 %v10142_v8, %v10141_v49  ;;  %v24949_v16 = vpack.c.bf16 %v10138_v6, %v10137_v19  ;;  %v20583_v62 = vld [vmem:[#allocation10 + $0x1c8] ss:$16 sps:$4 sm:$0xff]   ;;  %v20591_v19 = vld [vmem:[#allocation10 + $0x4] ss:$16 sps:$4 sm:$0xff]   ;;  %v20592_v11 = vld [vmem:[#allocation10 + $0x20] ss:$16 sps:$4 sm:$0xff]  }
 0x95f   :  { %v24951_v25 = vpack.c.bf16 %v10140_v18, %v10139_v7  ;;  %v20586_v4 = vld [vmem:[#allocation10 + $0x1e8] ss:$16 sps:$4 sm:$0xff]   ;;  %v20594_v56 = vld [vmem:[#allocation10 + $0x24] ss:$16 sps:$4 sm:$0xff]   ;;  %v20595_v49 = vld [vmem:[#allocation10 + $0x40] ss:$16 sps:$4 sm:$0xff]  }
 0x960   :  { %18957 = vmatpush3.bf16.msra.mxu1 %v24949_v16  ;;  %19037 = vmatpush3.bf16.msra.mxu0 %v24949_v16  ;;  %v20597_v57 = vld [vmem:[#allocation10 + $0x44] ss:$16 sps:$4 sm:$0xff]   ;;  %v20598_v6 = vld [vmem:[#allocation10 + $0x60] ss:$16 sps:$4 sm:$0xff]  }
 0x961   :  { %18958 = vmatprep.subr.bf16.mxu1 %v21578_v27  ;;  %19038 = vmatprep.subr.bf16.mxu0 %v21578_v27  ;;  %v20600_v8 = vld [vmem:[#allocation10 + $0x64] ss:$16 sps:$4 sm:$0xff]   ;;  %v20601_v18 = vld [vmem:[#allocation10 + $0x80] ss:$16 sps:$4 sm:$0xff]  }
 0x962   :  { %v20603_v7 = vld [vmem:[#allocation10 + $0x84] ss:$16 sps:$4 sm:$0xff]  }
 0x964   :  { %18959 = vmatpush3.bf16.msra.mxu1 %v24951_v25  ;;  %19039 = vmatpush3.bf16.msra.mxu0 %v24951_v25 }
 0x965   :  { %18960 = vmatprep.subr.bf16.mxu1 %v21578_v27  ;;  %19040 = vmatprep.subr.bf16.mxu0 %v21578_v27 }
 0x968   :  { %18961 = vmatpush3.bf16.msra.mxu1 %v24947_v24  ;;  %19041 = vmatpush3.bf16.msra.mxu0 %v24947_v24 }
 0x969   :  { %18966 = vmatprep.subr.bf16.mxu1 %v21578_v27 }
 0x96b   :  { %18963 = vmatmul.mubr.bf16.vlgmr.msra.gmra.mrb[96].mxu1 %v10151_v33  ;;  %v20606_v33 = vld [vmem:[#allocation10 + $0xa4] ss:$16 sps:$4 sm:$0xff]  }
 0x96c   :  { %18967 = vmatpush3.bf16.msra.mxu1 %v24894_v54  ;;  %18982 = vmatprep.mubr.msk.bf16.mxu1 %vm21579_vm5, %v21578_v27 }
 0x96d   :  { %18968 = vmatprep.subr.bf16.mxu1 %v21578_v27 }
 0x970   :  { %18969 = vmatpush3.bf16.msra.mxu1 %v24908_v61 }
 0x971   :  { %18970 = vmatprep.subr.bf16.mxu1 %v21578_v27 }
 0x974   :  { %18971 = vmatpush3.bf16.msra.mxu1 %v24910_v15 }
 0x975   :  { %18972 = vmatprep.subr.bf16.mxu1 %v21578_v27 }
 0x978   :  { %18973 = vmatpush3.bf16.msra.mxu1 %v24928_v59 }
 0x979   :  { %18974 = vmatprep.subr.bf16.mxu1 %v21578_v27 }
 0x97c   :  { %18975 = vmatpush3.bf16.msra.mxu1 %v24930_v17 }
 0x97d   :  { %18976 = vmatprep.subr.bf16.mxu1 %v21578_v27 }
 0x980   :  { %18977 = vmatpush3.bf16.msra.mxu1 %v24949_v16 }
 0x981   :  { %18978 = vmatprep.subr.bf16.mxu1 %v21578_v27 }
 0x984   :  { %18979 = vmatpush3.bf16.msra.mxu1 %v24951_v25 }
 0x985   :  { %18980 = vmatprep.subr.bf16.mxu1 %v21578_v27 }
 0x988   :  { %18981 = vmatpush3.bf16.msra.mxu1 %v24947_v24 }
 0x989   :  { %10465 = vmatprep.subr.bf16.mxu1 %v20543_v44  ;;  %v20609_v44 = vld [vmem:[#allocation10 + $0xc4] ss:$16 sps:$4 sm:$0xff]  }
 0x98b   :  { %18983 = vmatmul.mubr.bf16.vlgmr.msra.gmra.mrb[100].mxu1 %v10229_v29  ;;  %v20607_v29 = vld [vmem:[#allocation10 + $0xc0] ss:$16 sps:$4 sm:$0xff]  }
 0x98c   :  { %10466 = vmatpush1.bf16.msra.mxu1 %v20541_v52  ;;  %10497 = vmatprep.mubr.bf16.mxu1 %v25826_v3  ;;  %v20612_v52 = vld [vmem:[#allocation10 + $0xe4] ss:$16 sps:$4 sm:$0xff]  }
 0x98d   :  { %10467 = vmatprep.subr.bf16.mxu1 %v20546_v2  ;;  %v20610_v2 = vld [vmem:[#allocation10 + $0xe0] ss:$16 sps:$4 sm:$0xff]  }
 0x990   :  { %10468 = vmatpush1.bf16.msra.mxu1 %v20544_v38  ;;  %v20615_v38 = vld [vmem:[#allocation10 + $0xc] ss:$16 sps:$4 sm:$0xff]  }
 0x991   :  { %10469 = vmatprep.subr.bf16.mxu1 %v20549_v32  ;;  %v20613_v32 = vld [vmem:[#allocation10 + $0x8] ss:$16 sps:$4 sm:$0xff]  }
 0x994   :  { %10470 = vmatpush1.bf16.msra.mxu1 %v20547_v1 }
 0x995   :  { %10471 = vmatprep.subr.bf16.mxu1 %v20552_v51  ;;  %v20618_v51 = vld [vmem:[#allocation10 + $0x2c] ss:$16 sps:$4 sm:$0xff]  }
 0x998   :  { %10472 = vmatpush1.bf16.msra.mxu1 %v20550_v31  ;;  %v20616_v31 = vld [vmem:[#allocation10 + $0x28] ss:$16 sps:$4 sm:$0xff]  }
 0x999   :  { %10473 = vmatprep.subr.bf16.mxu1 %v20555_v30  ;;  %v20621_v30 = vld [vmem:[#allocation10 + $0x4c] ss:$16 sps:$4 sm:$0xff]  }
 0x99c   :  { %10474 = vmatpush1.bf16.msra.mxu1 %v20553_v37  ;;  %v20619_v37 = vld [vmem:[#allocation10 + $0x48] ss:$16 sps:$4 sm:$0xff]  }
 0x99d   :  { %10475 = vmatprep.subr.bf16.mxu1 %v20558_v5  ;;  %v20624_v5 = vld [vmem:[#allocation10 + $0x6c] ss:$16 sps:$4 sm:$0xff]  }
 0x9a0   :  { %10476 = vmatpush1.bf16.msra.mxu1 %v20556_v36  ;;  %v20622_v36 = vld [vmem:[#allocation10 + $0x68] ss:$16 sps:$4 sm:$0xff]  }
 0x9a1   :  { %10477 = vmatprep.subr.bf16.mxu1 %v20561_v53  ;;  %v20627_v53 = vld [vmem:[#allocation10 + $0x8c] ss:$16 sps:$4 sm:$0xff]  }
 0x9a4   :  { %10478 = vmatpush1.bf16.msra.mxu1 %v20559_v48  ;;  %v20625_v48 = vld [vmem:[#allocation10 + $0x88] ss:$16 sps:$4 sm:$0xff]  }
 0x9a5   :  { %10479 = vmatprep.subr.bf16.mxu1 %v20564_v55  ;;  %v20628_v55 = vld [vmem:[#allocation10 + $0xa8] ss:$16 sps:$4 sm:$0xff]  }
 0x9a8   :  { %10480 = vmatpush1.bf16.msra.mxu1 %v20562_v21  ;;  %v20630_v21 = vld [vmem:[#allocation10 + $0xac] ss:$16 sps:$4 sm:$0xff]  }
 0x9a9   :  { %10506 = vmatprep.subr.bf16.mxu1 %v20567_v23  ;;  %v20633_v23 = vld [vmem:[#allocation10 + $0xcc] ss:$16 sps:$4 sm:$0xff]  }
 0xa3e   :  { %v24982_v20 = vpop.f32.mrb[96].mxu1 }
 0xa3f   :  { %v18964_v58 = vpop.f32.mrb[97].mxu1  ;;  %v10192_v1 = vpack.c.bf16 %v24982_v20, %v24982_v20  ;;  %v20631_v20 = vld [vmem:[#allocation10 + $0xc8] ss:$16 sps:$4 sm:$0xff]  }
 0xa40   :  { %v10189_v60 = vpop.f32.mrb[98].mxu1  ;;  %v20636_v58 = vld [vmem:[#allocation10 + $0xec] ss:$16 sps:$4 sm:$0xff]  }
 0xa41   :  { %v18965_v13 = vpop.f32.mrb[99].mxu1  ;;  %v20634_v60 = vld [vmem:[#allocation10 + $0xe8] ss:$16 sps:$4 sm:$0xff]  }
 0xa42   :  { %v20637_v13 = vld [vmem:[#allocation8] ss:$0 sps:$4 sm:$0x44]  }
 0xa5e   :  { %v10265_v0 = vpop.f32.mrb[100].mxu1 }
 0xa5f   :  { %v10271_v14 = vpack.c.bf16 %v10265_v0, %v10265_v0  ;;  %v18984_v28 = vpop.f32.mrb[101].mxu1  ;;  %v20640_v0 = vld [vmem:[#allocation10 + $0x204] ss:$16 sps:$4 sm:$0xff]  }
 0xa60   :  { %v10268_v34 = vpop.f32.mrb[102].mxu1  ;;  %v20641_v28 = vld [vmem:[#allocation10 + $0x220] ss:$16 sps:$4 sm:$0xff]  }
 0xa61   :  { %10498 = vmatmul.mubr.bf16.vlgmr.msra.gmra.mrb[104].mxu1 %v10271_v14  ;;  %v18985_v39 = vpop.f32.mrb[103].mxu1  ;;  %v20646_v34 = vld [vmem:[#allocation10 + $0x244] ss:$16 sps:$4 sm:$0xff]  }
 0xa62   :  { %10507 = vmatpush1.bf16.msra.mxu1 %v20565_v12  ;;  %10538 = vmatprep.mubr.bf16.mxu1 %v25826_v3  ;;  %v10793_v12 = vrot.slane %v20637_v13, 2  ;;  %v20644_v39 = vld [vmem:[#allocation10 + $0x240] ss:$16 sps:$4 sm:$0xff]   ;;  %v20679_v13 = vld [vmem:[#allocation10 + $0x2ac] ss:$16 sps:$4 sm:$0xff]  }
 0xa63   :  { %10508 = vmatprep.subr.bf16.mxu1 %v20570_v9  ;;  %v20643_v9 = vld [vmem:[#allocation10 + $0x224] ss:$16 sps:$4 sm:$0xff]  }
 0xa66   :  { %10509 = vmatpush1.bf16.msra.mxu1 %v20568_v42  ;;  %v20649_v42 = vld [vmem:[#allocation10 + $0x264] ss:$16 sps:$4 sm:$0xff]  }
 0xa67   :  { %10510 = vmatprep.subr.bf16.mxu1 %v20573_v45  ;;  %v20647_v45 = vld [vmem:[#allocation10 + $0x260] ss:$16 sps:$4 sm:$0xff]  }
 0xa6a   :  { %10511 = vmatpush1.bf16.msra.mxu1 %v20571_v10  ;;  %v20652_v10 = vld [vmem:[#allocation10 + $0x284] ss:$16 sps:$4 sm:$0xff]  }
 0xa6b   :  { %10512 = vmatprep.subr.bf16.mxu1 %v20576_v43  ;;  %v20650_v43 = vld [vmem:[#allocation10 + $0x280] ss:$16 sps:$4 sm:$0xff]  }
 0xa6e   :  { %10513 = vmatpush1.bf16.msra.mxu1 %v20574_v41  ;;  %v20655_v41 = vld [vmem:[#allocation10 + $0x2a4] ss:$16 sps:$4 sm:$0xff]  }
 0xa6f   :  { %10514 = vmatprep.subr.bf16.mxu1 %v20579_v35  ;;  %v20653_v35 = vld [vmem:[#allocation10 + $0x2a0] ss:$16 sps:$4 sm:$0xff]  }
 0xa72   :  { %10515 = vmatpush1.bf16.msra.mxu1 %v20577_v47  ;;  %v20656_v47 = vld [vmem:[#allocation10 + $0x2c0] ss:$16 sps:$4 sm:$0xff]  }
 0xa73   :  { %10516 = vmatprep.subr.bf16.mxu1 %v20582_v22  ;;  %v20658_v22 = vld [vmem:[#allocation10 + $0x2c4] ss:$16 sps:$4 sm:$0xff]  }
 0xa76   :  { %10517 = vmatpush1.bf16.msra.mxu1 %v20580_v63  ;;  %v20659_v63 = vld [vmem:[#allocation10 + $0x2e0] ss:$16 sps:$4 sm:$0xff]  }
 0xa77   :  { %10518 = vmatprep.subr.bf16.mxu1 %v20585_v40  ;;  %v20661_v40 = vld [vmem:[#allocation10 + $0x2e4] ss:$16 sps:$4 sm:$0xff]  }
 0xa7a   :  { %10519 = vmatpush1.bf16.msra.mxu1 %v20583_v62 }
 0xa7b   :  { %10520 = vmatprep.subr.bf16.mxu1 %v20588_v46  ;;  %v20664_v46 = vld [vmem:[#allocation10 + $0x20c] ss:$16 sps:$4 sm:$0xff]  }
 0xa7e   :  { %10521 = vmatpush1.bf16.msra.mxu1 %v20586_v4 }
 0xa7f   :  { %10707 = vmatprep.subr.bf16.mxu1 %v20591_v19 }
 0xa81   :  { %10539 = vmatmul.mubr.bf16.vlgmr.msra.gmra.mrb[108].mxu1 %v10271_v14  ;;  %v20638_v14 = vld [vmem:[#allocation10 + $0x200] ss:$16 sps:$4 sm:$0xff]  }
 0xa82   :  { %10708 = vmatpush1.bf16.msra.mxu1 %v20589_v26  ;;  %10739 = vmatprep.mubr.bf16.mxu1 %v25826_v3 }
 0xa83   :  { %10709 = vmatprep.subr.bf16.mxu1 %v20594_v56 }
 0xa86   :  { %10710 = vmatpush1.bf16.msra.mxu1 %v20592_v11 }
 0xa87   :  { %10711 = vmatprep.subr.bf16.mxu1 %v20597_v57 }
 0xa8a   :  { %10712 = vmatpush1.bf16.msra.mxu1 %v20595_v49 }
 0xa8b   :  { %10713 = vmatprep.subr.bf16.mxu1 %v20600_v8 }
 0xa8e   :  { %10714 = vmatpush1.bf16.msra.mxu1 %v20598_v6 }
 0xa8f   :  { %10715 = vmatprep.subr.bf16.mxu1 %v20603_v7 }
 0xa92   :  { %10716 = vmatpush1.bf16.msra.mxu1 %v20601_v18 }
 0xa93   :  { %10717 = vmatprep.subr.bf16.mxu1 %v20606_v33 }
 0xa96   :  { %10718 = vmatpush1.bf16.msra.mxu1 %v20604_v50 }
 0xa97   :  { %10719 = vmatprep.subr.bf16.mxu1 %v20609_v44  ;;  %v11441_v44 = vld [vmem:[#allocation8 + $0x4] sm:$0x1] }
 0xa98   :  { %19043 = vmatmul.mubr.bf16.vlgmr.msra.gmra.mrb[208].mxu0 %v11441_v44  ;;  %v20734_v44 = vld [vmem:[#allocation10 + $0x46c] ss:$16 sps:$4 sm:$0xff]  }
 0xa99   :  { %11749 = vmatprep.mubr.bf16.mxu0 %v25826_v3 }
 0xa9a   :  { %10720 = vmatpush1.bf16.msra.mxu1 %v20607_v29 }
 0xa9b   :  { %10721 = vmatprep.subr.bf16.mxu1 %v20612_v52 }
 0xa9e   :  { %10722 = vmatpush1.bf16.msra.mxu1 %v20610_v2 }
 0xa9f   :  { %10748 = vmatprep.subr.bf16.mxu1 %v20615_v38 }
 0xaa1   :  { %10740 = vmatmul.mubr.bf16.vlgmr.msra.gmra.mrb[112].mxu1 %v10192_v1 }
 0xaa2   :  { %10749 = vmatpush1.bf16.msra.mxu1 %v20613_v32  ;;  %10780 = vmatprep.mubr.bf16.mxu1 %v25826_v3 }
 0xaa3   :  { %10750 = vmatprep.subr.bf16.mxu1 %v20618_v51 }
 0xaa6   :  { %10751 = vmatpush1.bf16.msra.mxu1 %v20616_v31  ;;  %v20662_v31 = vld [vmem:[#allocation10 + $0x208] ss:$16 sps:$4 sm:$0xff]  }
 0xaa7   :  { %10752 = vmatprep.subr.bf16.mxu1 %v20621_v30 }
 0xaaa   :  { %10753 = vmatpush1.bf16.msra.mxu1 %v20619_v37  ;;  %v20667_v37 = vld [vmem:[#allocation10 + $0x22c] ss:$16 sps:$4 sm:$0xff]  }
 0xaab   :  { %10754 = vmatprep.subr.bf16.mxu1 %v20624_v5 }
 0xaae   :  { %10755 = vmatpush1.bf16.msra.mxu1 %v20622_v36 }
 0xaaf   :  { %10756 = vmatprep.subr.bf16.mxu1 %v20627_v53 }
 0xab2   :  { %10757 = vmatpush1.bf16.msra.mxu1 %v20625_v48  ;;  %v20665_v48 = vld [vmem:[#allocation10 + $0x228] ss:$16 sps:$4 sm:$0xff]  }
 0xab3   :  { %10758 = vmatprep.subr.bf16.mxu1 %v20630_v21  ;;  %v20670_v21 = vld [vmem:[#allocation10 + $0x24c] ss:$16 sps:$4 sm:$0xff]  }
 0xab6   :  { %10759 = vmatpush1.bf16.msra.mxu1 %v20628_v55  ;;  %v20668_v55 = vld [vmem:[#allocation10 + $0x248] ss:$16 sps:$4 sm:$0xff]  }
 0xab7   :  { %10760 = vmatprep.subr.bf16.mxu1 %v20633_v23  ;;  %v20673_v23 = vld [vmem:[#allocation10 + $0x26c] ss:$16 sps:$4 sm:$0xff]  }
 0xaba   :  { %10761 = vmatpush1.bf16.msra.mxu1 %v20631_v20  ;;  %v20671_v20 = vld [vmem:[#allocation10 + $0x268] ss:$16 sps:$4 sm:$0xff]  }
 0xabb   :  { %10762 = vmatprep.subr.bf16.mxu1 %v20636_v58  ;;  %v20676_v58 = vld [vmem:[#allocation10 + $0x28c] ss:$16 sps:$4 sm:$0xff]  }
 0xabe   :  { %10763 = vmatpush1.bf16.msra.mxu1 %v20634_v60  ;;  %v20674_v60 = vld [vmem:[#allocation10 + $0x288] ss:$16 sps:$4 sm:$0xff]  }
 0xabf   :  { %18986 = vmatprep.subr.bf16.mxu1 %v21578_v27 }
 0xac1   :  { %10781 = vmatmul.mubr.bf16.vlgmr.msra.gmra.mrb[116].mxu1 %v10192_v1 }
 0xac2   :  { %18987 = vmatpush3.bf16.msra.mxu1 %v24894_v54  ;;  %19002 = vmatprep.mubr.msk.bf16.mxu1 %vm21579_vm5, %v21578_v27 }
 0xac3   :  { %18988 = vmatprep.subr.bf16.mxu1 %v21578_v27 }
 0xac6   :  { %18989 = vmatpush3.bf16.msra.mxu1 %v24908_v61 }
 0xac7   :  { %18990 = vmatprep.subr.bf16.mxu1 %v21578_v27 }
 0xaca   :  { %18991 = vmatpush3.bf16.msra.mxu1 %v24910_v15 }
 0xacb   :  { %18992 = vmatprep.subr.bf16.mxu1 %v21578_v27 }
 0xace   :  { %18993 = vmatpush3.bf16.msra.mxu1 %v24928_v59 }
 0xacf   :  { %18994 = vmatprep.subr.bf16.mxu1 %v21578_v27 }
 0xad2   :  { %18995 = vmatpush3.bf16.msra.mxu1 %v24930_v17 }
 0xad3   :  { %18996 = vmatprep.subr.bf16.mxu1 %v21578_v27 }
 0xad6   :  { %18997 = vmatpush3.bf16.msra.mxu1 %v24949_v16 }
 0xad7   :  { %18998 = vmatprep.subr.bf16.mxu1 %v21578_v27 }
 0xada   :  { %18999 = vmatpush3.bf16.msra.mxu1 %v24951_v25 }
 0xadb   :  { %19000 = vmatprep.subr.bf16.mxu1 %v21578_v27 }
 0xade   :  { %19001 = vmatpush3.bf16.msra.mxu1 %v24947_v24 }
 0xadf   :  { %11029 = vmatprep.subr.bf16.mxu1 %v20640_v0  ;;  %v20677_v0 = vld [vmem:[#allocation10 + $0x2a8] ss:$16 sps:$4 sm:$0xff]  }
 0xae1   :  { %19003 = vmatmul.mubr.bf16.vlgmr.msra.gmra.mrb[120].mxu1 %v10793_v12  ;;  %v20682_v12 = vld [vmem:[#allocation10 + $0x2cc] ss:$16 sps:$4 sm:$0xff]  }
 0xae2   :  { %11030 = vmatpush1.bf16.msra.mxu1 %v20638_v14  ;;  %11061 = vmatprep.mubr.bf16.mxu1 %v25826_v3  ;;  %v20680_v14 = vld [vmem:[#allocation10 + $0x2c8] ss:$16 sps:$4 sm:$0xff]  }
 0xae3   :  { %11031 = vmatprep.subr.bf16.mxu1 %v20643_v9  ;;  %v20685_v9 = vld [vmem:[#allocation10 + $0x2ec] ss:$16 sps:$4 sm:$0xff]  }
 0xae6   :  { %11032 = vmatpush1.bf16.msra.mxu1 %v20641_v28  ;;  %v20683_v28 = vld [vmem:[#allocation10 + $0x2e8] ss:$16 sps:$4 sm:$0xff]  }
 0xae7   :  { %11033 = vmatprep.subr.bf16.mxu1 %v20646_v34  ;;  %v20686_v34 = vld [vmem:[#allocation8] ss:$0 sps:$4 sm:$0x88]  }
 0xaea   :  { %11034 = vmatpush1.bf16.msra.mxu1 %v20644_v39  ;;  %v11119_v39 = vrot.slane %v20686_v34, 3 }
 0xaeb   :  { %11035 = vmatprep.subr.bf16.mxu1 %v20649_v42  ;;  %v20689_v42 = vld [vmem:[#allocation10 + $0x304] ss:$16 sps:$4 sm:$0xff]  }
 0xaee   :  { %11036 = vmatpush1.bf16.msra.mxu1 %v20647_v45  ;;  %v20687_v45 = vld [vmem:[#allocation10 + $0x300] ss:$16 sps:$4 sm:$0xff]  }
 0xaef   :  { %11037 = vmatprep.subr.bf16.mxu1 %v20652_v10  ;;  %v20692_v10 = vld [vmem:[#allocation10 + $0x324] ss:$16 sps:$4 sm:$0xff]  }
 0xaf2   :  { %11038 = vmatpush1.bf16.msra.mxu1 %v20650_v43  ;;  %v20690_v43 = vld [vmem:[#allocation10 + $0x320] ss:$16 sps:$4 sm:$0xff]  }
 0xaf3   :  { %11039 = vmatprep.subr.bf16.mxu1 %v20655_v41  ;;  %v20695_v41 = vld [vmem:[#allocation10 + $0x344] ss:$16 sps:$4 sm:$0xff]  }
 0xaf6   :  { %11040 = vmatpush1.bf16.msra.mxu1 %v20653_v35  ;;  %v20693_v35 = vld [vmem:[#allocation10 + $0x340] ss:$16 sps:$4 sm:$0xff]  }
 0xaf7   :  { %11041 = vmatprep.subr.bf16.mxu1 %v20658_v22  ;;  %v20696_v22 = vld [vmem:[#allocation10 + $0x360] ss:$16 sps:$4 sm:$0xff]  }
 0xafa   :  { %11042 = vmatpush1.bf16.msra.mxu1 %v20656_v47  ;;  %v20698_v47 = vld [vmem:[#allocation10 + $0x364] ss:$16 sps:$4 sm:$0xff]  }
 0xafb   :  { %11043 = vmatprep.subr.bf16.mxu1 %v20661_v40  ;;  %v20699_v40 = vld [vmem:[#allocation10 + $0x380] ss:$16 sps:$4 sm:$0xff]  }
 0xafe   :  { %11044 = vmatpush1.bf16.msra.mxu1 %v20659_v63  ;;  %v20701_v63 = vld [vmem:[#allocation10 + $0x384] ss:$16 sps:$4 sm:$0xff]  }
 0xaff   :  { %11070 = vmatprep.subr.bf16.mxu1 %v20664_v46  ;;  %v20702_v46 = vld [vmem:[#allocation10 + $0x3a0] ss:$16 sps:$4 sm:$0xff]  }
 0xb34   :  { %v10499_v62 = vpop.f32.mrb[104].mxu1 }
 0xb35   :  { %v10501_v4 = vpop.f32.mrb[105].mxu1 }
 0xb36   :  { %v10503_v19 = vpop.f32.mrb[106].mxu1 }
 0xb37   :  { %v10504_v26 = vpop.f32.mrb[107].mxu1  ;;  %v20705_v19 = vld [vmem:[#allocation10 + $0x3c0] ss:$16 sps:$4 sm:$0xff]  }
 0xb38   :  { %v20710_v26 = vld [vmem:[#allocation10 + $0x3e4] ss:$16 sps:$4 sm:$0xff]  }
 0xb54   :  { %v10540_v56 = vpop.f32.mrb[108].mxu1 }
 0xb55   :  { %v10542_v11 = vpop.f32.mrb[109].mxu1 }
 0xb56   :  { %v10544_v57 = vpop.f32.mrb[110].mxu1 }
 0xb57   :  { %v10545_v49 = vpop.f32.mrb[111].mxu1  ;;  %v20716_v57 = vld [vmem:[#allocation10 + $0x40c] ss:$16 sps:$4 sm:$0xff]  }
 0xb58   :  { %v20714_v49 = vld [vmem:[#allocation10 + $0x408] ss:$16 sps:$4 sm:$0xff]   ;;  %11717 = vmatprep.subr.bf16.mxu0 %v20716_v57  ;;  %v20759_v57 = vld [vmem:[#allocation10 + $0x400] ss:$16 sps:$4 sm:$0xff]  }
 0xb59   :  { %11718 = vmatpush1.bf16.msra.mxu0 %v20714_v49  ;;  %v20764_v49 = vld [vmem:[#allocation10 + $0x424] ss:$16 sps:$4 sm:$0xff]  }
 0xb74   :  { %v10741_v8 = vpop.f32.mrb[112].mxu1 }
 0xb75   :  { %v25008_v6 = vadd.f32 %v10741_v8, %v10499_v62  ;;  %v10743_v7 = vpop.f32.mrb[113].mxu1  ;;  %v20704_v62 = vld [vmem:[#allocation10 + $0x3a4] ss:$16 sps:$4 sm:$0xff]   ;;  %v20722_v8 = vld [vmem:[#allocation10 + $0x42c] ss:$16 sps:$4 sm:$0xff]  }
 0xb76   :  { %v25010_v18 = vadd.f32 %v10743_v7, %v10501_v4  ;;  %v10745_v33 = vpop.f32.mrb[114].mxu1  ;;  %v20707_v4 = vld [vmem:[#allocation10 + $0x3c4] ss:$16 sps:$4 sm:$0xff]   ;;  %v20720_v7 = vld [vmem:[#allocation10 + $0x428] ss:$16 sps:$4 sm:$0xff]   ;;  %11719 = vmatprep.subr.bf16.mxu0 %v20722_v8 }
 0xb77   :  { %v10746_v50 = vpop.f32.mrb[115].mxu1  ;;  %11720 = vmatpush1.bf16.msra.mxu0 %v20720_v7  ;;  %v20728_v33 = vld [vmem:[#allocation10 + $0x44c] ss:$16 sps:$4 sm:$0xff]   ;;  %v20762_v8 = vld [vmem:[#allocation10 + $0x420] ss:$16 sps:$4 sm:$0xff]  }
 0xb78   :  { %v20726_v50 = vld [vmem:[#allocation10 + $0x448] ss:$16 sps:$4 sm:$0xff]   ;;  %11721 = vmatprep.subr.bf16.mxu0 %v20728_v33  ;;  %v20767_v7 = vld [vmem:[#allocation10 + $0x444] ss:$16 sps:$4 sm:$0xff]   ;;  %v20765_v33 = vld [vmem:[#allocation10 + $0x440] ss:$16 sps:$4 sm:$0xff]  }
 0xb7b   :  { %11722 = vmatpush1.bf16.msra.mxu0 %v20726_v50  ;;  %v20770_v50 = vld [vmem:[#allocation10 + $0x464] ss:$16 sps:$4 sm:$0xff]  }
 0xb7c   :  { %11723 = vmatprep.subr.bf16.mxu0 %v20734_v44  ;;  %v20768_v44 = vld [vmem:[#allocation10 + $0x460] ss:$16 sps:$4 sm:$0xff]  }
 0xb94   :  { %v10782_v29 = vpop.f32.mrb[116].mxu1 }
 0xb95   :  { %v25013_v52 = vadd.f32 %v10782_v29, %v10540_v56  ;;  %v10784_v2 = vpop.f32.mrb[117].mxu1  ;;  %v20708_v56 = vld [vmem:[#allocation10 + $0x3e0] ss:$16 sps:$4 sm:$0xff]   ;;  %v20732_v29 = vld [vmem:[#allocation10 + $0x468] ss:$16 sps:$4 sm:$0xff]  }
 0xb96   :  { %v25015_v38 = vadd.f32 %v10784_v2, %v10542_v11  ;;  %v10786_v32 = vpop.f32.mrb[118].mxu1  ;;  %v20713_v11 = vld [vmem:[#allocation10 + $0x30c] ss:$16 sps:$4 sm:$0xff]   ;;  %11724 = vmatpush1.bf16.msra.mxu0 %v20732_v29  ;;  %v20773_v29 = vld [vmem:[#allocation10 + $0x484] ss:$16 sps:$4 sm:$0xff]  }
 0xb97   :  { %v10787_v1 = vpop.f32.mrb[119].mxu1  ;;  %v20740_v2 = vld [vmem:[#allocation10 + $0x48c] ss:$16 sps:$4 sm:$0xff]   ;;  %v20738_v32 = vld [vmem:[#allocation10 + $0x488] ss:$16 sps:$4 sm:$0xff]  }
 0xb98   :  { %11725 = vmatprep.subr.bf16.mxu0 %v20740_v2  ;;  %v20746_v1 = vld [vmem:[#allocation10 + $0x4ac] ss:$16 sps:$4 sm:$0xff]   ;;  %v20771_v2 = vld [vmem:[#allocation10 + $0x480] ss:$16 sps:$4 sm:$0xff]  }
 0xb9a   :  { %11726 = vmatpush1.bf16.msra.mxu0 %v20738_v32  ;;  %v20776_v32 = vld [vmem:[#allocation10 + $0x4a4] ss:$16 sps:$4 sm:$0xff]  }
 0xb9b   :  { %11727 = vmatprep.subr.bf16.mxu0 %v20746_v1  ;;  %v20774_v1 = vld [vmem:[#allocation10 + $0x4a0] ss:$16 sps:$4 sm:$0xff]  }
 0xbb4   :  { %v10829_v51 = vpop.f32.mrb[120].mxu1 }
 0xbb5   :  { %v10835_v30 = vpack.c.bf16 %v10829_v51, %v10829_v51  ;;  %v19004_v5 = vpop.f32.mrb[121].mxu1  ;;  %v20744_v51 = vld [vmem:[#allocation10 + $0x4a8] ss:$16 sps:$4 sm:$0xff]  }
 0xbb6   :  { %v10832_v36 = vpop.f32.mrb[122].mxu1  ;;  %11728 = vmatpush1.bf16.msra.mxu0 %v20744_v51  ;;  %v20756_v5 = vld [vmem:[#allocation10 + $0x4e8] ss:$16 sps:$4 sm:$0xff]   ;;  %v20779_v51 = vld [vmem:[#allocation10 + $0x4c4] ss:$16 sps:$4 sm:$0xff]  }
 0xbb7   :  { %11062 = vmatmul.mubr.bf16.vlgmr.msra.gmra.mrb[124].mxu1 %v10835_v30  ;;  %v19005_v53 = vpop.f32.mrb[123].mxu1  ;;  %v11476_v36 = vpop.f32.mrb[208].mxu0 }
 0xbb8   :  { %11071 = vmatpush1.bf16.msra.mxu1 %v20662_v31  ;;  %11102 = vmatprep.mubr.bf16.mxu1 %v25826_v3  ;;  %v20752_v31 = vld [vmem:[#allocation10 + $0x4cc] ss:$16 sps:$4 sm:$0xff]   ;;  %v25037_v53 = vpack.c.bf16 %v11476_v36, %v11476_v36 }
 0xbb9   :  { %11072 = vmatprep.subr.bf16.mxu1 %v20667_v37  ;;  %11729 = vmatprep.subr.bf16.mxu0 %v20752_v31  ;;  %v20758_v37 = vld [vmem:[#allocation10 + $0x4ec] ss:$16 sps:$4 sm:$0xff]   ;;  %v20777_v31 = vld [vmem:[#allocation10 + $0x4c0] ss:$16 sps:$4 sm:$0xff]  }
 0xbbc   :  { %11073 = vmatpush1.bf16.msra.mxu1 %v20665_v48  ;;  %v19044_v48 = vpop.f32.mrb[209].mxu0 }
 0xbbd   :  { %11074 = vmatprep.subr.bf16.mxu1 %v20670_v21  ;;  %v11479_v21 = vpop.f32.mrb[210].mxu0 }
 0xbc0   :  { %11075 = vmatpush1.bf16.msra.mxu1 %v20668_v55  ;;  %v19045_v55 = vpop.f32.mrb[211].mxu0 }
 0xbc1   :  { %11076 = vmatprep.subr.bf16.mxu1 %v20673_v23 }
 0xbc4   :  { %11077 = vmatpush1.bf16.msra.mxu1 %v20671_v20 }
 0xbc5   :  { %11078 = vmatprep.subr.bf16.mxu1 %v20676_v58 }
 0xbc8   :  { %11079 = vmatpush1.bf16.msra.mxu1 %v20674_v60 }
 0xbc9   :  { %11080 = vmatprep.subr.bf16.mxu1 %v20679_v13 }
 0xbcc   :  { %11081 = vmatpush1.bf16.msra.mxu1 %v20677_v0 }
 0xbcd   :  { %11082 = vmatprep.subr.bf16.mxu1 %v20682_v12 }
 0xbd0   :  { %11083 = vmatpush1.bf16.msra.mxu1 %v20680_v14 }
 0xbd1   :  { %11084 = vmatprep.subr.bf16.mxu1 %v20685_v9 }
 0xbd4   :  { %11085 = vmatpush1.bf16.msra.mxu1 %v20683_v28 }
 0xbd5   :  { %19006 = vmatprep.subr.bf16.mxu1 %v21578_v27 }
 0xbd7   :  { %11103 = vmatmul.mubr.bf16.vlgmr.msra.gmra.mrb[128].mxu1 %v10835_v30  ;;  %v20750_v30 = vld [vmem:[#allocation10 + $0x4c8] ss:$16 sps:$4 sm:$0xff]  }
 0xbd8   :  { %19007 = vmatpush3.bf16.msra.mxu1 %v24894_v54  ;;  %19022 = vmatprep.mubr.msk.bf16.mxu1 %vm21579_vm5, %v21578_v27 }
 0xbd9   :  { %19008 = vmatprep.subr.bf16.mxu1 %v21578_v27  ;;  %11730 = vmatpush1.bf16.msra.mxu0 %v20750_v30  ;;  %v20782_v30 = vld [vmem:[#allocation10 + $0x4e4] ss:$16 sps:$4 sm:$0xff]  }
 0xbda   :  { %11731 = vmatprep.subr.bf16.mxu0 %v20758_v37  ;;  %v20780_v37 = vld [vmem:[#allocation10 + $0x4e0] ss:$16 sps:$4 sm:$0xff]  }
 0xbdc   :  { %19009 = vmatpush3.bf16.msra.mxu1 %v24908_v61 }
 0xbdd   :  { %19010 = vmatprep.subr.bf16.mxu1 %v21578_v27  ;;  %11732 = vmatpush1.bf16.msra.mxu0 %v20756_v5  ;;  %v20783_v5 = vld [vmem:[#allocation8 + $0x4] ss:$0 sps:$4 sm:$0x22]  }
 0xbde   :  { %v11766_v36 = vrot.slane %v20783_v5, 1 }
 0xbe0   :  { %19011 = vmatpush3.bf16.msra.mxu1 %v24910_v15  ;;  %11750 = vmatmul.mubr.bf16.vlgmr.msra.gmra.mrb[212].mxu0 %v25037_v53 }
 0xbe1   :  { %19012 = vmatprep.subr.bf16.mxu1 %v21578_v27  ;;  %12034 = vmatprep.mubr.bf16.mxu0 %v25826_v3 }
 0xbe4   :  { %19013 = vmatpush3.bf16.msra.mxu1 %v24928_v59 }
 0xbe5   :  { %19014 = vmatprep.subr.bf16.mxu1 %v21578_v27 }
 0xbe8   :  { %19015 = vmatpush3.bf16.msra.mxu1 %v24930_v17 }
 0xbe9   :  { %19016 = vmatprep.subr.bf16.mxu1 %v21578_v27 }
 0xbec   :  { %19017 = vmatpush3.bf16.msra.mxu1 %v24949_v16 }
 0xbed   :  { %19018 = vmatprep.subr.bf16.mxu1 %v21578_v27 }
 0xbf0   :  { %19019 = vmatpush3.bf16.msra.mxu1 %v24951_v25 }
 0xbf1   :  { %19020 = vmatprep.subr.bf16.mxu1 %v21578_v27 }
 0xbf4   :  { %19021 = vmatpush3.bf16.msra.mxu1 %v24947_v24 }
 0xbf5   :  { %11355 = vmatprep.subr.bf16.mxu1 %v20689_v42 }
 0xbf7   :  { %19023 = vmatmul.mubr.bf16.vlgmr.msra.gmra.mrb[132].mxu1 %v11119_v39 }
 0xbf8   :  { %11387 = vmatprep.mubr.bf16.mxu1 %v25826_v3  ;;  %11356 = vmatpush1.bf16.msra.mxu1 %v20687_v45  ;;  %v20711_v45 = vld [vmem:[#allocation10 + $0x308] ss:$16 sps:$4 sm:$0xff]  }
 0xbf9   :  { %11357 = vmatprep.subr.bf16.mxu1 %v20692_v10  ;;  %v20719_v10 = vld [vmem:[#allocation10 + $0x32c] ss:$16 sps:$4 sm:$0xff]  }
 0xbfc   :  { %11358 = vmatpush1.bf16.msra.mxu1 %v20690_v43 }
 0xbfd   :  { %11359 = vmatprep.subr.bf16.mxu1 %v20695_v41 }
 0xc00   :  { %11360 = vmatpush1.bf16.msra.mxu1 %v20693_v35  ;;  %v20717_v35 = vld [vmem:[#allocation10 + $0x328] ss:$16 sps:$4 sm:$0xff]  }
 0xc01   :  { %11361 = vmatprep.subr.bf16.mxu1 %v20698_v47  ;;  %v20723_v47 = vld [vmem:[#allocation10 + $0x348] ss:$16 sps:$4 sm:$0xff]  }
 0xc04   :  { %11362 = vmatpush1.bf16.msra.mxu1 %v20696_v22  ;;  %v20729_v22 = vld [vmem:[#allocation10 + $0x368] ss:$16 sps:$4 sm:$0xff]  }
 0xc05   :  { %11363 = vmatprep.subr.bf16.mxu1 %v20701_v63  ;;  %v20737_v63 = vld [vmem:[#allocation10 + $0x38c] ss:$16 sps:$4 sm:$0xff]  }
 0xc08   :  { %11364 = vmatpush1.bf16.msra.mxu1 %v20699_v40  ;;  %v20735_v40 = vld [vmem:[#allocation10 + $0x388] ss:$16 sps:$4 sm:$0xff]  }
 0xc09   :  { %11365 = vmatprep.subr.bf16.mxu1 %v20704_v62  ;;  %v20743_v62 = vld [vmem:[#allocation10 + $0x3ac] ss:$16 sps:$4 sm:$0xff]  }
 0xc0c   :  { %11366 = vmatpush1.bf16.msra.mxu1 %v20702_v46  ;;  %v20741_v46 = vld [vmem:[#allocation10 + $0x3a8] ss:$16 sps:$4 sm:$0xff]  }
 0xc0d   :  { %11367 = vmatprep.subr.bf16.mxu1 %v20707_v4  ;;  %v20749_v4 = vld [vmem:[#allocation10 + $0x3cc] ss:$16 sps:$4 sm:$0xff]  }
 0xc10   :  { %11368 = vmatpush1.bf16.msra.mxu1 %v20705_v19  ;;  %v20747_v19 = vld [vmem:[#allocation10 + $0x3c8] ss:$16 sps:$4 sm:$0xff]  }
 0xc11   :  { %11369 = vmatprep.subr.bf16.mxu1 %v20710_v26  ;;  %v20755_v26 = vld [vmem:[#allocation10 + $0x3ec] ss:$16 sps:$4 sm:$0xff]  }
 0xc14   :  { %11370 = vmatpush1.bf16.msra.mxu1 %v20708_v56  ;;  %v20753_v56 = vld [vmem:[#allocation10 + $0x3e8] ss:$16 sps:$4 sm:$0xff]  }
 0xc15   :  { %11396 = vmatprep.subr.bf16.mxu1 %v20713_v11  ;;  %v20761_v11 = vld [vmem:[#allocation10 + $0x404] ss:$16 sps:$4 sm:$0xff]  }
 0xc8a   :  { %v11063_v23 = vpop.f32.mrb[124].mxu1 }
 0xc8b   :  { %v25042_v20 = vadd.f32 %v11063_v23, %v25008_v6  ;;  %v11065_v58 = vpop.f32.mrb[125].mxu1  ;;  %v20786_v23 = vld [vmem:[#allocation10 + $0x504] ss:$16 sps:$4 sm:$0xff]  }
 0xc8c   :  { %v25045_v60 = vadd.f32 %v11065_v58, %v25010_v18  ;;  %v11067_v13 = vpop.f32.mrb[126].mxu1  ;;  %v20784_v58 = vld [vmem:[#allocation10 + $0x500] ss:$16 sps:$4 sm:$0xff]   ;;  %12002 = vmatprep.subr.bf16.mxu0 %v20786_v23 }
 0xc8d   :  { %v11068_v0 = vpop.f32.mrb[127].mxu1  ;;  %v20789_v13 = vld [vmem:[#allocation10 + $0x50c] ss:$16 sps:$4 sm:$0xff]   ;;  %12003 = vmatpush1.bf16.msra.mxu0 %v20784_v58 }
 0xc8e   :  { %v20787_v0 = vld [vmem:[#allocation10 + $0x508] ss:$16 sps:$4 sm:$0xff]  }
 0xcaa   :  { %v11104_v12 = vpop.f32.mrb[128].mxu1 }
 0xcab   :  { %v25048_v14 = vadd.f32 %v11104_v12, %v25013_v52  ;;  %v11106_v9 = vpop.f32.mrb[129].mxu1  ;;  %v20725_v52 = vld [vmem:[#allocation10 + $0x34c] ss:$16 sps:$4 sm:$0xff]   ;;  %v20792_v12 = vld [vmem:[#allocation10 + $0x524] ss:$16 sps:$4 sm:$0xff]  }
 0xcac   :  { %v25051_v28 = vadd.f32 %v11106_v9, %v25015_v38  ;;  %v11108_v34 = vpop.f32.mrb[130].mxu1  ;;  %v20731_v38 = vld [vmem:[#allocation10 + $0x36c] ss:$16 sps:$4 sm:$0xff]   ;;  %v20790_v9 = vld [vmem:[#allocation10 + $0x520] ss:$16 sps:$4 sm:$0xff]   ;;  %12004 = vmatprep.subr.bf16.mxu0 %v20792_v12 }
 0xcad   :  { %v11109_v39 = vpop.f32.mrb[131].mxu1  ;;  %v20795_v34 = vld [vmem:[#allocation10 + $0x52c] ss:$16 sps:$4 sm:$0xff]   ;;  %12005 = vmatpush1.bf16.msra.mxu0 %v20790_v9  ;;  %v20835_v9 = vld [vmem:[#allocation10 + $0x604] ss:$16 sps:$4 sm:$0xff]  }
 0xcae   :  { %v20793_v39 = vld [vmem:[#allocation10 + $0x528] ss:$16 sps:$4 sm:$0xff]  }
 0xcca   :  { %v11155_v42 = vpop.f32.mrb[132].mxu1 }
 0xccb   :  { %v11161_v6 = vpack.c.bf16 %v11155_v42, %v11155_v42  ;;  %v19024_v43 = vpop.f32.mrb[133].mxu1  ;;  %v20798_v42 = vld [vmem:[#allocation10 + $0x544] ss:$16 sps:$4 sm:$0xff]  }
 0xccc   :  { %v11158_v41 = vpop.f32.mrb[134].mxu1  ;;  %12006 = vmatprep.subr.bf16.mxu0 %v20798_v42  ;;  %v20804_v43 = vld [vmem:[#allocation10 + $0x564] ss:$16 sps:$4 sm:$0xff]   ;;  %v20836_v42 = vld [vmem:[#allocation10 + $0x608] ss:$16 sps:$4 sm:$0xff]  }
 0xccd   :  { %11388 = vmatmul.mubr.bf16.vlgmr.msra.gmra.mrb[136].mxu1 %v11161_v6  ;;  %v19025_v18 = vpop.f32.mrb[135].mxu1  ;;  %v20807_v41 = vld [vmem:[#allocation10 + $0x56c] ss:$16 sps:$4 sm:$0xff]  }
 0xcce   :  { %11397 = vmatpush1.bf16.msra.mxu1 %v20711_v45  ;;  %11428 = vmatprep.mubr.bf16.mxu1 %v25826_v3  ;;  %v20801_v45 = vld [vmem:[#allocation10 + $0x54c] ss:$16 sps:$4 sm:$0xff]   ;;  %v20802_v18 = vld [vmem:[#allocation10 + $0x560] ss:$16 sps:$4 sm:$0xff]  }
 0xccf   :  { %11398 = vmatprep.subr.bf16.mxu1 %v20719_v10  ;;  %v20799_v10 = vld [vmem:[#allocation10 + $0x548] ss:$16 sps:$4 sm:$0xff]  }
 0xcd2   :  { %11399 = vmatpush1.bf16.msra.mxu1 %v20717_v35  ;;  %v20805_v35 = vld [vmem:[#allocation10 + $0x568] ss:$16 sps:$4 sm:$0xff]  }
 0xcd3   :  { %11400 = vmatprep.subr.bf16.mxu1 %v20725_v52  ;;  %v20810_v52 = vld [vmem:[#allocation10 + $0x584] ss:$16 sps:$4 sm:$0xff]  }
 0xcd6   :  { %11401 = vmatpush1.bf16.msra.mxu1 %v20723_v47  ;;  %v20813_v47 = vld [vmem:[#allocation10 + $0x58c] ss:$16 sps:$4 sm:$0xff]  }
 0xcd7   :  { %11402 = vmatprep.subr.bf16.mxu1 %v20731_v38  ;;  %v20808_v38 = vld [vmem:[#allocation10 + $0x580] ss:$16 sps:$4 sm:$0xff]  }
 0xcda   :  { %11403 = vmatpush1.bf16.msra.mxu1 %v20729_v22  ;;  %v20811_v22 = vld [vmem:[#allocation10 + $0x588] ss:$16 sps:$4 sm:$0xff]  }
 0xcdb   :  { %11404 = vmatprep.subr.bf16.mxu1 %v20737_v63  ;;  %v20816_v63 = vld [vmem:[#allocation10 + $0x5a4] ss:$16 sps:$4 sm:$0xff]  }
 0xcde   :  { %11405 = vmatpush1.bf16.msra.mxu1 %v20735_v40  ;;  %v20819_v40 = vld [vmem:[#allocation10 + $0x5ac] ss:$16 sps:$4 sm:$0xff]  }
 0xcdf   :  { %11406 = vmatprep.subr.bf16.mxu1 %v20743_v62  ;;  %v20814_v62 = vld [vmem:[#allocation10 + $0x5a0] ss:$16 sps:$4 sm:$0xff]  }
 0xce2   :  { %11407 = vmatpush1.bf16.msra.mxu1 %v20741_v46  ;;  %v20817_v46 = vld [vmem:[#allocation10 + $0x5a8] ss:$16 sps:$4 sm:$0xff]  }
 0xce3   :  { %11408 = vmatprep.subr.bf16.mxu1 %v20749_v4  ;;  %v20822_v4 = vld [vmem:[#allocation10 + $0x5c4] ss:$16 sps:$4 sm:$0xff]  }
 0xce6   :  { %11409 = vmatpush1.bf16.msra.mxu1 %v20747_v19  ;;  %v20825_v19 = vld [vmem:[#allocation10 + $0x5cc] ss:$16 sps:$4 sm:$0xff]  }
 0xce7   :  { %11410 = vmatprep.subr.bf16.mxu1 %v20755_v26  ;;  %v20820_v26 = vld [vmem:[#allocation10 + $0x5c0] ss:$16 sps:$4 sm:$0xff]  }
 0xcea   :  { %11411 = vmatpush1.bf16.msra.mxu1 %v20753_v56  ;;  %v20823_v56 = vld [vmem:[#allocation10 + $0x5c8] ss:$16 sps:$4 sm:$0xff]  }
 0xceb   :  { %11676 = vmatprep.subr.bf16.mxu1 %v20761_v11  ;;  %v20828_v11 = vld [vmem:[#allocation10 + $0x5e4] ss:$16 sps:$4 sm:$0xff]  }
 0xced   :  { %11429 = vmatmul.mubr.bf16.vlgmr.msra.gmra.mrb[140].mxu1 %v11161_v6  ;;  %v20796_v6 = vld [vmem:[#allocation10 + $0x540] ss:$16 sps:$4 sm:$0xff]  }
 0xcee   :  { %11677 = vmatpush1.bf16.msra.mxu1 %v20759_v57  ;;  %11708 = vmatprep.mubr.bf16.mxu1 %v25826_v3  ;;  %v20831_v57 = vld [vmem:[#allocation10 + $0x5ec] ss:$16 sps:$4 sm:$0xff]  }
 0xcef   :  { %11678 = vmatprep.subr.bf16.mxu1 %v20764_v49  ;;  %12007 = vmatpush1.bf16.msra.mxu0 %v20796_v6  ;;  %v20826_v49 = vld [vmem:[#allocation10 + $0x5e0] ss:$16 sps:$4 sm:$0xff]  }
 0xcf0   :  { %12008 = vmatprep.subr.bf16.mxu0 %v20804_v43  ;;  %v20839_v6 = vld [vmem:[#allocation10 + $0x620] ss:$16 sps:$4 sm:$0xff]   ;;  %v20842_v43 = vld [vmem:[#allocation10 + $0x628] ss:$16 sps:$4 sm:$0xff]  }
 0xcf2   :  { %11679 = vmatpush1.bf16.msra.mxu1 %v20762_v8  ;;  %v20829_v8 = vld [vmem:[#allocation10 + $0x5e8] ss:$16 sps:$4 sm:$0xff]  }
 0xcf3   :  { %11680 = vmatprep.subr.bf16.mxu1 %v20767_v7  ;;  %12009 = vmatpush1.bf16.msra.mxu0 %v20802_v18  ;;  %v20850_v18 = vld [vmem:[#allocation10 + $0x64c] ss:$16 sps:$4 sm:$0xff]  }
 0xcf4   :  { %12010 = vmatprep.subr.bf16.mxu0 %v20810_v52  ;;  %v20848_v52 = vld [vmem:[#allocation10 + $0x648] ss:$16 sps:$4 sm:$0xff]  }
 0xcf6   :  { %11681 = vmatpush1.bf16.msra.mxu1 %v20765_v33 }
 0xcf7   :  { %11682 = vmatprep.subr.bf16.mxu1 %v20770_v50  ;;  %12011 = vmatpush1.bf16.msra.mxu0 %v20808_v38  ;;  %v20856_v38 = vld [vmem:[#allocation10 + $0x66c] ss:$16 sps:$4 sm:$0xff]  }
 0xcf8   :  { %12012 = vmatprep.subr.bf16.mxu0 %v20816_v63  ;;  %v20854_v63 = vld [vmem:[#allocation10 + $0x668] ss:$16 sps:$4 sm:$0xff]  }
 0xcfa   :  { %11683 = vmatpush1.bf16.msra.mxu1 %v20768_v44 }
 0xcfb   :  { %11684 = vmatprep.subr.bf16.mxu1 %v20773_v29  ;;  %12013 = vmatpush1.bf16.msra.mxu0 %v20814_v62  ;;  %v20862_v62 = vld [vmem:[#allocation10 + $0x68c] ss:$16 sps:$4 sm:$0xff]  }
 0xcfc   :  { %12014 = vmatprep.subr.bf16.mxu0 %v20822_v4  ;;  %v20860_v4 = vld [vmem:[#allocation10 + $0x688] ss:$16 sps:$4 sm:$0xff]  }
 0xcfe   :  { %11685 = vmatpush1.bf16.msra.mxu1 %v20771_v2 }
 0xcff   :  { %11686 = vmatprep.subr.bf16.mxu1 %v20776_v32  ;;  %12015 = vmatpush1.bf16.msra.mxu0 %v20820_v26  ;;  %v20868_v26 = vld [vmem:[#allocation10 + $0x6ac] ss:$16 sps:$4 sm:$0xff]  }
 0xd00   :  { %12016 = vmatprep.subr.bf16.mxu0 %v20828_v11  ;;  %v20866_v11 = vld [vmem:[#allocation10 + $0x6a8] ss:$16 sps:$4 sm:$0xff]  }
 0xd02   :  { %11687 = vmatpush1.bf16.msra.mxu1 %v20774_v1 }
 0xd03   :  { %11688 = vmatprep.subr.bf16.mxu1 %v20779_v51  ;;  %12017 = vmatpush1.bf16.msra.mxu0 %v20826_v49  ;;  %v20874_v49 = vld [vmem:[#allocation10 + $0x6cc] ss:$16 sps:$4 sm:$0xff]  }
 0xd04   :  { %19066 = vmatprep.subr.bf16.mxu0 %v21578_v27 }
 0xd06   :  { %11689 = vmatpush1.bf16.msra.mxu1 %v20777_v31 }
 0xd07   :  { %11690 = vmatprep.subr.bf16.mxu1 %v20782_v30 }
 0xd0a   :  { %11691 = vmatpush1.bf16.msra.mxu1 %v20780_v37 }
 0xd0b   :  { %19046 = vmatprep.subr.bf16.mxu1 %v21578_v27 }
 0xd0d   :  { %11709 = vmatmul.mubr.bf16.vlgmr.msra.gmra.mrb[144].mxu1 %v25037_v53  ;;  %v25075_v53 = vpop.f32.mrb[212].mxu0 }
 0xd0e   :  { %19047 = vmatpush3.bf16.msra.mxu1 %v24894_v54  ;;  %19062 = vmatprep.mubr.msk.bf16.mxu1 %vm21579_vm5, %v21578_v27  ;;  %v25077_v48 = vpop.f32.mrb[213].mxu0 }
 0xd0f   :  { %19048 = vmatprep.subr.bf16.mxu1 %v21578_v27  ;;  %v11755_v21 = vpop.f32.mrb[214].mxu0 }
 0xd10   :  { %v11756_v55 = vpop.f32.mrb[215].mxu0 }
 0xd12   :  { %19049 = vmatpush3.bf16.msra.mxu1 %v24908_v61 }
 0xd13   :  { %19050 = vmatprep.subr.bf16.mxu1 %v21578_v27 }
 0xd16   :  { %19051 = vmatpush3.bf16.msra.mxu1 %v24910_v15 }
 0xd17   :  { %19052 = vmatprep.subr.bf16.mxu1 %v21578_v27 }
 0xd1a   :  { %19053 = vmatpush3.bf16.msra.mxu1 %v24928_v59 }
 0xd1b   :  { %19054 = vmatprep.subr.bf16.mxu1 %v21578_v27 }
 0xd1e   :  { %19055 = vmatpush3.bf16.msra.mxu1 %v24930_v17 }
 0xd1f   :  { %19056 = vmatprep.subr.bf16.mxu1 %v21578_v27 }
 0xd22   :  { %19057 = vmatpush3.bf16.msra.mxu1 %v24949_v16 }
 0xd23   :  { %19058 = vmatprep.subr.bf16.mxu1 %v21578_v27 }
 0xd26   :  { %19059 = vmatpush3.bf16.msra.mxu1 %v24951_v25 }
 0xd27   :  { %19060 = vmatprep.subr.bf16.mxu1 %v21578_v27 }
 0xd2a   :  { %19061 = vmatpush3.bf16.msra.mxu1 %v24947_v24 }
 0xd2b   :  { %12043 = vmatprep.subr.bf16.mxu1 %v20789_v13 }
 0xd2d   :  { %19063 = vmatmul.mubr.bf16.vlgmr.msra.gmra.mrb[148].mxu1 %v11766_v36 }
 0xd2e   :  { %12075 = vmatprep.mubr.bf16.mxu1 %v25826_v3  ;;  %12044 = vmatpush1.bf16.msra.mxu1 %v20787_v0 }
 0xd2f   :  { %12045 = vmatprep.subr.bf16.mxu1 %v20795_v34  ;;  %v20833_v34 = vld [vmem:[#allocation10 + $0x600] ss:$16 sps:$4 sm:$0xff]  }
 0xd32   :  { %12046 = vmatpush1.bf16.msra.mxu1 %v20793_v39  ;;  %v20838_v39 = vld [vmem:[#allocation10 + $0x60c] ss:$16 sps:$4 sm:$0xff]  }
 0xd33   :  { %12047 = vmatprep.subr.bf16.mxu1 %v20801_v45  ;;  %v20841_v45 = vld [vmem:[#allocation10 + $0x624] ss:$16 sps:$4 sm:$0xff]  }
 0xd36   :  { %12048 = vmatpush1.bf16.msra.mxu1 %v20799_v10  ;;  %v20844_v10 = vld [vmem:[#allocation10 + $0x62c] ss:$16 sps:$4 sm:$0xff]  }
 0xd37   :  { %12049 = vmatprep.subr.bf16.mxu1 %v20807_v41  ;;  %v20847_v41 = vld [vmem:[#allocation10 + $0x644] ss:$16 sps:$4 sm:$0xff]  }
 0xd3a   :  { %12050 = vmatpush1.bf16.msra.mxu1 %v20805_v35  ;;  %v20845_v35 = vld [vmem:[#allocation10 + $0x640] ss:$16 sps:$4 sm:$0xff]  }
 0xd3b   :  { %12051 = vmatprep.subr.bf16.mxu1 %v20813_v47  ;;  %v20853_v47 = vld [vmem:[#allocation10 + $0x664] ss:$16 sps:$4 sm:$0xff]  }
 0xd3e   :  { %12052 = vmatpush1.bf16.msra.mxu1 %v20811_v22  ;;  %v20851_v22 = vld [vmem:[#allocation10 + $0x660] ss:$16 sps:$4 sm:$0xff]  }
 0xd3f   :  { %12053 = vmatprep.subr.bf16.mxu1 %v20819_v40  ;;  %v20859_v40 = vld [vmem:[#allocation10 + $0x684] ss:$16 sps:$4 sm:$0xff]  }
 0xd42   :  { %12054 = vmatpush1.bf16.msra.mxu1 %v20817_v46  ;;  %v20857_v46 = vld [vmem:[#allocation10 + $0x680] ss:$16 sps:$4 sm:$0xff]  }
 0xd43   :  { %12055 = vmatprep.subr.bf16.mxu1 %v20825_v19  ;;  %v20865_v19 = vld [vmem:[#allocation10 + $0x6a4] ss:$16 sps:$4 sm:$0xff]  }
 0xd46   :  { %12056 = vmatpush1.bf16.msra.mxu1 %v20823_v56  ;;  %v20863_v56 = vld [vmem:[#allocation10 + $0x6a0] ss:$16 sps:$4 sm:$0xff]  }
 0xd47   :  { %12057 = vmatprep.subr.bf16.mxu1 %v20831_v57  ;;  %v20871_v57 = vld [vmem:[#allocation10 + $0x6c4] ss:$16 sps:$4 sm:$0xff]  }
 0xd4a   :  { %12058 = vmatpush1.bf16.msra.mxu1 %v20829_v8  ;;  %v20869_v8 = vld [vmem:[#allocation10 + $0x6c0] ss:$16 sps:$4 sm:$0xff]  }
 0xd4b   :  { %12328 = vmatprep.subr.bf16.mxu1 %v20835_v9  ;;  %v20885_v9 = vld [vmem:[#allocation10 + $0x708] ss:$16 sps:$4 sm:$0xff]  }
 0xda0   :  { %v11389_v7 = vpop.f32.mrb[136].mxu1 }
 0xda1   :  { %v11437_v33 = vadd.f32 %v11389_v7, %v25042_v20  ;;  %v11391_v50 = vpop.f32.mrb[137].mxu1  ;;  %v20872_v7 = vld [vmem:[#allocation10 + $0x6c8] ss:$16 sps:$4 sm:$0xff]  }
 0xda2   :  { %v11438_v44 = vadd.f32 %v11391_v50, %v25045_v60  ;;  %v11393_v29 = vpop.f32.mrb[138].mxu1  ;;  %v20880_v50 = vld [vmem:[#allocation10 + $0x6ec] ss:$16 sps:$4 sm:$0xff]  }
 0xda3   :  { %v11394_v2 = vpop.f32.mrb[139].mxu1  ;;  %v20878_v29 = vld [vmem:[#allocation10 + $0x6e8] ss:$16 sps:$4 sm:$0xff]  }
 0xdc0   :  { %v11430_v32 = vpop.f32.mrb[140].mxu1 }
 0xdc1   :  { %v11439_v1 = vadd.f32 %v11430_v32, %v25048_v14  ;;  %v11432_v51 = vpop.f32.mrb[141].mxu1 }
 0xdc2   :  { %v11440_v31 = vadd.f32 %v11432_v51, %v25051_v28  ;;  %v11434_v30 = vpop.f32.mrb[142].mxu1 }
 0xdc3   :  { %v25085_v37 = vadd.f32 %v25075_v53, %v11439_v1  ;;  %v11435_v5 = vpop.f32.mrb[143].mxu1 }
 0xdc4   :  { %v25088_v36 = vadd.f32 %v25077_v48, %v11440_v31  ;;  %v20832_v48 = vld [vmem:[#allocation8 + $0x4] ss:$0 sps:$4 sm:$0x44]  }
 0xdc5   :  { %v12092_v12 = vrot.slane %v20832_v48, 2  ;;  %v20882_v48 = vld [vmem:[#allocation10 + $0x700] ss:$16 sps:$4 sm:$0xff]  }
 0xde0   :  { %v11710_v20 = vpop.f32.mrb[144].mxu1 }
 0xde1   :  { %v25090_v21 = vadd.f32 %v11710_v20, %v11437_v33  ;;  %v11712_v60 = vpop.f32.mrb[145].mxu1  ;;  %v20877_v33 = vld [vmem:[#allocation10 + $0x6e4] ss:$16 sps:$4 sm:$0xff]  }
 0xde2   :  { %v25092_v55 = vadd.f32 %v11712_v60, %v11438_v44  ;;  %v11714_v23 = vpop.f32.mrb[146].mxu1  ;;  %v20875_v44 = vld [vmem:[#allocation10 + $0x6e0] ss:$16 sps:$4 sm:$0xff]  }
 0xde3   :  { %v11715_v58 = vpop.f32.mrb[147].mxu1 }
 0xe00   :  { %v11802_v14 = vpop.f32.mrb[148].mxu1 }
 0xe01   :  { %v11808_v13 = vpack.c.bf16 %v11802_v14, %v11802_v14  ;;  %v19064_v0 = vpop.f32.mrb[149].mxu1 }
 0xe02   :  { %v11805_v28 = vpop.f32.mrb[150].mxu1 }
 0xe03   :  { %12035 = vmatmul.mubr.bf16.vlgmr.msra.gmra.mrb[216].mxu0 %v11808_v13  ;;  %12076 = vmatmul.mubr.bf16.vlgmr.msra.gmra.mrb[152].mxu1 %v11808_v13  ;;  %v19065_v53 = vpop.f32.mrb[151].mxu1 }
 0xe04   :  { %19067 = vmatpush3.bf16.msra.mxu0 %v24894_v54  ;;  %19082 = vmatprep.mubr.msk.bf16.mxu0 %vm21579_vm5, %v21578_v27  ;;  %v20884_v53 = vld [vmem:[#allocation10 + $0x704] ss:$16 sps:$4 sm:$0xff]  }
 0xe05   :  { %19068 = vmatprep.subr.bf16.mxu0 %v21578_v27  ;;  %12360 = vmatprep.mubr.bf16.mxu1 %v25826_v3 }
 0xe06   :  { %12329 = vmatpush1.bf16.msra.mxu1 %v20833_v34  ;;  %v20890_v34 = vld [vmem:[#allocation10 + $0x724] ss:$16 sps:$4 sm:$0xff]  }
 0xe07   :  { %12330 = vmatprep.subr.bf16.mxu1 %v20841_v45  ;;  %v20891_v45 = vld [vmem:[#allocation10 + $0x728] ss:$16 sps:$4 sm:$0xff]  }
 0xe08   :  { %19069 = vmatpush3.bf16.msra.mxu0 %v24908_v61 }
 0xe09   :  { %19070 = vmatprep.subr.bf16.mxu0 %v21578_v27 }
 0xe0a   :  { %12331 = vmatpush1.bf16.msra.mxu1 %v20839_v6  ;;  %v20896_v6 = vld [vmem:[#allocation10 + $0x744] ss:$16 sps:$4 sm:$0xff]  }
 0xe0b   :  { %12332 = vmatprep.subr.bf16.mxu1 %v20847_v41  ;;  %v20897_v41 = vld [vmem:[#allocation10 + $0x748] ss:$16 sps:$4 sm:$0xff]  }
 0xe0c   :  { %19071 = vmatpush3.bf16.msra.mxu0 %v24910_v15 }
 0xe0d   :  { %19072 = vmatprep.subr.bf16.mxu0 %v21578_v27 }
 0xe0e   :  { %12333 = vmatpush1.bf16.msra.mxu1 %v20845_v35  ;;  %v20905_v35 = vld [vmem:[#allocation10 + $0x76c] ss:$16 sps:$4 sm:$0xff]  }
 0xe0f   :  { %12334 = vmatprep.subr.bf16.mxu1 %v20853_v47  ;;  %v20903_v47 = vld [vmem:[#allocation10 + $0x768] ss:$16 sps:$4 sm:$0xff]  }
 0xe10   :  { %19073 = vmatpush3.bf16.msra.mxu0 %v24928_v59 }
 0xe11   :  { %19074 = vmatprep.subr.bf16.mxu0 %v21578_v27 }
 0xe12   :  { %12335 = vmatpush1.bf16.msra.mxu1 %v20851_v22  ;;  %v20911_v22 = vld [vmem:[#allocation10 + $0x78c] ss:$16 sps:$4 sm:$0xff]  }
 0xe13   :  { %12336 = vmatprep.subr.bf16.mxu1 %v20859_v40  ;;  %v20909_v40 = vld [vmem:[#allocation10 + $0x788] ss:$16 sps:$4 sm:$0xff]  }
 0xe14   :  { %19075 = vmatpush3.bf16.msra.mxu0 %v24930_v17 }
 0xe15   :  { %19076 = vmatprep.subr.bf16.mxu0 %v21578_v27 }
 0xe16   :  { %12337 = vmatpush1.bf16.msra.mxu1 %v20857_v46  ;;  %v20917_v46 = vld [vmem:[#allocation10 + $0x7ac] ss:$16 sps:$4 sm:$0xff]  }
 0xe17   :  { %12338 = vmatprep.subr.bf16.mxu1 %v20865_v19  ;;  %v20915_v19 = vld [vmem:[#allocation10 + $0x7a8] ss:$16 sps:$4 sm:$0xff]  }
 0xe18   :  { %19077 = vmatpush3.bf16.msra.mxu0 %v24949_v16 }
 0xe19   :  { %19078 = vmatprep.subr.bf16.mxu0 %v21578_v27 }
 0xe1a   :  { %12339 = vmatpush1.bf16.msra.mxu1 %v20863_v56  ;;  %v20923_v56 = vld [vmem:[#allocation10 + $0x7cc] ss:$16 sps:$4 sm:$0xff]  }
 0xe1b   :  { %12340 = vmatprep.subr.bf16.mxu1 %v20871_v57  ;;  %v20921_v57 = vld [vmem:[#allocation10 + $0x7c8] ss:$16 sps:$4 sm:$0xff]  }
 0xe1c   :  { %19079 = vmatpush3.bf16.msra.mxu0 %v24951_v25 }
 0xe1d   :  { %19080 = vmatprep.subr.bf16.mxu0 %v21578_v27 }
 0xe1e   :  { %12341 = vmatpush1.bf16.msra.mxu1 %v20869_v8  ;;  %v20929_v8 = vld [vmem:[#allocation10 + $0x7ec] ss:$16 sps:$4 sm:$0xff]  }
 0xe1f   :  { %12342 = vmatprep.subr.bf16.mxu1 %v20877_v33  ;;  %v20927_v33 = vld [vmem:[#allocation10 + $0x7e8] ss:$16 sps:$4 sm:$0xff]  }
 0xe20   :  { %19081 = vmatpush3.bf16.msra.mxu0 %v24947_v24 }
 0xe21   :  { %12369 = vmatprep.subr.bf16.mxu0 %v20838_v39  ;;  %v20888_v39 = vld [vmem:[#allocation10 + $0x720] ss:$16 sps:$4 sm:$0xff]  }
 0xe22   :  { %12343 = vmatpush1.bf16.msra.mxu1 %v20875_v44 }
 0xe23   :  { %19083 = vmatmul.mubr.bf16.vlgmr.msra.gmra.mrb[220].mxu0 %v12092_v12  ;;  %19086 = vmatprep.subr.bf16.mxu1 %v21578_v27  ;;  %v20887_v12 = vld [vmem:[#allocation10 + $0x70c] ss:$16 sps:$4 sm:$0xff]  }
 0xe24   :  { %12401 = vmatprep.mubr.bf16.mxu0 %v25826_v3  ;;  %12370 = vmatpush1.bf16.msra.mxu0 %v20836_v42  ;;  %v20893_v42 = vld [vmem:[#allocation10 + $0x72c] ss:$16 sps:$4 sm:$0xff]  }
 0xe25   :  { %12371 = vmatprep.subr.bf16.mxu0 %v20844_v10  ;;  %v20899_v10 = vld [vmem:[#allocation10 + $0x74c] ss:$16 sps:$4 sm:$0xff]  }
 0xe28   :  { %12372 = vmatpush1.bf16.msra.mxu0 %v20842_v43  ;;  %v20894_v43 = vld [vmem:[#allocation10 + $0x740] ss:$16 sps:$4 sm:$0xff]  }
 0xe29   :  { %12373 = vmatprep.subr.bf16.mxu0 %v20850_v18  ;;  %v20902_v18 = vld [vmem:[#allocation10 + $0x764] ss:$16 sps:$4 sm:$0xff]  }
 0xe2c   :  { %12374 = vmatpush1.bf16.msra.mxu0 %v20848_v52  ;;  %v20900_v52 = vld [vmem:[#allocation10 + $0x760] ss:$16 sps:$4 sm:$0xff]  }
 0xe2d   :  { %12375 = vmatprep.subr.bf16.mxu0 %v20856_v38  ;;  %v20908_v38 = vld [vmem:[#allocation10 + $0x784] ss:$16 sps:$4 sm:$0xff]  }
 0xe30   :  { %12376 = vmatpush1.bf16.msra.mxu0 %v20854_v63  ;;  %v20906_v63 = vld [vmem:[#allocation10 + $0x780] ss:$16 sps:$4 sm:$0xff]  }
 0xe31   :  { %12377 = vmatprep.subr.bf16.mxu0 %v20862_v62  ;;  %v20914_v62 = vld [vmem:[#allocation10 + $0x7a4] ss:$16 sps:$4 sm:$0xff]  }
 0xe34   :  { %12378 = vmatpush1.bf16.msra.mxu0 %v20860_v4  ;;  %v20912_v4 = vld [vmem:[#allocation10 + $0x7a0] ss:$16 sps:$4 sm:$0xff]  }
 0xe35   :  { %12379 = vmatprep.subr.bf16.mxu0 %v20868_v26  ;;  %v20920_v26 = vld [vmem:[#allocation10 + $0x7c4] ss:$16 sps:$4 sm:$0xff]  }
 0xe38   :  { %12380 = vmatpush1.bf16.msra.mxu0 %v20866_v11  ;;  %v20918_v11 = vld [vmem:[#allocation10 + $0x7c0] ss:$16 sps:$4 sm:$0xff]  }
 0xe39   :  { %12381 = vmatprep.subr.bf16.mxu0 %v20874_v49  ;;  %v20926_v49 = vld [vmem:[#allocation10 + $0x7e4] ss:$16 sps:$4 sm:$0xff]  }
 0xe3c   :  { %12382 = vmatpush1.bf16.msra.mxu0 %v20872_v7  ;;  %v20924_v7 = vld [vmem:[#allocation10 + $0x7e0] ss:$16 sps:$4 sm:$0xff]  }
 0xe3d   :  { %12383 = vmatprep.subr.bf16.mxu0 %v20880_v50 }
 0xe40   :  { %12384 = vmatpush1.bf16.msra.mxu0 %v20878_v29 }
 0xe41   :  { %12654 = vmatprep.subr.bf16.mxu0 %v20884_v53  ;;  %v20938_v53 = vld [vmem:[#allocation10 + $0x824] ss:$16 sps:$4 sm:$0xff]  }
 0xed6   :  { %v12036_v2 = vpop.f32.mrb[216].mxu0  ;;  %v12077_v32 = vpop.f32.mrb[152].mxu1 }
 0xed7   :  { %v25115_v1 = vadd.f32 %v12036_v2, %v25090_v21  ;;  %v25118_v51 = vadd.f32 %v12077_v32, %v25085_v37  ;;  %v12038_v31 = vpop.f32.mrb[217].mxu0  ;;  %v12079_v30 = vpop.f32.mrb[153].mxu1 }
 0xed8   :  { %v25121_v5 = vadd.f32 %v12038_v31, %v25092_v55  ;;  %v25124_v20 = vadd.f32 %v12079_v30, %v25088_v36  ;;  %v12040_v60 = vpop.f32.mrb[218].mxu0  ;;  %v12081_v23 = vpop.f32.mrb[154].mxu1  ;;  %v20881_v36 = vld [vmem:[#allocation8 + $0x4] ss:$0 sps:$4 sm:$0x88]  }
 0xed9   :  { %v12041_v58 = vpop.f32.mrb[219].mxu0  ;;  %v12082_v14 = vpop.f32.mrb[155].mxu1  ;;  %v12418_v55 = vrot.slane %v20881_v36, 3  ;;  %v20935_v36 = vld [vmem:[#allocation10 + $0x80c] ss:$16 sps:$4 sm:$0xff]  }
 0xef6   :  { %v12128_v13 = vpop.f32.mrb[220].mxu0 }
 0xef7   :  { %v12134_v0 = vpack.c.bf16 %v12128_v13, %v12128_v13  ;;  %v19084_v28 = vpop.f32.mrb[221].mxu0 }
 0xef8   :  { %v12131_v21 = vpop.f32.mrb[222].mxu0 }
 0xef9   :  { %12361 = vmatmul.mubr.bf16.vlgmr.msra.gmra.mrb[156].mxu1 %v12134_v0  ;;  %12402 = vmatmul.mubr.bf16.vlgmr.msra.gmra.mrb[224].mxu0 %v12134_v0  ;;  %v19085_v37 = vpop.f32.mrb[223].mxu0 }
 0xefa   :  { %19087 = vmatpush3.bf16.msra.mxu1 %v24894_v54  ;;  %19102 = vmatprep.mubr.msk.bf16.mxu1 %vm21579_vm5, %v21578_v27  ;;  %v20930_v37 = vld [vmem:[#allocation10 + $0x800] ss:$16 sps:$4 sm:$0xff]  }
 0xefb   :  { %19088 = vmatprep.subr.bf16.mxu1 %v21578_v27  ;;  %12686 = vmatprep.mubr.bf16.mxu0 %v25826_v3 }
 0xefc   :  { %12655 = vmatpush1.bf16.msra.mxu0 %v20882_v48  ;;  %v20936_v48 = vld [vmem:[#allocation10 + $0x820] ss:$16 sps:$4 sm:$0xff]  }
 0xefd   :  { %12656 = vmatprep.subr.bf16.mxu0 %v20890_v34  ;;  %v20944_v34 = vld [vmem:[#allocation10 + $0x844] ss:$16 sps:$4 sm:$0xff]  }
 0xefe   :  { %19089 = vmatpush3.bf16.msra.mxu1 %v24908_v61 }
 0xeff   :  { %19090 = vmatprep.subr.bf16.mxu1 %v21578_v27 }
 0xf00   :  { %12657 = vmatpush1.bf16.msra.mxu0 %v20888_v39  ;;  %v20947_v39 = vld [vmem:[#allocation10 + $0x84c] ss:$16 sps:$4 sm:$0xff]  }
 0xf01   :  { %12658 = vmatprep.subr.bf16.mxu0 %v20896_v6  ;;  %v20950_v6 = vld [vmem:[#allocation10 + $0x864] ss:$16 sps:$4 sm:$0xff]  }
 0xf02   :  { %19091 = vmatpush3.bf16.msra.mxu1 %v24910_v15 }
 0xf03   :  { %19092 = vmatprep.subr.bf16.mxu1 %v21578_v27 }
 0xf04   :  { %12659 = vmatpush1.bf16.msra.mxu0 %v20894_v43  ;;  %v20948_v43 = vld [vmem:[#allocation10 + $0x860] ss:$16 sps:$4 sm:$0xff]  }
 0xf05   :  { %12660 = vmatprep.subr.bf16.mxu0 %v20902_v18  ;;  %v20956_v18 = vld [vmem:[#allocation10 + $0x884] ss:$16 sps:$4 sm:$0xff]  }
 0xf06   :  { %19093 = vmatpush3.bf16.msra.mxu1 %v24928_v59 }
 0xf07   :  { %19094 = vmatprep.subr.bf16.mxu1 %v21578_v27 }
 0xf08   :  { %12661 = vmatpush1.bf16.msra.mxu0 %v20900_v52  ;;  %v20954_v52 = vld [vmem:[#allocation10 + $0x880] ss:$16 sps:$4 sm:$0xff]  }
 0xf09   :  { %12662 = vmatprep.subr.bf16.mxu0 %v20908_v38  ;;  %v20962_v38 = vld [vmem:[#allocation10 + $0x8a4] ss:$16 sps:$4 sm:$0xff]  }
 0xf0a   :  { %19095 = vmatpush3.bf16.msra.mxu1 %v24930_v17 }
 0xf0b   :  { %19096 = vmatprep.subr.bf16.mxu1 %v21578_v27 }
 0xf0c   :  { %12663 = vmatpush1.bf16.msra.mxu0 %v20906_v63  ;;  %v20960_v63 = vld [vmem:[#allocation10 + $0x8a0] ss:$16 sps:$4 sm:$0xff]  }
 0xf0d   :  { %12664 = vmatprep.subr.bf16.mxu0 %v20914_v62  ;;  %v20968_v62 = vld [vmem:[#allocation10 + $0x8c4] ss:$16 sps:$4 sm:$0xff]  }
 0xf0e   :  { %19097 = vmatpush3.bf16.msra.mxu1 %v24949_v16 }
 0xf0f   :  { %19098 = vmatprep.subr.bf16.mxu1 %v21578_v27 }
 0xf10   :  { %12665 = vmatpush1.bf16.msra.mxu0 %v20912_v4  ;;  %v20966_v4 = vld [vmem:[#allocation10 + $0x8c0] ss:$16 sps:$4 sm:$0xff]  }
 0xf11   :  { %12666 = vmatprep.subr.bf16.mxu0 %v20920_v26  ;;  %v20974_v26 = vld [vmem:[#allocation10 + $0x8e4] ss:$16 sps:$4 sm:$0xff]  }
 0xf12   :  { %19099 = vmatpush3.bf16.msra.mxu1 %v24951_v25 }
 0xf13   :  { %19100 = vmatprep.subr.bf16.mxu1 %v21578_v27 }
 0xf14   :  { %12667 = vmatpush1.bf16.msra.mxu0 %v20918_v11  ;;  %v20972_v11 = vld [vmem:[#allocation10 + $0x8e0] ss:$16 sps:$4 sm:$0xff]  }
 0xf15   :  { %12668 = vmatprep.subr.bf16.mxu0 %v20926_v49 }
 0xf16   :  { %19101 = vmatpush3.bf16.msra.mxu1 %v24947_v24 }
 0xf17   :  { %12695 = vmatprep.subr.bf16.mxu1 %v20887_v12  ;;  %v20941_v12 = vld [vmem:[#allocation10 + $0x82c] ss:$16 sps:$4 sm:$0xff]  }
 0xf18   :  { %12669 = vmatpush1.bf16.msra.mxu0 %v20924_v7 }
 0xf19   :  { %19103 = vmatmul.mubr.bf16.vlgmr.msra.gmra.mrb[160].mxu1 %v12418_v55  ;;  %19106 = vmatprep.subr.bf16.mxu0 %v21578_v27  ;;  %v20933_v55 = vld [vmem:[#allocation10 + $0x808] ss:$16 sps:$4 sm:$0xff]  }
 0xf1a   :  { %12727 = vmatprep.mubr.bf16.mxu1 %v25826_v3  ;;  %12696 = vmatpush1.bf16.msra.mxu1 %v20885_v9  ;;  %v20939_v9 = vld [vmem:[#allocation10 + $0x828] ss:$16 sps:$4 sm:$0xff]  }
 0xf1b   :  { %12697 = vmatprep.subr.bf16.mxu1 %v20893_v42  ;;  %v20942_v42 = vld [vmem:[#allocation10 + $0x840] ss:$16 sps:$4 sm:$0xff]  }
 0xf1e   :  { %12698 = vmatpush1.bf16.msra.mxu1 %v20891_v45  ;;  %v20945_v45 = vld [vmem:[#allocation10 + $0x848] ss:$16 sps:$4 sm:$0xff]  }
 0xf1f   :  { %12699 = vmatprep.subr.bf16.mxu1 %v20899_v10  ;;  %v20953_v10 = vld [vmem:[#allocation10 + $0x86c] ss:$16 sps:$4 sm:$0xff]  }
 0xf22   :  { %12700 = vmatpush1.bf16.msra.mxu1 %v20897_v41  ;;  %v20951_v41 = vld [vmem:[#allocation10 + $0x868] ss:$16 sps:$4 sm:$0xff]  }
 0xf23   :  { %12701 = vmatprep.subr.bf16.mxu1 %v20905_v35  ;;  %v20959_v35 = vld [vmem:[#allocation10 + $0x88c] ss:$16 sps:$4 sm:$0xff]  }
 0xf26   :  { %12702 = vmatpush1.bf16.msra.mxu1 %v20903_v47  ;;  %v20957_v47 = vld [vmem:[#allocation10 + $0x888] ss:$16 sps:$4 sm:$0xff]  }
 0xf27   :  { %12703 = vmatprep.subr.bf16.mxu1 %v20911_v22  ;;  %v20965_v22 = vld [vmem:[#allocation10 + $0x8ac] ss:$16 sps:$4 sm:$0xff]  }
 0xf2a   :  { %12704 = vmatpush1.bf16.msra.mxu1 %v20909_v40  ;;  %v20963_v40 = vld [vmem:[#allocation10 + $0x8a8] ss:$16 sps:$4 sm:$0xff]  }
 0xf2b   :  { %12705 = vmatprep.subr.bf16.mxu1 %v20917_v46  ;;  %v20971_v46 = vld [vmem:[#allocation10 + $0x8cc] ss:$16 sps:$4 sm:$0xff]  }
 0xf2e   :  { %12706 = vmatpush1.bf16.msra.mxu1 %v20915_v19  ;;  %v20969_v19 = vld [vmem:[#allocation10 + $0x8c8] ss:$16 sps:$4 sm:$0xff]  }
 0xf2f   :  { %12707 = vmatprep.subr.bf16.mxu1 %v20923_v56  ;;  %v20977_v56 = vld [vmem:[#allocation10 + $0x8ec] ss:$16 sps:$4 sm:$0xff]  }
 0xf32   :  { %12708 = vmatpush1.bf16.msra.mxu1 %v20921_v57  ;;  %v20975_v57 = vld [vmem:[#allocation10 + $0x8e8] ss:$16 sps:$4 sm:$0xff]  }
 0xf33   :  { %12709 = vmatprep.subr.bf16.mxu1 %v20929_v8 }
 0xf36   :  { %12710 = vmatpush1.bf16.msra.mxu1 %v20927_v33 }
 0xfcc   :  { %v12362_v50 = vpop.f32.mrb[156].mxu1  ;;  %v12403_v44 = vpop.f32.mrb[224].mxu0 }
 0xfcd   :  { %v25147_v29 = vadd.f32 %v12362_v50, %v25115_v1  ;;  %v25150_v2 = vadd.f32 %v12403_v44, %v25118_v51  ;;  %v12364_v32 = vpop.f32.mrb[157].mxu1  ;;  %v12405_v31 = vpop.f32.mrb[225].mxu0 }
 0xfce   :  { %v25153_v30 = vadd.f32 %v12364_v32, %v25121_v5  ;;  %v25156_v60 = vadd.f32 %v12405_v31, %v25124_v20  ;;  %v12366_v23 = vpop.f32.mrb[158].mxu1  ;;  %v12407_v58 = vpop.f32.mrb[226].mxu0  ;;  %v12740_v5 = vld [vmem:[#allocation8 + $0x8] sm:$0x1]  ;;  %v20932_v20 = vld [vmem:[#allocation10 + $0x804] ss:$16 sps:$4 sm:$0xff]  }
 0xfcf   :  { %v12367_v14 = vpop.f32.mrb[159].mxu1  ;;  %v12408_v13 = vpop.f32.mrb[227].mxu0  ;;  %12975 = vmatprep.subr.bf16.mxu1 %v20932_v20  ;;  %v20982_v20 = vld [vmem:[#allocation10 + $0x908] ss:$16 sps:$4 sm:$0xff]  }
 0xfec   :  { %v12454_v0 = vpop.f32.mrb[160].mxu1 }
 0xfed   :  { %v12460_v28 = vpack.c.bf16 %v12454_v0, %v12454_v0  ;;  %v19104_v21 = vpop.f32.mrb[161].mxu1 }
 0xfee   :  { %v12457_v1 = vpop.f32.mrb[162].mxu1 }
 0xfef   :  { %12687 = vmatmul.mubr.bf16.vlgmr.msra.gmra.mrb[228].mxu0 %v12460_v28  ;;  %12728 = vmatmul.mubr.bf16.vlgmr.msra.gmra.mrb[164].mxu1 %v12460_v28  ;;  %v19105_v51 = vpop.f32.mrb[163].mxu1  ;;  %v20981_v1 = vld [vmem:[#allocation10 + $0x904] ss:$16 sps:$4 sm:$0xff]  }
 0xff0   :  { %19107 = vmatpush3.bf16.msra.mxu0 %v24894_v54  ;;  %19122 = vmatprep.mubr.msk.bf16.mxu0 %vm21579_vm5, %v21578_v27  ;;  %v20979_v51 = vld [vmem:[#allocation10 + $0x900] ss:$16 sps:$4 sm:$0xff]  }
 0xff1   :  { %19108 = vmatprep.subr.bf16.mxu0 %v21578_v27  ;;  %13007 = vmatprep.mubr.bf16.mxu1 %v25826_v3 }
 0xff2   :  { %12976 = vmatpush1.bf16.msra.mxu1 %v20930_v37  ;;  %v20987_v37 = vld [vmem:[#allocation10 + $0x924] ss:$16 sps:$4 sm:$0xff]  }
 0xff3   :  { %12977 = vmatprep.subr.bf16.mxu1 %v20938_v53  ;;  %v20988_v53 = vld [vmem:[#allocation10 + $0x928] ss:$16 sps:$4 sm:$0xff]  }
 0xff4   :  { %19109 = vmatpush3.bf16.msra.mxu0 %v24908_v61 }
 0xff5   :  { %19110 = vmatprep.subr.bf16.mxu0 %v21578_v27 }
 0xff6   :  { %12978 = vmatpush1.bf16.msra.mxu1 %v20936_v48  ;;  %v20993_v48 = vld [vmem:[#allocation10 + $0x944] ss:$16 sps:$4 sm:$0xff]  }
 0xff7   :  { %12979 = vmatprep.subr.bf16.mxu1 %v20944_v34  ;;  %v20994_v34 = vld [vmem:[#allocation10 + $0x948] ss:$16 sps:$4 sm:$0xff]  }
 0xff8   :  { %19111 = vmatpush3.bf16.msra.mxu0 %v24910_v15 }
 0xff9   :  { %19112 = vmatprep.subr.bf16.mxu0 %v21578_v27 }
 0xffa   :  { %12980 = vmatpush1.bf16.msra.mxu1 %v20942_v42  ;;  %v21002_v42 = vld [vmem:[#allocation10 + $0x96c] ss:$16 sps:$4 sm:$0xff]  }
 0xffb   :  { %12981 = vmatprep.subr.bf16.mxu1 %v20950_v6  ;;  %v21000_v6 = vld [vmem:[#allocation10 + $0x968] ss:$16 sps:$4 sm:$0xff]  }
 0xffc   :  { %19113 = vmatpush3.bf16.msra.mxu0 %v24928_v59 }
 0xffd   :  { %19114 = vmatprep.subr.bf16.mxu0 %v21578_v27 }
 0xffe   :  { %12982 = vmatpush1.bf16.msra.mxu1 %v20948_v43  ;;  %v21008_v43 = vld [vmem:[#allocation10 + $0x98c] ss:$16 sps:$4 sm:$0xff]  }
 0xfff   :  { %12983 = vmatprep.subr.bf16.mxu1 %v20956_v18  ;;  %v21006_v18 = vld [vmem:[#allocation10 + $0x988] ss:$16 sps:$4 sm:$0xff]  }
0x1000   :  { %19115 = vmatpush3.bf16.msra.mxu0 %v24930_v17 }
0x1001   :  { %19116 = vmatprep.subr.bf16.mxu0 %v21578_v27 }
0x1002   :  { %12984 = vmatpush1.bf16.msra.mxu1 %v20954_v52  ;;  %v21014_v52 = vld [vmem:[#allocation10 + $0x9ac] ss:$16 sps:$4 sm:$0xff]  }
0x1003   :  { %12985 = vmatprep.subr.bf16.mxu1 %v20962_v38  ;;  %v21012_v38 = vld [vmem:[#allocation10 + $0x9a8] ss:$16 sps:$4 sm:$0xff]  }
0x1004   :  { %19117 = vmatpush3.bf16.msra.mxu0 %v24949_v16 }
0x1005   :  { %19118 = vmatprep.subr.bf16.mxu0 %v21578_v27 }
0x1006   :  { %12986 = vmatpush1.bf16.msra.mxu1 %v20960_v63  ;;  %v21020_v63 = vld [vmem:[#allocation10 + $0x9cc] ss:$16 sps:$4 sm:$0xff]  }
0x1007   :  { %12987 = vmatprep.subr.bf16.mxu1 %v20968_v62  ;;  %v21018_v62 = vld [vmem:[#allocation10 + $0x9c8] ss:$16 sps:$4 sm:$0xff]  }
0x1008   :  { %19119 = vmatpush3.bf16.msra.mxu0 %v24951_v25 }
0x1009   :  { %19120 = vmatprep.subr.bf16.mxu0 %v21578_v27 }
0x100a   :  { %12988 = vmatpush1.bf16.msra.mxu1 %v20966_v4  ;;  %v21026_v4 = vld [vmem:[#allocation10 + $0x9ec] ss:$16 sps:$4 sm:$0xff]  }
0x100b   :  { %12989 = vmatprep.subr.bf16.mxu1 %v20974_v26  ;;  %v21024_v26 = vld [vmem:[#allocation10 + $0x9e8] ss:$16 sps:$4 sm:$0xff]  }
0x100c   :  { %19121 = vmatpush3.bf16.msra.mxu0 %v24947_v24 }
0x100d   :  { %13016 = vmatprep.subr.bf16.mxu0 %v20935_v36  ;;  %v20985_v36 = vld [vmem:[#allocation10 + $0x920] ss:$16 sps:$4 sm:$0xff]  }
0x100e   :  { %12990 = vmatpush1.bf16.msra.mxu1 %v20972_v11 }
0x100f   :  { %19123 = vmatmul.mubr.bf16.vlgmr.msra.gmra.mrb[232].mxu0 %v12740_v5  ;;  %19126 = vmatprep.subr.bf16.mxu1 %v21578_v27  ;;  %v20984_v5 = vld [vmem:[#allocation10 + $0x90c] ss:$16 sps:$4 sm:$0xff]  }
0x1010   :  { %13048 = vmatprep.mubr.bf16.mxu0 %v25826_v3  ;;  %13017 = vmatpush1.bf16.msra.mxu0 %v20933_v55  ;;  %v20990_v55 = vld [vmem:[#allocation10 + $0x92c] ss:$16 sps:$4 sm:$0xff]  }
0x1011   :  { %13018 = vmatprep.subr.bf16.mxu0 %v20941_v12  ;;  %v20996_v12 = vld [vmem:[#allocation10 + $0x94c] ss:$16 sps:$4 sm:$0xff]  }
0x1014   :  { %13019 = vmatpush1.bf16.msra.mxu0 %v20939_v9  ;;  %v20991_v9 = vld [vmem:[#allocation10 + $0x940] ss:$16 sps:$4 sm:$0xff]  }
0x1015   :  { %13020 = vmatprep.subr.bf16.mxu0 %v20947_v39  ;;  %v20999_v39 = vld [vmem:[#allocation10 + $0x964] ss:$16 sps:$4 sm:$0xff]  }
0x1018   :  { %13021 = vmatpush1.bf16.msra.mxu0 %v20945_v45  ;;  %v20997_v45 = vld [vmem:[#allocation10 + $0x960] ss:$16 sps:$4 sm:$0xff]  }
0x1019   :  { %13022 = vmatprep.subr.bf16.mxu0 %v20953_v10  ;;  %v21005_v10 = vld [vmem:[#allocation10 + $0x984] ss:$16 sps:$4 sm:$0xff]  }
0x101c   :  { %13023 = vmatpush1.bf16.msra.mxu0 %v20951_v41  ;;  %v21003_v41 = vld [vmem:[#allocation10 + $0x980] ss:$16 sps:$4 sm:$0xff]  }
0x101d   :  { %13024 = vmatprep.subr.bf16.mxu0 %v20959_v35  ;;  %v21011_v35 = vld [vmem:[#allocation10 + $0x9a4] ss:$16 sps:$4 sm:$0xff]  }
0x1020   :  { %13025 = vmatpush1.bf16.msra.mxu0 %v20957_v47  ;;  %v21009_v47 = vld [vmem:[#allocation10 + $0x9a0] ss:$16 sps:$4 sm:$0xff]  }
0x1021   :  { %13026 = vmatprep.subr.bf16.mxu0 %v20965_v22  ;;  %v21017_v22 = vld [vmem:[#allocation10 + $0x9c4] ss:$16 sps:$4 sm:$0xff]  }
0x1024   :  { %13027 = vmatpush1.bf16.msra.mxu0 %v20963_v40  ;;  %v21015_v40 = vld [vmem:[#allocation10 + $0x9c0] ss:$16 sps:$4 sm:$0xff]  }
0x1025   :  { %13028 = vmatprep.subr.bf16.mxu0 %v20971_v46  ;;  %v21023_v46 = vld [vmem:[#allocation10 + $0x9e4] ss:$16 sps:$4 sm:$0xff]  }
0x1028   :  { %13029 = vmatpush1.bf16.msra.mxu0 %v20969_v19  ;;  %v21021_v19 = vld [vmem:[#allocation10 + $0x9e0] ss:$16 sps:$4 sm:$0xff]  }
0x1029   :  { %13030 = vmatprep.subr.bf16.mxu0 %v20977_v56 }
0x102c   :  { %13031 = vmatpush1.bf16.msra.mxu0 %v20975_v57 }
0x102d   :  { %13301 = vmatprep.subr.bf16.mxu0 %v20981_v1  ;;  %v21031_v1 = vld [vmem:[#allocation10 + $0xa08] ss:$16 sps:$4 sm:$0xff]  }
0x10c2   :  { %v12688_v49 = vpop.f32.mrb[228].mxu0  ;;  %v12729_v8 = vpop.f32.mrb[164].mxu1 }
0x10c3   :  { %v25179_v7 = vadd.f32 %v12688_v49, %v25147_v29  ;;  %v25182_v33 = vadd.f32 %v12729_v8, %v25150_v2  ;;  %v12690_v50 = vpop.f32.mrb[229].mxu0  ;;  %v12731_v44 = vpop.f32.mrb[165].mxu1 }
0x10c4   :  { %v25185_v32 = vadd.f32 %v12690_v50, %v25153_v30  ;;  %v25188_v31 = vadd.f32 %v12731_v44, %v25156_v60  ;;  %v12692_v23 = vpop.f32.mrb[230].mxu0  ;;  %v12733_v58 = vpop.f32.mrb[166].mxu1  ;;  %v20978_v30 = vld [vmem:[#allocation8 + $0x8] ss:$0 sps:$4 sm:$0x22]  }
0x10c5   :  { %v12693_v14 = vpop.f32.mrb[231].mxu0  ;;  %v12734_v13 = vpop.f32.mrb[167].mxu1  ;;  %v13065_v60 = vrot.slane %v20978_v30, 1  ;;  %v21028_v30 = vld [vmem:[#allocation10 + $0xa00] ss:$16 sps:$4 sm:$0xff]  }
0x10e2   :  { %v12775_v0 = vpop.f32.mrb[232].mxu0 }
0x10e3   :  { %v12781_v28 = vpack.c.bf16 %v12775_v0, %v12775_v0  ;;  %v19124_v21 = vpop.f32.mrb[233].mxu0 }
0x10e4   :  { %v12778_v29 = vpop.f32.mrb[234].mxu0 }
0x10e5   :  { %13008 = vmatmul.mubr.bf16.vlgmr.msra.gmra.mrb[168].mxu1 %v12781_v28  ;;  %13049 = vmatmul.mubr.bf16.vlgmr.msra.gmra.mrb[236].mxu0 %v12781_v28  ;;  %v19125_v2 = vpop.f32.mrb[235].mxu0 }
0x10e6   :  { %19127 = vmatpush3.bf16.msra.mxu1 %v24894_v54  ;;  %19142 = vmatprep.mubr.msk.bf16.mxu1 %vm21579_vm5, %v21578_v27  ;;  %v21030_v2 = vld [vmem:[#allocation10 + $0xa04] ss:$16 sps:$4 sm:$0xff]  }
0x10e7   :  { %19128 = vmatprep.subr.bf16.mxu1 %v21578_v27  ;;  %13333 = vmatprep.mubr.bf16.mxu0 %v25826_v3 }
0x10e8   :  { %13302 = vmatpush1.bf16.msra.mxu0 %v20979_v51  ;;  %v21036_v51 = vld [vmem:[#allocation10 + $0xa24] ss:$16 sps:$4 sm:$0xff]  }
0x10e9   :  { %13303 = vmatprep.subr.bf16.mxu0 %v20987_v37  ;;  %v21037_v37 = vld [vmem:[#allocation10 + $0xa28] ss:$16 sps:$4 sm:$0xff]  }
0x10ea   :  { %19129 = vmatpush3.bf16.msra.mxu1 %v24908_v61 }
0x10eb   :  { %19130 = vmatprep.subr.bf16.mxu1 %v21578_v27 }
0x10ec   :  { %13304 = vmatpush1.bf16.msra.mxu0 %v20985_v36  ;;  %v21042_v36 = vld [vmem:[#allocation10 + $0xa44] ss:$16 sps:$4 sm:$0xff]  }
0x10ed   :  { %13305 = vmatprep.subr.bf16.mxu0 %v20993_v48  ;;  %v21043_v48 = vld [vmem:[#allocation10 + $0xa48] ss:$16 sps:$4 sm:$0xff]  }
0x10ee   :  { %19131 = vmatpush3.bf16.msra.mxu1 %v24910_v15 }
0x10ef   :  { %19132 = vmatprep.subr.bf16.mxu1 %v21578_v27 }
0x10f0   :  { %13306 = vmatpush1.bf16.msra.mxu0 %v20991_v9  ;;  %v21051_v9 = vld [vmem:[#allocation10 + $0xa6c] ss:$16 sps:$4 sm:$0xff]  }
0x10f1   :  { %13307 = vmatprep.subr.bf16.mxu0 %v20999_v39  ;;  %v21049_v39 = vld [vmem:[#allocation10 + $0xa68] ss:$16 sps:$4 sm:$0xff]  }
0x10f2   :  { %19133 = vmatpush3.bf16.msra.mxu1 %v24928_v59 }
0x10f3   :  { %19134 = vmatprep.subr.bf16.mxu1 %v21578_v27 }
0x10f4   :  { %13308 = vmatpush1.bf16.msra.mxu0 %v20997_v45  ;;  %v21057_v45 = vld [vmem:[#allocation10 + $0xa8c] ss:$16 sps:$4 sm:$0xff]  }
0x10f5   :  { %13309 = vmatprep.subr.bf16.mxu0 %v21005_v10  ;;  %v21055_v10 = vld [vmem:[#allocation10 + $0xa88] ss:$16 sps:$4 sm:$0xff]  }
0x10f6   :  { %19135 = vmatpush3.bf16.msra.mxu1 %v24930_v17 }
0x10f7   :  { %19136 = vmatprep.subr.bf16.mxu1 %v21578_v27 }
0x10f8   :  { %13310 = vmatpush1.bf16.msra.mxu0 %v21003_v41  ;;  %v21063_v41 = vld [vmem:[#allocation10 + $0xaac] ss:$16 sps:$4 sm:$0xff]  }
0x10f9   :  { %13311 = vmatprep.subr.bf16.mxu0 %v21011_v35  ;;  %v21061_v35 = vld [vmem:[#allocation10 + $0xaa8] ss:$16 sps:$4 sm:$0xff]  }
0x10fa   :  { %19137 = vmatpush3.bf16.msra.mxu1 %v24949_v16 }
0x10fb   :  { %19138 = vmatprep.subr.bf16.mxu1 %v21578_v27 }
0x10fc   :  { %13312 = vmatpush1.bf16.msra.mxu0 %v21009_v47  ;;  %v21069_v47 = vld [vmem:[#allocation10 + $0xacc] ss:$16 sps:$4 sm:$0xff]  }
0x10fd   :  { %13313 = vmatprep.subr.bf16.mxu0 %v21017_v22  ;;  %v21067_v22 = vld [vmem:[#allocation10 + $0xac8] ss:$16 sps:$4 sm:$0xff]  }
0x10fe   :  { %19139 = vmatpush3.bf16.msra.mxu1 %v24951_v25 }
0x10ff   :  { %19140 = vmatprep.subr.bf16.mxu1 %v21578_v27 }
0x1100   :  { %13314 = vmatpush1.bf16.msra.mxu0 %v21015_v40  ;;  %v21075_v40 = vld [vmem:[#allocation10 + $0xaec] ss:$16 sps:$4 sm:$0xff]  }
0x1101   :  { %13315 = vmatprep.subr.bf16.mxu0 %v21023_v46  ;;  %v21073_v46 = vld [vmem:[#allocation10 + $0xae8] ss:$16 sps:$4 sm:$0xff]  }
0x1102   :  { %19141 = vmatpush3.bf16.msra.mxu1 %v24947_v24 }
0x1103   :  { %13342 = vmatprep.subr.bf16.mxu1 %v20984_v5  ;;  %v21034_v5 = vld [vmem:[#allocation10 + $0xa20] ss:$16 sps:$4 sm:$0xff]  }
0x1104   :  { %13316 = vmatpush1.bf16.msra.mxu0 %v21021_v19 }
0x1105   :  { %19143 = vmatmul.mubr.bf16.vlgmr.msra.gmra.mrb[172].mxu1 %v13065_v60  ;;  %19146 = vmatprep.subr.bf16.mxu0 %v21578_v27  ;;  %v21033_v60 = vld [vmem:[#allocation10 + $0xa0c] ss:$16 sps:$4 sm:$0xff]  }
0x1106   :  { %13374 = vmatprep.mubr.bf16.mxu1 %v25826_v3  ;;  %13343 = vmatpush1.bf16.msra.mxu1 %v20982_v20  ;;  %v21039_v20 = vld [vmem:[#allocation10 + $0xa2c] ss:$16 sps:$4 sm:$0xff]  }
0x1107   :  { %13344 = vmatprep.subr.bf16.mxu1 %v20990_v55  ;;  %v21045_v55 = vld [vmem:[#allocation10 + $0xa4c] ss:$16 sps:$4 sm:$0xff]  }
0x110a   :  { %13345 = vmatpush1.bf16.msra.mxu1 %v20988_v53  ;;  %v21040_v53 = vld [vmem:[#allocation10 + $0xa40] ss:$16 sps:$4 sm:$0xff]  }
0x110b   :  { %13346 = vmatprep.subr.bf16.mxu1 %v20996_v12  ;;  %v21048_v12 = vld [vmem:[#allocation10 + $0xa64] ss:$16 sps:$4 sm:$0xff]  }
0x110e   :  { %13347 = vmatpush1.bf16.msra.mxu1 %v20994_v34  ;;  %v21046_v34 = vld [vmem:[#allocation10 + $0xa60] ss:$16 sps:$4 sm:$0xff]  }
0x110f   :  { %13348 = vmatprep.subr.bf16.mxu1 %v21002_v42  ;;  %v21054_v42 = vld [vmem:[#allocation10 + $0xa84] ss:$16 sps:$4 sm:$0xff]  }
0x1112   :  { %13349 = vmatpush1.bf16.msra.mxu1 %v21000_v6  ;;  %v21052_v6 = vld [vmem:[#allocation10 + $0xa80] ss:$16 sps:$4 sm:$0xff]  }
0x1113   :  { %13350 = vmatprep.subr.bf16.mxu1 %v21008_v43  ;;  %v21060_v43 = vld [vmem:[#allocation10 + $0xaa4] ss:$16 sps:$4 sm:$0xff]  }
0x1116   :  { %13351 = vmatpush1.bf16.msra.mxu1 %v21006_v18  ;;  %v21058_v18 = vld [vmem:[#allocation10 + $0xaa0] ss:$16 sps:$4 sm:$0xff]  }
0x1117   :  { %13352 = vmatprep.subr.bf16.mxu1 %v21014_v52  ;;  %v21066_v52 = vld [vmem:[#allocation10 + $0xac4] ss:$16 sps:$4 sm:$0xff]  }
0x111a   :  { %13353 = vmatpush1.bf16.msra.mxu1 %v21012_v38  ;;  %v21064_v38 = vld [vmem:[#allocation10 + $0xac0] ss:$16 sps:$4 sm:$0xff]  }
0x111b   :  { %13354 = vmatprep.subr.bf16.mxu1 %v21020_v63  ;;  %v21072_v63 = vld [vmem:[#allocation10 + $0xae4] ss:$16 sps:$4 sm:$0xff]  }
0x111e   :  { %13355 = vmatpush1.bf16.msra.mxu1 %v21018_v62  ;;  %v21070_v62 = vld [vmem:[#allocation10 + $0xae0] ss:$16 sps:$4 sm:$0xff]  }
0x111f   :  { %13356 = vmatprep.subr.bf16.mxu1 %v21026_v4 }
0x1122   :  { %13357 = vmatpush1.bf16.msra.mxu1 %v21024_v26 }
0x1123   :  { %13627 = vmatprep.subr.bf16.mxu1 %v21030_v2  ;;  %v21080_v2 = vld [vmem:[#allocation10 + $0xb08] ss:$16 sps:$4 sm:$0xff]  }
0x11b8   :  { %v13009_v56 = vpop.f32.mrb[168].mxu1  ;;  %v13050_v11 = vpop.f32.mrb[236].mxu0 }
0x11b9   :  { %v25211_v57 = vadd.f32 %v13009_v56, %v25179_v7  ;;  %v25214_v49 = vadd.f32 %v13050_v11, %v25182_v33  ;;  %v13011_v8 = vpop.f32.mrb[169].mxu1  ;;  %v13052_v50 = vpop.f32.mrb[237].mxu0 }
0x11ba   :  { %v25217_v44 = vadd.f32 %v13011_v8, %v25185_v32  ;;  %v25220_v23 = vadd.f32 %v13052_v50, %v25188_v31  ;;  %v13013_v58 = vpop.f32.mrb[170].mxu1  ;;  %v13054_v14 = vpop.f32.mrb[238].mxu0  ;;  %v21027_v32 = vld [vmem:[#allocation8 + $0x8] ss:$0 sps:$4 sm:$0x44]  }
0x11bb   :  { %v13014_v13 = vpop.f32.mrb[171].mxu1  ;;  %v13055_v0 = vpop.f32.mrb[239].mxu0  ;;  %v13391_v31 = vrot.slane %v21027_v32, 2  ;;  %v21077_v32 = vld [vmem:[#allocation10 + $0xb00] ss:$16 sps:$4 sm:$0xff]  }
0x11d8   :  { %v13101_v28 = vpop.f32.mrb[172].mxu1 }
0x11d9   :  { %v13107_v21 = vpack.c.bf16 %v13101_v28, %v13101_v28  ;;  %v19144_v29 = vpop.f32.mrb[173].mxu1 }
0x11da   :  { %v13104_v7 = vpop.f32.mrb[174].mxu1 }
0x11db   :  { %13334 = vmatmul.mubr.bf16.vlgmr.msra.gmra.mrb[240].mxu0 %v13107_v21  ;;  %13375 = vmatmul.mubr.bf16.vlgmr.msra.gmra.mrb[176].mxu1 %v13107_v21  ;;  %v19145_v33 = vpop.f32.mrb[175].mxu1 }
0x11dc   :  { %19147 = vmatpush3.bf16.msra.mxu0 %v24894_v54  ;;  %19162 = vmatprep.mubr.msk.bf16.mxu0 %vm21579_vm5, %v21578_v27  ;;  %v21079_v33 = vld [vmem:[#allocation10 + $0xb04] ss:$16 sps:$4 sm:$0xff]  }
0x11dd   :  { %19148 = vmatprep.subr.bf16.mxu0 %v21578_v27  ;;  %13659 = vmatprep.mubr.bf16.mxu1 %v25826_v3 }
0x11de   :  { %13628 = vmatpush1.bf16.msra.mxu1 %v21028_v30  ;;  %v21085_v30 = vld [vmem:[#allocation10 + $0xb24] ss:$16 sps:$4 sm:$0xff]  }
0x11df   :  { %13629 = vmatprep.subr.bf16.mxu1 %v21036_v51  ;;  %v21086_v51 = vld [vmem:[#allocation10 + $0xb28] ss:$16 sps:$4 sm:$0xff]  }
0x11e0   :  { %19149 = vmatpush3.bf16.msra.mxu0 %v24908_v61 }
0x11e1   :  { %19150 = vmatprep.subr.bf16.mxu0 %v21578_v27 }
0x11e2   :  { %13630 = vmatpush1.bf16.msra.mxu1 %v21034_v5  ;;  %v21091_v5 = vld [vmem:[#allocation10 + $0xb44] ss:$16 sps:$4 sm:$0xff]  }
0x11e3   :  { %13631 = vmatprep.subr.bf16.mxu1 %v21042_v36  ;;  %v21092_v36 = vld [vmem:[#allocation10 + $0xb48] ss:$16 sps:$4 sm:$0xff]  }
0x11e4   :  { %19151 = vmatpush3.bf16.msra.mxu0 %v24910_v15 }
0x11e5   :  { %19152 = vmatprep.subr.bf16.mxu0 %v21578_v27 }
0x11e6   :  { %13632 = vmatpush1.bf16.msra.mxu1 %v21040_v53  ;;  %v21100_v53 = vld [vmem:[#allocation10 + $0xb6c] ss:$16 sps:$4 sm:$0xff]  }
0x11e7   :  { %13633 = vmatprep.subr.bf16.mxu1 %v21048_v12  ;;  %v21098_v12 = vld [vmem:[#allocation10 + $0xb68] ss:$16 sps:$4 sm:$0xff]  }
0x11e8   :  { %19153 = vmatpush3.bf16.msra.mxu0 %v24928_v59 }
0x11e9   :  { %19154 = vmatprep.subr.bf16.mxu0 %v21578_v27 }
0x11ea   :  { %13634 = vmatpush1.bf16.msra.mxu1 %v21046_v34  ;;  %v21106_v34 = vld [vmem:[#allocation10 + $0xb8c] ss:$16 sps:$4 sm:$0xff]  }
0x11eb   :  { %13635 = vmatprep.subr.bf16.mxu1 %v21054_v42  ;;  %v21104_v42 = vld [vmem:[#allocation10 + $0xb88] ss:$16 sps:$4 sm:$0xff]  }
0x11ec   :  { %19155 = vmatpush3.bf16.msra.mxu0 %v24930_v17 }
0x11ed   :  { %19156 = vmatprep.subr.bf16.mxu0 %v21578_v27 }
0x11ee   :  { %13636 = vmatpush1.bf16.msra.mxu1 %v21052_v6  ;;  %v21112_v6 = vld [vmem:[#allocation10 + $0xbac] ss:$16 sps:$4 sm:$0xff]  }
0x11ef   :  { %13637 = vmatprep.subr.bf16.mxu1 %v21060_v43  ;;  %v21110_v43 = vld [vmem:[#allocation10 + $0xba8] ss:$16 sps:$4 sm:$0xff]  }
0x11f0   :  { %19157 = vmatpush3.bf16.msra.mxu0 %v24949_v16 }
0x11f1   :  { %19158 = vmatprep.subr.bf16.mxu0 %v21578_v27 }
0x11f2   :  { %13638 = vmatpush1.bf16.msra.mxu1 %v21058_v18  ;;  %v21118_v18 = vld [vmem:[#allocation10 + $0xbcc] ss:$16 sps:$4 sm:$0xff]  }
0x11f3   :  { %13639 = vmatprep.subr.bf16.mxu1 %v21066_v52  ;;  %v21116_v52 = vld [vmem:[#allocation10 + $0xbc8] ss:$16 sps:$4 sm:$0xff]  }
0x11f4   :  { %19159 = vmatpush3.bf16.msra.mxu0 %v24951_v25 }
0x11f5   :  { %19160 = vmatprep.subr.bf16.mxu0 %v21578_v27 }
0x11f6   :  { %13640 = vmatpush1.bf16.msra.mxu1 %v21064_v38  ;;  %v21124_v38 = vld [vmem:[#allocation10 + $0xbec] ss:$16 sps:$4 sm:$0xff]  }
0x11f7   :  { %13641 = vmatprep.subr.bf16.mxu1 %v21072_v63  ;;  %v21122_v63 = vld [vmem:[#allocation10 + $0xbe8] ss:$16 sps:$4 sm:$0xff]  }
0x11f8   :  { %19161 = vmatpush3.bf16.msra.mxu0 %v24947_v24 }
0x11f9   :  { %13668 = vmatprep.subr.bf16.mxu0 %v21033_v60  ;;  %v21083_v60 = vld [vmem:[#allocation10 + $0xb20] ss:$16 sps:$4 sm:$0xff]  }
0x11fa   :  { %13642 = vmatpush1.bf16.msra.mxu1 %v21070_v62 }
0x11fb   :  { %19163 = vmatmul.mubr.bf16.vlgmr.msra.gmra.mrb[244].mxu0 %v13391_v31  ;;  %19166 = vmatprep.subr.bf16.mxu1 %v21578_v27  ;;  %v21082_v31 = vld [vmem:[#allocation10 + $0xb0c] ss:$16 sps:$4 sm:$0xff]  }
0x11fc   :  { %13700 = vmatprep.mubr.bf16.mxu0 %v25826_v3  ;;  %13669 = vmatpush1.bf16.msra.mxu0 %v21031_v1  ;;  %v21088_v1 = vld [vmem:[#allocation10 + $0xb2c] ss:$16 sps:$4 sm:$0xff]  }
0x11fd   :  { %13670 = vmatprep.subr.bf16.mxu0 %v21039_v20  ;;  %v21094_v20 = vld [vmem:[#allocation10 + $0xb4c] ss:$16 sps:$4 sm:$0xff]  }
0x1200   :  { %13671 = vmatpush1.bf16.msra.mxu0 %v21037_v37  ;;  %v21089_v37 = vld [vmem:[#allocation10 + $0xb40] ss:$16 sps:$4 sm:$0xff]  }
0x1201   :  { %13672 = vmatprep.subr.bf16.mxu0 %v21045_v55  ;;  %v21097_v55 = vld [vmem:[#allocation10 + $0xb64] ss:$16 sps:$4 sm:$0xff]  }
0x1204   :  { %13673 = vmatpush1.bf16.msra.mxu0 %v21043_v48  ;;  %v21095_v48 = vld [vmem:[#allocation10 + $0xb60] ss:$16 sps:$4 sm:$0xff]  }
0x1205   :  { %13674 = vmatprep.subr.bf16.mxu0 %v21051_v9  ;;  %v21103_v9 = vld [vmem:[#allocation10 + $0xb84] ss:$16 sps:$4 sm:$0xff]  }
0x1208   :  { %13675 = vmatpush1.bf16.msra.mxu0 %v21049_v39  ;;  %v21101_v39 = vld [vmem:[#allocation10 + $0xb80] ss:$16 sps:$4 sm:$0xff]  }
0x1209   :  { %13676 = vmatprep.subr.bf16.mxu0 %v21057_v45  ;;  %v21109_v45 = vld [vmem:[#allocation10 + $0xba4] ss:$16 sps:$4 sm:$0xff]  }
0x120c   :  { %13677 = vmatpush1.bf16.msra.mxu0 %v21055_v10  ;;  %v21107_v10 = vld [vmem:[#allocation10 + $0xba0] ss:$16 sps:$4 sm:$0xff]  }
0x120d   :  { %13678 = vmatprep.subr.bf16.mxu0 %v21063_v41  ;;  %v21115_v41 = vld [vmem:[#allocation10 + $0xbc4] ss:$16 sps:$4 sm:$0xff]  }
0x1210   :  { %13679 = vmatpush1.bf16.msra.mxu0 %v21061_v35  ;;  %v21113_v35 = vld [vmem:[#allocation10 + $0xbc0] ss:$16 sps:$4 sm:$0xff]  }
0x1211   :  { %13680 = vmatprep.subr.bf16.mxu0 %v21069_v47  ;;  %v21121_v47 = vld [vmem:[#allocation10 + $0xbe4] ss:$16 sps:$4 sm:$0xff]  }
0x1214   :  { %13681 = vmatpush1.bf16.msra.mxu0 %v21067_v22  ;;  %v21119_v22 = vld [vmem:[#allocation10 + $0xbe0] ss:$16 sps:$4 sm:$0xff]  }
0x1215   :  { %13682 = vmatprep.subr.bf16.mxu0 %v21075_v40 }
0x1218   :  { %13683 = vmatpush1.bf16.msra.mxu0 %v21073_v46 }
0x1219   :  { %13953 = vmatprep.subr.bf16.mxu0 %v21079_v33  ;;  %v21133_v33 = vld [vmem:[#allocation10 + $0xc24] ss:$16 sps:$4 sm:$0xff]  }
0x12ae   :  { %v13335_v4 = vpop.f32.mrb[240].mxu0  ;;  %v13376_v19 = vpop.f32.mrb[176].mxu1 }
0x12af   :  { %v25243_v26 = vadd.f32 %v13335_v4, %v25211_v57  ;;  %v25246_v56 = vadd.f32 %v13376_v19, %v25214_v49  ;;  %v13337_v11 = vpop.f32.mrb[241].mxu0  ;;  %v13378_v8 = vpop.f32.mrb[177].mxu1 }
0x12b0   :  { %v25249_v50 = vadd.f32 %v13337_v11, %v25217_v44  ;;  %v25252_v58 = vadd.f32 %v13378_v8, %v25220_v23  ;;  %v13339_v14 = vpop.f32.mrb[242].mxu0  ;;  %v13380_v13 = vpop.f32.mrb[178].mxu1  ;;  %v21076_v44 = vld [vmem:[#allocation8 + $0x8] ss:$0 sps:$4 sm:$0x88]  }
0x12b1   :  { %v13340_v0 = vpop.f32.mrb[243].mxu0  ;;  %v13381_v28 = vpop.f32.mrb[179].mxu1  ;;  %v13717_v23 = vrot.slane %v21076_v44, 3  ;;  %v21130_v44 = vld [vmem:[#allocation10 + $0xc0c] ss:$16 sps:$4 sm:$0xff]  }
0x12ce   :  { %v13427_v21 = vpop.f32.mrb[244].mxu0 }
0x12cf   :  { %v13433_v29 = vpack.c.bf16 %v13427_v21, %v13427_v21  ;;  %v19164_v7 = vpop.f32.mrb[245].mxu0 }
0x12d0   :  { %v13430_v57 = vpop.f32.mrb[246].mxu0 }
0x12d1   :  { %13660 = vmatmul.mubr.bf16.vlgmr.msra.gmra.mrb[180].mxu1 %v13433_v29  ;;  %13701 = vmatmul.mubr.bf16.vlgmr.msra.gmra.mrb[248].mxu0 %v13433_v29  ;;  %v19165_v49 = vpop.f32.mrb[247].mxu0 }
0x12d2   :  { %19167 = vmatpush3.bf16.msra.mxu1 %v24894_v54  ;;  %19182 = vmatprep.mubr.msk.bf16.mxu1 %vm21579_vm5, %v21578_v27  ;;  %v21125_v49 = vld [vmem:[#allocation10 + $0xc00] ss:$16 sps:$4 sm:$0xff]  }
0x12d3   :  { %19168 = vmatprep.subr.bf16.mxu1 %v21578_v27  ;;  %13985 = vmatprep.mubr.bf16.mxu0 %v25826_v3 }
0x12d4   :  { %13954 = vmatpush1.bf16.msra.mxu0 %v21077_v32  ;;  %v21131_v32 = vld [vmem:[#allocation10 + $0xc20] ss:$16 sps:$4 sm:$0xff]  }
0x12d5   :  { %13955 = vmatprep.subr.bf16.mxu0 %v21085_v30  ;;  %v21139_v30 = vld [vmem:[#allocation10 + $0xc44] ss:$16 sps:$4 sm:$0xff]  }
0x12d6   :  { %19169 = vmatpush3.bf16.msra.mxu1 %v24908_v61 }
0x12d7   :  { %19170 = vmatprep.subr.bf16.mxu1 %v21578_v27 }
0x12d8   :  { %13956 = vmatpush1.bf16.msra.mxu0 %v21083_v60  ;;  %v21142_v60 = vld [vmem:[#allocation10 + $0xc4c] ss:$16 sps:$4 sm:$0xff]  }
0x12d9   :  { %13957 = vmatprep.subr.bf16.mxu0 %v21091_v5  ;;  %v21145_v5 = vld [vmem:[#allocation10 + $0xc64] ss:$16 sps:$4 sm:$0xff]  }
0x12da   :  { %19171 = vmatpush3.bf16.msra.mxu1 %v24910_v15 }
0x12db   :  { %19172 = vmatprep.subr.bf16.mxu1 %v21578_v27 }
0x12dc   :  { %13958 = vmatpush1.bf16.msra.mxu0 %v21089_v37  ;;  %v21143_v37 = vld [vmem:[#allocation10 + $0xc60] ss:$16 sps:$4 sm:$0xff]  }
0x12dd   :  { %13959 = vmatprep.subr.bf16.mxu0 %v21097_v55  ;;  %v21151_v55 = vld [vmem:[#allocation10 + $0xc84] ss:$16 sps:$4 sm:$0xff]  }
0x12de   :  { %19173 = vmatpush3.bf16.msra.mxu1 %v24928_v59 }
0x12df   :  { %19174 = vmatprep.subr.bf16.mxu1 %v21578_v27 }
0x12e0   :  { %13960 = vmatpush1.bf16.msra.mxu0 %v21095_v48  ;;  %v21149_v48 = vld [vmem:[#allocation10 + $0xc80] ss:$16 sps:$4 sm:$0xff]  }
0x12e1   :  { %13961 = vmatprep.subr.bf16.mxu0 %v21103_v9  ;;  %v21157_v9 = vld [vmem:[#allocation10 + $0xca4] ss:$16 sps:$4 sm:$0xff]  }
0x12e2   :  { %19175 = vmatpush3.bf16.msra.mxu1 %v24930_v17 }
0x12e3   :  { %19176 = vmatprep.subr.bf16.mxu1 %v21578_v27 }
0x12e4   :  { %13962 = vmatpush1.bf16.msra.mxu0 %v21101_v39  ;;  %v21155_v39 = vld [vmem:[#allocation10 + $0xca0] ss:$16 sps:$4 sm:$0xff]  }
0x12e5   :  { %13963 = vmatprep.subr.bf16.mxu0 %v21109_v45  ;;  %v21163_v45 = vld [vmem:[#allocation10 + $0xcc4] ss:$16 sps:$4 sm:$0xff]  }
0x12e6   :  { %19177 = vmatpush3.bf16.msra.mxu1 %v24949_v16 }
0x12e7   :  { %19178 = vmatprep.subr.bf16.mxu1 %v21578_v27 }
0x12e8   :  { %13964 = vmatpush1.bf16.msra.mxu0 %v21107_v10  ;;  %v21161_v10 = vld [vmem:[#allocation10 + $0xcc0] ss:$16 sps:$4 sm:$0xff]  }
0x12e9   :  { %13965 = vmatprep.subr.bf16.mxu0 %v21115_v41  ;;  %v21169_v41 = vld [vmem:[#allocation10 + $0xce4] ss:$16 sps:$4 sm:$0xff]  }
0x12ea   :  { %19179 = vmatpush3.bf16.msra.mxu1 %v24951_v25 }
0x12eb   :  { %19180 = vmatprep.subr.bf16.mxu1 %v21578_v27 }
0x12ec   :  { %13966 = vmatpush1.bf16.msra.mxu0 %v21113_v35  ;;  %v21167_v35 = vld [vmem:[#allocation10 + $0xce0] ss:$16 sps:$4 sm:$0xff]  }
0x12ed   :  { %13967 = vmatprep.subr.bf16.mxu0 %v21121_v47 }
0x12ee   :  { %19181 = vmatpush3.bf16.msra.mxu1 %v24947_v24 }
0x12ef   :  { %13994 = vmatprep.subr.bf16.mxu1 %v21082_v31  ;;  %v21136_v31 = vld [vmem:[#allocation10 + $0xc2c] ss:$16 sps:$4 sm:$0xff]  }
0x12f0   :  { %13968 = vmatpush1.bf16.msra.mxu0 %v21119_v22 }
0x12f1   :  { %19183 = vmatmul.mubr.bf16.vlgmr.msra.gmra.mrb[184].mxu1 %v13717_v23  ;;  %19186 = vmatprep.subr.bf16.mxu0 %v21578_v27  ;;  %v21128_v23 = vld [vmem:[#allocation10 + $0xc08] ss:$16 sps:$4 sm:$0xff]  }
0x12f2   :  { %14026 = vmatprep.mubr.bf16.mxu1 %v25826_v3  ;;  %13995 = vmatpush1.bf16.msra.mxu1 %v21080_v2  ;;  %v21134_v2 = vld [vmem:[#allocation10 + $0xc28] ss:$16 sps:$4 sm:$0xff]  }
0x12f3   :  { %13996 = vmatprep.subr.bf16.mxu1 %v21088_v1  ;;  %v21137_v1 = vld [vmem:[#allocation10 + $0xc40] ss:$16 sps:$4 sm:$0xff]  }
0x12f6   :  { %13997 = vmatpush1.bf16.msra.mxu1 %v21086_v51  ;;  %v21140_v51 = vld [vmem:[#allocation10 + $0xc48] ss:$16 sps:$4 sm:$0xff]  }
0x12f7   :  { %13998 = vmatprep.subr.bf16.mxu1 %v21094_v20  ;;  %v21148_v20 = vld [vmem:[#allocation10 + $0xc6c] ss:$16 sps:$4 sm:$0xff]  }
0x12fa   :  { %13999 = vmatpush1.bf16.msra.mxu1 %v21092_v36  ;;  %v21146_v36 = vld [vmem:[#allocation10 + $0xc68] ss:$16 sps:$4 sm:$0xff]  }
0x12fb   :  { %14000 = vmatprep.subr.bf16.mxu1 %v21100_v53  ;;  %v21154_v53 = vld [vmem:[#allocation10 + $0xc8c] ss:$16 sps:$4 sm:$0xff]  }
0x12fe   :  { %14001 = vmatpush1.bf16.msra.mxu1 %v21098_v12  ;;  %v21152_v12 = vld [vmem:[#allocation10 + $0xc88] ss:$16 sps:$4 sm:$0xff]  }
0x12ff   :  { %14002 = vmatprep.subr.bf16.mxu1 %v21106_v34  ;;  %v21160_v34 = vld [vmem:[#allocation10 + $0xcac] ss:$16 sps:$4 sm:$0xff]  }
0x1302   :  { %14003 = vmatpush1.bf16.msra.mxu1 %v21104_v42  ;;  %v21158_v42 = vld [vmem:[#allocation10 + $0xca8] ss:$16 sps:$4 sm:$0xff]  }
0x1303   :  { %14004 = vmatprep.subr.bf16.mxu1 %v21112_v6  ;;  %v21166_v6 = vld [vmem:[#allocation10 + $0xccc] ss:$16 sps:$4 sm:$0xff]  }
0x1306   :  { %14005 = vmatpush1.bf16.msra.mxu1 %v21110_v43  ;;  %v21164_v43 = vld [vmem:[#allocation10 + $0xcc8] ss:$16 sps:$4 sm:$0xff]  }
0x1307   :  { %14006 = vmatprep.subr.bf16.mxu1 %v21118_v18  ;;  %v21172_v18 = vld [vmem:[#allocation10 + $0xcec] ss:$16 sps:$4 sm:$0xff]  }
0x130a   :  { %14007 = vmatpush1.bf16.msra.mxu1 %v21116_v52  ;;  %v21170_v52 = vld [vmem:[#allocation10 + $0xce8] ss:$16 sps:$4 sm:$0xff]  }
0x130b   :  { %14008 = vmatprep.subr.bf16.mxu1 %v21124_v38 }
0x130e   :  { %14009 = vmatpush1.bf16.msra.mxu1 %v21122_v63 }
0x13a4   :  { %v13661_v40 = vpop.f32.mrb[180].mxu1  ;;  %v13702_v62 = vpop.f32.mrb[248].mxu0 }
0x13a5   :  { %v25275_v46 = vadd.f32 %v13661_v40, %v25243_v26  ;;  %v25278_v4 = vadd.f32 %v13702_v62, %v25246_v56  ;;  %v13663_v19 = vpop.f32.mrb[181].mxu1  ;;  %v13704_v11 = vpop.f32.mrb[249].mxu0 }
0x13a6   :  { %v25281_v8 = vadd.f32 %v13663_v19, %v25249_v50  ;;  %v25284_v14 = vadd.f32 %v13704_v11, %v25252_v58  ;;  %v13665_v13 = vpop.f32.mrb[182].mxu1  ;;  %v13706_v0 = vpop.f32.mrb[250].mxu0  ;;  %v14039_v50 = vld [vmem:[#allocation8 + $0xc] sm:$0x1]  ;;  %v21127_v58 = vld [vmem:[#allocation10 + $0xc04] ss:$16 sps:$4 sm:$0xff]  }
0x13a7   :  { %v13666_v28 = vpop.f32.mrb[183].mxu1  ;;  %v13707_v21 = vpop.f32.mrb[251].mxu0  ;;  %14274 = vmatprep.subr.bf16.mxu1 %v21127_v58  ;;  %v21177_v58 = vld [vmem:[#allocation10 + $0xd08] ss:$16 sps:$4 sm:$0xff]  }
0x13c4   :  { %v13753_v29 = vpop.f32.mrb[184].mxu1 }
0x13c5   :  { %v13759_v7 = vpack.c.bf16 %v13753_v29, %v13753_v29  ;;  %v19184_v57 = vpop.f32.mrb[185].mxu1 }
0x13c6   :  { %v13756_v26 = vpop.f32.mrb[186].mxu1 }
0x13c7   :  { %13986 = vmatmul.mubr.bf16.vlgmr.msra.gmra.mrb[252].mxu0 %v13759_v7  ;;  %14027 = vmatmul.mubr.bf16.vlgmr.msra.gmra.mrb[188].mxu1 %v13759_v7  ;;  %v19185_v56 = vpop.f32.mrb[187].mxu1  ;;  %v21176_v26 = vld [vmem:[#allocation10 + $0xd04] ss:$16 sps:$4 sm:$0xff]  }
0x13c8   :  { %19187 = vmatpush3.bf16.msra.mxu0 %v24894_v54  ;;  %19202 = vmatprep.mubr.msk.bf16.mxu0 %vm21579_vm5, %v21578_v27  ;;  %v21174_v56 = vld [vmem:[#allocation10 + $0xd00] ss:$16 sps:$4 sm:$0xff]  }
0x13c9   :  { %19188 = vmatprep.subr.bf16.mxu0 %v21578_v27  ;;  %14306 = vmatprep.mubr.bf16.mxu1 %v25826_v3 }
0x13ca   :  { %14275 = vmatpush1.bf16.msra.mxu1 %v21125_v49  ;;  %v21182_v49 = vld [vmem:[#allocation10 + $0xd24] ss:$16 sps:$4 sm:$0xff]  }
0x13cb   :  { %14276 = vmatprep.subr.bf16.mxu1 %v21133_v33  ;;  %v21183_v33 = vld [vmem:[#allocation10 + $0xd28] ss:$16 sps:$4 sm:$0xff]  }
0x13cc   :  { %19189 = vmatpush3.bf16.msra.mxu0 %v24908_v61 }
0x13cd   :  { %19190 = vmatprep.subr.bf16.mxu0 %v21578_v27 }
0x13ce   :  { %14277 = vmatpush1.bf16.msra.mxu1 %v21131_v32  ;;  %v21188_v32 = vld [vmem:[#allocation10 + $0xd44] ss:$16 sps:$4 sm:$0xff]  }
0x13cf   :  { %14278 = vmatprep.subr.bf16.mxu1 %v21139_v30  ;;  %v21189_v30 = vld [vmem:[#allocation10 + $0xd48] ss:$16 sps:$4 sm:$0xff]  }
0x13d0   :  { %19191 = vmatpush3.bf16.msra.mxu0 %v24910_v15 }
0x13d1   :  { %19192 = vmatprep.subr.bf16.mxu0 %v21578_v27 }
0x13d2   :  { %14279 = vmatpush1.bf16.msra.mxu1 %v21137_v1  ;;  %v21197_v1 = vld [vmem:[#allocation10 + $0xd6c] ss:$16 sps:$4 sm:$0xff]  }
0x13d3   :  { %14280 = vmatprep.subr.bf16.mxu1 %v21145_v5  ;;  %v21195_v5 = vld [vmem:[#allocation10 + $0xd68] ss:$16 sps:$4 sm:$0xff]  }
0x13d4   :  { %19193 = vmatpush3.bf16.msra.mxu0 %v24928_v59 }
0x13d5   :  { %19194 = vmatprep.subr.bf16.mxu0 %v21578_v27 }
0x13d6   :  { %14281 = vmatpush1.bf16.msra.mxu1 %v21143_v37  ;;  %v21203_v37 = vld [vmem:[#allocation10 + $0xd8c] ss:$16 sps:$4 sm:$0xff]  }
0x13d7   :  { %14282 = vmatprep.subr.bf16.mxu1 %v21151_v55  ;;  %v21201_v55 = vld [vmem:[#allocation10 + $0xd88] ss:$16 sps:$4 sm:$0xff]  }
0x13d8   :  { %19195 = vmatpush3.bf16.msra.mxu0 %v24930_v17 }
0x13d9   :  { %19196 = vmatprep.subr.bf16.mxu0 %v21578_v27 }
0x13da   :  { %14283 = vmatpush1.bf16.msra.mxu1 %v21149_v48  ;;  %v21209_v48 = vld [vmem:[#allocation10 + $0xdac] ss:$16 sps:$4 sm:$0xff]  }
0x13db   :  { %14284 = vmatprep.subr.bf16.mxu1 %v21157_v9  ;;  %v21207_v9 = vld [vmem:[#allocation10 + $0xda8] ss:$16 sps:$4 sm:$0xff]  }
0x13dc   :  { %19197 = vmatpush3.bf16.msra.mxu0 %v24949_v16 }
0x13dd   :  { %19198 = vmatprep.subr.bf16.mxu0 %v21578_v27 }
0x13de   :  { %14285 = vmatpush1.bf16.msra.mxu1 %v21155_v39  ;;  %v21215_v39 = vld [vmem:[#allocation10 + $0xdcc] ss:$16 sps:$4 sm:$0xff]  }
0x13df   :  { %14286 = vmatprep.subr.bf16.mxu1 %v21163_v45  ;;  %v21213_v45 = vld [vmem:[#allocation10 + $0xdc8] ss:$16 sps:$4 sm:$0xff]  }
0x13e0   :  { %19199 = vmatpush3.bf16.msra.mxu0 %v24951_v25 }
0x13e1   :  { %19200 = vmatprep.subr.bf16.mxu0 %v21578_v27 }
0x13e2   :  { %14287 = vmatpush1.bf16.msra.mxu1 %v21161_v10  ;;  %v21221_v10 = vld [vmem:[#allocation10 + $0xdec] ss:$16 sps:$4 sm:$0xff]  }
0x13e3   :  { %14288 = vmatprep.subr.bf16.mxu1 %v21169_v41  ;;  %v21219_v41 = vld [vmem:[#allocation10 + $0xde8] ss:$16 sps:$4 sm:$0xff]  }
0x13e4   :  { %19201 = vmatpush3.bf16.msra.mxu0 %v24947_v24 }
0x13e5   :  { %14315 = vmatprep.subr.bf16.mxu0 %v21130_v44  ;;  %v21180_v44 = vld [vmem:[#allocation10 + $0xd20] ss:$16 sps:$4 sm:$0xff]  }
0x13e6   :  { %14289 = vmatpush1.bf16.msra.mxu1 %v21167_v35 }
0x13e7   :  { %19203 = vmatmul.mubr.bf16.vlgmr.msra.gmra.mrb[0].mxu0 %v14039_v50  ;;  %19206 = vmatprep.subr.bf16.mxu1 %v21578_v27  ;;  %v21179_v50 = vld [vmem:[#allocation10 + $0xd0c] ss:$16 sps:$4 sm:$0xff]  }
0x13e8   :  { %14347 = vmatprep.mubr.bf16.mxu0 %v25826_v3  ;;  %14316 = vmatpush1.bf16.msra.mxu0 %v21128_v23  ;;  %v21185_v23 = vld [vmem:[#allocation10 + $0xd2c] ss:$16 sps:$4 sm:$0xff]  }
0x13e9   :  { %14317 = vmatprep.subr.bf16.mxu0 %v21136_v31  ;;  %v21191_v31 = vld [vmem:[#allocation10 + $0xd4c] ss:$16 sps:$4 sm:$0xff]  }
0x13ec   :  { %14318 = vmatpush1.bf16.msra.mxu0 %v21134_v2  ;;  %v21186_v2 = vld [vmem:[#allocation10 + $0xd40] ss:$16 sps:$4 sm:$0xff]  }
0x13ed   :  { %14319 = vmatprep.subr.bf16.mxu0 %v21142_v60  ;;  %v21194_v60 = vld [vmem:[#allocation10 + $0xd64] ss:$16 sps:$4 sm:$0xff]  }
0x13f0   :  { %14320 = vmatpush1.bf16.msra.mxu0 %v21140_v51  ;;  %v21192_v51 = vld [vmem:[#allocation10 + $0xd60] ss:$16 sps:$4 sm:$0xff]  }
0x13f1   :  { %14321 = vmatprep.subr.bf16.mxu0 %v21148_v20  ;;  %v21200_v20 = vld [vmem:[#allocation10 + $0xd84] ss:$16 sps:$4 sm:$0xff]  }
0x13f4   :  { %14322 = vmatpush1.bf16.msra.mxu0 %v21146_v36  ;;  %v21198_v36 = vld [vmem:[#allocation10 + $0xd80] ss:$16 sps:$4 sm:$0xff]  }
0x13f5   :  { %14323 = vmatprep.subr.bf16.mxu0 %v21154_v53  ;;  %v21206_v53 = vld [vmem:[#allocation10 + $0xda4] ss:$16 sps:$4 sm:$0xff]  }
0x13f8   :  { %14324 = vmatpush1.bf16.msra.mxu0 %v21152_v12  ;;  %v21204_v12 = vld [vmem:[#allocation10 + $0xda0] ss:$16 sps:$4 sm:$0xff]  }
0x13f9   :  { %14325 = vmatprep.subr.bf16.mxu0 %v21160_v34  ;;  %v21212_v34 = vld [vmem:[#allocation10 + $0xdc4] ss:$16 sps:$4 sm:$0xff]  }
0x13fc   :  { %14326 = vmatpush1.bf16.msra.mxu0 %v21158_v42  ;;  %v21210_v42 = vld [vmem:[#allocation10 + $0xdc0] ss:$16 sps:$4 sm:$0xff]  }
0x13fd   :  { %14327 = vmatprep.subr.bf16.mxu0 %v21166_v6  ;;  %v21218_v6 = vld [vmem:[#allocation10 + $0xde4] ss:$16 sps:$4 sm:$0xff]  }
0x1400   :  { %14328 = vmatpush1.bf16.msra.mxu0 %v21164_v43  ;;  %v21216_v43 = vld [vmem:[#allocation10 + $0xde0] ss:$16 sps:$4 sm:$0xff]  }
0x1401   :  { %14329 = vmatprep.subr.bf16.mxu0 %v21172_v18 }
0x1404   :  { %14330 = vmatpush1.bf16.msra.mxu0 %v21170_v52 }
0x1405   :  { %14600 = vmatprep.subr.bf16.mxu0 %v21176_v26  ;;  %v21226_v26 = vld [vmem:[#allocation10 + $0xe08] ss:$16 sps:$4 sm:$0xff]  }
0x149a   :  { %v13987_v47 = vpop.f32.mrb[252].mxu0  ;;  %v14028_v38 = vpop.f32.mrb[188].mxu1 }
0x149b   :  { %v25307_v22 = vadd.f32 %v13987_v47, %v25275_v46  ;;  %v25310_v63 = vadd.f32 %v14028_v38, %v25278_v4  ;;  %v13989_v40 = vpop.f32.mrb[253].mxu0  ;;  %v14030_v62 = vpop.f32.mrb[189].mxu1 }
0x149c   :  { %v25313_v19 = vadd.f32 %v13989_v40, %v25281_v8  ;;  %v25316_v11 = vadd.f32 %v14030_v62, %v25284_v14  ;;  %v13991_v13 = vpop.f32.mrb[254].mxu0  ;;  %v14032_v0 = vpop.f32.mrb[190].mxu1  ;;  %v21173_v8 = vld [vmem:[#allocation8 + $0xc] ss:$0 sps:$4 sm:$0x22]  }
0x149d   :  { %v13992_v28 = vpop.f32.mrb[255].mxu0  ;;  %v14033_v21 = vpop.f32.mrb[191].mxu1  ;;  %v14364_v14 = vrot.slane %v21173_v8, 1  ;;  %v21223_v8 = vld [vmem:[#allocation10 + $0xe00] ss:$16 sps:$4 sm:$0xff]  }
0x14ba   :  { %v14074_v29 = vpop.f32.mrb[0].mxu0 }
0x14bb   :  { %v14080_v7 = vpack.c.bf16 %v14074_v29, %v14074_v29  ;;  %v19204_v57 = vpop.f32.mrb[1].mxu0 }
0x14bc   :  { %v14077_v46 = vpop.f32.mrb[2].mxu0 }
0x14bd   :  { %14307 = vmatmul.mubr.bf16.vlgmr.msra.gmra.mrb[192].mxu1 %v14080_v7  ;;  %14348 = vmatmul.mubr.bf16.vlgmr.msra.gmra.mrb[4].mxu0 %v14080_v7  ;;  %v19205_v4 = vpop.f32.mrb[3].mxu0 }
0x14be   :  { %19207 = vmatpush3.bf16.msra.mxu1 %v24894_v54  ;;  %19222 = vmatprep.mubr.msk.bf16.mxu1 %vm21579_vm5, %v21578_v27  ;;  %v21225_v4 = vld [vmem:[#allocation10 + $0xe04] ss:$16 sps:$4 sm:$0xff]  }
0x14bf   :  { %19208 = vmatprep.subr.bf16.mxu1 %v21578_v27  ;;  %14632 = vmatprep.mubr.bf16.mxu0 %v25826_v3 }
0x14c0   :  { %14601 = vmatpush1.bf16.msra.mxu0 %v21174_v56  ;;  %v21231_v56 = vld [vmem:[#allocation10 + $0xe24] ss:$16 sps:$4 sm:$0xff]  }
0x14c1   :  { %14602 = vmatprep.subr.bf16.mxu0 %v21182_v49  ;;  %v21232_v49 = vld [vmem:[#allocation10 + $0xe28] ss:$16 sps:$4 sm:$0xff]  }
0x14c2   :  { %19209 = vmatpush3.bf16.msra.mxu1 %v24908_v61 }
0x14c3   :  { %19210 = vmatprep.subr.bf16.mxu1 %v21578_v27 }
0x14c4   :  { %14603 = vmatpush1.bf16.msra.mxu0 %v21180_v44  ;;  %v21237_v44 = vld [vmem:[#allocation10 + $0xe44] ss:$16 sps:$4 sm:$0xff]  }
0x14c5   :  { %14604 = vmatprep.subr.bf16.mxu0 %v21188_v32  ;;  %v21238_v32 = vld [vmem:[#allocation10 + $0xe48] ss:$16 sps:$4 sm:$0xff]  }
0x14c6   :  { %19211 = vmatpush3.bf16.msra.mxu1 %v24910_v15 }
0x14c7   :  { %19212 = vmatprep.subr.bf16.mxu1 %v21578_v27 }
0x14c8   :  { %14605 = vmatpush1.bf16.msra.mxu0 %v21186_v2  ;;  %v21246_v2 = vld [vmem:[#allocation10 + $0xe6c] ss:$16 sps:$4 sm:$0xff]  }
0x14c9   :  { %14606 = vmatprep.subr.bf16.mxu0 %v21194_v60  ;;  %v21244_v60 = vld [vmem:[#allocation10 + $0xe68] ss:$16 sps:$4 sm:$0xff]  }
0x14ca   :  { %19213 = vmatpush3.bf16.msra.mxu1 %v24928_v59 }
0x14cb   :  { %19214 = vmatprep.subr.bf16.mxu1 %v21578_v27 }
0x14cc   :  { %14607 = vmatpush1.bf16.msra.mxu0 %v21192_v51  ;;  %v21252_v51 = vld [vmem:[#allocation10 + $0xe8c] ss:$16 sps:$4 sm:$0xff]  }
0x14cd   :  { %14608 = vmatprep.subr.bf16.mxu0 %v21200_v20  ;;  %v21250_v20 = vld [vmem:[#allocation10 + $0xe88] ss:$16 sps:$4 sm:$0xff]  }
0x14ce   :  { %19215 = vmatpush3.bf16.msra.mxu1 %v24930_v17 }
0x14cf   :  { %19216 = vmatprep.subr.bf16.mxu1 %v21578_v27 }
0x14d0   :  { %14609 = vmatpush1.bf16.msra.mxu0 %v21198_v36  ;;  %v21258_v36 = vld [vmem:[#allocation10 + $0xeac] ss:$16 sps:$4 sm:$0xff]  }
0x14d1   :  { %14610 = vmatprep.subr.bf16.mxu0 %v21206_v53  ;;  %v21256_v53 = vld [vmem:[#allocation10 + $0xea8] ss:$16 sps:$4 sm:$0xff]  }
0x14d2   :  { %19217 = vmatpush3.bf16.msra.mxu1 %v24949_v16 }
0x14d3   :  { %19218 = vmatprep.subr.bf16.mxu1 %v21578_v27 }
0x14d4   :  { %14611 = vmatpush1.bf16.msra.mxu0 %v21204_v12  ;;  %v21264_v12 = vld [vmem:[#allocation10 + $0xecc] ss:$16 sps:$4 sm:$0xff]  }
0x14d5   :  { %14612 = vmatprep.subr.bf16.mxu0 %v21212_v34  ;;  %v21262_v34 = vld [vmem:[#allocation10 + $0xec8] ss:$16 sps:$4 sm:$0xff]  }
0x14d6   :  { %19219 = vmatpush3.bf16.msra.mxu1 %v24951_v25 }
0x14d7   :  { %19220 = vmatprep.subr.bf16.mxu1 %v21578_v27 }
0x14d8   :  { %14613 = vmatpush1.bf16.msra.mxu0 %v21210_v42  ;;  %v21270_v42 = vld [vmem:[#allocation10 + $0xeec] ss:$16 sps:$4 sm:$0xff]  }
0x14d9   :  { %14614 = vmatprep.subr.bf16.mxu0 %v21218_v6  ;;  %v21268_v6 = vld [vmem:[#allocation10 + $0xee8] ss:$16 sps:$4 sm:$0xff]  }
0x14da   :  { %19221 = vmatpush3.bf16.msra.mxu1 %v24947_v24 }
0x14db   :  { %14641 = vmatprep.subr.bf16.mxu1 %v21179_v50  ;;  %v21229_v50 = vld [vmem:[#allocation10 + $0xe20] ss:$16 sps:$4 sm:$0xff]  }
0x14dc   :  { %14615 = vmatpush1.bf16.msra.mxu0 %v21216_v43 }
0x14dd   :  { %19223 = vmatmul.mubr.bf16.vlgmr.msra.gmra.mrb[196].mxu1 %v14364_v14  ;;  %19226 = vmatprep.subr.bf16.mxu0 %v21578_v27  ;;  %v21228_v14 = vld [vmem:[#allocation10 + $0xe0c] ss:$16 sps:$4 sm:$0xff]  }
0x14de   :  { %14673 = vmatprep.mubr.bf16.mxu1 %v25826_v3  ;;  %14642 = vmatpush1.bf16.msra.mxu1 %v21177_v58  ;;  %v21234_v58 = vld [vmem:[#allocation10 + $0xe2c] ss:$16 sps:$4 sm:$0xff]  }
0x14df   :  { %14643 = vmatprep.subr.bf16.mxu1 %v21185_v23  ;;  %v21240_v23 = vld [vmem:[#allocation10 + $0xe4c] ss:$16 sps:$4 sm:$0xff]  }
0x14e2   :  { %14644 = vmatpush1.bf16.msra.mxu1 %v21183_v33  ;;  %v21235_v33 = vld [vmem:[#allocation10 + $0xe40] ss:$16 sps:$4 sm:$0xff]  }
0x14e3   :  { %14645 = vmatprep.subr.bf16.mxu1 %v21191_v31  ;;  %v21243_v31 = vld [vmem:[#allocation10 + $0xe64] ss:$16 sps:$4 sm:$0xff]  }
0x14e6   :  { %14646 = vmatpush1.bf16.msra.mxu1 %v21189_v30  ;;  %v21241_v30 = vld [vmem:[#allocation10 + $0xe60] ss:$16 sps:$4 sm:$0xff]  }
0x14e7   :  { %14647 = vmatprep.subr.bf16.mxu1 %v21197_v1  ;;  %v21249_v1 = vld [vmem:[#allocation10 + $0xe84] ss:$16 sps:$4 sm:$0xff]  }
0x14ea   :  { %14648 = vmatpush1.bf16.msra.mxu1 %v21195_v5  ;;  %v21247_v5 = vld [vmem:[#allocation10 + $0xe80] ss:$16 sps:$4 sm:$0xff]  }
0x14eb   :  { %14649 = vmatprep.subr.bf16.mxu1 %v21203_v37  ;;  %v21255_v37 = vld [vmem:[#allocation10 + $0xea4] ss:$16 sps:$4 sm:$0xff]  }
0x14ee   :  { %14650 = vmatpush1.bf16.msra.mxu1 %v21201_v55  ;;  %v21253_v55 = vld [vmem:[#allocation10 + $0xea0] ss:$16 sps:$4 sm:$0xff]  }
0x14ef   :  { %14651 = vmatprep.subr.bf16.mxu1 %v21209_v48  ;;  %v21261_v48 = vld [vmem:[#allocation10 + $0xec4] ss:$16 sps:$4 sm:$0xff]  }
0x14f2   :  { %14652 = vmatpush1.bf16.msra.mxu1 %v21207_v9  ;;  %v21259_v9 = vld [vmem:[#allocation10 + $0xec0] ss:$16 sps:$4 sm:$0xff]  }
0x14f3   :  { %14653 = vmatprep.subr.bf16.mxu1 %v21215_v39  ;;  %v21267_v39 = vld [vmem:[#allocation10 + $0xee4] ss:$16 sps:$4 sm:$0xff]  }
0x14f6   :  { %14654 = vmatpush1.bf16.msra.mxu1 %v21213_v45  ;;  %v21265_v45 = vld [vmem:[#allocation10 + $0xee0] ss:$16 sps:$4 sm:$0xff]  }
0x14f7   :  { %14655 = vmatprep.subr.bf16.mxu1 %v21221_v10 }
0x14fa   :  { %14656 = vmatpush1.bf16.msra.mxu1 %v21219_v41 }
0x14fb   :  { %14926 = vmatprep.subr.bf16.mxu1 %v21225_v4  ;;  %v21295_v4 = vld [vmem:[#allocation10 + $0xf6c] ss:$16 sps:$4 sm:$0xff]  }
0x1590   :  { %v14308_v18 = vpop.f32.mrb[192].mxu1  ;;  %v14349_v35 = vpop.f32.mrb[4].mxu0 }
0x1591   :  { %v25339_v52 = vadd.f32 %v14308_v18, %v25307_v22  ;;  %v25342_v47 = vadd.f32 %v14349_v35, %v25310_v63  ;;  %v14310_v38 = vpop.f32.mrb[193].mxu1  ;;  %v14351_v40 = vpop.f32.mrb[5].mxu0 }
0x1592   :  { %v25345_v62 = vadd.f32 %v14310_v38, %v25313_v19  ;;  %v25348_v13 = vadd.f32 %v14351_v40, %v25316_v11  ;;  %v14312_v0 = vpop.f32.mrb[194].mxu1  ;;  %v14353_v28 = vpop.f32.mrb[6].mxu0  ;;  %v21222_v19 = vld [vmem:[#allocation8 + $0xc] ss:$0 sps:$4 sm:$0x44]  }
0x1593   :  { %v14313_v21 = vpop.f32.mrb[195].mxu1  ;;  %v14354_v29 = vpop.f32.mrb[7].mxu0  ;;  %v14690_v11 = vrot.slane %v21222_v19, 2  ;;  %v21289_v19 = vld [vmem:[#allocation10 + $0xf4c] ss:$16 sps:$4 sm:$0xff]  }
0x15b0   :  { %v14400_v7 = vpop.f32.mrb[196].mxu1 }
0x15b1   :  { %v14406_v57 = vpack.c.bf16 %v14400_v7, %v14400_v7  ;;  %v19224_v46 = vpop.f32.mrb[197].mxu1 }
0x15b2   :  { %v14403_v22 = vpop.f32.mrb[198].mxu1 }
0x15b3   :  { %14633 = vmatmul.mubr.bf16.vlgmr.msra.gmra.mrb[8].mxu0 %v14406_v57  ;;  %14674 = vmatmul.mubr.bf16.vlgmr.msra.gmra.mrb[200].mxu1 %v14406_v57  ;;  %v19225_v63 = vpop.f32.mrb[199].mxu1 }
0x15b4   :  { %19227 = vmatpush3.bf16.msra.mxu0 %v24894_v54  ;;  %19242 = vmatprep.mubr.msk.bf16.mxu0 %vm21579_vm5, %v21578_v27  ;;  %v21278_v63 = vld [vmem:[#allocation10 + $0xf20] ss:$16 sps:$4 sm:$0xff]  }
0x15b5   :  { %19228 = vmatprep.subr.bf16.mxu0 %v21578_v27  ;;  %14958 = vmatprep.mubr.bf16.mxu1 %v25826_v3 }
0x15b6   :  { %14927 = vmatpush1.bf16.msra.mxu1 %v21223_v8  ;;  %v21290_v8 = vld [vmem:[#allocation10 + $0xf60] ss:$16 sps:$4 sm:$0xff]  }
0x15b7   :  { %14928 = vmatprep.subr.bf16.mxu1 %v21231_v56  ;;  %v21301_v56 = vld [vmem:[#allocation10 + $0xf8c] ss:$16 sps:$4 sm:$0xff]  }
0x15b8   :  { %19229 = vmatpush3.bf16.msra.mxu0 %v24908_v61 }
0x15b9   :  { %19230 = vmatprep.subr.bf16.mxu0 %v21578_v27 }
0x15ba   :  { %14929 = vmatpush1.bf16.msra.mxu1 %v21229_v50  ;;  %v21296_v50 = vld [vmem:[#allocation10 + $0xf80] ss:$16 sps:$4 sm:$0xff]  }
0x15bb   :  { %14930 = vmatprep.subr.bf16.mxu1 %v21237_v44  ;;  %v21307_v44 = vld [vmem:[#allocation10 + $0xfac] ss:$16 sps:$4 sm:$0xff]  }
0x15bc   :  { %19231 = vmatpush3.bf16.msra.mxu0 %v24910_v15 }
0x15bd   :  { %19232 = vmatprep.subr.bf16.mxu0 %v21578_v27 }
0x15be   :  { %14931 = vmatpush1.bf16.msra.mxu1 %v21235_v33  ;;  %v21305_v33 = vld [vmem:[#allocation10 + $0xfa8] ss:$16 sps:$4 sm:$0xff]  }
0x15bf   :  { %14932 = vmatprep.subr.bf16.mxu1 %v21243_v31  ;;  %v21313_v31 = vld [vmem:[#allocation10 + $0xfcc] ss:$16 sps:$4 sm:$0xff]  }
0x15c0   :  { %19233 = vmatpush3.bf16.msra.mxu0 %v24928_v59 }
0x15c1   :  { %19234 = vmatprep.subr.bf16.mxu0 %v21578_v27 }
0x15c2   :  { %14933 = vmatpush1.bf16.msra.mxu1 %v21241_v30  ;;  %v21311_v30 = vld [vmem:[#allocation10 + $0xfc8] ss:$16 sps:$4 sm:$0xff]  }
0x15c3   :  { %14934 = vmatprep.subr.bf16.mxu1 %v21249_v1  ;;  %v21319_v1 = vld [vmem:[#allocation10 + $0xfec] ss:$16 sps:$4 sm:$0xff]  }
0x15c4   :  { %19235 = vmatpush3.bf16.msra.mxu0 %v24930_v17 }
0x15c5   :  { %19236 = vmatprep.subr.bf16.mxu0 %v21578_v27 }
0x15c6   :  { %14935 = vmatpush1.bf16.msra.mxu1 %v21247_v5  ;;  %v21317_v5 = vld [vmem:[#allocation10 + $0xfe8] ss:$16 sps:$4 sm:$0xff]  }
0x15c7   :  { %14936 = vmatprep.subr.bf16.mxu1 %v21255_v37  ;;  %v21321_v37 = vld [vmem:[#allocation13 + $0xc0] sm:$0xff]  }
0x15c8   :  { %19237 = vmatpush3.bf16.msra.mxu0 %v24949_v16 }
0x15c9   :  { %19238 = vmatprep.subr.bf16.mxu0 %v21578_v27 }
0x15ca   :  { %14937 = vmatpush1.bf16.msra.mxu1 %v21253_v55 }
0x15cb   :  { %14938 = vmatprep.subr.bf16.mxu1 %v21261_v48 }
0x15cc   :  { %19239 = vmatpush3.bf16.msra.mxu0 %v24951_v25 }
0x15cd   :  { %19240 = vmatprep.subr.bf16.mxu0 %v21578_v27 }
0x15ce   :  { %14939 = vmatpush1.bf16.msra.mxu1 %v21259_v9 }
0x15cf   :  { %14940 = vmatprep.subr.bf16.mxu1 %v21267_v39 }
0x15d0   :  { %19241 = vmatpush3.bf16.msra.mxu0 %v24947_v24 }
0x15d1   :  { %14967 = vmatprep.subr.bf16.mxu0 %v21228_v14  ;;  %v21293_v14 = vld [vmem:[#allocation10 + $0xf68] ss:$16 sps:$4 sm:$0xff]  }
0x15d2   :  { %14941 = vmatpush1.bf16.msra.mxu1 %v21265_v45 }
0x15d3   :  { %19243 = vmatmul.mubr.bf16.vlgmr.msra.gmra.mrb[12].mxu0 %v14690_v11  ;;  %19246 = vmatprep.subr.bf16.mxu1 %v21578_v27  ;;  %v21292_v11 = vld [vmem:[#allocation10 + $0xf64] ss:$16 sps:$4 sm:$0xff]  }
0x15d4   :  { %14999 = vmatprep.mubr.bf16.mxu0 %v25826_v3  ;;  %14968 = vmatpush1.bf16.msra.mxu0 %v21226_v26  ;;  %v21298_v26 = vld [vmem:[#allocation10 + $0xf84] ss:$16 sps:$4 sm:$0xff]  }
0x15d5   :  { %14969 = vmatprep.subr.bf16.mxu0 %v21234_v58  ;;  %v21299_v58 = vld [vmem:[#allocation10 + $0xf88] ss:$16 sps:$4 sm:$0xff]  }
0x15d8   :  { %14970 = vmatpush1.bf16.msra.mxu0 %v21232_v49  ;;  %v21304_v49 = vld [vmem:[#allocation10 + $0xfa4] ss:$16 sps:$4 sm:$0xff]  }
0x15d9   :  { %14971 = vmatprep.subr.bf16.mxu0 %v21240_v23  ;;  %v21302_v23 = vld [vmem:[#allocation10 + $0xfa0] ss:$16 sps:$4 sm:$0xff]  }
0x15dc   :  { %14972 = vmatpush1.bf16.msra.mxu0 %v21238_v32  ;;  %v21310_v32 = vld [vmem:[#allocation10 + $0xfc4] ss:$16 sps:$4 sm:$0xff]  }
0x15dd   :  { %14973 = vmatprep.subr.bf16.mxu0 %v21246_v2  ;;  %v21308_v2 = vld [vmem:[#allocation10 + $0xfc0] ss:$16 sps:$4 sm:$0xff]  }
0x15e0   :  { %14974 = vmatpush1.bf16.msra.mxu0 %v21244_v60  ;;  %v21316_v60 = vld [vmem:[#allocation10 + $0xfe4] ss:$16 sps:$4 sm:$0xff]  }
0x15e1   :  { %14975 = vmatprep.subr.bf16.mxu0 %v21252_v51  ;;  %v21314_v51 = vld [vmem:[#allocation10 + $0xfe0] ss:$16 sps:$4 sm:$0xff]  }
0x15e4   :  { %14976 = vmatpush1.bf16.msra.mxu0 %v21250_v20  ;;  %v21320_v20 = vld [vmem:[#allocation13 + $0x40] sm:$0xff]  }
0x15e5   :  { %14977 = vmatprep.subr.bf16.mxu0 %v21258_v36 }
0x15e8   :  { %14978 = vmatpush1.bf16.msra.mxu0 %v21256_v53 }
0x15e9   :  { %14979 = vmatprep.subr.bf16.mxu0 %v21264_v12 }
0x15ec   :  { %14980 = vmatpush1.bf16.msra.mxu0 %v21262_v34 }
0x15ed   :  { %14981 = vmatprep.subr.bf16.mxu0 %v21270_v42 }
0x15f0   :  { %14982 = vmatpush1.bf16.msra.mxu0 %v21268_v6 }
0x1686   :  { %v14634_v10 = vpop.f32.mrb[8].mxu0  ;;  %v14675_v43 = vpop.f32.mrb[200].mxu1 }
0x1687   :  { %v25371_v41 = vadd.f32 %v14634_v10, %v25339_v52  ;;  %v25374_v18 = vadd.f32 %v14675_v43, %v25342_v47  ;;  %v14636_v35 = vpop.f32.mrb[9].mxu0  ;;  %v14677_v38 = vpop.f32.mrb[201].mxu1 }
0x1688   :  { %v25377_v40 = vadd.f32 %v14636_v35, %v25345_v62  ;;  %v25380_v0 = vadd.f32 %v14677_v38, %v25348_v13  ;;  %v14638_v28 = vpop.f32.mrb[10].mxu0  ;;  %v14679_v21 = vpop.f32.mrb[202].mxu1  ;;  %v21275_v62 = vld [vmem:[#allocation10 + $0xf08] ss:$16 sps:$4 sm:$0xff]   ;;  %v21283_v13 = vld [vmem:[#allocation10 + $0xf2c] ss:$16 sps:$4 sm:$0xff]  }
0x1689   :  { %v14639_v29 = vpop.f32.mrb[11].mxu0  ;;  %v14680_v7 = vpop.f32.mrb[203].mxu1  ;;  %v21322_v35 = vld [vmem:[#allocation13] sm:$0xff]   ;;  %v21324_v21 = vld [vmem:[#allocation13 + $0x48] sm:$0xff]  }
0x168a   :  { %v21323_v38 = vld [vmem:[#allocation13 + $0x80] sm:$0xff]  }
0x16a6   :  { %v14726_v57 = vpop.f32.mrb[12].mxu0 }
0x16a7   :  { %v14732_v46 = vpack.c.bf16 %v14726_v57, %v14726_v57  ;;  %v19244_v22 = vpop.f32.mrb[13].mxu0  ;;  %v21328_v57 = vld [vmem:[#allocation13 + $0x50] sm:$0xff]  }
0x16a8   :  { %v14729_v52 = vpop.f32.mrb[14].mxu0  ;;  %v21330_v22 = vld [vmem:[#allocation13 + $0x10] sm:$0xff]  }
0x16a9   :  { %14959 = vmatmul.mubr.bf16.vlgmr.msra.gmra.mrb[204].mxu1 %v14732_v46  ;;  %15000 = vmatmul.mubr.bf16.vlgmr.msra.gmra.mrb[16].mxu0 %v14732_v46  ;;  %v19245_v47 = vpop.f32.mrb[15].mxu0  ;;  %v21329_v46 = vld [vmem:[#allocation13 + $0xd0] sm:$0xff]  }
0x16aa   :  { %19247 = vmatpush3.bf16.msra.mxu1 %v24894_v54  ;;  %19262 = vmatprep.mubr.msk.bf16.mxu1 %vm21579_vm5, %v21578_v27  ;;  %v21271_v54 = vld [vmem:[#allocation8 + $0xc] ss:$0 sps:$4 sm:$0x88]   ;;  %v21331_v52 = vld [vmem:[#allocation13 + $0x90] sm:$0xff]  }
0x16ab   :  { %19248 = vmatprep.subr.bf16.mxu1 %v21578_v27  ;;  %15284 = vmatprep.mubr.bf16.mxu0 %v25826_v3  ;;  %v21332_v47 = vld [vmem:[#allocation13 + $0x58] sm:$0xff]  }
0x16ae   :  { %19249 = vmatpush3.bf16.msra.mxu1 %v24908_v61  ;;  %v15016_v61 = vrot.slane %v21271_v54, 3  ;;  %v21333_v54 = vld [vmem:[#allocation13 + $0xd8] sm:$0xff]  }
0x16af   :  { %19250 = vmatprep.subr.bf16.mxu1 %v21578_v27 }
0x16b2   :  { %19251 = vmatpush3.bf16.msra.mxu1 %v24910_v15  ;;  %v21274_v15 = vld [vmem:[#allocation10 + $0xf04] ss:$16 sps:$4 sm:$0xff]  }
0x16b3   :  { %19252 = vmatprep.subr.bf16.mxu1 %v21578_v27  ;;  %15252 = vmatprep.subr.bf16.mxu0 %v21274_v15  ;;  %v21335_v15 = vld [vmem:[#allocation13 + $0x98] sm:$0xff]  }
0x16b6   :  { %19253 = vmatpush3.bf16.msra.mxu1 %v24928_v59  ;;  %v21277_v59 = vld [vmem:[#allocation10 + $0xf0c] ss:$16 sps:$4 sm:$0xff]  }
0x16b7   :  { %19254 = vmatprep.subr.bf16.mxu1 %v21578_v27 }
0x16ba   :  { %19255 = vmatpush3.bf16.msra.mxu1 %v24930_v17  ;;  %v21272_v17 = vld [vmem:[#allocation10 + $0xf00] ss:$16 sps:$4 sm:$0xff]  }
0x16bb   :  { %19256 = vmatprep.subr.bf16.mxu1 %v21578_v27  ;;  %15253 = vmatpush1.bf16.msra.mxu0 %v21272_v17  ;;  %v21337_v17 = vld [vmem:[#allocation13 + $0xe0] sm:$0xff]  }
0x16be   :  { %19257 = vmatpush3.bf16.msra.mxu1 %v24949_v16  ;;  %v21280_v16 = vld [vmem:[#allocation10 + $0xf24] ss:$16 sps:$4 sm:$0xff]  }
0x16bf   :  { %19258 = vmatprep.subr.bf16.mxu1 %v21578_v27  ;;  %15254 = vmatprep.subr.bf16.mxu0 %v21280_v16  ;;  %v21339_v16 = vld [vmem:[#allocation13 + $0xa0] sm:$0xff]  }
0x16c0   :  { %15255 = vmatpush1.bf16.msra.mxu0 %v21278_v63  ;;  %v21341_v63 = vld [vmem:[#allocation13 + $0xe8] sm:$0xff]  }
0x16c2   :  { %19259 = vmatpush3.bf16.msra.mxu1 %v24951_v25  ;;  %v21281_v25 = vld [vmem:[#allocation10 + $0xf28] ss:$16 sps:$4 sm:$0xff]  }
0x16c3   :  { %19260 = vmatprep.subr.bf16.mxu1 %v21578_v27  ;;  %v21286_v27 = vld [vmem:[#allocation10 + $0xf44] ss:$16 sps:$4 sm:$0xff]  }
0x16c4   :  { %15256 = vmatprep.subr.bf16.mxu0 %v21286_v27  ;;  %v21343_v27 = vld [vmem:[#allocation13 + $0xa8] sm:$0xff]  }
0x16c6   :  { %19261 = vmatpush3.bf16.msra.mxu1 %v24947_v24  ;;  %v21284_v24 = vld [vmem:[#allocation10 + $0xf40] ss:$16 sps:$4 sm:$0xff]  }
0x16c7   :  { %15293 = vmatprep.subr.bf16.mxu1 %v21277_v59  ;;  %15257 = vmatpush1.bf16.msra.mxu0 %v21284_v24  ;;  %v21336_v59 = vld [vmem:[#allocation13 + $0x60] sm:$0xff]   ;;  %v21345_v24 = vld [vmem:[#allocation13 + $0xf0] sm:$0xff]  }
0x16c8   :  { %15258 = vmatprep.subr.bf16.mxu0 %v21292_v11  ;;  %v21347_v11 = vld [vmem:[#allocation13 + $0xb0] sm:$0xff]  }
0x16c9   :  { %19263 = vmatmul.mubr.bf16.vlgmr.msra.gmra.mrb[208].mxu1 %v15016_v61  ;;  %v21334_v61 = vld [vmem:[#allocation13 + $0x18] sm:$0xff]  }
0x16ca   :  { %15325 = vmatprep.mubr.bf16.mxu1 %v25826_v3  ;;  %15294 = vmatpush1.bf16.msra.mxu1 %v21275_v62  ;;  %v21287_v3 = vld [vmem:[#allocation10 + $0xf48] ss:$16 sps:$4 sm:$0xff]  }
0x16cb   :  { %15295 = vmatprep.subr.bf16.mxu1 %v21283_v13  ;;  %15259 = vmatpush1.bf16.msra.mxu0 %v21290_v8  ;;  %v21338_v62 = vld [vmem:[#allocation13 + $0x20] sm:$0xff]   ;;  %v21340_v13 = vld [vmem:[#allocation13 + $0x68] sm:$0xff]   ;;  %v21349_v8 = vld [vmem:[#allocation13 + $0xf8] sm:$0xff]  }
0x16cc   :  { %15260 = vmatprep.subr.bf16.mxu0 %v21298_v26  ;;  %v21351_v26 = vld [vmem:[#allocation13 + $0xb8] sm:$0xff]  }
0x16ce   :  { %15296 = vmatpush1.bf16.msra.mxu1 %v21281_v25  ;;  %v21342_v25 = vld [vmem:[#allocation13 + $0x28] sm:$0xff]  }
0x16cf   :  { %15297 = vmatprep.subr.bf16.mxu1 %v21289_v19  ;;  %15261 = vmatpush1.bf16.msra.mxu0 %v21296_v50  ;;  %v21344_v19 = vld [vmem:[#allocation13 + $0x70] sm:$0xff]  }
0x16d0   :  { %15262 = vmatprep.subr.bf16.mxu0 %v21304_v49 }
0x16d2   :  { %15298 = vmatpush1.bf16.msra.mxu1 %v21287_v3  ;;  %v21346_v3 = vld [vmem:[#allocation13 + $0x30] sm:$0xff]  }
0x16d3   :  { %15299 = vmatprep.subr.bf16.mxu1 %v21295_v4  ;;  %15263 = vmatpush1.bf16.msra.mxu0 %v21302_v23  ;;  %v21348_v4 = vld [vmem:[#allocation13 + $0x78] sm:$0xff]  }
0x16d4   :  { %15264 = vmatprep.subr.bf16.mxu0 %v21310_v32 }
0x16d6   :  { %15300 = vmatpush1.bf16.msra.mxu1 %v21293_v14  ;;  %v21350_v14 = vld [vmem:[#allocation13 + $0x38] sm:$0xff]  }
0x16d7   :  { %15301 = vmatprep.subr.bf16.mxu1 %v21301_v56  ;;  %15265 = vmatpush1.bf16.msra.mxu0 %v21308_v2  ;;  %v15340_v56 = vlaneseq }
0x16d8   :  { %15266 = vmatprep.subr.bf16.mxu0 %v21316_v60 }
0x16d9   :  { %v15341_v50 = vshrl.u32 %v15340_v56, 7 }
0x16da   :  { %15302 = vmatpush1.bf16.msra.mxu1 %v21299_v58 }
0x16db   :  { %15303 = vmatprep.subr.bf16.mxu1 %v21307_v44  ;;  %15267 = vmatpush1.bf16.msra.mxu0 %v21314_v51  ;;  %v15342_v58 = vsub.s32 0, %v15341_v50  ;;  %v15350_v49 = vsub.s32 2, %v15341_v50  ;;  %v15338_v44 = vld [vmem:[#allocation11] sm:$0xf]  ;;  %v15346_v23 = vsub.s32 1, %v15341_v50 }
0x16dc   :  { %17890 = vmatprep.subr.bf16.mxu0 %v21320_v20 }
0x16dd   :  { %v15343_v32 = vrot.slane %v15338_v44, %v15342_v58  ;;  %v15347_v60 = vrot.slane %v15338_v44, %v15346_v23 }
0x16de   :  { %15304 = vmatpush1.bf16.msra.mxu1 %v21305_v33  ;;  %v15354_v33 = vsub.s32 3, %v15341_v50 }
0x16df   :  { %15305 = vmatprep.subr.bf16.mxu1 %v21313_v31  ;;  %v15351_v31 = vrot.slane %v15338_v44, %v15350_v49 }
0x16e2   :  { %15306 = vmatpush1.bf16.msra.mxu1 %v21311_v30 }
0x16e3   :  { %15307 = vmatprep.subr.bf16.mxu1 %v21319_v1  ;;  %v15355_v1 = vrot.slane %v15338_v44, %v15354_v33 }
0x16e6   :  { %15308 = vmatpush1.bf16.msra.mxu1 %v21317_v5 }
0x16e7   :  { %17912 = vmatprep.subr.bf16.mxu1 %v21321_v37 }
0x177c   :  { %v14960_v36 = vpop.f32.mrb[204].mxu1  ;;  %v15001_v55 = vpop.f32.mrb[16].mxu0 }
0x177d   :  { %v25402_v53 = vadd.f32 %v14960_v36, %v25371_v41  ;;  %v25405_v48 = vadd.f32 %v15001_v55, %v25374_v18  ;;  %v14962_v12 = vpop.f32.mrb[205].mxu1  ;;  %v15003_v9 = vpop.f32.mrb[17].mxu0  ;;  %v21325_v18 = vld [vmem:[#allocation13 + $0xc8] sm:$0xff]  }
0x177e   :  { %v25408_v34 = vadd.f32 %v14962_v12, %v25377_v40  ;;  %v25411_v39 = vadd.f32 %v15003_v9, %v25380_v0  ;;  %v14964_v42 = vpop.f32.mrb[206].mxu1  ;;  %v15005_v45 = vpop.f32.mrb[18].mxu0  ;;  %v21326_v40 = vld [vmem:[#allocation13 + $0x8] sm:$0xff]  }
0x177f   :  { %v14965_v6 = vpop.f32.mrb[207].mxu1  ;;  %v15006_v10 = vpop.f32.mrb[19].mxu0  ;;  %v21327_v0 = vld [vmem:[#allocation13 + $0x88] sm:$0xff]  }
0x179c   :  { %v15052_v43 = vpop.f32.mrb[208].mxu1 }
0x179d   :  { %v15058_v41 = vpack.c.bf16 %v15052_v43, %v15052_v43  ;;  %v19264_v28 = vpop.f32.mrb[209].mxu1 }
0x179e   :  { %v15055_v29 = vpop.f32.mrb[210].mxu1 }
0x179f   :  { %15285 = vmatmul.mubr.bf16.vlgmr.msra.gmra.mrb[20].mxu0 %v15058_v41  ;;  %15326 = vmatmul.mubr.bf16.vlgmr.msra.gmra.mrb[212].mxu1 %v15058_v41  ;;  %v19265_v7 = vpop.f32.mrb[211].mxu1 }
0x17a0   :  { %17891 = vmatpush3.bf16.msra.mxu0 %v21322_v35  ;;  %17913 = vmatpush3.bf16.msra.mxu1 %v21323_v38  ;;  %v17207_v7 = vld [vmem:[#allocation14] ss:$0 sm:$0xff] }
0x17a1   :  { %17892 = vmatprep.subr.bf16.mxu0 %v21324_v21  ;;  %17914 = vmatprep.subr.bf16.mxu1 %v21325_v18 }
0x17a4   :  { %17893 = vmatpush3.bf16.msra.mxu0 %v21326_v40  ;;  %17915 = vmatpush3.bf16.msra.mxu1 %v21327_v0 }
0x17a5   :  { %17894 = vmatprep.subr.bf16.mxu0 %v21328_v57  ;;  %17916 = vmatprep.subr.bf16.mxu1 %v21329_v46 }
0x17a8   :  { %17895 = vmatpush3.bf16.msra.mxu0 %v21330_v22  ;;  %17917 = vmatpush3.bf16.msra.mxu1 %v21331_v52 }
0x17a9   :  { %17896 = vmatprep.subr.bf16.mxu0 %v21332_v47  ;;  %17918 = vmatprep.subr.bf16.mxu1 %v21333_v54 }
0x17ac   :  { %17897 = vmatpush3.bf16.msra.mxu0 %v21334_v61  ;;  %17919 = vmatpush3.bf16.msra.mxu1 %v21335_v15 }
0x17ad   :  { %17898 = vmatprep.subr.bf16.mxu0 %v21336_v59  ;;  %17920 = vmatprep.subr.bf16.mxu1 %v21337_v17 }
0x17b0   :  { %17899 = vmatpush3.bf16.msra.mxu0 %v21338_v62  ;;  %17921 = vmatpush3.bf16.msra.mxu1 %v21339_v16 }
0x17b1   :  { %17900 = vmatprep.subr.bf16.mxu0 %v21340_v13  ;;  %17922 = vmatprep.subr.bf16.mxu1 %v21341_v63 }
0x17b4   :  { %17901 = vmatpush3.bf16.msra.mxu0 %v21342_v25  ;;  %17923 = vmatpush3.bf16.msra.mxu1 %v21343_v27 }
0x17b5   :  { %17902 = vmatprep.subr.bf16.mxu0 %v21344_v19  ;;  %17924 = vmatprep.subr.bf16.mxu1 %v21345_v24 }
0x17b8   :  { %17903 = vmatpush3.bf16.msra.mxu0 %v21346_v3  ;;  %17925 = vmatpush3.bf16.msra.mxu1 %v21347_v11 }
0x17b9   :  { %17904 = vmatprep.subr.bf16.mxu0 %v21348_v4  ;;  %17926 = vmatprep.subr.bf16.mxu1 %v21349_v8 }
0x17bc   :  { %17905 = vmatpush3.bf16.msra.mxu0 %v21350_v14  ;;  %17927 = vmatpush3.bf16.msra.mxu1 %v21351_v26 }
0x1872   :  { %v15286_v2 = vpop.f32.mrb[20].mxu0  ;;  %v15327_v30 = vpop.f32.mrb[212].mxu1 }
0x1873   :  { %v15334_v51 = vadd.f32 %v15286_v2, %v25402_v53  ;;  %v15336_v5 = vadd.f32 %v15327_v30, %v25405_v48  ;;  %v15288_v20 = vpop.f32.mrb[21].mxu0  ;;  %v15329_v37 = vpop.f32.mrb[213].mxu1 }
0x1874   :  { %v15335_v36 = vadd.f32 %v15288_v20, %v25408_v34  ;;  %v15337_v55 = vadd.f32 %v15329_v37, %v25411_v39  ;;  %v15290_v12 = vpop.f32.mrb[22].mxu0  ;;  %v15331_v9 = vpop.f32.mrb[214].mxu1 }
0x1875   :  { %v15360_v42 = vadd.f32 %v15343_v32, %v15334_v51  ;;  %v15362_v45 = vadd.f32 %v15351_v31, %v15336_v5  ;;  %v15291_v6 = vpop.f32.mrb[23].mxu0  ;;  %v15332_v10 = vpop.f32.mrb[215].mxu1 }
0x1876   :  { %v15361_v43 = vadd.f32 %v15347_v60, %v15335_v36  ;;  %v15363_v35 = vadd.f32 %v15355_v1, %v15337_v55 }
0x1877   :  { %v15364_v38 = vmax.f32 %v15360_v42, 0.0  ;;  %v15366_v41 = vmax.f32 %v15362_v45, 0.0 }
0x1878   :  { %v15365_v28 = vmax.f32 %v15361_v43, 0.0  ;;  %v15367_v53 = vmax.f32 %v15363_v35, 0.0 }
0x1879   :  { %v15368_v18 = vpack.c.bf16 %v15364_v38, %v15364_v38  ;;  %v15370_v29 = vpack.c.bf16 %v15366_v41, %v15366_v41 }
0x187a   :  { %v15369_v21 = vpack.c.bf16 %v15365_v28, %v15365_v28  ;;  %v15371_v48 = vpack.c.bf16 %v15367_v53, %v15367_v53 }
0x187c   :  { %15667 = vmatprep.mubr.bf16.mxu0 %v15369_v21  ;;  %15707 = vmatprep.mubr.bf16.mxu1 %v15371_v48 }
0x187d   :  { %15668 = vmatmul.mubr.bf16.vlgmr.msra.gmra.mrb[24].mxu0 %v15368_v18  ;;  %15708 = vmatmul.mubr.bf16.vlgmr.msra.gmra.mrb[216].mxu1 %v15370_v29 }
0x1950   :  { %v17906_v34 = vpop.f32.mrb[24].mxu0  ;;  %v17928_v39 = vpop.f32.mrb[216].mxu1 }
0x1951   :  { %v17907_v40 = vpop.f32.mrb[25].mxu0  ;;  %v17929_v0 = vpop.f32.mrb[217].mxu1 }
0x1952   :  { %v17908_v57 = vadd.f32 %v17907_v40, %v17906_v34  ;;  %v17930_v46 = vadd.f32 %v17929_v0, %v17928_v39  ;;  %v17909_v22 = vpop.f32.mrb[26].mxu0  ;;  %v17931_v52 = vpop.f32.mrb[218].mxu1 }
0x1953   :  { %v17910_v47 = vpop.f32.mrb[27].mxu0  ;;  %v17932_v54 = vpop.f32.mrb[219].mxu1 }
0x1954   :  { %v15670_v61 = vadd.f32 %v17908_v57, %v17207_v7 }
0x1956   :  { %v15710_v15 = vadd.f32 %v17930_v46, %v15670_v61 }
0x1958   :  { %15715 = vst [vmem:[#allocation16] sm:$0x3] %v15710_v15 }
0x1959   :  { %21542 = shalt.err (!%p21539_p12)
}
0x195a   :  { %s21543_s14 = scalar_lea.hbm %s25440_s11, 32 }
0x195b   :  { %p21544_p13 = scmp.ne.s32.totalorder %s25440_s11, %s21543_s14  ;;  %p21547_p0 = scmp.lt.u32.totalorder %s21543_s14, %s25440_s11 }
0x195d   :  { %p21549_p1 = pnand %p21547_p0, %p21544_p13 }
0x195f   :  { %21552 = shalt.err (!%p21549_p1)
}
0x1960   :  { %15725 = dma.vmem_to_hbm [thread:$0]  %s15723_s24, 32, %s25440_s11, [#allocation4]  }
0x1961   :  { %21563 = dma.done.wait [#allocation4], 32  }
0x1962   :  { %21564 = vsyncadd [#allocation4], 4294967264 }
0x1963   :  { %15729 = vsyncpa [#allocation3], 1 }
0x1964   :  { %15730 = vsyncpa [#allocation6], 1 }
0x1965   :  { %15731 = vsyncpa [#allocation9], 1 }
0x1966   :  { %15732 = vsyncpa [#allocation12], 1 }
0x1967   :  { %15733 = vsyncpa [#allocation15], 1 }
0x1968   :  { %15734 = vsyncpa [#allocation4], 1 }

</bundles_post_ra>
